<compile_context>
chip_gen: v7x
topology: tpu7x:2x2x1
jax: 0.10.0
libtpu: 0.0.40
codegen_flags: <defaults>
</compile_context>

<pallas_src>
import functools

import jax
import jax.numpy as jnp
import numpy as np
from jax import lax
from jax.experimental import pallas as pl
from jax.experimental.pallas import tpu as pltpu

_LAYER_CFG = ((1, 1, 1), (4, 2, 1), (8, 2, 1))   # (kernel, stride, pad) per conv
_CHANS = (3, 16, 32, 1)
_EPS = 1e-5
_MIN_VALUE = -1.3402
_MAX_VALUE = 1.886

_N1 = 66 * 66          # conv1 output positions (BN1 population, incl. bias ring)
_N2 = 33 * 33          # conv2 output positions (BN2 population)
_N3 = 14 * 14          # conv3 output positions (BN3 population)
_CPAD = 24             # phase-grid column count padded 17 -> 24 (multiple of 8)
_ROWS = 17 * _CPAD     # 408 phase-grid rows fed to the conv2 matmul


# --------------------------------------------------------------------------- #
# Fused kernel
# --------------------------------------------------------------------------- #
def _fused_kernel(xs_ref, x2_ref, w1_ref, w2c_ref, w3p_ref, v3p_ref,
                  g1_ref, be1_ref, g2_ref, be2_ref, g3_ref, be3_ref,
                  out_ref, z2_ref, *, eps, clamp_min, clamp_max):
    f32 = jnp.float32

    # ---------------- BN1 from sufficient statistics ----------------------- #
    # u = W1 @ x per interior pixel (conv1 bias cancels in training-mode BN;
    # the 66x66 bias-only ring contributes exactly zero to both sums).
    xc0 = xs_ref[0]                                   # (32, 128)
    xc1 = xs_ref[1]
    xc2 = xs_ref[2]
    sum_c0 = jnp.sum(xc0)
    sum_c1 = jnp.sum(xc1)
    sum_c2 = jnp.sum(xc2)
    g00 = jnp.sum(xc0 * xc0)
    g11 = jnp.sum(xc1 * xc1)
    g22 = jnp.sum(xc2 * xc2)
    g01 = jnp.sum(xc0 * xc1)
    g02 = jnp.sum(xc0 * xc2)
    g12 = jnp.sum(xc1 * xc2)

    w1 = w1_ref[...]                                  # (16, 3)
    wa = w1[:, 0:1]
    wb = w1[:, 1:2]
    wc = w1[:, 2:3]
    inv_n1 = 1.0 / float(_N1)
    mean1 = (wa * sum_c0 + wb * sum_c1 + wc * sum_c2) * inv_n1        # (16, 1)
    eu2 = (wa * wa * g00 + wb * wb * g11 + wc * wc * g22
           + 2.0 * (wa * wb * g01 + wa * wc * g02 + wb * wc * g12)) * inv_n1
    var1 = eu2 - mean1 * mean1
    s1 = g1_ref[...] * lax.rsqrt(var1 + eps)          # (16, 1)
    t1 = be1_ref[...] - s1 * mean1                    # (16, 1)

    # --------- Fold BN1 into the conv2 kernel (block-diag over 4 planes) --- #
    # kmat_small[a*16 + tap, co] = sum_ci coef_a[ci] * W2[co, ci, tap]
    # coef_a = s1*W1[:, a] for raw channels, t1 for the indicator channel.
    w2c = w2c_ref[...]                                # (16 ci, 16 tap, 32 co)
    coefs = (s1 * wa, s1 * wb, s1 * wc, t1)
    kb = [jnp.sum(w2c * c.reshape(16, 1, 1), axis=0) for c in coefs]  # 4x(16,32)
    ks = jnp.concatenate(kb, axis=0)                  # (64, 32)
    zer = jnp.zeros((64, 32), f32)
    kbig = jnp.concatenate([
        jnp.concatenate([ks, zer, zer, zer], axis=1),
        jnp.concatenate([zer, ks, zer, zer], axis=1),
        jnp.concatenate([zer, zer, ks, zer], axis=1),
        jnp.concatenate([zer, zer, zer, ks], axis=1)], axis=0)        # (256,128)

    # ------------- conv2 for all 4 parity planes in one MXU matmul --------- #
    # Output lane = plane*32 + channel, row m = phase_row*24 + phase_col.
    # Invalid (conv3-padding) plane entries and the 7 filler columns are
    # exactly zero because the wrapper zeroed the corresponding im2col rows.
    z2 = jnp.dot(x2_ref[...], kbig, preferred_element_type=f32)       # (408,128)

    # BN2 batch statistics: plain sums (zero entries contribute nothing).
    inv_n2 = 1.0 / float(_N2)
    sum2 = jnp.sum(z2, axis=0, keepdims=True)                         # (1, 128)
    sq2 = jnp.sum(z2 * z2, axis=0, keepdims=True)                     # (1, 128)
    csum = sum2[:, 0:32] + sum2[:, 32:64] + sum2[:, 64:96] + sum2[:, 96:128]
    csq = sq2[:, 0:32] + sq2[:, 32:64] + sq2[:, 64:96] + sq2[:, 96:128]
    m2 = csum * inv_n2                                                # (1, 32)
    v2 = csq * inv_n2 - m2 * m2
    s2 = g2_ref[...] * lax.rsqrt(v2 + eps)                            # (1, 32)
    t2 = be2_ref[...] - s2 * m2                                       # (1, 32)

    # Park the raw plane-packed conv2 output in VMEM (no BN2 apply, no
    # zero-fill, no scatter): aligned full-width row stores only.
    for r in range(17):
        z2_ref[r, :, :] = z2[r * _CPAD:(r + 1) * _CPAD, :]

    # -------- Layer 3: 8x8/s2 conv, Cout=1, as 16 lane-packed VPU FMAs ----- #
    # BN2 scale is folded into the packed conv3 weights; the BN2 shift enters
    # only through the constant-geometry border map (corr) below.
    s2_128 = jnp.concatenate([s2, s2, s2, s2], axis=1)                # (1, 128)
    w3e = w3p_ref[...] * s2_128.reshape(1, 1, 128)                    # (4,4,128)
    z3 = jnp.zeros((14, 14), f32)
    for di in range(4):
        blk = z2_ref[di:di + 14, :, :]                # (14, 24, 128), aligned
        for dj in range(4):
            w = w3e[di, dj, :].reshape(1, 1, 128)
            t = jnp.sum(blk * w, axis=-1)             # (14, 24)  lane reduce
            z3 = z3 + t[:, dj:dj + 14]
    corr = jnp.sum(v3p_ref[...] * t2.reshape(1, 1, 32), axis=-1)      # (14, 14)
    z3 = z3 + corr

    # ---------------- BN3 (two-pass) + clamp ------------------------------- #
    inv_n3 = 1.0 / float(_N3)
    m3 = jnp.sum(z3) * inv_n3
    d3 = z3 - m3
    v3 = jnp.sum(d3 * d3) * inv_n3
    s3 = g3_ref[...] * lax.rsqrt(v3 + eps)
    y = d3 * s3 + be3_ref[...]
    y = jnp.minimum(jnp.maximum(y, clamp_min), clamp_max)
    out_ref[...] = y


def _fused_forward(xs3, x2, p, min_value, max_value):
    kernel = functools.partial(
        _fused_kernel, eps=_EPS,
        clamp_min=float(min_value), clamp_max=float(max_value))
    return pl.pallas_call(
        kernel,
        out_shape=jax.ShapeDtypeStruct((14, 14), jnp.float32),
        grid=(1,),
        in_specs=[
            pl.BlockSpec((3, 32, 128), lambda i: (0, 0, 0)),    # raw pixels
            pl.BlockSpec((_ROWS, 256), lambda i: (0, 0)),       # phase-grid im2col
            pl.BlockSpec((16, 3), lambda i: (0, 0)),            # w1
            pl.BlockSpec((16, 16, 32), lambda i: (0, 0, 0)),    # w2 (ci, tap, co)
            pl.BlockSpec((4, 4, 128), lambda i: (0, 0, 0)),     # w3 lane-packed
            pl.BlockSpec((14, 14, 32), lambda i: (0, 0, 0)),    # conv3 border map
            pl.BlockSpec((16, 1), lambda i: (0, 0)),            # gamma1
            pl.BlockSpec((16, 1), lambda i: (0, 0)),            # beta1
            pl.BlockSpec((1, 32), lambda i: (0, 0)),            # gamma2
            pl.BlockSpec((1, 32), lambda i: (0, 0)),            # beta2
            pl.BlockSpec((1, 1), lambda i: (0, 0)),             # gamma3
            pl.BlockSpec((1, 1), lambda i: (0, 0)),             # beta3
        ],
        out_specs=pl.BlockSpec((14, 14), lambda i: (0, 0)),
        scratch_shapes=[pltpu.VMEM((17, _CPAD, 128), jnp.float32)],
        compiler_params=pltpu.CompilerParams(
            dimension_semantics=("arbitrary",)),
    )(xs3, x2, p["w1"], p["w2c"], p["w3p"], p["v3p"],
      p["g1"], p["be1"], p["g2"], p["be2"], p["g3"], p["be3"])


# --------------------------------------------------------------------------- #
# Wrapper: builds the phase-grid im2col directly in the layout the kernel eats
# --------------------------------------------------------------------------- #
def model_forward(x1, params, min_value=_MIN_VALUE, max_value=_MAX_VALUE):
    assert x1.size == 1 * 3 * 64 * 64, "only batch_size=1 is supported"
    x = x1.reshape(1, 3, 64, 64).astype(jnp.float32)

    # Per-channel pixel blocks for in-kernel BN1 sufficient statistics.
    xs3 = x[0].reshape(3, 32, 128)

    # Augmented 72x72 frame: channels 0..2 = raw pixels (conv1 interior taps),
    # channel 3 = "inside the 66x66 conv1 output frame" indicator.
    # Frame row r corresponds to conv2-input (frame68) row r-2, so the union
    # window for phase-grid row R covers frame rows 4R .. 4R+5.
    x_hwc = jnp.transpose(x[0], (1, 2, 0))                        # (64, 64, 3)
    aug = jnp.zeros((72, 72, 4), jnp.float32)
    aug = aug.at[4:68, 4:68, 0:3].set(x_hwc)
    aug = aug.at[3:69, 3:69, 3].set(1.0)
    blk = aug.reshape(18, 4, 18, 4, 4)                            # (BR,sr,BC,sc,a)

    planes = []
    for pi in (0, 1):
        if pi == 0:
            rsel = blk[0:17, 0:4]                                 # rows 4R+di
        else:
            rsel = jnp.concatenate([blk[0:17, 2:4], blk[1:18, 0:2]],
                                   axis=1)                        # rows 4R+2+di
        for pj in (0, 1):
            if pj == 0:
                xp = rsel[:, :, 0:17, 0:4]                        # cols 4C+dj
            else:
                xp = jnp.concatenate([rsel[:, :, 0:17, 2:4],
                                      rsel[:, :, 1:18, 0:2]], axis=3)
            # (R, di, C, dj, a) -> (R, C, a*16 + di*4 + dj)
            xp = jnp.transpose(xp, (0, 2, 4, 1, 3)).reshape(17, 17, 64)
            # conv3-padding entries of this parity plane must be exactly zero
            # (keeps BN2 sums unmasked and the packed scratch conv3-ready).
            if pi == 0:
                xp = xp.at[0, :, :].set(0.0)
            if pj == 0:
                xp = xp.at[:, 0, :].set(0.0)
            planes.append(xp)
    xall = jnp.concatenate(planes, axis=-1)                       # (17, 17, 256)
    xall = jnp.pad(xall, ((0, 0), (0, _CPAD - 17), (0, 0)))       # (17, 24, 256)
    x2 = xall.reshape(_ROWS, 256)
    assert x2.shape == (_ROWS, 256)

    out = _fused_forward(xs3, x2, params, min_value, max_value)
    # permute -> clamp -> permute collapses to clamped NCHW output.
    return out.reshape(1, 1, 14, 14)


# --------------------------------------------------------------------------- #
# Parameters (PyTorch-default-style init), prepared once at init time
# --------------------------------------------------------------------------- #
def init_params(key):
    raw = []
    for li, (k, _, _) in enumerate(_LAYER_CFG):
        cin, cout = _CHANS[li], _CHANS[li + 1]
        key, kw_, kb_ = jax.random.split(key, 3)
        fan_in = cin * k * k
        bound = 1.0 / (fan_in ** 0.5)
        w = jax.random.uniform(kw_, (cout, cin, k, k), jnp.float32, -bound, bound)
        b = jax.random.uniform(kb_, (cout,), jnp.float32, -bound, bound)
        gamma = jnp.ones((cout,), jnp.float32)
        beta = jnp.zeros((cout,), jnp.float32)
        raw.append((w, b, gamma, beta))
    return raw


def prepare_params(raw):
    """One-time weight layout preparation (kept out of the per-call hot path)."""
    (w1, _b1, g1, be1), (w2, _b2, g2, be2), (w3, _b3, g3, be3) = raw
    w1m = w1.reshape(16, 3)
    # conv2 weights as (ci, tap=kh*4+kw, co) for the in-kernel BN1 fold.
    w2c = jnp.transpose(w2, (1, 2, 3, 0)).reshape(16, 16, 32)
    # conv3 weights lane-packed: w3p[di, dj, (2*pi+pj)*32 + c] = W3[c, 2di+pi, 2dj+pj]
    w3hw = jnp.transpose(w3[0], (1, 2, 0))                        # (i, j, c)
    w3p = jnp.transpose(w3hw.reshape(4, 2, 4, 2, 32),
                        (0, 2, 1, 3, 4)).reshape(4, 4, 128)
    # conv3 border map: V[oh, ow, c] = sum_{i,j} W3[c,i,j] * [real conv2 output]
    valid = jnp.zeros((35, 35), jnp.float32).at[1:34, 1:34].set(1.0)
    v3p = jnp.zeros((14, 14, 32), jnp.float32)
    for i in range(8):
        for j in range(8):
            v3p = v3p + valid[i:i + 28:2, j:j + 28:2][:, :, None] * w3hw[i, j, :]
    return dict(
        w1=w1m, w2c=w2c, w3p=w3p, v3p=v3p,
        g1=g1.reshape(16, 1), be1=be1.reshape(16, 1),
        g2=g2.reshape(1, 32), be2=be2.reshape(1, 32),
        g3=g3.reshape(1, 1), be3=be3.reshape(1, 1),
    )


# --------------------------------------------------------------------------- #
# Pure-JAX reference (raw PyTorch-layout params, incl. conv biases)
# --------------------------------------------------------------------------- #
def reference_forward(x1, raw_params, min_value=_MIN_VALUE, max_value=_MAX_VALUE,
                      eps=_EPS):
    y = x1.reshape(1, 3, 64, 64).astype(jnp.float32)
    for (w, b, g, be), (_k, s, p) in zip(raw_params, _LAYER_CFG):
        y = lax.conv_general_dilated(
            y, w, (s, s), [(p, p), (p, p)],
            dimension_numbers=("NCHW", "OIHW", "NCHW"),
            precision=lax.Precision.HIGHEST)
        y = y + b.reshape(1, -1, 1, 1)
        mu = jnp.mean(y, axis=(0, 2, 3), keepdims=True)
        var = jnp.mean(jnp.square(y - mu), axis=(0, 2, 3), keepdims=True)
        y = (g.reshape(1, -1, 1, 1) * (y - mu) * lax.rsqrt(var + eps)
             + be.reshape(1, -1, 1, 1))
    return jnp.clip(y, min_value, max_value)


if __name__ == "__main__":
    key = jax.random.PRNGKey(0)
    kx, kp = jax.random.split(key)
    x1 = jax.random.normal(kx, (1, 3, 64, 64), jnp.float32)

    raw_params = init_params(kp)
    params = prepare_params(raw_params)

    fwd = jax.jit(model_forward)
    out = jax.block_until_ready(fwd(x1, params))

    assert out.shape == (1, 1, 14, 14), out.shape
    assert out.dtype == jnp.float32

    ref = jax.block_until_ready(jax.jit(reference_forward)(x1, raw_params))
    np.testing.assert_allclose(np.asarray(out), np.asarray(ref),
                               rtol=5e-3, atol=5e-3)
    assert bool(jnp.all(out >= _MIN_VALUE - 1e-5))
    assert bool(jnp.all(out <= _MAX_VALUE + 1e-5))
    print("KERNEL_OK")
</pallas_src>

<mosaic_0001>
module attributes {stable_mosaic.version = 11 : i64} {
  func.func @_fused_kernel(%arg0: i32, %arg1: memref<3x32x128xf32, #tpu.memory_space<vmem>>, %arg2: memref<408x256xf32, #tpu.memory_space<vmem>>, %arg3: memref<16x3xf32, #tpu.memory_space<vmem>>, %arg4: memref<16x16x32xf32, #tpu.memory_space<vmem>>, %arg5: memref<4x4x128xf32, #tpu.memory_space<vmem>>, %arg6: memref<14x14x32xf32, #tpu.memory_space<vmem>>, %arg7: memref<16x1xf32, #tpu.memory_space<vmem>>, %arg8: memref<16x1xf32, #tpu.memory_space<vmem>>, %arg9: memref<1x32xf32, #tpu.memory_space<vmem>>, %arg10: memref<1x32xf32, #tpu.memory_space<vmem>>, %arg11: memref<1x1xf32, #tpu.memory_space<vmem>>, %arg12: memref<1x1xf32, #tpu.memory_space<vmem>>, %arg13: memref<14x14xf32, #tpu.memory_space<vmem>>, %arg14: memref<17x24x128xf32, #tpu.memory_space<vmem>>) attributes {dimension_semantics = [#tpu.dimension_semantics<arbitrary>], iteration_bounds = array<i64: 1>, scalar_prefetch = 0 : i64, scratch_operands = 1 : i64, tpu.core_type = #tpu.core_type<tc>, window_params = [{pipeline_mode = #tpu.pipeline_mode<synchronous>, transform_indices = @transform_0, window_bounds = array<i64: 3, 32, 128>}, {pipeline_mode = #tpu.pipeline_mode<synchronous>, transform_indices = @transform_1, window_bounds = array<i64: 408, 256>}, {pipeline_mode = #tpu.pipeline_mode<synchronous>, transform_indices = @transform_2, window_bounds = array<i64: 16, 3>}, {pipeline_mode = #tpu.pipeline_mode<synchronous>, transform_indices = @transform_3, window_bounds = array<i64: 16, 16, 32>}, {pipeline_mode = #tpu.pipeline_mode<synchronous>, transform_indices = @transform_4, window_bounds = array<i64: 4, 4, 128>}, {pipeline_mode = #tpu.pipeline_mode<synchronous>, transform_indices = @transform_5, window_bounds = array<i64: 14, 14, 32>}, {pipeline_mode = #tpu.pipeline_mode<synchronous>, transform_indices = @transform_6, window_bounds = array<i64: 16, 1>}, {pipeline_mode = #tpu.pipeline_mode<synchronous>, transform_indices = @transform_7, window_bounds = array<i64: 16, 1>}, {pipeline_mode = #tpu.pipeline_mode<synchronous>, transform_indices = @transform_8, window_bounds = array<i64: 1, 32>}, {pipeline_mode = #tpu.pipeline_mode<synchronous>, transform_indices = @transform_9, window_bounds = array<i64: 1, 32>}, {pipeline_mode = #tpu.pipeline_mode<synchronous>, transform_indices = @transform_10, window_bounds = array<i64: 1, 1>}, {pipeline_mode = #tpu.pipeline_mode<synchronous>, transform_indices = @transform_11, window_bounds = array<i64: 1, 1>}, {pipeline_mode = #tpu.pipeline_mode<synchronous>, transform_indices = @transform_12, window_bounds = array<i64: 14, 14>}]} {
    %c0 = arith.constant 0 : index
    %c0_0 = arith.constant 0 : index
    %c0_1 = arith.constant 0 : index
    %0 = vector.load %arg1[%c0, %c0_0, %c0_1] : memref<3x32x128xf32, #tpu.memory_space<vmem>>, vector<1x32x128xf32>
    %1 = vector.shape_cast %0 : vector<1x32x128xf32> to vector<32x128xf32>
    %c1 = arith.constant 1 : index
    %c0_2 = arith.constant 0 : index
    %c0_3 = arith.constant 0 : index
    %2 = vector.load %arg1[%c1, %c0_2, %c0_3] : memref<3x32x128xf32, #tpu.memory_space<vmem>>, vector<1x32x128xf32>
    %3 = vector.shape_cast %2 : vector<1x32x128xf32> to vector<32x128xf32>
    %c2 = arith.constant 2 : index
    %c0_4 = arith.constant 0 : index
    %c0_5 = arith.constant 0 : index
    %4 = vector.load %arg1[%c2, %c0_4, %c0_5] : memref<3x32x128xf32, #tpu.memory_space<vmem>>, vector<1x32x128xf32>
    %5 = vector.shape_cast %4 : vector<1x32x128xf32> to vector<32x128xf32>
    %6 = vector.shape_cast %1 : vector<32x128xf32> to vector<1x32x128xf32>
    %cst = arith.constant dense<0.000000e+00> : vector<1xf32>
    %7 = vector.multi_reduction <add>, %6, %cst [1, 2] : vector<1x32x128xf32> to vector<1xf32>
    %8 = vector.shape_cast %7 : vector<1xf32> to vector<1x1x1xf32>
    %9 = vector.extract %8[0, 0, 0] : f32 from vector<1x1x1xf32>
    %10 = vector.shape_cast %3 : vector<32x128xf32> to vector<1x32x128xf32>
    %cst_6 = arith.constant dense<0.000000e+00> : vector<1xf32>
    %11 = vector.multi_reduction <add>, %10, %cst_6 [1, 2] : vector<1x32x128xf32> to vector<1xf32>
    %12 = vector.shape_cast %11 : vector<1xf32> to vector<1x1x1xf32>
    %13 = vector.extract %12[0, 0, 0] : f32 from vector<1x1x1xf32>
    %14 = vector.shape_cast %5 : vector<32x128xf32> to vector<1x32x128xf32>
    %cst_7 = arith.constant dense<0.000000e+00> : vector<1xf32>
    %15 = vector.multi_reduction <add>, %14, %cst_7 [1, 2] : vector<1x32x128xf32> to vector<1xf32>
    %16 = vector.shape_cast %15 : vector<1xf32> to vector<1x1x1xf32>
    %17 = vector.extract %16[0, 0, 0] : f32 from vector<1x1x1xf32>
    %18 = arith.mulf %1, %1 : vector<32x128xf32>
    %19 = vector.shape_cast %18 : vector<32x128xf32> to vector<1x32x128xf32>
    %cst_8 = arith.constant dense<0.000000e+00> : vector<1xf32>
    %20 = vector.multi_reduction <add>, %19, %cst_8 [1, 2] : vector<1x32x128xf32> to vector<1xf32>
    %21 = vector.shape_cast %20 : vector<1xf32> to vector<1x1x1xf32>
    %22 = vector.extract %21[0, 0, 0] : f32 from vector<1x1x1xf32>
    %23 = arith.mulf %3, %3 : vector<32x128xf32>
    %24 = vector.shape_cast %23 : vector<32x128xf32> to vector<1x32x128xf32>
    %cst_9 = arith.constant dense<0.000000e+00> : vector<1xf32>
    %25 = vector.multi_reduction <add>, %24, %cst_9 [1, 2] : vector<1x32x128xf32> to vector<1xf32>
    %26 = vector.shape_cast %25 : vector<1xf32> to vector<1x1x1xf32>
    %27 = vector.extract %26[0, 0, 0] : f32 from vector<1x1x1xf32>
    %28 = arith.mulf %5, %5 : vector<32x128xf32>
    %29 = vector.shape_cast %28 : vector<32x128xf32> to vector<1x32x128xf32>
    %cst_10 = arith.constant dense<0.000000e+00> : vector<1xf32>
    %30 = vector.multi_reduction <add>, %29, %cst_10 [1, 2] : vector<1x32x128xf32> to vector<1xf32>
    %31 = vector.shape_cast %30 : vector<1xf32> to vector<1x1x1xf32>
    %32 = vector.extract %31[0, 0, 0] : f32 from vector<1x1x1xf32>
    %33 = arith.mulf %1, %3 : vector<32x128xf32>
    %34 = vector.shape_cast %33 : vector<32x128xf32> to vector<1x32x128xf32>
    %cst_11 = arith.constant dense<0.000000e+00> : vector<1xf32>
    %35 = vector.multi_reduction <add>, %34, %cst_11 [1, 2] : vector<1x32x128xf32> to vector<1xf32>
    %36 = vector.shape_cast %35 : vector<1xf32> to vector<1x1x1xf32>
    %37 = vector.extract %36[0, 0, 0] : f32 from vector<1x1x1xf32>
    %38 = arith.mulf %1, %5 : vector<32x128xf32>
    %39 = vector.shape_cast %38 : vector<32x128xf32> to vector<1x32x128xf32>
    %cst_12 = arith.constant dense<0.000000e+00> : vector<1xf32>
    %40 = vector.multi_reduction <add>, %39, %cst_12 [1, 2] : vector<1x32x128xf32> to vector<1xf32>
    %41 = vector.shape_cast %40 : vector<1xf32> to vector<1x1x1xf32>
    %42 = vector.extract %41[0, 0, 0] : f32 from vector<1x1x1xf32>
    %43 = arith.mulf %3, %5 : vector<32x128xf32>
    %44 = vector.shape_cast %43 : vector<32x128xf32> to vector<1x32x128xf32>
    %cst_13 = arith.constant dense<0.000000e+00> : vector<1xf32>
    %45 = vector.multi_reduction <add>, %44, %cst_13 [1, 2] : vector<1x32x128xf32> to vector<1xf32>
    %46 = vector.shape_cast %45 : vector<1xf32> to vector<1x1x1xf32>
    %47 = vector.extract %46[0, 0, 0] : f32 from vector<1x1x1xf32>
    %c0_14 = arith.constant 0 : index
    %c0_15 = arith.constant 0 : index
    %48 = vector.load %arg3[%c0_14, %c0_15] : memref<16x3xf32, #tpu.memory_space<vmem>>, vector<16x3xf32>
    %49 = vector.extract_strided_slice %48 {offsets = [0, 0], sizes = [16, 1], strides = [1, 1]} : vector<16x3xf32> to vector<16x1xf32>
    %50 = vector.extract_strided_slice %48 {offsets = [0, 1], sizes = [16, 1], strides = [1, 1]} : vector<16x3xf32> to vector<16x1xf32>
    %51 = vector.extract_strided_slice %48 {offsets = [0, 2], sizes = [16, 1], strides = [1, 1]} : vector<16x3xf32> to vector<16x1xf32>
    %52 = vector.broadcast %9 : f32 to vector<16x1xf32>
    %53 = arith.mulf %49, %52 : vector<16x1xf32>
    %54 = vector.broadcast %13 : f32 to vector<16x1xf32>
    %55 = arith.mulf %50, %54 : vector<16x1xf32>
    %56 = arith.addf %53, %55 : vector<16x1xf32>
    %57 = vector.broadcast %17 : f32 to vector<16x1xf32>
    %58 = arith.mulf %51, %57 : vector<16x1xf32>
    %59 = arith.addf %56, %58 : vector<16x1xf32>
    %cst_16 = arith.constant 2.2956841E-4 : f32
    %60 = vector.broadcast %cst_16 : f32 to vector<16x1xf32>
    %61 = arith.mulf %59, %60 : vector<16x1xf32>
    %62 = arith.mulf %49, %49 : vector<16x1xf32>
    %63 = vector.broadcast %22 : f32 to vector<16x1xf32>
    %64 = arith.mulf %62, %63 : vector<16x1xf32>
    %65 = arith.mulf %50, %50 : vector<16x1xf32>
    %66 = vector.broadcast %27 : f32 to vector<16x1xf32>
    %67 = arith.mulf %65, %66 : vector<16x1xf32>
    %68 = arith.addf %64, %67 : vector<16x1xf32>
    %69 = arith.mulf %51, %51 : vector<16x1xf32>
    %70 = vector.broadcast %32 : f32 to vector<16x1xf32>
    %71 = arith.mulf %69, %70 : vector<16x1xf32>
    %72 = arith.addf %68, %71 : vector<16x1xf32>
    %73 = arith.mulf %49, %50 : vector<16x1xf32>
    %74 = vector.broadcast %37 : f32 to vector<16x1xf32>
    %75 = arith.mulf %73, %74 : vector<16x1xf32>
    %76 = arith.mulf %49, %51 : vector<16x1xf32>
    %77 = vector.broadcast %42 : f32 to vector<16x1xf32>
    %78 = arith.mulf %76, %77 : vector<16x1xf32>
    %79 = arith.addf %75, %78 : vector<16x1xf32>
    %80 = arith.mulf %50, %51 : vector<16x1xf32>
    %81 = vector.broadcast %47 : f32 to vector<16x1xf32>
    %82 = arith.mulf %80, %81 : vector<16x1xf32>
    %83 = arith.addf %79, %82 : vector<16x1xf32>
    %cst_17 = arith.constant 2.000000e+00 : f32
    %84 = vector.broadcast %cst_17 : f32 to vector<16x1xf32>
    %85 = arith.mulf %84, %83 : vector<16x1xf32>
    %86 = arith.addf %72, %85 : vector<16x1xf32>
    %cst_18 = arith.constant 2.2956841E-4 : f32
    %87 = vector.broadcast %cst_18 : f32 to vector<16x1xf32>
    %88 = arith.mulf %86, %87 : vector<16x1xf32>
    %89 = arith.mulf %61, %61 : vector<16x1xf32>
    %90 = arith.subf %88, %89 : vector<16x1xf32>
    %c0_19 = arith.constant 0 : index
    %c0_20 = arith.constant 0 : index
    %91 = vector.load %arg7[%c0_19, %c0_20] : memref<16x1xf32, #tpu.memory_space<vmem>>, vector<16x1xf32>
    %cst_21 = arith.constant 9.99999974E-6 : f32
    %92 = vector.broadcast %cst_21 : f32 to vector<16x1xf32>
    %93 = arith.addf %90, %92 : vector<16x1xf32>
    %94 = math.rsqrt %93 : vector<16x1xf32>
    %95 = arith.mulf %91, %94 : vector<16x1xf32>
    %c0_22 = arith.constant 0 : index
    %c0_23 = arith.constant 0 : index
    %96 = vector.load %arg8[%c0_22, %c0_23] : memref<16x1xf32, #tpu.memory_space<vmem>>, vector<16x1xf32>
    %97 = arith.mulf %95, %61 : vector<16x1xf32>
    %98 = arith.subf %96, %97 : vector<16x1xf32>
    %c0_24 = arith.constant 0 : index
    %c0_25 = arith.constant 0 : index
    %c0_26 = arith.constant 0 : index
    %99 = vector.load %arg4[%c0_24, %c0_25, %c0_26] : memref<16x16x32xf32, #tpu.memory_space<vmem>>, vector<16x16x32xf32>
    %100 = arith.mulf %95, %49 : vector<16x1xf32>
    %101 = arith.mulf %95, %50 : vector<16x1xf32>
    %102 = arith.mulf %95, %51 : vector<16x1xf32>
    %103 = vector.shape_cast %100 : vector<16x1xf32> to vector<16x1x1xf32>
    %104 = vector.broadcast %103 : vector<16x1x1xf32> to vector<16x16x32xf32>
    %105 = arith.mulf %99, %104 : vector<16x16x32xf32>
    %cst_27 = arith.constant dense<0.000000e+00> : vector<16x32xf32>
    %106 = vector.multi_reduction <add>, %105, %cst_27 [0] : vector<16x16x32xf32> to vector<16x32xf32>
    %107 = vector.shape_cast %101 : vector<16x1xf32> to vector<16x1x1xf32>
    %108 = vector.broadcast %107 : vector<16x1x1xf32> to vector<16x16x32xf32>
    %109 = arith.mulf %99, %108 : vector<16x16x32xf32>
    %cst_28 = arith.constant dense<0.000000e+00> : vector<16x32xf32>
    %110 = vector.multi_reduction <add>, %109, %cst_28 [0] : vector<16x16x32xf32> to vector<16x32xf32>
    %111 = vector.shape_cast %102 : vector<16x1xf32> to vector<16x1x1xf32>
    %112 = vector.broadcast %111 : vector<16x1x1xf32> to vector<16x16x32xf32>
    %113 = arith.mulf %99, %112 : vector<16x16x32xf32>
    %cst_29 = arith.constant dense<0.000000e+00> : vector<16x32xf32>
    %114 = vector.multi_reduction <add>, %113, %cst_29 [0] : vector<16x16x32xf32> to vector<16x32xf32>
    %115 = vector.shape_cast %98 : vector<16x1xf32> to vector<16x1x1xf32>
    %116 = vector.broadcast %115 : vector<16x1x1xf32> to vector<16x16x32xf32>
    %117 = arith.mulf %99, %116 : vector<16x16x32xf32>
    %cst_30 = arith.constant dense<0.000000e+00> : vector<16x32xf32>
    %118 = vector.multi_reduction <add>, %117, %cst_30 [0] : vector<16x16x32xf32> to vector<16x32xf32>
    %119 = tpu.concatenate %106, %110, %114, %118 in 0 : vector<16x32xf32>, vector<16x32xf32>, vector<16x32xf32>, vector<16x32xf32> -> vector<64x32xf32>
    %cst_31 = arith.constant 0.000000e+00 : f32
    %120 = vector.broadcast %cst_31 : f32 to vector<64x32xf32>
    %121 = tpu.concatenate %119, %120, %120, %120 in 1 : vector<64x32xf32>, vector<64x32xf32>, vector<64x32xf32>, vector<64x32xf32> -> vector<64x128xf32>
    %122 = tpu.concatenate %120, %119, %120, %120 in 1 : vector<64x32xf32>, vector<64x32xf32>, vector<64x32xf32>, vector<64x32xf32> -> vector<64x128xf32>
    %123 = tpu.concatenate %120, %120, %119, %120 in 1 : vector<64x32xf32>, vector<64x32xf32>, vector<64x32xf32>, vector<64x32xf32> -> vector<64x128xf32>
    %124 = tpu.concatenate %120, %120, %120, %119 in 1 : vector<64x32xf32>, vector<64x32xf32>, vector<64x32xf32>, vector<64x32xf32> -> vector<64x128xf32>
    %125 = tpu.concatenate %121, %122, %123, %124 in 0 : vector<64x128xf32>, vector<64x128xf32>, vector<64x128xf32>, vector<64x128xf32> -> vector<256x128xf32>
    %c0_32 = arith.constant 0 : index
    %c0_33 = arith.constant 0 : index
    %126 = vector.load %arg2[%c0_32, %c0_33] : memref<408x256xf32, #tpu.memory_space<vmem>>, vector<408x256xf32>
    %cst_34 = arith.constant dense<0.000000e+00> : vector<408x128xf32>
    %127 = tpu.matmul %126, %125, %cst_34 {dimension_numbers = #tpu.dot_dimension_numbers<[1], [0], [0], [1], [0, 0, 1, 1], [], []>} : vector<408x256xf32>, vector<256x128xf32>, vector<408x128xf32> -> vector<408x128xf32>
    %cst_35 = arith.constant dense<0.000000e+00> : vector<128xf32>
    %128 = vector.multi_reduction <add>, %127, %cst_35 [0] : vector<408x128xf32> to vector<128xf32>
    %129 = vector.shape_cast %128 : vector<128xf32> to vector<1x128xf32>
    %130 = arith.mulf %127, %127 : vector<408x128xf32>
    %cst_36 = arith.constant dense<0.000000e+00> : vector<128xf32>
    %131 = vector.multi_reduction <add>, %130, %cst_36 [0] : vector<408x128xf32> to vector<128xf32>
    %132 = vector.shape_cast %131 : vector<128xf32> to vector<1x128xf32>
    %133 = vector.extract_strided_slice %129 {offsets = [0, 0], sizes = [1, 32], strides = [1, 1]} : vector<1x128xf32> to vector<1x32xf32>
    %134 = vector.extract_strided_slice %129 {offsets = [0, 32], sizes = [1, 32], strides = [1, 1]} : vector<1x128xf32> to vector<1x32xf32>
    %135 = arith.addf %133, %134 : vector<1x32xf32>
    %136 = vector.extract_strided_slice %129 {offsets = [0, 64], sizes = [1, 32], strides = [1, 1]} : vector<1x128xf32> to vector<1x32xf32>
    %137 = arith.addf %135, %136 : vector<1x32xf32>
    %138 = vector.extract_strided_slice %129 {offsets = [0, 96], sizes = [1, 32], strides = [1, 1]} : vector<1x128xf32> to vector<1x32xf32>
    %139 = arith.addf %137, %138 : vector<1x32xf32>
    %140 = vector.extract_strided_slice %132 {offsets = [0, 0], sizes = [1, 32], strides = [1, 1]} : vector<1x128xf32> to vector<1x32xf32>
    %141 = vector.extract_strided_slice %132 {offsets = [0, 32], sizes = [1, 32], strides = [1, 1]} : vector<1x128xf32> to vector<1x32xf32>
    %142 = arith.addf %140, %141 : vector<1x32xf32>
    %143 = vector.extract_strided_slice %132 {offsets = [0, 64], sizes = [1, 32], strides = [1, 1]} : vector<1x128xf32> to vector<1x32xf32>
    %144 = arith.addf %142, %143 : vector<1x32xf32>
    %145 = vector.extract_strided_slice %132 {offsets = [0, 96], sizes = [1, 32], strides = [1, 1]} : vector<1x128xf32> to vector<1x32xf32>
    %146 = arith.addf %144, %145 : vector<1x32xf32>
    %cst_37 = arith.constant 9.18273639E-4 : f32
    %147 = vector.broadcast %cst_37 : f32 to vector<1x32xf32>
    %148 = arith.mulf %139, %147 : vector<1x32xf32>
    %cst_38 = arith.constant 9.18273639E-4 : f32
    %149 = vector.broadcast %cst_38 : f32 to vector<1x32xf32>
    %150 = arith.mulf %146, %149 : vector<1x32xf32>
    %151 = arith.mulf %148, %148 : vector<1x32xf32>
    %152 = arith.subf %150, %151 : vector<1x32xf32>
    %c0_39 = arith.constant 0 : index
    %c0_40 = arith.constant 0 : index
    %153 = vector.load %arg9[%c0_39, %c0_40] : memref<1x32xf32, #tpu.memory_space<vmem>>, vector<1x32xf32>
    %cst_41 = arith.constant 9.99999974E-6 : f32
    %154 = vector.broadcast %cst_41 : f32 to vector<1x32xf32>
    %155 = arith.addf %152, %154 : vector<1x32xf32>
    %156 = math.rsqrt %155 : vector<1x32xf32>
    %157 = arith.mulf %153, %156 : vector<1x32xf32>
    %c0_42 = arith.constant 0 : index
    %c0_43 = arith.constant 0 : index
    %158 = vector.load %arg10[%c0_42, %c0_43] : memref<1x32xf32, #tpu.memory_space<vmem>>, vector<1x32xf32>
    %159 = arith.mulf %157, %148 : vector<1x32xf32>
    %160 = arith.subf %158, %159 : vector<1x32xf32>
    %161 = vector.extract_strided_slice %127 {offsets = [0, 0], sizes = [24, 128], strides = [1, 1]} : vector<408x128xf32> to vector<24x128xf32>
    %c0_44 = arith.constant 0 : index
    %c0_45 = arith.constant 0 : index
    %c0_46 = arith.constant 0 : index
    %162 = vector.load %arg14[%c0_44, %c0_45, %c0_46] : memref<17x24x128xf32, #tpu.memory_space<vmem>>, vector<1x24x128xf32>
    %163 = vector.shape_cast %162 : vector<1x24x128xf32> to vector<24x128xf32>
    %164 = vector.shape_cast %161 : vector<24x128xf32> to vector<1x24x128xf32>
    tpu.vector_store %arg14[%c0_44, %c0_45, %c0_46], %164 {strides = array<i32>} : memref<17x24x128xf32, #tpu.memory_space<vmem>>, vector<1x24x128xf32>,
    %165 = vector.extract_strided_slice %127 {offsets = [24, 0], sizes = [24, 128], strides = [1, 1]} : vector<408x128xf32> to vector<24x128xf32>
    %c1_47 = arith.constant 1 : index
    %c0_48 = arith.constant 0 : index
    %c0_49 = arith.constant 0 : index
    %166 = vector.load %arg14[%c1_47, %c0_48, %c0_49] : memref<17x24x128xf32, #tpu.memory_space<vmem>>, vector<1x24x128xf32>
    %167 = vector.shape_cast %166 : vector<1x24x128xf32> to vector<24x128xf32>
    %168 = vector.shape_cast %165 : vector<24x128xf32> to vector<1x24x128xf32>
    tpu.vector_store %arg14[%c1_47, %c0_48, %c0_49], %168 {strides = array<i32>} : memref<17x24x128xf32, #tpu.memory_space<vmem>>, vector<1x24x128xf32>,
    %169 = vector.extract_strided_slice %127 {offsets = [48, 0], sizes = [24, 128], strides = [1, 1]} : vector<408x128xf32> to vector<24x128xf32>
    %c2_50 = arith.constant 2 : index
    %c0_51 = arith.constant 0 : index
    %c0_52 = arith.constant 0 : index
    %170 = vector.load %arg14[%c2_50, %c0_51, %c0_52] : memref<17x24x128xf32, #tpu.memory_space<vmem>>, vector<1x24x128xf32>
    %171 = vector.shape_cast %170 : vector<1x24x128xf32> to vector<24x128xf32>
    %172 = vector.shape_cast %169 : vector<24x128xf32> to vector<1x24x128xf32>
    tpu.vector_store %arg14[%c2_50, %c0_51, %c0_52], %172 {strides = array<i32>} : memref<17x24x128xf32, #tpu.memory_space<vmem>>, vector<1x24x128xf32>,
    %173 = vector.extract_strided_slice %127 {offsets = [72, 0], sizes = [24, 128], strides = [1, 1]} : vector<408x128xf32> to vector<24x128xf32>
    %c3 = arith.constant 3 : index
    %c0_53 = arith.constant 0 : index
    %c0_54 = arith.constant 0 : index
    %174 = vector.load %arg14[%c3, %c0_53, %c0_54] : memref<17x24x128xf32, #tpu.memory_space<vmem>>, vector<1x24x128xf32>
    %175 = vector.shape_cast %174 : vector<1x24x128xf32> to vector<24x128xf32>
    %176 = vector.shape_cast %173 : vector<24x128xf32> to vector<1x24x128xf32>
    tpu.vector_store %arg14[%c3, %c0_53, %c0_54], %176 {strides = array<i32>} : memref<17x24x128xf32, #tpu.memory_space<vmem>>, vector<1x24x128xf32>,
    %177 = vector.extract_strided_slice %127 {offsets = [96, 0], sizes = [24, 128], strides = [1, 1]} : vector<408x128xf32> to vector<24x128xf32>
    %c4 = arith.constant 4 : index
    %c0_55 = arith.constant 0 : index
    %c0_56 = arith.constant 0 : index
    %178 = vector.load %arg14[%c4, %c0_55, %c0_56] : memref<17x24x128xf32, #tpu.memory_space<vmem>>, vector<1x24x128xf32>
    %179 = vector.shape_cast %178 : vector<1x24x128xf32> to vector<24x128xf32>
    %180 = vector.shape_cast %177 : vector<24x128xf32> to vector<1x24x128xf32>
    tpu.vector_store %arg14[%c4, %c0_55, %c0_56], %180 {strides = array<i32>} : memref<17x24x128xf32, #tpu.memory_space<vmem>>, vector<1x24x128xf32>,
    %181 = vector.extract_strided_slice %127 {offsets = [120, 0], sizes = [24, 128], strides = [1, 1]} : vector<408x128xf32> to vector<24x128xf32>
    %c5 = arith.constant 5 : index
    %c0_57 = arith.constant 0 : index
    %c0_58 = arith.constant 0 : index
    %182 = vector.load %arg14[%c5, %c0_57, %c0_58] : memref<17x24x128xf32, #tpu.memory_space<vmem>>, vector<1x24x128xf32>
    %183 = vector.shape_cast %182 : vector<1x24x128xf32> to vector<24x128xf32>
    %184 = vector.shape_cast %181 : vector<24x128xf32> to vector<1x24x128xf32>
    tpu.vector_store %arg14[%c5, %c0_57, %c0_58], %184 {strides = array<i32>} : memref<17x24x128xf32, #tpu.memory_space<vmem>>, vector<1x24x128xf32>,
    %185 = vector.extract_strided_slice %127 {offsets = [144, 0], sizes = [24, 128], strides = [1, 1]} : vector<408x128xf32> to vector<24x128xf32>
    %c6 = arith.constant 6 : index
    %c0_59 = arith.constant 0 : index
    %c0_60 = arith.constant 0 : index
    %186 = vector.load %arg14[%c6, %c0_59, %c0_60] : memref<17x24x128xf32, #tpu.memory_space<vmem>>, vector<1x24x128xf32>
    %187 = vector.shape_cast %186 : vector<1x24x128xf32> to vector<24x128xf32>
    %188 = vector.shape_cast %185 : vector<24x128xf32> to vector<1x24x128xf32>
    tpu.vector_store %arg14[%c6, %c0_59, %c0_60], %188 {strides = array<i32>} : memref<17x24x128xf32, #tpu.memory_space<vmem>>, vector<1x24x128xf32>,
    %189 = vector.extract_strided_slice %127 {offsets = [168, 0], sizes = [24, 128], strides = [1, 1]} : vector<408x128xf32> to vector<24x128xf32>
    %c7 = arith.constant 7 : index
    %c0_61 = arith.constant 0 : index
    %c0_62 = arith.constant 0 : index
    %190 = vector.load %arg14[%c7, %c0_61, %c0_62] : memref<17x24x128xf32, #tpu.memory_space<vmem>>, vector<1x24x128xf32>
    %191 = vector.shape_cast %190 : vector<1x24x128xf32> to vector<24x128xf32>
    %192 = vector.shape_cast %189 : vector<24x128xf32> to vector<1x24x128xf32>
    tpu.vector_store %arg14[%c7, %c0_61, %c0_62], %192 {strides = array<i32>} : memref<17x24x128xf32, #tpu.memory_space<vmem>>, vector<1x24x128xf32>,
    %193 = vector.extract_strided_slice %127 {offsets = [192, 0], sizes = [24, 128], strides = [1, 1]} : vector<408x128xf32> to vector<24x128xf32>
    %c8 = arith.constant 8 : index
    %c0_63 = arith.constant 0 : index
    %c0_64 = arith.constant 0 : index
    %194 = vector.load %arg14[%c8, %c0_63, %c0_64] : memref<17x24x128xf32, #tpu.memory_space<vmem>>, vector<1x24x128xf32>
    %195 = vector.shape_cast %194 : vector<1x24x128xf32> to vector<24x128xf32>
    %196 = vector.shape_cast %193 : vector<24x128xf32> to vector<1x24x128xf32>
    tpu.vector_store %arg14[%c8, %c0_63, %c0_64], %196 {strides = array<i32>} : memref<17x24x128xf32, #tpu.memory_space<vmem>>, vector<1x24x128xf32>,
    %197 = vector.extract_strided_slice %127 {offsets = [216, 0], sizes = [24, 128], strides = [1, 1]} : vector<408x128xf32> to vector<24x128xf32>
    %c9 = arith.constant 9 : index
    %c0_65 = arith.constant 0 : index
    %c0_66 = arith.constant 0 : index
    %198 = vector.load %arg14[%c9, %c0_65, %c0_66] : memref<17x24x128xf32, #tpu.memory_space<vmem>>, vector<1x24x128xf32>
    %199 = vector.shape_cast %198 : vector<1x24x128xf32> to vector<24x128xf32>
    %200 = vector.shape_cast %197 : vector<24x128xf32> to vector<1x24x128xf32>
    tpu.vector_store %arg14[%c9, %c0_65, %c0_66], %200 {strides = array<i32>} : memref<17x24x128xf32, #tpu.memory_space<vmem>>, vector<1x24x128xf32>,
    %201 = vector.extract_strided_slice %127 {offsets = [240, 0], sizes = [24, 128], strides = [1, 1]} : vector<408x128xf32> to vector<24x128xf32>
    %c10 = arith.constant 10 : index
    %c0_67 = arith.constant 0 : index
    %c0_68 = arith.constant 0 : index
    %202 = vector.load %arg14[%c10, %c0_67, %c0_68] : memref<17x24x128xf32, #tpu.memory_space<vmem>>, vector<1x24x128xf32>
    %203 = vector.shape_cast %202 : vector<1x24x128xf32> to vector<24x128xf32>
    %204 = vector.shape_cast %201 : vector<24x128xf32> to vector<1x24x128xf32>
    tpu.vector_store %arg14[%c10, %c0_67, %c0_68], %204 {strides = array<i32>} : memref<17x24x128xf32, #tpu.memory_space<vmem>>, vector<1x24x128xf32>,
    %205 = vector.extract_strided_slice %127 {offsets = [264, 0], sizes = [24, 128], strides = [1, 1]} : vector<408x128xf32> to vector<24x128xf32>
    %c11 = arith.constant 11 : index
    %c0_69 = arith.constant 0 : index
    %c0_70 = arith.constant 0 : index
    %206 = vector.load %arg14[%c11, %c0_69, %c0_70] : memref<17x24x128xf32, #tpu.memory_space<vmem>>, vector<1x24x128xf32>
    %207 = vector.shape_cast %206 : vector<1x24x128xf32> to vector<24x128xf32>
    %208 = vector.shape_cast %205 : vector<24x128xf32> to vector<1x24x128xf32>
    tpu.vector_store %arg14[%c11, %c0_69, %c0_70], %208 {strides = array<i32>} : memref<17x24x128xf32, #tpu.memory_space<vmem>>, vector<1x24x128xf32>,
    %209 = vector.extract_strided_slice %127 {offsets = [288, 0], sizes = [24, 128], strides = [1, 1]} : vector<408x128xf32> to vector<24x128xf32>
    %c12 = arith.constant 12 : index
    %c0_71 = arith.constant 0 : index
    %c0_72 = arith.constant 0 : index
    %210 = vector.load %arg14[%c12, %c0_71, %c0_72] : memref<17x24x128xf32, #tpu.memory_space<vmem>>, vector<1x24x128xf32>
    %211 = vector.shape_cast %210 : vector<1x24x128xf32> to vector<24x128xf32>
    %212 = vector.shape_cast %209 : vector<24x128xf32> to vector<1x24x128xf32>
    tpu.vector_store %arg14[%c12, %c0_71, %c0_72], %212 {strides = array<i32>} : memref<17x24x128xf32, #tpu.memory_space<vmem>>, vector<1x24x128xf32>,
    %213 = vector.extract_strided_slice %127 {offsets = [312, 0], sizes = [24, 128], strides = [1, 1]} : vector<408x128xf32> to vector<24x128xf32>
    %c13 = arith.constant 13 : index
    %c0_73 = arith.constant 0 : index
    %c0_74 = arith.constant 0 : index
    %214 = vector.load %arg14[%c13, %c0_73, %c0_74] : memref<17x24x128xf32, #tpu.memory_space<vmem>>, vector<1x24x128xf32>
    %215 = vector.shape_cast %214 : vector<1x24x128xf32> to vector<24x128xf32>
    %216 = vector.shape_cast %213 : vector<24x128xf32> to vector<1x24x128xf32>
    tpu.vector_store %arg14[%c13, %c0_73, %c0_74], %216 {strides = array<i32>} : memref<17x24x128xf32, #tpu.memory_space<vmem>>, vector<1x24x128xf32>,
    %217 = vector.extract_strided_slice %127 {offsets = [336, 0], sizes = [24, 128], strides = [1, 1]} : vector<408x128xf32> to vector<24x128xf32>
    %c14 = arith.constant 14 : index
    %c0_75 = arith.constant 0 : index
    %c0_76 = arith.constant 0 : index
    %218 = vector.load %arg14[%c14, %c0_75, %c0_76] : memref<17x24x128xf32, #tpu.memory_space<vmem>>, vector<1x24x128xf32>
    %219 = vector.shape_cast %218 : vector<1x24x128xf32> to vector<24x128xf32>
    %220 = vector.shape_cast %217 : vector<24x128xf32> to vector<1x24x128xf32>
    tpu.vector_store %arg14[%c14, %c0_75, %c0_76], %220 {strides = array<i32>} : memref<17x24x128xf32, #tpu.memory_space<vmem>>, vector<1x24x128xf32>,
    %221 = vector.extract_strided_slice %127 {offsets = [360, 0], sizes = [24, 128], strides = [1, 1]} : vector<408x128xf32> to vector<24x128xf32>
    %c15 = arith.constant 15 : index
    %c0_77 = arith.constant 0 : index
    %c0_78 = arith.constant 0 : index
    %222 = vector.load %arg14[%c15, %c0_77, %c0_78] : memref<17x24x128xf32, #tpu.memory_space<vmem>>, vector<1x24x128xf32>
    %223 = vector.shape_cast %222 : vector<1x24x128xf32> to vector<24x128xf32>
    %224 = vector.shape_cast %221 : vector<24x128xf32> to vector<1x24x128xf32>
    tpu.vector_store %arg14[%c15, %c0_77, %c0_78], %224 {strides = array<i32>} : memref<17x24x128xf32, #tpu.memory_space<vmem>>, vector<1x24x128xf32>,
    %225 = vector.extract_strided_slice %127 {offsets = [384, 0], sizes = [24, 128], strides = [1, 1]} : vector<408x128xf32> to vector<24x128xf32>
    %c16 = arith.constant 16 : index
    %c0_79 = arith.constant 0 : index
    %c0_80 = arith.constant 0 : index
    %226 = vector.load %arg14[%c16, %c0_79, %c0_80] : memref<17x24x128xf32, #tpu.memory_space<vmem>>, vector<1x24x128xf32>
    %227 = vector.shape_cast %226 : vector<1x24x128xf32> to vector<24x128xf32>
    %228 = vector.shape_cast %225 : vector<24x128xf32> to vector<1x24x128xf32>
    tpu.vector_store %arg14[%c16, %c0_79, %c0_80], %228 {strides = array<i32>} : memref<17x24x128xf32, #tpu.memory_space<vmem>>, vector<1x24x128xf32>,
    %229 = tpu.concatenate %157, %157, %157, %157 in 1 : vector<1x32xf32>, vector<1x32xf32>, vector<1x32xf32>, vector<1x32xf32> -> vector<1x128xf32>
    %c0_81 = arith.constant 0 : index
    %c0_82 = arith.constant 0 : index
    %c0_83 = arith.constant 0 : index
    %230 = vector.load %arg5[%c0_81, %c0_82, %c0_83] : memref<4x4x128xf32, #tpu.memory_space<vmem>>, vector<4x4x128xf32>
    %231 = vector.shape_cast %229 : vector<1x128xf32> to vector<1x1x128xf32>
    %232 = vector.broadcast %231 : vector<1x1x128xf32> to vector<4x4x128xf32>
    %233 = arith.mulf %230, %232 : vector<4x4x128xf32>
    %cst_84 = arith.constant 0.000000e+00 : f32
    %234 = vector.broadcast %cst_84 : f32 to vector<14x14xf32>
    %c0_85 = arith.constant 0 : index
    %c0_86 = arith.constant 0 : index
    %c0_87 = arith.constant 0 : index
    %235 = vector.load %arg14[%c0_85, %c0_86, %c0_87] : memref<17x24x128xf32, #tpu.memory_space<vmem>>, vector<14x24x128xf32>
    %236 = vector.extract_strided_slice %233 {offsets = [0, 0, 0], sizes = [1, 1, 128], strides = [1, 1, 1]} : vector<4x4x128xf32> to vector<1x1x128xf32>
    %237 = vector.shape_cast %236 : vector<1x1x128xf32> to vector<128xf32>
    %238 = vector.shape_cast %237 : vector<128xf32> to vector<1x1x128xf32>
    %239 = vector.broadcast %238 : vector<1x1x128xf32> to vector<14x24x128xf32>
    %240 = arith.mulf %235, %239 : vector<14x24x128xf32>
    %cst_88 = arith.constant dense<0.000000e+00> : vector<14x24xf32>
    %241 = vector.multi_reduction <add>, %240, %cst_88 [2] : vector<14x24x128xf32> to vector<14x24xf32>
    %242 = vector.extract_strided_slice %241 {offsets = [0, 0], sizes = [14, 14], strides = [1, 1]} : vector<14x24xf32> to vector<14x14xf32>
    %243 = arith.addf %234, %242 : vector<14x14xf32>
    %244 = vector.extract_strided_slice %233 {offsets = [0, 1, 0], sizes = [1, 1, 128], strides = [1, 1, 1]} : vector<4x4x128xf32> to vector<1x1x128xf32>
    %245 = vector.shape_cast %244 : vector<1x1x128xf32> to vector<128xf32>
    %246 = vector.shape_cast %245 : vector<128xf32> to vector<1x1x128xf32>
    %247 = vector.broadcast %246 : vector<1x1x128xf32> to vector<14x24x128xf32>
    %248 = arith.mulf %235, %247 : vector<14x24x128xf32>
    %cst_89 = arith.constant dense<0.000000e+00> : vector<14x24xf32>
    %249 = vector.multi_reduction <add>, %248, %cst_89 [2] : vector<14x24x128xf32> to vector<14x24xf32>
    %250 = vector.extract_strided_slice %249 {offsets = [0, 1], sizes = [14, 14], strides = [1, 1]} : vector<14x24xf32> to vector<14x14xf32>
    %251 = arith.addf %243, %250 : vector<14x14xf32>
    %252 = vector.extract_strided_slice %233 {offsets = [0, 2, 0], sizes = [1, 1, 128], strides = [1, 1, 1]} : vector<4x4x128xf32> to vector<1x1x128xf32>
    %253 = vector.shape_cast %252 : vector<1x1x128xf32> to vector<128xf32>
    %254 = vector.shape_cast %253 : vector<128xf32> to vector<1x1x128xf32>
    %255 = vector.broadcast %254 : vector<1x1x128xf32> to vector<14x24x128xf32>
    %256 = arith.mulf %235, %255 : vector<14x24x128xf32>
    %cst_90 = arith.constant dense<0.000000e+00> : vector<14x24xf32>
    %257 = vector.multi_reduction <add>, %256, %cst_90 [2] : vector<14x24x128xf32> to vector<14x24xf32>
    %258 = vector.extract_strided_slice %257 {offsets = [0, 2], sizes = [14, 14], strides = [1, 1]} : vector<14x24xf32> to vector<14x14xf32>
    %259 = arith.addf %251, %258 : vector<14x14xf32>
    %260 = vector.extract_strided_slice %233 {offsets = [0, 3, 0], sizes = [1, 1, 128], strides = [1, 1, 1]} : vector<4x4x128xf32> to vector<1x1x128xf32>
    %261 = vector.shape_cast %260 : vector<1x1x128xf32> to vector<128xf32>
    %262 = vector.shape_cast %261 : vector<128xf32> to vector<1x1x128xf32>
    %263 = vector.broadcast %262 : vector<1x1x128xf32> to vector<14x24x128xf32>
    %264 = arith.mulf %235, %263 : vector<14x24x128xf32>
    %cst_91 = arith.constant dense<0.000000e+00> : vector<14x24xf32>
    %265 = vector.multi_reduction <add>, %264, %cst_91 [2] : vector<14x24x128xf32> to vector<14x24xf32>
    %266 = vector.extract_strided_slice %265 {offsets = [0, 3], sizes = [14, 14], strides = [1, 1]} : vector<14x24xf32> to vector<14x14xf32>
    %267 = arith.addf %259, %266 : vector<14x14xf32>
    %c1_92 = arith.constant 1 : index
    %c0_93 = arith.constant 0 : index
    %c0_94 = arith.constant 0 : index
    %268 = vector.load %arg14[%c1_92, %c0_93, %c0_94] : memref<17x24x128xf32, #tpu.memory_space<vmem>>, vector<14x24x128xf32>
    %269 = vector.extract_strided_slice %233 {offsets = [1, 0, 0], sizes = [1, 1, 128], strides = [1, 1, 1]} : vector<4x4x128xf32> to vector<1x1x128xf32>
    %270 = vector.shape_cast %269 : vector<1x1x128xf32> to vector<128xf32>
    %271 = vector.shape_cast %270 : vector<128xf32> to vector<1x1x128xf32>
    %272 = vector.broadcast %271 : vector<1x1x128xf32> to vector<14x24x128xf32>
    %273 = arith.mulf %268, %272 : vector<14x24x128xf32>
    %cst_95 = arith.constant dense<0.000000e+00> : vector<14x24xf32>
    %274 = vector.multi_reduction <add>, %273, %cst_95 [2] : vector<14x24x128xf32> to vector<14x24xf32>
    %275 = vector.extract_strided_slice %274 {offsets = [0, 0], sizes = [14, 14], strides = [1, 1]} : vector<14x24xf32> to vector<14x14xf32>
    %276 = arith.addf %267, %275 : vector<14x14xf32>
    %277 = vector.extract_strided_slice %233 {offsets = [1, 1, 0], sizes = [1, 1, 128], strides = [1, 1, 1]} : vector<4x4x128xf32> to vector<1x1x128xf32>
    %278 = vector.shape_cast %277 : vector<1x1x128xf32> to vector<128xf32>
    %279 = vector.shape_cast %278 : vector<128xf32> to vector<1x1x128xf32>
    %280 = vector.broadcast %279 : vector<1x1x128xf32> to vector<14x24x128xf32>
    %281 = arith.mulf %268, %280 : vector<14x24x128xf32>
    %cst_96 = arith.constant dense<0.000000e+00> : vector<14x24xf32>
    %282 = vector.multi_reduction <add>, %281, %cst_96 [2] : vector<14x24x128xf32> to vector<14x24xf32>
    %283 = vector.extract_strided_slice %282 {offsets = [0, 1], sizes = [14, 14], strides = [1, 1]} : vector<14x24xf32> to vector<14x14xf32>
    %284 = arith.addf %276, %283 : vector<14x14xf32>
    %285 = vector.extract_strided_slice %233 {offsets = [1, 2, 0], sizes = [1, 1, 128], strides = [1, 1, 1]} : vector<4x4x128xf32> to vector<1x1x128xf32>
    %286 = vector.shape_cast %285 : vector<1x1x128xf32> to vector<128xf32>
    %287 = vector.shape_cast %286 : vector<128xf32> to vector<1x1x128xf32>
    %288 = vector.broadcast %287 : vector<1x1x128xf32> to vector<14x24x128xf32>
    %289 = arith.mulf %268, %288 : vector<14x24x128xf32>
    %cst_97 = arith.constant dense<0.000000e+00> : vector<14x24xf32>
    %290 = vector.multi_reduction <add>, %289, %cst_97 [2] : vector<14x24x128xf32> to vector<14x24xf32>
    %291 = vector.extract_strided_slice %290 {offsets = [0, 2], sizes = [14, 14], strides = [1, 1]} : vector<14x24xf32> to vector<14x14xf32>
    %292 = arith.addf %284, %291 : vector<14x14xf32>
    %293 = vector.extract_strided_slice %233 {offsets = [1, 3, 0], sizes = [1, 1, 128], strides = [1, 1, 1]} : vector<4x4x128xf32> to vector<1x1x128xf32>
    %294 = vector.shape_cast %293 : vector<1x1x128xf32> to vector<128xf32>
    %295 = vector.shape_cast %294 : vector<128xf32> to vector<1x1x128xf32>
    %296 = vector.broadcast %295 : vector<1x1x128xf32> to vector<14x24x128xf32>
    %297 = arith.mulf %268, %296 : vector<14x24x128xf32>
    %cst_98 = arith.constant dense<0.000000e+00> : vector<14x24xf32>
    %298 = vector.multi_reduction <add>, %297, %cst_98 [2] : vector<14x24x128xf32> to vector<14x24xf32>
    %299 = vector.extract_strided_slice %298 {offsets = [0, 3], sizes = [14, 14], strides = [1, 1]} : vector<14x24xf32> to vector<14x14xf32>
    %300 = arith.addf %292, %299 : vector<14x14xf32>
    %c2_99 = arith.constant 2 : index
    %c0_100 = arith.constant 0 : index
    %c0_101 = arith.constant 0 : index
    %301 = vector.load %arg14[%c2_99, %c0_100, %c0_101] : memref<17x24x128xf32, #tpu.memory_space<vmem>>, vector<14x24x128xf32>
    %302 = vector.extract_strided_slice %233 {offsets = [2, 0, 0], sizes = [1, 1, 128], strides = [1, 1, 1]} : vector<4x4x128xf32> to vector<1x1x128xf32>
    %303 = vector.shape_cast %302 : vector<1x1x128xf32> to vector<128xf32>
    %304 = vector.shape_cast %303 : vector<128xf32> to vector<1x1x128xf32>
    %305 = vector.broadcast %304 : vector<1x1x128xf32> to vector<14x24x128xf32>
    %306 = arith.mulf %301, %305 : vector<14x24x128xf32>
    %cst_102 = arith.constant dense<0.000000e+00> : vector<14x24xf32>
    %307 = vector.multi_reduction <add>, %306, %cst_102 [2] : vector<14x24x128xf32> to vector<14x24xf32>
    %308 = vector.extract_strided_slice %307 {offsets = [0, 0], sizes = [14, 14], strides = [1, 1]} : vector<14x24xf32> to vector<14x14xf32>
    %309 = arith.addf %300, %308 : vector<14x14xf32>
    %310 = vector.extract_strided_slice %233 {offsets = [2, 1, 0], sizes = [1, 1, 128], strides = [1, 1, 1]} : vector<4x4x128xf32> to vector<1x1x128xf32>
    %311 = vector.shape_cast %310 : vector<1x1x128xf32> to vector<128xf32>
    %312 = vector.shape_cast %311 : vector<128xf32> to vector<1x1x128xf32>
    %313 = vector.broadcast %312 : vector<1x1x128xf32> to vector<14x24x128xf32>
    %314 = arith.mulf %301, %313 : vector<14x24x128xf32>
    %cst_103 = arith.constant dense<0.000000e+00> : vector<14x24xf32>
    %315 = vector.multi_reduction <add>, %314, %cst_103 [2] : vector<14x24x128xf32> to vector<14x24xf32>
    %316 = vector.extract_strided_slice %315 {offsets = [0, 1], sizes = [14, 14], strides = [1, 1]} : vector<14x24xf32> to vector<14x14xf32>
    %317 = arith.addf %309, %316 : vector<14x14xf32>
    %318 = vector.extract_strided_slice %233 {offsets = [2, 2, 0], sizes = [1, 1, 128], strides = [1, 1, 1]} : vector<4x4x128xf32> to vector<1x1x128xf32>
    %319 = vector.shape_cast %318 : vector<1x1x128xf32> to vector<128xf32>
    %320 = vector.shape_cast %319 : vector<128xf32> to vector<1x1x128xf32>
    %321 = vector.broadcast %320 : vector<1x1x128xf32> to vector<14x24x128xf32>
    %322 = arith.mulf %301, %321 : vector<14x24x128xf32>
    %cst_104 = arith.constant dense<0.000000e+00> : vector<14x24xf32>
    %323 = vector.multi_reduction <add>, %322, %cst_104 [2] : vector<14x24x128xf32> to vector<14x24xf32>
    %324 = vector.extract_strided_slice %323 {offsets = [0, 2], sizes = [14, 14], strides = [1, 1]} : vector<14x24xf32> to vector<14x14xf32>
    %325 = arith.addf %317, %324 : vector<14x14xf32>
    %326 = vector.extract_strided_slice %233 {offsets = [2, 3, 0], sizes = [1, 1, 128], strides = [1, 1, 1]} : vector<4x4x128xf32> to vector<1x1x128xf32>
    %327 = vector.shape_cast %326 : vector<1x1x128xf32> to vector<128xf32>
    %328 = vector.shape_cast %327 : vector<128xf32> to vector<1x1x128xf32>
    %329 = vector.broadcast %328 : vector<1x1x128xf32> to vector<14x24x128xf32>
    %330 = arith.mulf %301, %329 : vector<14x24x128xf32>
    %cst_105 = arith.constant dense<0.000000e+00> : vector<14x24xf32>
    %331 = vector.multi_reduction <add>, %330, %cst_105 [2] : vector<14x24x128xf32> to vector<14x24xf32>
    %332 = vector.extract_strided_slice %331 {offsets = [0, 3], sizes = [14, 14], strides = [1, 1]} : vector<14x24xf32> to vector<14x14xf32>
    %333 = arith.addf %325, %332 : vector<14x14xf32>
    %c3_106 = arith.constant 3 : index
    %c0_107 = arith.constant 0 : index
    %c0_108 = arith.constant 0 : index
    %334 = vector.load %arg14[%c3_106, %c0_107, %c0_108] : memref<17x24x128xf32, #tpu.memory_space<vmem>>, vector<14x24x128xf32>
    %335 = vector.extract_strided_slice %233 {offsets = [3, 0, 0], sizes = [1, 1, 128], strides = [1, 1, 1]} : vector<4x4x128xf32> to vector<1x1x128xf32>
    %336 = vector.shape_cast %335 : vector<1x1x128xf32> to vector<128xf32>
    %337 = vector.shape_cast %336 : vector<128xf32> to vector<1x1x128xf32>
    %338 = vector.broadcast %337 : vector<1x1x128xf32> to vector<14x24x128xf32>
    %339 = arith.mulf %334, %338 : vector<14x24x128xf32>
    %cst_109 = arith.constant dense<0.000000e+00> : vector<14x24xf32>
    %340 = vector.multi_reduction <add>, %339, %cst_109 [2] : vector<14x24x128xf32> to vector<14x24xf32>
    %341 = vector.extract_strided_slice %340 {offsets = [0, 0], sizes = [14, 14], strides = [1, 1]} : vector<14x24xf32> to vector<14x14xf32>
    %342 = arith.addf %333, %341 : vector<14x14xf32>
    %343 = vector.extract_strided_slice %233 {offsets = [3, 1, 0], sizes = [1, 1, 128], strides = [1, 1, 1]} : vector<4x4x128xf32> to vector<1x1x128xf32>
    %344 = vector.shape_cast %343 : vector<1x1x128xf32> to vector<128xf32>
    %345 = vector.shape_cast %344 : vector<128xf32> to vector<1x1x128xf32>
    %346 = vector.broadcast %345 : vector<1x1x128xf32> to vector<14x24x128xf32>
    %347 = arith.mulf %334, %346 : vector<14x24x128xf32>
    %cst_110 = arith.constant dense<0.000000e+00> : vector<14x24xf32>
    %348 = vector.multi_reduction <add>, %347, %cst_110 [2] : vector<14x24x128xf32> to vector<14x24xf32>
    %349 = vector.extract_strided_slice %348 {offsets = [0, 1], sizes = [14, 14], strides = [1, 1]} : vector<14x24xf32> to vector<14x14xf32>
    %350 = arith.addf %342, %349 : vector<14x14xf32>
    %351 = vector.extract_strided_slice %233 {offsets = [3, 2, 0], sizes = [1, 1, 128], strides = [1, 1, 1]} : vector<4x4x128xf32> to vector<1x1x128xf32>
    %352 = vector.shape_cast %351 : vector<1x1x128xf32> to vector<128xf32>
    %353 = vector.shape_cast %352 : vector<128xf32> to vector<1x1x128xf32>
    %354 = vector.broadcast %353 : vector<1x1x128xf32> to vector<14x24x128xf32>
    %355 = arith.mulf %334, %354 : vector<14x24x128xf32>
    %cst_111 = arith.constant dense<0.000000e+00> : vector<14x24xf32>
    %356 = vector.multi_reduction <add>, %355, %cst_111 [2] : vector<14x24x128xf32> to vector<14x24xf32>
    %357 = vector.extract_strided_slice %356 {offsets = [0, 2], sizes = [14, 14], strides = [1, 1]} : vector<14x24xf32> to vector<14x14xf32>
    %358 = arith.addf %350, %357 : vector<14x14xf32>
    %359 = vector.extract_strided_slice %233 {offsets = [3, 3, 0], sizes = [1, 1, 128], strides = [1, 1, 1]} : vector<4x4x128xf32> to vector<1x1x128xf32>
    %360 = vector.shape_cast %359 : vector<1x1x128xf32> to vector<128xf32>
    %361 = vector.shape_cast %360 : vector<128xf32> to vector<1x1x128xf32>
    %362 = vector.broadcast %361 : vector<1x1x128xf32> to vector<14x24x128xf32>
    %363 = arith.mulf %334, %362 : vector<14x24x128xf32>
    %cst_112 = arith.constant dense<0.000000e+00> : vector<14x24xf32>
    %364 = vector.multi_reduction <add>, %363, %cst_112 [2] : vector<14x24x128xf32> to vector<14x24xf32>
    %365 = vector.extract_strided_slice %364 {offsets = [0, 3], sizes = [14, 14], strides = [1, 1]} : vector<14x24xf32> to vector<14x14xf32>
    %366 = arith.addf %358, %365 : vector<14x14xf32>
    %c0_113 = arith.constant 0 : index
    %c0_114 = arith.constant 0 : index
    %c0_115 = arith.constant 0 : index
    %367 = vector.load %arg6[%c0_113, %c0_114, %c0_115] : memref<14x14x32xf32, #tpu.memory_space<vmem>>, vector<14x14x32xf32>
    %368 = vector.shape_cast %160 : vector<1x32xf32> to vector<1x1x32xf32>
    %369 = vector.broadcast %368 : vector<1x1x32xf32> to vector<14x14x32xf32>
    %370 = arith.mulf %367, %369 : vector<14x14x32xf32>
    %cst_116 = arith.constant dense<0.000000e+00> : vector<14x14xf32>
    %371 = vector.multi_reduction <add>, %370, %cst_116 [2] : vector<14x14x32xf32> to vector<14x14xf32>
    %372 = arith.addf %366, %371 : vector<14x14xf32>
    %373 = vector.shape_cast %372 : vector<14x14xf32> to vector<1x14x14xf32>
    %cst_117 = arith.constant dense<0.000000e+00> : vector<1xf32>
    %374 = vector.multi_reduction <add>, %373, %cst_117 [1, 2] : vector<1x14x14xf32> to vector<1xf32>
    %375 = vector.shape_cast %374 : vector<1xf32> to vector<1x1x1xf32>
    %376 = vector.extract %375[0, 0, 0] : f32 from vector<1x1x1xf32>
    %cst_118 = arith.constant 0.00510204071 : f32
    %377 = arith.mulf %376, %cst_118 : f32
    %378 = vector.broadcast %377 : f32 to vector<14x14xf32>
    %379 = arith.subf %372, %378 : vector<14x14xf32>
    %380 = arith.mulf %379, %379 : vector<14x14xf32>
    %381 = vector.shape_cast %380 : vector<14x14xf32> to vector<1x14x14xf32>
    %cst_119 = arith.constant dense<0.000000e+00> : vector<1xf32>
    %382 = vector.multi_reduction <add>, %381, %cst_119 [1, 2] : vector<1x14x14xf32> to vector<1xf32>
    %383 = vector.shape_cast %382 : vector<1xf32> to vector<1x1x1xf32>
    %384 = vector.extract %383[0, 0, 0] : f32 from vector<1x1x1xf32>
    %cst_120 = arith.constant 0.00510204071 : f32
    %385 = arith.mulf %384, %cst_120 : f32
    %c0_121 = arith.constant 0 : index
    %c0_122 = arith.constant 0 : index
    %386 = vector.load %arg11[%c0_121, %c0_122] : memref<1x1xf32, #tpu.memory_space<vmem>>, vector<1x1xf32>
    %cst_123 = arith.constant 9.99999974E-6 : f32
    %387 = arith.addf %385, %cst_123 : f32
    %388 = math.rsqrt %387 : f32
    %389 = vector.broadcast %388 : f32 to vector<1x1xf32>
    %390 = arith.mulf %386, %389 : vector<1x1xf32>
    %391 = vector.broadcast %390 : vector<1x1xf32> to vector<14x14xf32>
    %392 = arith.mulf %379, %391 : vector<14x14xf32>
    %c0_124 = arith.constant 0 : index
    %c0_125 = arith.constant 0 : index
    %393 = vector.load %arg12[%c0_124, %c0_125] : memref<1x1xf32, #tpu.memory_space<vmem>>, vector<1x1xf32>
    %394 = vector.broadcast %393 : vector<1x1xf32> to vector<14x14xf32>
    %395 = arith.addf %392, %394 : vector<14x14xf32>
    %cst_126 = arith.constant -1.340200e+00 : f32
    %396 = vector.broadcast %cst_126 : f32 to vector<14x14xf32>
    %397 = arith.maximumf %395, %396 : vector<14x14xf32>
    %cst_127 = arith.constant 1.886000e+00 : f32
    %398 = vector.broadcast %cst_127 : f32 to vector<14x14xf32>
    %399 = arith.minimumf %397, %398 : vector<14x14xf32>
    %c0_128 = arith.constant 0 : index
    %c0_129 = arith.constant 0 : index
    %400 = vector.load %arg13[%c0_128, %c0_129] : memref<14x14xf32, #tpu.memory_space<vmem>>, vector<14x14xf32>
    tpu.vector_store %arg13[%c0_128, %c0_129], %399 {strides = array<i32>} : memref<14x14xf32, #tpu.memory_space<vmem>>, vector<14x14xf32>,
    return
  }
  func.func @transform_0(%arg0: i32) -> (i32, i32, i32) {
    %c0_i32 = arith.constant 0 : i32
    %c0_i32_0 = arith.constant 0 : i32
    %c0_i32_1 = arith.constant 0 : i32
    %c0_i32_2 = arith.constant 0 : i32
    return %c0_i32, %c0_i32_0, %c0_i32_1 : i32, i32, i32
  }
  func.func @transform_1(%arg0: i32) -> (i32, i32) {
    %c0_i32 = arith.constant 0 : i32
    %c0_i32_0 = arith.constant 0 : i32
    %c0_i32_1 = arith.constant 0 : i32
    return %c0_i32, %c0_i32_0 : i32, i32
  }
  func.func @transform_2(%arg0: i32) -> (i32, i32) {
    %c0_i32 = arith.constant 0 : i32
    %c0_i32_0 = arith.constant 0 : i32
    %c0_i32_1 = arith.constant 0 : i32
    return %c0_i32, %c0_i32_0 : i32, i32
  }
  func.func @transform_3(%arg0: i32) -> (i32, i32, i32) {
    %c0_i32 = arith.constant 0 : i32
    %c0_i32_0 = arith.constant 0 : i32
    %c0_i32_1 = arith.constant 0 : i32
    %c0_i32_2 = arith.constant 0 : i32
    return %c0_i32, %c0_i32_0, %c0_i32_1 : i32, i32, i32
  }
  func.func @transform_4(%arg0: i32) -> (i32, i32, i32) {
    %c0_i32 = arith.constant 0 : i32
    %c0_i32_0 = arith.constant 0 : i32
    %c0_i32_1 = arith.constant 0 : i32
    %c0_i32_2 = arith.constant 0 : i32
    return %c0_i32, %c0_i32_0, %c0_i32_1 : i32, i32, i32
  }
  func.func @transform_5(%arg0: i32) -> (i32, i32, i32) {
    %c0_i32 = arith.constant 0 : i32
    %c0_i32_0 = arith.constant 0 : i32
    %c0_i32_1 = arith.constant 0 : i32
    %c0_i32_2 = arith.constant 0 : i32
    return %c0_i32, %c0_i32_0, %c0_i32_1 : i32, i32, i32
  }
  func.func @transform_6(%arg0: i32) -> (i32, i32) {
    %c0_i32 = arith.constant 0 : i32
    %c0_i32_0 = arith.constant 0 : i32
    %c0_i32_1 = arith.constant 0 : i32
    return %c0_i32, %c0_i32_0 : i32, i32
  }
  func.func @transform_7(%arg0: i32) -> (i32, i32) {
    %c0_i32 = arith.constant 0 : i32
    %c0_i32_0 = arith.constant 0 : i32
    %c0_i32_1 = arith.constant 0 : i32
    return %c0_i32, %c0_i32_0 : i32, i32
  }
  func.func @transform_8(%arg0: i32) -> (i32, i32) {
    %c0_i32 = arith.constant 0 : i32
    %c0_i32_0 = arith.constant 0 : i32
    %c0_i32_1 = arith.constant 0 : i32
    return %c0_i32, %c0_i32_0 : i32, i32
  }
  func.func @transform_9(%arg0: i32) -> (i32, i32) {
    %c0_i32 = arith.constant 0 : i32
    %c0_i32_0 = arith.constant 0 : i32
    %c0_i32_1 = arith.constant 0 : i32
    return %c0_i32, %c0_i32_0 : i32, i32
  }
  func.func @transform_10(%arg0: i32) -> (i32, i32) {
    %c0_i32 = arith.constant 0 : i32
    %c0_i32_0 = arith.constant 0 : i32
    %c0_i32_1 = arith.constant 0 : i32
    return %c0_i32, %c0_i32_0 : i32, i32
  }
  func.func @transform_11(%arg0: i32) -> (i32, i32) {
    %c0_i32 = arith.constant 0 : i32
    %c0_i32_0 = arith.constant 0 : i32
    %c0_i32_1 = arith.constant 0 : i32
    return %c0_i32, %c0_i32_0 : i32, i32
  }
  func.func @transform_12(%arg0: i32) -> (i32, i32) {
    %c0_i32 = arith.constant 0 : i32
    %c0_i32_0 = arith.constant 0 : i32
    %c0_i32_1 = arith.constant 0 : i32
    return %c0_i32, %c0_i32_0 : i32, i32
  }
}

</mosaic_0001>

<bundles_post_ra>
// kernel: squeeze.2
= control target key start
LH: loop header
LB: loop body
LE: loop exit
PB: predicated region body
PF: predicated region fallthrough
CT: control target
= control target key end

     0   :  { %2 = vsyncpa [#allocation1], 0  ;;  %s202_s6 = smov [#allocation0]   ;;  %s334_s0 = inlined_call_operand.hbm [shape: f32[1,3,64,64], index: 0, kind: input, shape index: {}]   ;;  %s335_s1 = inlined_call_operand.vmem [shape: f32[3,32,128], index: 1, kind: output, shape index: {}]  }
   0x1   :  { %s7_s7 = sshll.u32 %s202_s6, 4  ;;  %s178_s10 = scalar_lea.hbm %s334_s0, 3072  ;;  %s8_s7 = int_to_ptr.vmem [resolvable:$true] %s7_s7 }
   0x2   :  { %p179_p0 = scmp.ne.s32.totalorder %s334_s0, %s178_s10  ;;  %p182_p1 = scmp.lt.u32.totalorder %s178_s10, %s334_s0 }
   0x4   :  { %p184_p2 = pnand %p182_p1, %p179_p0 }
   0x6   :  { %187 = shalt.err (!%p184_p2)
}
   0x7   :  { %s188_s15 = scalar_lea.vmem %s8_s7, 3072  ;;  %p193_p4 = scmp.lt.s32.totalorder %s8_s7, %s8_s7 }
   0x8   :  { %p189_p3 = scmp.ne.s32.totalorder %s8_s7, %s188_s15  ;;  %p194_p5 = scmp.lt.s32.totalorder %s188_s15, %s188_s15 }
   0xa   :  { %p195_p6 = por %p194_p5, %p193_p4 }
   0xc   :  { %p196_p7 = pnand %p195_p6, %p189_p3 }
   0xe   :  { %199 = shalt.err (!%p196_p7)
}
   0xf   :  { %10 = dma.hbm_to_vmem [thread:$0]  %s334_s0, 3072, %s8_s7, [#allocation1]  }
  0x10   :  { %200 = dma.done.wait [#allocation1], 3072  }
  0x11   :  { %201 = vsyncadd [#allocation1], 4294964224  ;;  %v84_v0 = vld [vmem:[#allocation0 + $0x81] ss:$2 sm:$0xff]   ;;  %s203_s0 = smov 64   ;;  %vm13_vm0 = vcmask 523264  }
  0x12   :  { %v71_v1 = vld [vmem:[#allocation0 + $0x1] ss:$2 sm:$0xff]   ;;  %85 = vrot.lane.b32.xlu1 %v84_v0, %s203_s0  ;;  %v91_v2 = vld [vmem:[#allocation0 + $0x11] ss:$2 sm:$0xff]   ;;  %v51_v6 = vld [vmem:[#allocation0 + $0x80] ss:$2 sm:$0xff]  }
  0x13   :  { %72 = vrot.lane.b32.xlu0 %v71_v1, %s203_s0  ;;  %v77_v3 = vld [vmem:[#allocation0 + $0x41] ss:$2 sm:$0xff]   ;;  %v105_v4 = vld [vmem:[#allocation0 + $0x91] ss:$2 sm:$0xff]   ;;  %v12_v7 = vld [vmem:[#allocation0] ss:$2 sm:$0xff]  }
  0x14   :  { %v98_v5 = vld [vmem:[#allocation0 + $0x51] ss:$2 sm:$0xff]   ;;  %v16_v8 = vld [vmem:[#allocation0 + $0x10] ss:$2 sm:$0xff]   ;;  %161 = vst.msk [vmem:[%s335_s1 + $0x40] sm:$0xff] %vm13_vm0, %v51_v6   ;;  %14 = vst.msk [vmem:[%s335_s1] sm:$0xff] %vm13_vm0, %v12_v7  }
  0x15   :  { %154 = vst.msk [vmem:[%s335_s1 + $0x8] sm:$0xff] %vm13_vm0, %v16_v8   ;;  %v31_v9 = vld [vmem:[#allocation0 + $0x40] ss:$2 sm:$0xff]   ;;  %v56_v10 = vld [vmem:[#allocation0 + $0x90] ss:$2 sm:$0xff]   ;;  %vm74_vm1 = vcmask 1048064  }
  0x16   :  { %92 = vrot.lane.b32.xlu1 %v91_v2, %s203_s0  ;;  %v36_v11 = vld [vmem:[#allocation0 + $0x50] ss:$2 sm:$0xff]   ;;  %157 = vst.msk [vmem:[%s335_s1 + $0x20] sm:$0xff] %vm13_vm0, %v31_v9   ;;  %162 = vst.msk [vmem:[%s335_s1 + $0x48] sm:$0xff] %vm13_vm0, %v56_v10   ;;  %v41_v12 = vld [vmem:[#allocation0 + $0x60] ss:$2 sm:$0xff]  }
  0x17   :  { %78 = vrot.lane.b32.xlu0 %v77_v3, %s203_s0  ;;  %158 = vst.msk [vmem:[%s335_s1 + $0x28] sm:$0xff] %vm13_vm0, %v36_v11   ;;  %v21_v13 = vld [vmem:[#allocation0 + $0x20] ss:$2 sm:$0xff]   ;;  %v26_v14 = vld [vmem:[#allocation0 + $0x30] ss:$2 sm:$0xff]   ;;  %159 = vst.msk [vmem:[%s335_s1 + $0x30] sm:$0xff] %vm13_vm0, %v41_v12  }
  0x18   :  { %155 = vst.msk [vmem:[%s335_s1 + $0x10] sm:$0xff] %vm13_vm0, %v21_v13   ;;  %156 = vst.msk [vmem:[%s335_s1 + $0x18] sm:$0xff] %vm13_vm0, %v26_v14   ;;  %v61_v15 = vld [vmem:[#allocation0 + $0xa0] ss:$2 sm:$0xff]   ;;  %v66_v16 = vld [vmem:[#allocation0 + $0xb0] ss:$2 sm:$0xff]  }
  0x19   :  { %v46_v17 = vld [vmem:[#allocation0 + $0x70] ss:$2 sm:$0xff]   ;;  %163 = vst.msk [vmem:[%s335_s1 + $0x50] sm:$0xff] %vm13_vm0, %v61_v15   ;;  %164 = vst.msk [vmem:[%s335_s1 + $0x58] sm:$0xff] %vm13_vm0, %v66_v16   ;;  %v119_v18 = vld [vmem:[#allocation0 + $0x61] ss:$2 sm:$0xff]  }
  0x1a   :  { %160 = vst.msk [vmem:[%s335_s1 + $0x38] sm:$0xff] %vm13_vm0, %v46_v17   ;;  %106 = vrot.lane.b32.xlu1 %v105_v4, %s203_s0  ;;  %v112_v19 = vld [vmem:[#allocation0 + $0x21] ss:$2 sm:$0xff]   ;;  %v133_v20 = vld [vmem:[#allocation0 + $0x31] ss:$2 sm:$0xff]  }
  0x1b   :  { %99 = vrot.lane.b32.xlu0 %v98_v5, %s203_s0  ;;  %v126_v21 = vld [vmem:[#allocation0 + $0xa1] ss:$2 sm:$0xff]   ;;  %v147_v22 = vld [vmem:[#allocation0 + $0xb1] ss:$2 sm:$0xff]  }
  0x1c   :  { %v140_v23 = vld [vmem:[#allocation0 + $0x71] ss:$2 sm:$0xff]  }
  0x1e   :  { %120 = vrot.lane.b32.xlu1 %v119_v18, %s203_s0 }
  0x1f   :  { %113 = vrot.lane.b32.xlu0 %v112_v19, %s203_s0 }
  0x22   :  { %134 = vrot.lane.b32.xlu1 %v133_v20, %s203_s0 }
  0x23   :  { %127 = vrot.lane.b32.xlu0 %v126_v21, %s203_s0 }
  0x26   :  { %148 = vrot.lane.b32.xlu1 %v147_v22, %s203_s0 }
  0x27   :  { %141 = vrot.lane.b32.xlu0 %v140_v23, %s203_s0 }
  0x84   :  { %v86_v24 = vpop.permute.xlu1 %85  }
  0x85   :  { %v73_v25 = vpop.permute.xlu0 %72   ;;  %166 = vst.msk [vmem:[%s335_s1 + $0x40] sm:$0xff] %vm74_vm1, %v86_v24  }
  0x86   :  { %75 = vst.msk [vmem:[%s335_s1] sm:$0xff] %vm74_vm1, %v73_v25  }
  0x88   :  { %v93_v26 = vpop.permute.xlu1 %92  }
  0x89   :  { %v79_v27 = vpop.permute.xlu0 %78   ;;  %167 = vst.msk [vmem:[%s335_s1 + $0x8] sm:$0xff] %vm74_vm1, %v93_v26  }
  0x8a   :  { %165 = vst.msk [vmem:[%s335_s1 + $0x20] sm:$0xff] %vm74_vm1, %v79_v27  }
  0x8c   :  { %v107_v28 = vpop.permute.xlu1 %106  }
  0x8d   :  { %v100_v29 = vpop.permute.xlu0 %99   ;;  %169 = vst.msk [vmem:[%s335_s1 + $0x48] sm:$0xff] %vm74_vm1, %v107_v28  }
  0x8e   :  { %168 = vst.msk [vmem:[%s335_s1 + $0x28] sm:$0xff] %vm74_vm1, %v100_v29  }
  0x90   :  { %v121_v30 = vpop.permute.xlu1 %120  }
  0x91   :  { %v114_v31 = vpop.permute.xlu0 %113   ;;  %171 = vst.msk [vmem:[%s335_s1 + $0x30] sm:$0xff] %vm74_vm1, %v121_v30  }
  0x92   :  { %170 = vst.msk [vmem:[%s335_s1 + $0x10] sm:$0xff] %vm74_vm1, %v114_v31  }
  0x94   :  { %v135_v32 = vpop.permute.xlu1 %134  }
  0x95   :  { %v128_v33 = vpop.permute.xlu0 %127   ;;  %173 = vst.msk [vmem:[%s335_s1 + $0x18] sm:$0xff] %vm74_vm1, %v135_v32  }
  0x96   :  { %172 = vst.msk [vmem:[%s335_s1 + $0x50] sm:$0xff] %vm74_vm1, %v128_v33  }
  0x98   :  { %v149_v34 = vpop.permute.xlu1 %148  }
  0x99   :  { %v142_v35 = vpop.permute.xlu0 %141   ;;  %175 = vst.msk [vmem:[%s335_s1 + $0x58] sm:$0xff] %vm74_vm1, %v149_v34  }
  0x9a   :  { %174 = vst.msk [vmem:[%s335_s1 + $0x38] sm:$0xff] %vm74_vm1, %v142_v35  }
  0x9b   :  { %153 = vsyncpa [#allocation1], 1 }

// kernel: model_forward.1
= control target key start
LH: loop header
LB: loop body
LE: loop exit
PB: predicated region body
PF: predicated region fallthrough
CT: control target
= control target key end

     0   :  { %s7474_s28 = smov 127   ;;  %s7475_s29 = smov 126   ;;  %vm616_vm0 = vcmask 261120   ;;  %vm1653_vm1 = vcmask 523264   ;;  %vm1662_vm2 = vcmask 785408   ;;  %vm6121_vm6 = vcmask 259072   ;;  %s14019_s0 = inlined_call_operand.vmem [shape: f32[3,32,128], index: 0, kind: input, shape index: {}]   ;;  %s14020_s2 = inlined_call_operand.vmem [shape: f32[16,3], index: 2, kind: input, shape index: {}]   ;;  %s14021_s6 = inlined_call_operand.vmem [shape: f32[16,1], index: 6, kind: input, shape index: {}]   ;;  %s14022_s7 = inlined_call_operand.vmem [shape: f32[16,1], index: 7, kind: input, shape index: {}]   ;;  %s14023_s3 = inlined_call_operand.vmem [shape: f32[16,16,32], index: 3, kind: input, shape index: {}]   ;;  %s14024_s1 = inlined_call_operand.vmem [shape: f32[408,256], index: 1, kind: input, shape index: {}]   ;;  %s14025_s8 = inlined_call_operand.vmem [shape: f32[1,32], index: 8, kind: input, shape index: {}]   ;;  %s14026_s9 = inlined_call_operand.vmem [shape: f32[1,32], index: 9, kind: input, shape index: {}]   ;;  %s14027_s5 = inlined_call_operand.vmem [shape: f32[14,14,32], index: 5, kind: input, shape index: {}]   ;;  %s14028_s4 = inlined_call_operand.vmem [shape: f32[4,4,128], index: 4, kind: input, shape index: {}]   ;;  %s14029_s10 = inlined_call_operand.<no memory space> [shape: f32[1,1], index: 10, kind: input, shape index: {}]   ;;  %s14030_s11 = inlined_call_operand.<no memory space> [shape: f32[1,1], index: 11, kind: input, shape index: {}]   ;;  %s14031_s12 = inlined_call_operand.vmem [shape: f32[14,14], index: 12, kind: output, shape index: {}]  }
   0x1   :  { %v45_v0 = vld [vmem:[%s14019_s0] sm:$0xff]  ;;  %v46_v1 = vld [vmem:[%s14019_s0 + $0x8] sm:$0xff]  ;;  %v47_v2 = vld [vmem:[%s14019_s0 + $0x10] sm:$0xff]  ;;  %s7481_s27 = smov 96   ;;  %vm2791_vm7 = vcmask 1046528   ;;  %vm3006_vm8 = vcmask 1045504  }
   0x2   :  { %v48_v3 = vld [vmem:[%s14019_s0 + $0x18] sm:$0xff]  ;;  %v59_v4 = vadd.f32 %v46_v1, %v45_v0  ;;  %v7231_v5 = vld [vmem:[%s14019_s0 + $0x40] sm:$0xff]  ;;  %v7232_v6 = vld [vmem:[%s14019_s0 + $0x48] sm:$0xff]  ;;  %v95_v7 = vmul.f32 %v45_v0, %v45_v0  ;;  %v96_v8 = vmul.f32 %v46_v1, %v46_v1  ;;  %v97_v9 = vmul.f32 %v47_v2, %v47_v2 }
   0x3   :  { %v7233_v10 = vld [vmem:[%s14019_s0 + $0x50] sm:$0xff]  ;;  %v83_v11 = vadd.f32 %v7232_v6, %v7231_v5  ;;  %v7227_v12 = vld [vmem:[%s14019_s0 + $0x20] sm:$0xff]  ;;  %v98_v13 = vmul.f32 %v48_v3, %v48_v3  ;;  %v127_v14 = vmul.f32 %v7231_v5, %v7231_v5  ;;  %v128_v15 = vmul.f32 %v7232_v6, %v7232_v6  ;;  %v7234_v17 = vld [vmem:[%s14019_s0 + $0x58] sm:$0xff] }
   0x4   :  { %v60_v16 = vadd.f32 %v59_v4, %v47_v2  ;;  %v7228_v18 = vld [vmem:[%s14019_s0 + $0x28] sm:$0xff]  ;;  %v7229_v19 = vld [vmem:[%s14019_s0 + $0x30] sm:$0xff]  ;;  %v99_v20 = vadd.f32 %v96_v8, %v95_v7  ;;  %v111_v21 = vmul.f32 %v7227_v12, %v7227_v12  ;;  %v129_v22 = vmul.f32 %v7233_v10, %v7233_v10  ;;  %v7230_v24 = vld [vmem:[%s14019_s0 + $0x38] sm:$0xff]  ;;  %s7480_s0 = smov 64  }
   0x5   :  { %v84_v23 = vadd.f32 %v7233_v10, %v83_v11  ;;  %v71_v25 = vadd.f32 %v7228_v18, %v7227_v12  ;;  %v112_v26 = vmul.f32 %v7228_v18, %v7228_v18  ;;  %v113_v27 = vmul.f32 %v7229_v19, %v7229_v19  ;;  %v7586_v63 = vld [vmem:[%s14020_s2] sm:$0xff]  ;;  %vm8602_vm3 = vmpackc.low %vm1662_vm2, %vm1662_vm2 }
   0x6   :  { %v61_v28 = vadd.f32 %v60_v16, %v48_v3  ;;  %v100_v29 = vadd.f32 %v99_v20, %v97_v9  ;;  %v114_v30 = vmul.f32 %v7230_v24, %v7230_v24  ;;  %v131_v34 = vadd.f32 %v128_v15, %v127_v14  ;;  %vm7259_vm4 = vmneg %vm1662_vm2 }
   0x7   :  { %v85_v31 = vadd.f32 %v7234_v17, %v84_v23  ;;  %v72_v32 = vadd.f32 %v7229_v19, %v71_v25  ;;  %v115_v33 = vadd.f32 %v112_v26, %v111_v21  ;;  %v130_v35 = vmul.f32 %v7234_v17, %v7234_v17  ;;  %vm8809_vm5 = vmpackc.low %vm7259_vm4, %vm7259_vm4 }
   0x8   :  { %62 = vadd.xlane.f32.xlu0 %v61_v28  ;;  %v143_v36 = vmul.f32 %v7227_v12, %v45_v0  ;;  %v144_v37 = vmul.f32 %v7228_v18, %v46_v1  ;;  %v145_v38 = vmul.f32 %v7229_v19, %v47_v2  ;;  %v101_v40 = vadd.f32 %v100_v29, %v98_v13 }
   0x9   :  { %86 = vadd.xlane.f32.xlu1 %v85_v31  ;;  %v73_v39 = vadd.f32 %v7230_v24, %v72_v32  ;;  %v116_v41 = vadd.f32 %v115_v33, %v113_v27  ;;  %v132_v42 = vadd.f32 %v131_v34, %v129_v22  ;;  %v159_v44 = vmul.f32 %v7231_v5, %v45_v0  ;;  %v7595_v0 = vld [vmem:[%s14020_s2 + $0x8] sm:$0xff] }
   0xa   :  { %v147_v43 = vadd.f32 %v144_v37, %v143_v36  ;;  %v160_v45 = vmul.f32 %v7232_v6, %v46_v1  ;;  %v161_v46 = vmul.f32 %v7233_v10, %v47_v2  ;;  %v146_v48 = vmul.f32 %v7230_v24, %v48_v3 }
   0xb   :  { %v117_v47 = vadd.f32 %v116_v41, %v114_v30  ;;  %v175_v49 = vmul.f32 %v7231_v5, %v7227_v12  ;;  %v176_v52 = vmul.f32 %v7232_v6, %v7228_v18  ;;  %v177_v53 = vmul.f32 %v7233_v10, %v7229_v19 }
   0xc   :  { %74 = vadd.xlane.f32.xlu0 %v73_v39  ;;  %v148_v50 = vadd.f32 %v147_v43, %v145_v38  ;;  %v163_v51 = vadd.f32 %v160_v45, %v159_v44  ;;  %v133_v54 = vadd.f32 %v132_v42, %v130_v35  ;;  %v162_v55 = vmul.f32 %v7234_v17, %v48_v3 }
   0xd   :  { %102 = vadd.xlane.f32.xlu1 %v101_v40  ;;  %v179_v57 = vadd.f32 %v176_v52, %v175_v49  ;;  %v178_v59 = vmul.f32 %v7234_v17, %v7230_v24  ;;  %vm3277_vm9 = vcmask 1044480   ;;  %vm6354_vm10 = vcmask 130112  }
   0xe   :  { %v164_v56 = vadd.f32 %v163_v51, %v161_v46  ;;  %v149_v58 = vadd.f32 %v148_v50, %v146_v48  ;;  %vm6473_vm11 = vcmask 1041409   ;;  %vm6475_vm12 = vcmask 1042434  }
   0xf   :  { %v180_v60 = vadd.f32 %v179_v57, %v177_v53  ;;  %vm6477_vm13 = vcmask 1043459   ;;  %vm6479_vm14 = vcmask 1044484   ;;  %vm6481_vm15 = vcmask 1045509  }
  0x10   :  { %118 = vadd.xlane.f32.xlu0 %v117_v47  ;;  %v165_v61 = vadd.f32 %v164_v56, %v162_v55 }
  0x11   :  { %134 = vadd.xlane.f32.xlu1 %v133_v54  ;;  %v181_v62 = vadd.f32 %v180_v60, %v178_v59 }
  0x14   :  { %150 = vadd.xlane.f32.xlu0 %v149_v58 }
  0x15   :  { %166 = vadd.xlane.f32.xlu1 %v165_v61 }
  0x18   :  { %182 = vadd.xlane.f32.xlu0 %v181_v62 }
  0x26   :  { %257 = vrot.lane.b32.xlu1 %v7586_v63, %s7474_s28 }
  0x2a   :  { %268 = vrot.lane.b32.xlu1 %v7586_v63, %s7475_s29 }
  0x2e   :  { %259 = vrot.lane.b32.xlu0 %v7595_v0, %s7474_s28 }
  0x32   :  { %270 = vrot.lane.b32.xlu0 %v7595_v0, %s7475_s29 }
  0x95   :  { %v63_v1 = vpop.xlane.xlu0 %62 }
  0x96   :  { %v64_v2 = vrot.slane %v63_v1, 4  ;;  %v87_v3 = vpop.xlane.xlu1 %86 }
  0x97   :  { %v88_v4 = vrot.slane %v87_v3, 4 }
  0x98   :  { %v65_v5 = vadd.f32 %v64_v2, %v63_v1 }
  0x99   :  { %v89_v6 = vadd.f32 %v88_v4, %v87_v3  ;;  %v75_v7 = vpop.xlane.xlu0 %74  ;;  %v224_v4 = vmul.f32 %v7586_v63, %v7586_v63 }
  0x9a   :  { %v76_v8 = vrot.slane %v75_v7, 4  ;;  %v103_v9 = vpop.xlane.xlu1 %102  ;;  %v66_v10 = vrot.slane %v65_v5, 2 }
  0x9b   :  { %v104_v11 = vrot.slane %v103_v9, 4  ;;  %v90_v12 = vrot.slane %v89_v6, 2 }
  0x9c   :  { %v77_v13 = vadd.f32 %v76_v8, %v75_v7  ;;  %v67_v14 = vadd.f32 %v66_v10, %v65_v5  ;;  %v225_v8 = vmul.f32 %v7595_v0, %v7595_v0 }
  0x9d   :  { %v105_v15 = vadd.f32 %v104_v11, %v103_v9  ;;  %v119_v16 = vpop.xlane.xlu0 %118  ;;  %v91_v17 = vadd.f32 %v90_v12, %v89_v6 }
  0x9e   :  { %v120_v18 = vrot.slane %v119_v16, 4  ;;  %v135_v19 = vpop.xlane.xlu1 %134  ;;  %v68_v20 = vrot.slane %v67_v14, 1  ;;  %v78_v21 = vrot.slane %v77_v13, 2 }
  0x9f   :  { %v136_v22 = vrot.slane %v135_v19, 4  ;;  %v106_v23 = vrot.slane %v105_v15, 2  ;;  %v92_v29 = vrot.slane %v91_v17, 1 }
  0xa0   :  { %v121_v24 = vadd.f32 %v120_v18, %v119_v16  ;;  %v69_v25 = vadd.f32 %v68_v20, %v67_v14  ;;  %v79_v26 = vadd.f32 %v78_v21, %v77_v13 }
  0xa1   :  { %v137_v27 = vadd.f32 %v136_v22, %v135_v19  ;;  %v151_v28 = vpop.xlane.xlu0 %150  ;;  %v107_v30 = vadd.f32 %v106_v23, %v105_v15  ;;  %v93_v43 = vadd.f32 %v92_v29, %v91_v17 }
  0xa2   :  { %v152_v31 = vrot.slane %v151_v28, 4  ;;  %7372 = vpush %v69_v25  ;;  %v167_v32 = vpop.xlane.xlu1 %166  ;;  %v80_v33 = vrot.slane %v79_v26, 1  ;;  %v122_v34 = vrot.slane %v121_v24, 2 }
  0xa3   :  { %v168_v35 = vrot.slane %v167_v32, 4  ;;  %v108_v36 = vrot.slane %v107_v30, 1  ;;  %v138_v37 = vrot.slane %v137_v27, 2 }
  0xa4   :  { %v153_v38 = vadd.f32 %v152_v31, %v151_v28  ;;  %v81_v39 = vadd.f32 %v80_v33, %v79_v26  ;;  %v123_v40 = vadd.f32 %v122_v34, %v121_v24 }
  0xa5   :  { %v169_v41 = vadd.f32 %v168_v35, %v167_v32  ;;  %v183_v42 = vpop.xlane.xlu0 %182  ;;  %v109_v44 = vadd.f32 %v108_v36, %v107_v30  ;;  %v139_v45 = vadd.f32 %v138_v37, %v137_v27 }
  0xa6   :  { %v184_v46 = vrot.slane %v183_v42, 4  ;;  %7374 = vpush %v81_v39  ;;  %v124_v47 = vrot.slane %v123_v40, 1  ;;  %v154_v48 = vrot.slane %v153_v38, 2  ;;  %v7601_v2 = vpop.permute.xlu1 %257 }
  0xa7   :  { %7376 = vpush %v93_v43  ;;  %v140_v49 = vrot.slane %v139_v45, 1  ;;  %v170_v50 = vrot.slane %v169_v41, 2  ;;  %v263_v16 = vmul.f32 %v7601_v2, %v7586_v63 }
  0xa8   :  { %v185_v51 = vadd.f32 %v184_v46, %v183_v42  ;;  %7378 = vpush %v109_v44  ;;  %v125_v52 = vadd.f32 %v124_v47, %v123_v40  ;;  %v155_v53 = vadd.f32 %v154_v48, %v153_v38  ;;  %v7476_v38 = vmov 0  }
  0xa9   :  { %v141_v54 = vadd.f32 %v140_v49, %v139_v45  ;;  %v171_v55 = vadd.f32 %v170_v50, %v169_v41  ;;  %v7603_v3 = vpop.permute.xlu0 %259  ;;  %7405 = vset.pattern.permute.xlu0 %v7476_v38  ;;  %7404 = vset.pattern.permute.xlu1 %v7476_v38 }
  0xaa   :  { %7380 = vpush %v125_v52  ;;  %v156_v56 = vrot.slane %v155_v53, 1  ;;  %v186_v57 = vrot.slane %v185_v51, 2  ;;  %v7619_v13 = vpop.permute.xlu1 %268  ;;  %v264_v20 = vmul.f32 %v7603_v3, %v7595_v0 }
  0xab   :  { %7382 = vpush %v141_v54  ;;  %v172_v58 = vrot.slane %v171_v55, 1  ;;  %v274_v21 = vmul.f32 %v7619_v13, %v7586_v63 }
  0xac   :  { %v157_v59 = vadd.f32 %v156_v56, %v155_v53  ;;  %v187_v60 = vadd.f32 %v186_v57, %v185_v51 }
  0xad   :  { %v173_v61 = vadd.f32 %v172_v58, %v171_v55  ;;  %v7621_v14 = vpop.permute.xlu0 %270 }
  0xae   :  { %7384 = vpush %v157_v59  ;;  %v188_v62 = vrot.slane %v187_v60, 1  ;;  %v275_v22 = vmul.f32 %v7621_v14, %v7595_v0 }
  0xaf   :  { %7386 = vpush %v173_v61 }
  0xb0   :  { %v189_v1 = vadd.f32 %v188_v62, %v187_v60 }
  0xb2   :  { %7388 = vpush %v189_v1 }
  0xd3   :  { %s7605_s2 = spop %7372 }
  0xd4   :  { %v193_v41 = vstv %s7605_s2 }
  0xd5   :  { %v195_v44 = vmul.f32 %v193_v41, %v7595_v0  ;;  %v194_v53 = vmul.f32 %v193_v41, %v7586_v63 }
  0xd7   :  { %s7375_s14 = spop %7374 }
  0xd8   :  { %v196_v5 = vstv %s7375_s14  ;;  %s7377_s15 = spop %7376 }
  0xd9   :  { %v197_v6 = vmul.f32 %v196_v5, %v7586_v63  ;;  %v198_v7 = vmul.f32 %v196_v5, %v7595_v0  ;;  %s7379_s16 = spop %7378  ;;  %v209_v9 = vstv %s7377_s15 }
  0xda   :  { %v226_v10 = vstv %s7379_s16  ;;  %v210_v17 = vmul.f32 %v209_v9, %v7586_v63  ;;  %v211_v25 = vmul.f32 %v209_v9, %v7595_v0 }
  0xdb   :  { %203 = vrot.lane.b32.xlu0 %v198_v7, %s7474_s28  ;;  %201 = vrot.lane.b32.xlu1 %v197_v6, %s7474_s28  ;;  %v7615_v11 = vmul.f32 %v226_v10, %v224_v4  ;;  %v228_v12 = vmul.f32 %v226_v10, %v225_v8  ;;  %s7617_s17 = spop %7380 }
  0xdc   :  { %v229_v15 = vstv %s7617_s17  ;;  %s7624_s18 = spop %7382 }
  0xdd   :  { %v231_v18 = vmul.f32 %v229_v15, %v225_v8  ;;  %v242_v19 = vstv %s7624_s18  ;;  %v230_v34 = vmul.f32 %v229_v15, %v224_v4 }
  0xde   :  { %v244_v23 = vmul.f32 %v242_v19, %v225_v8  ;;  %v243_v36 = vmul.f32 %v242_v19, %v224_v4  ;;  %v14032_v19 = vlaneseq }
  0xdf   :  { %214 = vrot.lane.b32.xlu1 %v210_v17, %s7475_s29  ;;  %236 = vrot.lane.b32.xlu0 %v231_v18, %s7474_s28  ;;  %s7385_s19 = spop %7384  ;;  %v7477_v17 = vmov 1966171168  }
  0xe0   :  { %v265_v24 = vstv %s7385_s19  ;;  %s7387_s20 = spop %7386  ;;  %v360_v18 = vunpack.c.l.s4 %v7477_v17  ;;  %v312_v17 = vld [vmem:[%s14022_s7] sm:$0xff] }
  0xe1   :  { %v266_v26 = vmul.f32 %v265_v24, %v263_v16  ;;  %v267_v27 = vmul.f32 %v265_v24, %v264_v20  ;;  %v276_v28 = vstv %s7387_s20 }
  0xe2   :  { %v277_v29 = vmul.f32 %v276_v28, %v274_v21  ;;  %v278_v30 = vmul.f32 %v276_v28, %v275_v22  ;;  %v361_v22 = vunpack.c.0.s8 %v360_v18 }
  0xe3   :  { %216 = vrot.lane.b32.xlu1 %v211_v25, %s7475_s29  ;;  %249 = vrot.lane.b32.xlu0 %v244_v23, %s7475_s29  ;;  %s7389_s21 = spop %7388  ;;  %v305_v23 = vld [vmem:[%s14021_s6 + $0x8] sm:$0xff] }
  0xe4   :  { %v279_v31 = vadd.f32 %v277_v29, %v266_v26  ;;  %v280_v32 = vadd.f32 %v278_v30, %v267_v27  ;;  %v281_v33 = vstv %s7389_s21 }
  0xe5   :  { %v283_v35 = vmul.f32 %v281_v33, %v264_v20  ;;  %v282_v37 = vmul.f32 %v281_v33, %v263_v16 }
  0xe7   :  { %234 = vrot.lane.b32.xlu1 %v230_v34, %s7474_s28  ;;  %288 = vrot.lane.b32.xlu0 %v283_v35, %s7474_s28 }
  0xeb   :  { %247 = vrot.lane.b32.xlu1 %v243_v36, %s7475_s29 }
  0xef   :  { %286 = vrot.lane.b32.xlu1 %v282_v37, %s7474_s28 }
 0x14d   :  { %v202_v39 = vpop.permute.xlu1 %201  ;;  %v204_v40 = vpop.permute.xlu0 %203 }
 0x14e   :  { %v208_v47 = vadd.f32 %v204_v40, %v195_v44  ;;  %v207_v58 = vadd.f32 %v202_v39, %v194_v53 }
 0x151   :  { %v215_v42 = vpop.permute.xlu1 %214  ;;  %v237_v43 = vpop.permute.xlu0 %236 }
 0x152   :  { %v241_v51 = vadd.f32 %v237_v43, %v228_v12  ;;  %v220_v60 = vadd.f32 %v215_v42, %v207_v58 }
 0x154   :  { %v7649_v7 = vmul.f32 0.00022956841, %v220_v60 }
 0x155   :  { %v217_v45 = vpop.permute.xlu1 %216  ;;  %v250_v46 = vpop.permute.xlu0 %249 }
 0x156   :  { %v221_v48 = vadd.f32 %v217_v45, %v208_v47  ;;  %v254_v55 = vadd.f32 %v250_v46, %v241_v51  ;;  %v300_v15 = vmul.f32 %v7649_v7, %v7649_v7 }
 0x158   :  { %v223_v54 = vmul.f32 0.00022956841, %v221_v48 }
 0x159   :  { %v235_v49 = vpop.permute.xlu1 %234  ;;  %v289_v50 = vpop.permute.xlu0 %288 }
 0x15a   :  { %v293_v52 = vadd.f32 %v289_v50, %v280_v32  ;;  %v301_v61 = vmul.f32 %v223_v54, %v223_v54  ;;  %v240_v4 = vadd.f32 %v235_v49, %v7615_v11  ;;  %v7654_v11 = vshrl.u32 %v14032_v19, 7 }
 0x15c   :  { %v295_v56 = vmul.f32 2.0, %v293_v52  ;;  %14140 = vst [vmem:[#allocation5_spill] sm:$0xff] %v7654_v11  ;;  %v7660_v26 = vsub.s32 %v361_v22, %v7654_v11  ;;  %v7668_v30 = vsub.s32 0, %v7654_v11 }
 0x15d   :  { %v248_v57 = vpop.permute.xlu1 %247 }
 0x15e   :  { %v297_v59 = vadd.f32 %v295_v56, %v254_v55  ;;  %v253_v9 = vadd.f32 %v248_v57, %v240_v4  ;;  %14141 = vst [vmem:[#allocation6_spill] sm:$0xff] %v7668_v30  ;;  %v313_v56 = vld [vmem:[%s14022_s7 + $0x8] sm:$0xff] }
 0x160   :  { %v299_v62 = vmul.f32 0.00022956841, %v297_v59 }
 0x161   :  { %v287_v1 = vpop.permute.xlu1 %286 }
 0x162   :  { %v303_v5 = vsub.f32 %v299_v62, %v301_v61  ;;  %v292_v6 = vadd.f32 %v287_v1, %v279_v31  ;;  %v304_v31 = vld [vmem:[%s14021_s6] sm:$0xff] }
 0x164   :  { %v307_v8 = vadd.f32 1e-05, %v303_v5  ;;  %v294_v10 = vmul.f32 2.0, %v292_v6 }
 0x166   :  { %7466 = vrsqrt.f32 %v307_v8  ;;  %v296_v12 = vadd.f32 %v294_v10, %v253_v9 }
 0x168   :  { %v298_v16 = vmul.f32 0.00022956841, %v296_v12 }
 0x16a   :  { %v302_v20 = vsub.f32 %v298_v16, %v300_v15 }
 0x16c   :  { %v306_v21 = vadd.f32 1e-05, %v302_v20 }
 0x16e   :  { %7468 = vrsqrt.f32 %v306_v21 }
 0x170   :  { %v7467_v24 = vpop.eup %7466 }
 0x171   :  { %v311_v25 = vmul.f32 %v7467_v24, %v305_v23 }
 0x173   :  { %v7663_v27 = vmul.f32 %v311_v25, %v7595_v0  ;;  %v315_v28 = vmul.f32 %v311_v25, %v223_v54  ;;  %v353_v34 = vmul.f32 %v311_v25, %v7603_v3  ;;  %v355_v43 = vmul.f32 %v311_v25, %v7621_v14 }
 0x175   :  { %v414_v29 = vrot.slane %v7663_v27, %v7660_v26  ;;  %v737_v38 = vrot.slane %v353_v34, %v7660_v26  ;;  %v1059_v48 = vrot.slane %v355_v43, %v7660_v26  ;;  %v1052_v59 = vcombine.high %v355_v43, %v355_v43 }
 0x176   :  { %v7728_v5 = vsub.f32 %v313_v56, %v315_v28  ;;  %v407_v24 = vcombine.high %v7663_v27, %v7663_v27 }
 0x177   :  { %v7674_v32 = vrot.slane %v414_v29, %v7660_v26  ;;  %v7714_v54 = vrot.slane %v1059_v48, %v7660_v26  ;;  %v745_v55 = vcombine.high %v737_v38, %v737_v38  ;;  %v1066_v16 = vrot.slane %v1052_v59, %v7660_v26 }
 0x178   :  { %v7469_v33 = vpop.eup %7468 }
 0x179   :  { %v491_v0 = vrot.slane %v7674_v32, %v7668_v30  ;;  %v310_v35 = vmul.f32 %v7469_v33, %v304_v31  ;;  %v1136_v6 = vrot.slane %v7714_v54, %v7668_v30  ;;  %v7733_v8 = vrot.slane %v745_v55, %v7660_v26 }
 0x17a   :  { %v7753_v23 = vrot.slane %v1066_v16, %v7660_v26  ;;  %v1067_v31 = vcombine.high %v1059_v48, %v1059_v48  ;;  %v1068_v33 = vcombine.high %v1066_v16, %v1066_v16 }
 0x17b   :  { %553 = vperm.xlu0 %7405, %v491_v0   ;;  %v350_v36 = vmul.f32 %v310_v35, %v7586_v63  ;;  %v7681_v37 = vmul.f32 %v310_v35, %v7601_v2  ;;  %v354_v41 = vmul.f32 %v310_v35, %v7619_v13  ;;  %v7694_v63 = vrot.slane %v737_v38, %v7660_v26 }
 0x17c   :  { %v422_v2 = vcombine.high %v414_v29, %v414_v29  ;;  %v730_v13 = vcombine.high %v353_v34, %v353_v34  ;;  %v314_v21 = vmul.f32 %v310_v35, %v7649_v7  ;;  %v818_v29 = vrot.slane %v7733_v8, %v7668_v30 }
 0x17d   :  { %v365_v39 = vrot.slane %v350_v36, %v7660_v26  ;;  %v688_v40 = vrot.slane %v7681_v37, %v7660_v26  ;;  %v1010_v47 = vrot.slane %v354_v41, %v7660_v26  ;;  %v814_v50 = vrot.slane %v7694_v63, %v7668_v30 }
 0x17e   :  { %v7702_v49 = vrot.slane %v422_v2, %v7660_v26  ;;  %v7711_v53 = vrot.slane %v730_v13, %v7660_v26  ;;  %v358_v58 = vcombine.high %v350_v36, %v350_v36  ;;  %v1003_v1 = vcombine.high %v354_v41, %v354_v41 }
 0x17f   :  { %v381_v3 = vrot.slane %v365_v39, %v7660_v26  ;;  %v7690_v42 = vrot.slane %v688_v40, %v7660_v26  ;;  %v7708_v51 = vrot.slane %v1010_v47, %v7660_v26  ;;  %v696_v52 = vcombine.high %v688_v40, %v688_v40 }
 0x180   :  { %v495_v57 = vrot.slane %v7702_v49, %v7668_v30  ;;  %v373_v62 = vcombine.high %v365_v39, %v365_v39  ;;  %v746_v4 = vcombine.high %v7711_v53, %v7711_v53  ;;  %v7736_v9 = vrot.slane %v1003_v1, %v7660_v26 }
 0x181   :  { %v459_v44 = vrot.slane %v381_v3, %v7668_v30  ;;  %v782_v45 = vrot.slane %v7690_v42, %v7668_v30  ;;  %v403_v46 = vcombine.high %v381_v3, %v381_v3  ;;  %v1104_v60 = vrot.slane %v7708_v51, %v7668_v30 }
 0x182   :  { %v7724_v61 = vrot.slane %v696_v52, %v7660_v26  ;;  %v372_v10 = vrot.slane %v358_v58, %v7660_v26  ;;  %v1018_v12 = vcombine.high %v1010_v47, %v1010_v47  ;;  %v7740_v15 = vrot.slane %v746_v4, %v7660_v26 }
 0x183   :  { %521 = vperm.xlu1 %7404, %v459_v44   ;;  %844 = vperm.xlu0 %7405, %v782_v45   ;;  %v467_v14 = vrot.slane %v403_v46, %v7668_v30  ;;  %v395_v20 = vrot.slane %v373_v62, %v7660_v26  ;;  %v1019_v22 = vcombine.high %v7736_v9, %v7736_v9 }
 0x184   :  { %v786_v18 = vrot.slane %v7724_v61, %v7668_v30  ;;  %v316_v25 = vsub.f32 %v312_v17, %v314_v21  ;;  %v1381_v7 = vrot.slane %v7728_v5, %v7660_v26  ;;  %v7766_v0 = vrot.slane %v372_v10, %v7660_v26 }
 0x185   :  { %v7758_v28 = vrot.slane %v1019_v22, %v7660_v26  ;;  %v463_v34 = vrot.slane %v395_v20, %v7668_v30  ;;  %v7769_v35 = vrot.slane %v1018_v12, %v7660_v26  ;;  %v7776_v38 = vrot.slane %v1068_v33, %v7660_v26 }
 0x186   :  { %v1332_v27 = vrot.slane %v316_v25, %v7660_v26  ;;  %v7773_v36 = vrot.slane %v1381_v7, %v7660_v26  ;;  %v1389_v39 = vcombine.high %v1381_v7, %v1381_v7  ;;  %v452_v3 = vcombine.high %v7674_v32, %v7674_v32 }
 0x187   :  { %529 = vperm.xlu1 %7404, %v467_v14   ;;  %876 = vperm.xlu0 %7405, %v814_v50   ;;  %v7784_v43 = vrot.slane %v1067_v31, %v7660_v26  ;;  %v421_v2 = vrot.slane %v407_v24, %v7660_v26  ;;  %v475_v44 = vrot.slane %v7766_v0, %v7668_v30 }
 0x188   :  { %v7779_v40 = vrot.slane %v1332_v27, %v7660_v26  ;;  %v1340_v41 = vcombine.high %v1332_v27, %v1332_v27  ;;  %v1108_v45 = vrot.slane %v7769_v35, %v7668_v30  ;;  %v7795_v47 = vrot.slane %v1389_v39, %v7660_v26 }
 0x189   :  { %v499_v32 = vrot.slane %v452_v3, %v7668_v30  ;;  %v1140_v13 = vrot.slane %v7784_v43, %v7668_v30  ;;  %v7801_v48 = vrot.slane %v421_v2, %v7660_v26  ;;  %v405_v14 = vcombine.high %v395_v20, %v395_v20 }
 0x18a   :  { %v7792_v46 = vrot.slane %v1340_v41, %v7660_v26  ;;  %v374_v50 = vcombine.high %v372_v10, %v372_v10  ;;  %v681_v52 = vcombine.high %v7681_v37, %v7681_v37  ;;  %v1325_v55 = vcombine.high %v316_v25, %v316_v25 }
 0x18b   :  { %1166 = vperm.xlu0 %7405, %v1104_v60   ;;  %557 = vperm.xlu1 %7404, %v495_v57   ;;  %v507_v56 = vrot.slane %v7801_v48, %v7668_v30  ;;  %v726_v57 = vcombine.high %v7690_v42, %v7690_v42  ;;  %v471_v59 = vrot.slane %v405_v14, %v7668_v30 }
 0x18c   :  { %v1339_v58 = vrot.slane %v1325_v55, %v7660_v26  ;;  %v7812_v60 = vrot.slane %v374_v50, %v7660_v26  ;;  %v695_v62 = vrot.slane %v681_v52, %v7660_v26  ;;  %v1374_v37 = vcombine.high %v7728_v5, %v7728_v5 }
 0x18d   :  { %v454_v10 = vcombine.high %v7702_v49, %v7702_v49  ;;  %v423_v12 = vcombine.high %v421_v2, %v421_v2  ;;  %v775_v49 = vcombine.high %v7694_v63, %v7694_v63  ;;  %v760_v7 = vrot.slane %v7711_v53, %v7660_v26 }
 0x18e   :  { %v7818_v1 = vrot.slane %v1339_v58, %v7660_v26  ;;  %v1341_v4 = vcombine.high %v1339_v58, %v1339_v58  ;;  %v1388_v42 = vrot.slane %v1374_v37, %v7660_v26  ;;  %v479_v5 = vrot.slane %v7812_v60, %v7668_v30 }
 0x18f   :  { %1198 = vperm.xlu0 %7405, %v1136_v6   ;;  %848 = vperm.xlu1 %7404, %v786_v18   ;;  %v790_v6 = vrot.slane %v726_v57, %v7668_v30  ;;  %v7830_v17 = vrot.slane %v695_v62, %v7660_v26  ;;  %v503_v22 = vrot.slane %v454_v10, %v7668_v30 }
 0x190   :  { %v7825_v16 = vrot.slane %v1341_v4, %v7660_v26  ;;  %v7833_v18 = vrot.slane %v1388_v42, %v7660_v26  ;;  %v1390_v20 = vcombine.high %v1388_v42, %v1388_v42  ;;  %v7844_v25 = vrot.slane %v423_v12, %v7660_v26 }
 0x191   :  { %v798_v24 = vrot.slane %v7830_v17, %v7668_v30  ;;  %v728_v63 = vcombine.high %v7724_v61, %v7724_v61  ;;  %v697_v33 = vcombine.high %v695_v62, %v695_v62  ;;  %v1048_v39 = vcombine.high %v7708_v51, %v7708_v51 }
 0x192   :  { %v7836_v21 = vrot.slane %v1390_v20, %v7660_v26  ;;  %v511_v31 = vrot.slane %v7844_v25, %v7668_v30  ;;  %v1033_v3 = vrot.slane %v7736_v9, %v7660_v26  ;;  %v777_v2 = vcombine.high %v7733_v8, %v7733_v8 }
 0x193   :  { %525 = vperm.xlu0 %7405, %v463_v34   ;;  %880 = vperm.xlu1 %7404, %v818_v29   ;;  %v822_v29 = vrot.slane %v775_v49, %v7668_v30  ;;  %v830_v34 = vrot.slane %v760_v7, %v7668_v30  ;;  %v794_v27 = vrot.slane %v728_v63, %v7668_v30 }
 0x194   :  { %v7858_v41 = vrot.slane %v697_v33, %v7660_v26  ;;  %v1112_v53 = vrot.slane %v1048_v39, %v7668_v30  ;;  %v1120_v51 = vrot.slane %v1033_v3, %v7668_v30  ;;  %v1050_v26 = vcombine.high %v7769_v35, %v7769_v35 }
 0x195   :  { %v1152_v8 = vrot.slane %v7753_v23, %v7668_v30  ;;  %v1124_v14 = vrot.slane %v7758_v28, %v7668_v30  ;;  %v1099_v50 = vcombine.high %v7784_v43, %v7784_v43  ;;  %v1458_v52 = vrot.slane %v7773_v36, %v7668_v30 }
 0x196   :  { %v802_v61 = vrot.slane %v7858_v41, %v7668_v30  ;;  %v1116_v9 = vrot.slane %v1050_v26, %v7668_v30  ;;  %v404_v55 = vcombine.high %v7766_v0, %v7766_v0  ;;  %v453_v43 = vcombine.high %v7801_v48, %v7801_v48 }
 0x197   :  { %537 = vperm.xlu0 %7405, %v475_v44   ;;  %1170 = vperm.xlu1 %7404, %v1108_v45   ;;  %v826_v44 = vrot.slane %v777_v2, %v7668_v30  ;;  %v1097_v45 = vcombine.high %v7714_v54, %v7714_v54  ;;  %v1426_v54 = vrot.slane %v7779_v40, %v7668_v30 }
 0x198   :  { %v1148_v35 = vrot.slane %v1099_v50, %v7668_v30  ;;  %v483_v57 = vrot.slane %v404_v55, %v7668_v30  ;;  %v1430_v58 = vrot.slane %v7792_v46, %v7668_v30  ;;  %v727_v0 = vcombine.high %v7830_v17, %v7830_v17 }
 0x199   :  { %v1462_v37 = vrot.slane %v7795_v47, %v7668_v30  ;;  %v776_v4 = vcombine.high %v760_v7, %v760_v7  ;;  %v406_v48 = vcombine.high %v7812_v60, %v7812_v60  ;;  %v1049_v10 = vcombine.high %v1033_v3, %v1033_v3 }
 0x19a   :  { %v806_v62 = vrot.slane %v727_v0, %v7668_v30  ;;  %v455_v12 = vcombine.high %v7844_v25, %v7844_v25  ;;  %v1098_v20 = vcombine.high %v7753_v23, %v7753_v23  ;;  %v729_v60 = vcombine.high %v7858_v41, %v7858_v41 }
 0x19b   :  { %561 = vperm.xlu0 %7405, %v499_v32   ;;  %1202 = vperm.xlu1 %7404, %v1140_v13   ;;  %v1144_v32 = vrot.slane %v1097_v45, %v7668_v30  ;;  %v834_v13 = vrot.slane %v7740_v15, %v7668_v30  ;;  %v838_v42 = vrot.slane %v776_v4, %v7668_v30  ;;  %v7992_v4 = vld [vmem:[%s14023_s3 + $0x88] sm:$0xff] }
 0x19c   :  { %v519_v17 = vrot.slane %v455_v12, %v7668_v30  ;;  %v1160_v49 = vrot.slane %v1098_v20, %v7668_v30  ;;  %v778_v25 = vcombine.high %v7740_v15, %v7740_v15  ;;  %v1442_v7 = vrot.slane %v7818_v1, %v7668_v30  ;;  %14143 = vst [vmem:[#allocation8_spill] sm:$0xff] %v7992_v4  ;;  %v8009_v12 = vld [vmem:[%s14023_s3 + $0x20] sm:$0xff] }
 0x19d   :  { %v1100_v15 = vcombine.high %v7776_v38, %v7776_v38  ;;  %v1474_v39 = vrot.slane %v7833_v18, %v7668_v30  ;;  %v1373_v2 = vcombine.high %v7825_v16, %v7825_v16 }
 0x19e   :  { %v842_v23 = vrot.slane %v778_v25, %v7668_v30 }
 0x19f   :  { %533 = vperm.xlu1 %7404, %v471_v59   ;;  %569 = vperm.xlu0 %7405, %v507_v56   ;;  %v1156_v56 = vrot.slane %v7776_v38, %v7668_v30  ;;  %v515_v59 = vrot.slane %v453_v43, %v7668_v30  ;;  %v1446_v38 = vrot.slane %v7825_v16, %v7668_v30 }
 0x1a3   :  { %541 = vperm.xlu1 %7404, %v479_v5   ;;  %852 = vperm.xlu0 %7405, %v790_v6   ;;  %v487_v6 = vrot.slane %v406_v48, %v7668_v30  ;;  %v1128_v5 = vrot.slane %v1049_v10, %v7668_v30  ;;  %v7997_v48 = vld [vmem:[%s14023_s3] sm:$0xff] }
 0x1a7   :  { %565 = vperm.xlu1 %7404, %v503_v22   ;;  %860 = vperm.xlu0 %7405, %v798_v24   ;;  %v810_v22 = vrot.slane %v729_v60, %v7668_v30  ;;  %v1370_v24 = vcombine.high %v7779_v40, %v7779_v40  ;;  %v1419_v40 = vcombine.high %v7773_v36, %v7773_v36 }
 0x1a8   :  { %v1371_v36 = vcombine.high %v7818_v1, %v7818_v1  ;;  %v1478_v1 = vrot.slane %v7836_v21, %v7668_v30 }
 0x1a9   :  { %v1466_v33 = vrot.slane %v1419_v40, %v7668_v30 }
 0x1aa   :  { %v1450_v41 = vrot.slane %v1371_v36, %v7668_v30 }
 0x1ab   :  { %884 = vperm.xlu0 %7405, %v822_v29   ;;  %573 = vperm.xlu1 %7404, %v511_v31   ;;  %v1434_v29 = vrot.slane %v1370_v24, %v7668_v30  ;;  %v1051_v31 = vcombine.high %v7758_v28, %v7758_v28  ;;  %v1372_v28 = vcombine.high %v7792_v46, %v7792_v46 }
 0x1ac   :  { %v1421_v46 = vcombine.high %v7795_v47, %v7795_v47  ;;  %v1454_v47 = vrot.slane %v1373_v2, %v7668_v30 }
 0x1ad   :  { %v1132_v63 = vrot.slane %v1051_v31, %v7668_v30 }
 0x1af   :  { %892 = vperm.xlu0 %7405, %v830_v34   ;;  %856 = vperm.xlu1 %7404, %v794_v27   ;;  %v1164_v34 = vrot.slane %v1100_v15, %v7668_v30  ;;  %v1438_v27 = vrot.slane %v1372_v28, %v7668_v30 }
 0x1b3   :  { %1174 = vperm.xlu0 %7405, %v1112_v53   ;;  %864 = vperm.xlu1 %7404, %v802_v61   ;;  %v1420_v53 = vcombine.high %v7833_v18, %v7833_v18  ;;  %v1470_v61 = vrot.slane %v1421_v46, %v7668_v30  ;;  %v1422_v18 = vcombine.high %v7836_v21, %v7836_v21  ;;  %v8057_v46 = vld [vmem:[%s14023_s3 + $0x90] sm:$0xff] }
 0x1b4   :  { %14145 = vst [vmem:[#allocation10_spill] sm:$0xff] %v8057_v46 }
 0x1b5   :  { %v1482_v3 = vrot.slane %v1420_v53, %v7668_v30  ;;  %v1486_v45 = vrot.slane %v1422_v18, %v7668_v30  ;;  %v8062_v53 = vld [vmem:[%s14023_s3 + $0x98] sm:$0xff] }
 0x1b6   :  { %14146 = vst [vmem:[#allocation11_spill] sm:$0xff] %v8062_v53 }
 0x1b7   :  { %1182 = vperm.xlu0 %7405, %v1120_v51   ;;  %888 = vperm.xlu1 %7404, %v826_v44   ;;  %v14033_v51 = vmov 0.0|0.0  }
 0x1b8   :  { %7276 = vmatprep.subr.bf16.mxu0 %v14033_v51  ;;  %7340 = vmatprep.subr.bf16.mxu1 %v14033_v51 }
 0x1bb   :  { %1206 = vperm.xlu0 %7405, %v1144_v32   ;;  %896 = vperm.xlu1 %7404, %v834_v13  }
 0x1bf   :  { %1214 = vperm.xlu0 %7405, %v1152_v8   ;;  %1178 = vperm.xlu1 %7404, %v1116_v9  }
 0x1c3   :  { %1488 = vperm.xlu0 %7405, %v1426_v54   ;;  %1186 = vperm.xlu1 %7404, %v1124_v14  }
 0x1c7   :  { %1210 = vperm.xlu1 %7404, %v1148_v35   ;;  %1520 = vperm.xlu0 %7405, %v1458_v52  }
 0x1cb   :  { %1218 = vperm.xlu1 %7404, %v1156_v56   ;;  %545 = vperm.xlu0 %7405, %v483_v57  }
 0x1cf   :  { %1492 = vperm.xlu1 %7404, %v1430_v58   ;;  %577 = vperm.xlu0 %7405, %v515_v59  }
 0x1d3   :  { %868 = vperm.xlu0 %7405, %v806_v62   ;;  %1524 = vperm.xlu1 %7404, %v1462_v37   ;;  %v7987_v37 = vld [vmem:[%s14023_s3 + $0x80] sm:$0xff] }
 0x1d4   :  { %14142 = vst [vmem:[#allocation7_spill] sm:$0xff] %v7987_v37 }
 0x1d7   :  { %900 = vperm.xlu0 %7405, %v838_v42   ;;  %549 = vperm.xlu1 %7404, %v487_v6   ;;  %v8002_v42 = vld [vmem:[%s14023_s3 + $0x8] sm:$0xff] }
 0x1db   :  { %1190 = vperm.xlu0 %7405, %v1128_v5   ;;  %581 = vperm.xlu1 %7404, %v519_v17   ;;  %v8014_v5 = vld [vmem:[%s14023_s3 + $0x28] sm:$0xff] }
 0x1dc   :  { %14144 = vst [vmem:[#allocation9_spill] sm:$0xff] %v8014_v5 }
 0x1df   :  { %1222 = vperm.xlu0 %7405, %v1160_v49   ;;  %872 = vperm.xlu1 %7404, %v810_v22  }
 0x1e3   :  { %1496 = vperm.xlu0 %7405, %v1434_v29   ;;  %904 = vperm.xlu1 %7404, %v842_v23  }
 0x1e7   :  { %1504 = vperm.xlu0 %7405, %v1442_v7   ;;  %1194 = vperm.xlu1 %7404, %v1132_v63   ;;  %v8031_v7 = vld [vmem:[%s14023_s3 + $0x10] sm:$0xff]  ;;  %v8036_v63 = vld [vmem:[%s14023_s3 + $0x18] sm:$0xff] }
 0x1eb   :  { %1528 = vperm.xlu0 %7405, %v1466_v33   ;;  %1226 = vperm.xlu1 %7404, %v1164_v34  }
 0x1ef   :  { %1500 = vperm.xlu1 %7404, %v1438_v27   ;;  %1536 = vperm.xlu0 %7405, %v1474_v39  }
 0x1f3   :  { %1508 = vperm.xlu1 %7404, %v1446_v38   ;;  %1512 = vperm.xlu0 %7405, %v1450_v41  }
 0x1f7   :  { %1532 = vperm.xlu1 %7404, %v1470_v61   ;;  %1544 = vperm.xlu0 %7405, %v1482_v3  }
 0x1fa   :  { %v554_v44 = vpop.permute.xlu0 %553 }
 0x1fb   :  { %1540 = vperm.xlu1 %7404, %v1478_v1   ;;  %v600_v6 = vmul.f32 %v554_v44, %v7987_v37  ;;  %v601_v10 = vmul.f32 %v554_v44, %v7992_v4 }
 0x1fd   :  { %v8039_v40 = vsel %vm616_vm0, %v600_v6, 0.0  ;;  %v8042_v15 = vsel %vm616_vm0, %v601_v10, 0.0 }
 0x1ff   :  { %1516 = vperm.xlu1 %7404, %v1454_v47  }
 0x202   :  { %v522_v32 = vpop.permute.xlu1 %521  ;;  %v845_v13 = vpop.permute.xlu0 %844 }
 0x203   :  { %1548 = vperm.xlu1 %7404, %v1486_v45   ;;  %v584_v60 = vmul.f32 %v522_v32, %v7997_v48  ;;  %v585_v49 = vmul.f32 %v522_v32, %v8002_v42  ;;  %v907_v22 = vmul.f32 %v845_v13, %v7997_v48  ;;  %v908_v24 = vmul.f32 %v845_v13, %v8002_v42 }
 0x205   :  { %v617_v39 = vsel %vm616_vm0, %v584_v60, 0.0  ;;  %v648_v36 = vsel %vm616_vm0, %v585_v49, 0.0  ;;  %v939_v61 = vsel %vm616_vm0, %v907_v22, 0.0  ;;  %v970_v3 = vsel %vm616_vm0, %v908_v24, 0.0 }
 0x206   :  { %v530_v26 = vpop.permute.xlu1 %529  ;;  %v877_v16 = vpop.permute.xlu0 %876 }
 0x207   :  { %v588_v25 = vmul.f32 %v530_v26, %v8009_v12  ;;  %v589_v29 = vmul.f32 %v530_v26, %v8014_v5  ;;  %v923_v23 = vmul.f32 %v877_v16, %v7987_v37  ;;  %v924_v31 = vmul.f32 %v877_v16, %v7992_v4 }
 0x209   :  { %v620_v47 = vsel %vm616_vm0, %v588_v25, 0.0  ;;  %v651_v18 = vsel %vm616_vm0, %v589_v29, 0.0  ;;  %v8071_v44 = vsel %vm616_vm0, %v923_v23, 0.0  ;;  %v8074_v45 = vsel %vm616_vm0, %v924_v31, 0.0  ;;  %v8109_v23 = vld [vmem:[%s14023_s3 + $0x40] sm:$0xff]  ;;  %v8114_v31 = vld [vmem:[%s14023_s3 + $0x48] sm:$0xff] }
 0x20a   :  { %v1167_v8 = vpop.permute.xlu0 %1166  ;;  %v558_v9 = vpop.permute.xlu1 %557  ;;  %14147 = vst [vmem:[#allocation12_spill] sm:$0xff] %v8071_v44  ;;  %14148 = vst [vmem:[#allocation13_spill] sm:$0xff] %v8074_v45 }
 0x20b   :  { %v1229_v38 = vmul.f32 %v1167_v8, %v7997_v48  ;;  %v1230_v41 = vmul.f32 %v1167_v8, %v8002_v42  ;;  %v602_v32 = vmul.f32 %v558_v9, %v8057_v46  ;;  %v603_v13 = vmul.f32 %v558_v9, %v8062_v53  ;;  %v8083_v8 = vld [vmem:[%s14023_s3 + $0x30] sm:$0xff] }
 0x20c   :  { %14149 = vst [vmem:[#allocation14_spill] sm:$0xff] %v8083_v8 }
 0x20d   :  { %v1261_v9 = vsel %vm616_vm0, %v1229_v38, 0.0  ;;  %v1292_v10 = vsel %vm616_vm0, %v1230_v41, 0.0  ;;  %v8124_v41 = vsel %vm616_vm0, %v603_v13, 0.0 }
 0x20e   :  { %v7960_v54 = vpop.permute.xlu0 %1198  ;;  %v849_v14 = vpop.permute.xlu1 %848 }
 0x20f   :  { %v909_v1 = vmul.f32 %v849_v14, %v8031_v7  ;;  %v910_v2 = vmul.f32 %v849_v14, %v8036_v63  ;;  %v8088_v14 = vld [vmem:[%s14023_s3 + $0x38] sm:$0xff]  ;;  %v1245_v60 = vmul.f32 %v7960_v54, %v7987_v37  ;;  %v1246_v49 = vmul.f32 %v7960_v54, %v7992_v4  ;;  %v8165_v37 = vld [vmem:[%s14023_s3 + $0x50] sm:$0xff] }
 0x210   :  { %14150 = vst [vmem:[#allocation15_spill] sm:$0xff] %v8088_v14  ;;  %14157 = vst [vmem:[#allocation22_spill] sm:$0xff] %v8165_v37 }
 0x211   :  { %v940_v22 = vsel %vm616_vm0, %v909_v1, 0.0  ;;  %v971_v24 = vsel %vm616_vm0, %v910_v2, 0.0 }
 0x212   :  { %v526_v21 = vpop.permute.xlu0 %525  ;;  %v7962_v50 = vpop.permute.xlu1 %880  ;;  %v972_v19 = vadd.f32 %v971_v24, %v970_v3 }
 0x213   :  { %v586_v33 = vmul.f32 %v526_v21, %v8031_v7  ;;  %v587_v34 = vmul.f32 %v526_v21, %v8036_v63  ;;  %v925_v25 = vmul.f32 %v7962_v50, %v8057_v46  ;;  %v926_v29 = vmul.f32 %v7962_v50, %v8062_v53 }
 0x214   :  { %v8121_v50 = vsel %vm616_vm0, %v602_v32, 0.0 }
 0x215   :  { %v618_v26 = vsel %vm616_vm0, %v586_v33, 0.0  ;;  %v649_v16 = vsel %vm616_vm0, %v587_v34, 0.0  ;;  %v8158_v51 = vsel %vm616_vm0, %v926_v29, 0.0 }
 0x216   :  { %v7964_v35 = vpop.permute.xlu0 %537  ;;  %v7966_v52 = vpop.permute.xlu1 %1170  ;;  %v619_v54 = vadd.f32 %v618_v26, %v617_v39  ;;  %v650_v33 = vadd.f32 %v649_v16, %v648_v36  ;;  %v8135_v26 = vsel %vm616_vm0, %v1245_v60, 0.0  ;;  %v8152_v16 = vld [vmem:[%s14023_s3 + $0xa8] sm:$0xff]  ;;  %v941_v60 = vadd.f32 %v940_v22, %v939_v61  ;;  %14156 = vst [vmem:[#allocation21_spill] sm:$0xff] %v8158_v51  ;;  %v8170_v61 = vld [vmem:[%s14023_s3 + $0x58] sm:$0xff] }
 0x217   :  { %v1231_v1 = vmul.f32 %v7966_v52, %v8031_v7  ;;  %v1232_v2 = vmul.f32 %v7966_v52, %v8036_v63  ;;  %14151 = vst [vmem:[#allocation16_spill] sm:$0xff] %v8135_v26  ;;  %v592_v32 = vmul.f32 %v7964_v35, %v8109_v23  ;;  %v593_v13 = vmul.f32 %v7964_v35, %v8114_v31  ;;  %v8147_v52 = vld [vmem:[%s14023_s3 + $0xa0] sm:$0xff] }
 0x218   :  { %14153 = vst [vmem:[#allocation18_spill] sm:$0xff] %v8147_v52  ;;  %14154 = vst [vmem:[#allocation19_spill] sm:$0xff] %v8152_v16  ;;  %v621_v11 = vadd.f32 %v620_v47, %v619_v54  ;;  %v652_v35 = vadd.f32 %v651_v18, %v650_v33 }
 0x219   :  { %14158 = vst [vmem:[#allocation23_spill] sm:$0xff] %v8170_v61  ;;  %v1262_v3 = vsel %vm616_vm0, %v1231_v1, 0.0  ;;  %v1293_v22 = vsel %vm616_vm0, %v1232_v2, 0.0  ;;  %v624_v29 = vsel %vm616_vm0, %v592_v32, 0.0  ;;  %v655_v54 = vsel %vm616_vm0, %v593_v13, 0.0  ;;  %v8196_v2 = vld [vmem:[%s14023_s3 + $0xc8] sm:$0xff] }
 0x21a   :  { %v7968_v55 = vpop.permute.xlu0 %561  ;;  %v7970_v56 = vpop.permute.xlu1 %1202  ;;  %14160 = vst [vmem:[#allocation25_spill] sm:$0xff] %v8196_v2 }
 0x21b   :  { %v604_v47 = vmul.f32 %v7968_v55, %v8147_v52  ;;  %v605_v18 = vmul.f32 %v7968_v55, %v8152_v16  ;;  %v8191_v55 = vld [vmem:[%s14023_s3 + $0xc0] sm:$0xff]  ;;  %v1247_v26 = vmul.f32 %v7970_v56, %v8057_v46 }
 0x21c   :  { %14159 = vst [vmem:[#allocation24_spill] sm:$0xff] %v8191_v55 }
 0x21e   :  { %v7972_v57 = vpop.permute.xlu1 %533  ;;  %v7974_v43 = vpop.permute.xlu0 %569 }
 0x21f   :  { %v590_v34 = vmul.f32 %v7972_v57, %v8083_v8  ;;  %v591_v38 = vmul.f32 %v7972_v57, %v8088_v14  ;;  %v8138_v57 = vsel %vm616_vm0, %v1246_v49, 0.0  ;;  %v8155_v49 = vsel %vm616_vm0, %v925_v25, 0.0 }
 0x220   :  { %14152 = vst [vmem:[#allocation17_spill] sm:$0xff] %v8138_v57  ;;  %14155 = vst [vmem:[#allocation20_spill] sm:$0xff] %v8155_v49  ;;  %v8202_v57 = vadd.f32 %v1262_v3, %v1261_v9  ;;  %v8223_v9 = vld [vmem:[%s14023_s3 + $0xb0] sm:$0xff] }
 0x221   :  { %v622_v30 = vsel %vm616_vm0, %v590_v34, 0.0  ;;  %v653_v4 = vsel %vm616_vm0, %v591_v38, 0.0  ;;  %14163 = vst [vmem:[#allocation28_spill] sm:$0xff] %v8223_v9 }
 0x222   :  { %v7976_v58 = vpop.permute.xlu1 %541  ;;  %v7978_v59 = vpop.permute.xlu0 %852  ;;  %v623_v38 = vadd.f32 %v622_v30, %v621_v11  ;;  %v654_v1 = vadd.f32 %v653_v4, %v652_v35  ;;  %v8204_v11 = vadd.f32 %v1293_v22, %v1292_v10  ;;  %v8211_v4 = vsel %vm616_vm0, %v604_v47, 0.0 }
 0x223   :  { %v911_v33 = vmul.f32 %v7978_v59, %v8009_v12  ;;  %v912_v34 = vmul.f32 %v7978_v59, %v8014_v5  ;;  %v594_v32 = vmul.f32 %v7976_v58, %v8165_v37  ;;  %v595_v13 = vmul.f32 %v7976_v58, %v8170_v61  ;;  %14161 = vst [vmem:[#allocation26_spill] sm:$0xff] %v8211_v4 }
 0x224   :  { %v8214_v35 = vsel %vm616_vm0, %v605_v18, 0.0  ;;  %v1248_v58 = vmul.f32 %v7970_v56, %v8062_v53  ;;  %v608_v22 = vmul.f32 %v7974_v43, %v8191_v55  ;;  %v609_v47 = vmul.f32 %v7974_v43, %v8196_v2 }
 0x225   :  { %14162 = vst [vmem:[#allocation27_spill] sm:$0xff] %v8214_v35  ;;  %v942_v56 = vsel %vm616_vm0, %v911_v33, 0.0  ;;  %v973_v18 = vsel %vm616_vm0, %v912_v34, 0.0  ;;  %v625_v53 = vadd.f32 %v624_v29, %v623_v38  ;;  %v656_v46 = vadd.f32 %v655_v54, %v654_v1 }
 0x226   :  { %v7980_v0 = vpop.permute.xlu1 %565  ;;  %v7982_v62 = vpop.permute.xlu0 %860  ;;  %v626_v51 = vsel %vm616_vm0, %v594_v32, 0.0  ;;  %v657_v49 = vsel %vm616_vm0, %v595_v13, 0.0  ;;  %v943_v4 = vadd.f32 %v942_v56, %v941_v60  ;;  %v974_v33 = vadd.f32 %v973_v18, %v972_v19 }
 0x227   :  { %v606_v45 = vmul.f32 %v7980_v0, %v8223_v9  ;;  %v915_v29 = vmul.f32 %v7982_v62, %v8109_v23  ;;  %v916_v54 = vmul.f32 %v7982_v62, %v8114_v31  ;;  %v8255_v1 = vsel %vm616_vm0, %v1247_v26, 0.0  ;;  %v8273_v62 = vld [vmem:[%s14023_s3 + $0xd0] sm:$0xff]  ;;  %v8278_v26 = vld [vmem:[%s14023_s3 + $0xd8] sm:$0xff] }
 0x228   :  { %14165 = vst [vmem:[#allocation30_spill] sm:$0xff] %v8255_v1  ;;  %v8261_v32 = vsel %vm616_vm0, %v608_v22, 0.0  ;;  %v8264_v19 = vsel %vm616_vm0, %v609_v47, 0.0  ;;  %v8266_v60 = vadd.f32 %v626_v51, %v625_v53  ;;  %v8268_v13 = vadd.f32 %v657_v49, %v656_v46  ;;  %14167 = vst [vmem:[#allocation32_spill] sm:$0xff] %v8273_v62 }
 0x229   :  { %14168 = vst [vmem:[#allocation33_spill] sm:$0xff] %v8278_v26  ;;  %v946_v49 = vsel %vm616_vm0, %v915_v29, 0.0  ;;  %v977_v22 = vsel %vm616_vm0, %v916_v54, 0.0 }
 0x22a   :  { %v8016_v17 = vpop.permute.xlu0 %884  ;;  %v8018_v20 = vpop.permute.xlu1 %573 }
 0x22b   :  { %v927_v47 = vmul.f32 %v8016_v17, %v8147_v52  ;;  %v610_v56 = vmul.f32 %v8018_v20, %v8273_v62  ;;  %v611_v18 = vmul.f32 %v8018_v20, %v8278_v26 }
 0x22e   :  { %v8046_v28 = vpop.permute.xlu0 %892  ;;  %v8048_v27 = vpop.permute.xlu1 %856 }
 0x22f   :  { %v913_v30 = vmul.f32 %v8048_v27, %v8083_v8  ;;  %v914_v59 = vmul.f32 %v8048_v27, %v8088_v14  ;;  %v8228_v27 = vld [vmem:[%s14023_s3 + $0xb8] sm:$0xff] }
 0x230   :  { %14164 = vst [vmem:[#allocation29_spill] sm:$0xff] %v8228_v27  ;;  %v607_v44 = vmul.f32 %v7980_v0, %v8228_v27  ;;  %v8258_v0 = vsel %vm616_vm0, %v1248_v58, 0.0  ;;  %v8281_v58 = vsel %vm616_vm0, %v606_v45, 0.0 }
 0x231   :  { %v944_v35 = vsel %vm616_vm0, %v913_v30, 0.0  ;;  %v975_v43 = vsel %vm616_vm0, %v914_v59, 0.0  ;;  %14166 = vst [vmem:[#allocation31_spill] sm:$0xff] %v8258_v0 }
 0x232   :  { %v8090_v21 = vpop.permute.xlu0 %1174  ;;  %v8092_v6 = vpop.permute.xlu1 %864  ;;  %v945_v30 = vadd.f32 %v944_v35, %v943_v4  ;;  %v976_v59 = vadd.f32 %v975_v43, %v974_v33  ;;  %v8284_v51 = vsel %vm616_vm0, %v607_v44, 0.0  ;;  %v931_v43 = vmul.f32 %v8046_v28, %v8191_v55 }
 0x233   :  { %v1233_v46 = vmul.f32 %v8090_v21, %v8009_v12  ;;  %v1234_v53 = vmul.f32 %v8090_v21, %v8014_v5  ;;  %v917_v4 = vmul.f32 %v8092_v6, %v8165_v37  ;;  %v918_v45 = vmul.f32 %v8092_v6, %v8170_v61 }
 0x234   :  { %v928_v21 = vmul.f32 %v8016_v17, %v8152_v16  ;;  %v932_v6 = vmul.f32 %v8046_v28, %v8196_v2  ;;  %v947_v33 = vadd.f32 %v946_v49, %v945_v30  ;;  %v978_v29 = vadd.f32 %v977_v22, %v976_v59 }
 0x235   :  { %v1264_v54 = vsel %vm616_vm0, %v1233_v46, 0.0  ;;  %v948_v1 = vsel %vm616_vm0, %v917_v4, 0.0  ;;  %v979_v20 = vsel %vm616_vm0, %v918_v45, 0.0  ;;  %v8323_v46 = vsel %vm616_vm0, %v927_v47, 0.0 }
 0x236   :  { %v8130_v39 = vpop.permute.xlu0 %1182  ;;  %v8132_v36 = vpop.permute.xlu1 %888  ;;  %v8332_v49 = vsel %vm616_vm0, %v611_v18, 0.0  ;;  %v8335_v22 = vsel %vm616_vm0, %v931_v43, 0.0  ;;  %v8338_v4 = vsel %vm616_vm0, %v932_v6, 0.0  ;;  %v8342_v47 = vadd.f32 %v948_v1, %v947_v33  ;;  %v8362_v1 = vld [vmem:[%s14023_s3 + $0x68] sm:$0xff] }
 0x237   :  { %v1237_v5 = vmul.f32 %v8130_v39, %v8109_v23  ;;  %v1238_v28 = vmul.f32 %v8130_v39, %v8114_v31  ;;  %v1265_v39 = vadd.f32 %v1264_v54, %v8202_v57  ;;  %v929_v6 = vmul.f32 %v8132_v36, %v8223_v9 }
 0x238   :  { %v930_v57 = vmul.f32 %v8132_v36, %v8228_v27 }
 0x239   :  { %v1268_v18 = vsel %vm616_vm0, %v1237_v5, 0.0  ;;  %v1299_v43 = vsel %vm616_vm0, %v1238_v28, 0.0 }
 0x23a   :  { %v8178_v24 = vpop.permute.xlu0 %1206  ;;  %v8180_v25 = vpop.permute.xlu1 %896 }
 0x23b   :  { %v1250_v33 = vmul.f32 %v8178_v24, %v8152_v16  ;;  %v933_v36 = vmul.f32 %v8180_v25, %v8273_v62 }
 0x23e   :  { %v8230_v10 = vpop.permute.xlu0 %1214  ;;  %v1179_v3 = vpop.permute.xlu1 %1178 }
 0x23f   :  { %v1235_v17 = vmul.f32 %v1179_v3, %v8083_v8  ;;  %v1236_v0 = vmul.f32 %v1179_v3, %v8088_v14  ;;  %v8329_v3 = vsel %vm616_vm0, %v610_v56, 0.0  ;;  %v1253_v54 = vmul.f32 %v8230_v10, %v8191_v55 }
 0x240   :  { %v8386_v55 = vsel %vm616_vm0, %v930_v57, 0.0 }
 0x241   :  { %v1266_v56 = vsel %vm616_vm0, %v1235_v17, 0.0  ;;  %v1297_v14 = vsel %vm616_vm0, %v1236_v0, 0.0  ;;  %v1254_v17 = vmul.f32 %v8230_v10, %v8196_v2 }
 0x242   :  { %v8250_v34 = vpop.permute.xlu0 %1488  ;;  %v8252_v38 = vpop.permute.xlu1 %1186 }
 0x243   :  { %v1239_v10 = vmul.f32 %v8252_v38, %v8165_v37 }
 0x246   :  { %v8296_v35 = vpop.permute.xlu1 %1210  ;;  %v8298_v44 = vpop.permute.xlu0 %1520 }
 0x247   :  { %14169 = vst [vmem:[#allocation34_spill] sm:$0xff] %v8298_v44  ;;  %v1295_v44 = vsel %vm616_vm0, %v1234_v53, 0.0  ;;  %v8326_v53 = vsel %vm616_vm0, %v928_v21, 0.0  ;;  %v8344_v21 = vadd.f32 %v979_v20, %v978_v29  ;;  %v934_v29 = vmul.f32 %v8180_v25, %v8278_v26 }
 0x248   :  { %v1296_v45 = vadd.f32 %v1295_v44, %v8204_v11  ;;  %v8357_v11 = vld [vmem:[%s14023_s3 + $0x60] sm:$0xff]  ;;  %v1249_v44 = vmul.f32 %v8178_v24, %v8147_v52  ;;  %v1267_v20 = vadd.f32 %v1266_v56, %v1265_v39  ;;  %v1551_v52 = vmul.f32 %v8250_v34, %v7997_v48 }
 0x249   :  { %v1552_v24 = vmul.f32 %v8250_v34, %v8002_v42  ;;  %v8383_v25 = vsel %vm616_vm0, %v929_v6, 0.0  ;;  %v8398_v34 = vsel %vm616_vm0, %v1250_v33, 0.0  ;;  %v8407_v56 = vsel %vm616_vm0, %v1253_v54, 0.0  ;;  %v8420_v33 = vld [vmem:[%s14023_s3 + $0x78] sm:$0xff] }
 0x24a   :  { %v1219_v30 = vpop.permute.xlu1 %1218  ;;  %v546_v59 = vpop.permute.xlu0 %545  ;;  %v1298_v28 = vadd.f32 %v1297_v14, %v1296_v45  ;;  %v1240_v14 = vmul.f32 %v8252_v38, %v8170_v61  ;;  %v8395_v42 = vsel %vm616_vm0, %v1249_v44, 0.0  ;;  %14171 = vst [vmem:[#allocation36_spill] sm:$0xff] %v8398_v34  ;;  %v8404_v45 = vsel %vm616_vm0, %v934_v29, 0.0  ;;  %14172 = vst [vmem:[#allocation37_spill] sm:$0xff] %v8407_v56  ;;  %v8415_v44 = vld [vmem:[%s14023_s3 + $0x70] sm:$0xff] }
 0x24b   :  { %v596_v16 = vmul.f32 %v546_v59, %v8357_v11  ;;  %v597_v8 = vmul.f32 %v546_v59, %v8362_v1  ;;  %v8401_v59 = vsel %vm616_vm0, %v933_v36, 0.0  ;;  %v8410_v38 = vsel %vm616_vm0, %v1254_v17, 0.0 }
 0x24c   :  { %14173 = vst [vmem:[#allocation38_spill] sm:$0xff] %v8410_v38  ;;  %v1269_v6 = vadd.f32 %v1268_v18, %v1267_v20  ;;  %v1300_v57 = vadd.f32 %v1299_v43, %v1298_v28  ;;  %v8423_v36 = vsel %vm616_vm0, %v1551_v52, 0.0  ;;  %v8426_v29 = vsel %vm616_vm0, %v1552_v24, 0.0 }
 0x24d   :  { %v628_v54 = vsel %vm616_vm0, %v596_v16, 0.0  ;;  %v659_v18 = vsel %vm616_vm0, %v597_v8, 0.0  ;;  %v1270_v43 = vsel %vm616_vm0, %v1239_v10, 0.0  ;;  %v1301_v17 = vsel %vm616_vm0, %v1240_v14, 0.0  ;;  %v8441_v8 = vld [vmem:[%s14023_s3 + $0xe0] sm:$0xff]  ;;  %v8446_v16 = vld [vmem:[%s14023_s3 + $0xe8] sm:$0xff] }
 0x24e   :  { %v1493_v0 = vpop.permute.xlu1 %1492  ;;  %v578_v5 = vpop.permute.xlu0 %577  ;;  %v1251_v20 = vmul.f32 %v8296_v35, %v8223_v9  ;;  %v1252_v28 = vmul.f32 %v8296_v35, %v8228_v27  ;;  %v1256_v24 = vmul.f32 %v1219_v30, %v8278_v26  ;;  %v629_v14 = vadd.f32 %v628_v54, %v8266_v60 }
 0x24f   :  { %v1553_v27 = vmul.f32 %v1493_v0, %v8031_v7  ;;  %v1554_v9 = vmul.f32 %v1493_v0, %v8036_v63  ;;  %v612_v38 = vmul.f32 %v578_v5, %v8441_v8  ;;  %v8462_v34 = vadd.f32 %v1301_v17, %v1300_v57 }
 0x250   :  { %v8465_v7 = vsel %vm616_vm0, %v1251_v20, 0.0  ;;  %v8468_v63 = vsel %vm616_vm0, %v1252_v28, 0.0 }
 0x251   :  { %v1615_v57 = vsel %vm616_vm0, %v1554_v9, 0.0 }
 0x252   :  { %v869_v48 = vpop.permute.xlu0 %868  ;;  %v8392_v39 = vpop.permute.xlu1 %1524 }
 0x253   :  { %14170 = vst [vmem:[#allocation35_spill] sm:$0xff] %v8392_v39  ;;  %v1255_v39 = vmul.f32 %v1219_v30, %v8273_v62  ;;  %v660_v62 = vadd.f32 %v659_v18, %v8268_v13  ;;  %v919_v30 = vmul.f32 %v869_v48, %v8357_v11  ;;  %v920_v26 = vmul.f32 %v869_v48, %v8362_v1 }
 0x254   :  { %v8460_v18 = vadd.f32 %v1270_v43, %v1269_v6  ;;  %v1584_v6 = vsel %vm616_vm0, %v1553_v27, 0.0  ;;  %v8483_v43 = vsel %vm616_vm0, %v612_v38, 0.0 }
 0x255   :  { %v950_v0 = vsel %vm616_vm0, %v919_v30, 0.0  ;;  %v981_v48 = vsel %vm616_vm0, %v920_v26, 0.0 }
 0x256   :  { %v901_v2 = vpop.permute.xlu0 %900  ;;  %v550_v52 = vpop.permute.xlu1 %549  ;;  %v982_v20 = vadd.f32 %v981_v48, %v8344_v21 }
 0x257   :  { %v598_v10 = vmul.f32 %v550_v52, %v8415_v44  ;;  %v599_v35 = vmul.f32 %v550_v52, %v8420_v33  ;;  %v613_v52 = vmul.f32 %v578_v5, %v8446_v16  ;;  %v935_v38 = vmul.f32 %v901_v2, %v8441_v8 }
 0x258   :  { %v936_v28 = vmul.f32 %v901_v2, %v8446_v16 }
 0x259   :  { %v630_v61 = vsel %vm616_vm0, %v598_v10, 0.0  ;;  %v661_v37 = vsel %vm616_vm0, %v599_v35, 0.0  ;;  %v8486_v17 = vsel %vm616_vm0, %v613_v52, 0.0  ;;  %v14175_v35 = vld [vmem:[#allocation27_spill] sm:$0xff] }
 0x25a   :  { %v631_v56 = vadd.f32 %v630_v61, %v629_v14  ;;  %v662_v60 = vadd.f32 %v661_v37, %v660_v62  ;;  %v1191_v54 = vpop.permute.xlu0 %1190  ;;  %v582_v13 = vpop.permute.xlu1 %581  ;;  %v8475_v61 = vsel %vm616_vm0, %v1255_v39, 0.0  ;;  %v8478_v62 = vsel %vm616_vm0, %v1256_v24, 0.0  ;;  %v14174_v24 = vld [vmem:[#allocation26_spill] sm:$0xff] }
 0x25b   :  { %v1241_v21 = vmul.f32 %v1191_v54, %v8357_v11  ;;  %v1242_v14 = vmul.f32 %v1191_v54, %v8362_v1 }
 0x25c   :  { %v633_v5 = vadd.f32 %v8039_v40, %v631_v56  ;;  %v664_v37 = vadd.f32 %v8042_v15, %v662_v60  ;;  %v951_v56 = vadd.f32 %v950_v0, %v8342_v47  ;;  %v8506_v47 = vld [vmem:[%s14023_s3 + $0xf8] sm:$0xff] }
 0x25d   :  { %v615_v54 = vmul.f32 %v582_v13, %v8506_v47 }
 0x25e   :  { %v635_v40 = vadd.f32 %v8121_v50, %v633_v5  ;;  %v666_v15 = vadd.f32 %v8124_v41, %v664_v37  ;;  %v1223_v26 = vpop.permute.xlu0 %1222  ;;  %v873_v39 = vpop.permute.xlu1 %872  ;;  %v8501_v41 = vld [vmem:[%s14023_s3 + $0xf0] sm:$0xff]  ;;  %s7479_s3 = smov 32  }
 0x25f   :  { %v921_v27 = vmul.f32 %v873_v39, %v8415_v44  ;;  %v922_v9 = vmul.f32 %v873_v39, %v8420_v33  ;;  %v614_v39 = vmul.f32 %v582_v13, %v8501_v41  ;;  %v1257_v13 = vmul.f32 %v1223_v26, %v8441_v8 }
 0x260   :  { %v637_v10 = vadd.f32 %v14174_v24, %v635_v40  ;;  %v668_v50 = vadd.f32 %v14175_v35, %v666_v15  ;;  %v1585_v40 = vadd.f32 %v1584_v6, %v8423_v36  ;;  %v1616_v15 = vadd.f32 %v1615_v57, %v8426_v29  ;;  %v14176_v24 = vld [vmem:[#allocation12_spill] sm:$0xff]  ;;  %v14179_v57 = vld [vmem:[#allocation21_spill] sm:$0xff] }
 0x261   :  { %v952_v2 = vsel %vm616_vm0, %v921_v27, 0.0  ;;  %v983_v30 = vsel %vm616_vm0, %v922_v9, 0.0  ;;  %v1272_v36 = vsel %vm616_vm0, %v1241_v21, 0.0  ;;  %v1303_v29 = vsel %vm616_vm0, %v1242_v14, 0.0  ;;  %v14178_v6 = vld [vmem:[#allocation20_spill] sm:$0xff] }
 0x262   :  { %v639_v52 = vadd.f32 %v8281_v58, %v637_v10  ;;  %v670_v60 = vadd.f32 %v8284_v51, %v668_v50  ;;  %v953_v0 = vadd.f32 %v952_v2, %v951_v56  ;;  %v984_v48 = vadd.f32 %v983_v30, %v982_v20  ;;  %v1497_v5 = vpop.permute.xlu0 %1496  ;;  %v905_v37 = vpop.permute.xlu1 %904  ;;  %v14177_v10 = vld [vmem:[#allocation13_spill] sm:$0xff] }
 0x263   :  { %v8523_v56 = vsel %vm616_vm0, %v935_v38, 0.0  ;;  %v8526_v20 = vsel %vm616_vm0, %v936_v28, 0.0  ;;  %v646_v38 = vsel %vm616_vm0, %v614_v39, 0.0  ;;  %v677_v30 = vsel %vm616_vm0, %v615_v54, 0.0 }
 0x264   :  { %v641_v27 = vadd.f32 %v8261_v32, %v639_v52  ;;  %v672_v9 = vadd.f32 %v8264_v19, %v670_v60  ;;  %v955_v58 = vadd.f32 %v14176_v24, %v953_v0  ;;  %v986_v51 = vadd.f32 %v14177_v10, %v984_v48  ;;  %v14180_v52 = vld [vmem:[#allocation9_spill] sm:$0xff] }
 0x265   :  { %v1258_v32 = vmul.f32 %v1223_v26, %v8446_v16  ;;  %v1555_v28 = vmul.f32 %v1497_v5, %v8009_v12  ;;  %v1556_v21 = vmul.f32 %v1497_v5, %v14180_v52  ;;  %v1273_v48 = vadd.f32 %v1272_v36, %v8460_v18  ;;  %v14183_v52 = vld [vmem:[#allocation14_spill] sm:$0xff] }
 0x266   :  { %v957_v19 = vadd.f32 %v14178_v6, %v955_v58  ;;  %v988_v35 = vadd.f32 %v14179_v57, %v986_v51  ;;  %v1505_v50 = vpop.permute.xlu0 %1504  ;;  %v1195_v2 = vpop.permute.xlu1 %1194  ;;  %v643_v14 = vadd.f32 %v8329_v3, %v641_v27  ;;  %v674_v60 = vadd.f32 %v8332_v49, %v672_v9 }
 0x267   :  { %v1304_v24 = vadd.f32 %v1303_v29, %v8462_v34  ;;  %v1243_v39 = vmul.f32 %v1195_v2, %v8415_v44  ;;  %v1244_v54 = vmul.f32 %v1195_v2, %v8420_v33  ;;  %v8547_v12 = vsel %vm616_vm0, %v1257_v13, 0.0 }
 0x268   :  { %v959_v26 = vadd.f32 %v8323_v46, %v957_v19  ;;  %v990_v0 = vadd.f32 %v8326_v53, %v988_v35  ;;  %v8550_v5 = vsel %vm616_vm0, %v1258_v32, 0.0  ;;  %v1586_v53 = vsel %vm616_vm0, %v1555_v28, 0.0  ;;  %v14181_v19 = vld [vmem:[#allocation16_spill] sm:$0xff]  ;;  %v14182_v35 = vld [vmem:[#allocation17_spill] sm:$0xff] }
 0x269   :  { %v1617_v34 = vsel %vm616_vm0, %v1556_v21, 0.0  ;;  %v1274_v18 = vsel %vm616_vm0, %v1243_v39, 0.0  ;;  %v1305_v27 = vsel %vm616_vm0, %v1244_v54, 0.0  ;;  %v645_v58 = vadd.f32 %v8483_v43, %v643_v14 }
 0x26a   :  { %v961_v3 = vadd.f32 %v8383_v25, %v959_v26  ;;  %v992_v46 = vadd.f32 %v8386_v55, %v990_v0  ;;  %v1227_v49 = vpop.permute.xlu1 %1226  ;;  %v8558_v9 = vpop.permute.xlu0 %1528  ;;  %v676_v10 = vadd.f32 %v8486_v17, %v674_v60  ;;  %v1275_v25 = vadd.f32 %v1274_v18, %v1273_v48  ;;  %v14185_v26 = vld [vmem:[#allocation30_spill] sm:$0xff] }
 0x26b   :  { %v1306_v51 = vadd.f32 %v1305_v27, %v1304_v24  ;;  %v937_v29 = vmul.f32 %v905_v37, %v8501_v41  ;;  %v938_v13 = vmul.f32 %v905_v37, %v8506_v47  ;;  %v1587_v32 = vadd.f32 %v1586_v53, %v1585_v40  ;;  %v14186_v37 = vld [vmem:[#allocation31_spill] sm:$0xff] }
 0x26c   :  { %v963_v55 = vadd.f32 %v8335_v22, %v961_v3  ;;  %v994_v36 = vadd.f32 %v8338_v4, %v992_v46  ;;  %v1618_v6 = vadd.f32 %v1617_v34, %v1616_v15  ;;  %v1277_v57 = vadd.f32 %v14181_v19, %v1275_v25  ;;  %v14184_v22 = vld [vmem:[#allocation15_spill] sm:$0xff] }
 0x26d   :  { %v1308_v2 = vadd.f32 %v14182_v35, %v1306_v51  ;;  %v1559_v43 = vmul.f32 %v1505_v50, %v8109_v23  ;;  %v1560_v17 = vmul.f32 %v1505_v50, %v8114_v31  ;;  %v647_v4 = vadd.f32 %v646_v38, %v645_v58  ;;  %v14193_v35 = vld [vmem:[#allocation23_spill] sm:$0xff] }
 0x26e   :  { %v1501_v28 = vpop.permute.xlu1 %1500  ;;  %v678_v60 = vadd.f32 %v677_v30, %v676_v10  ;;  %v1279_v0 = vadd.f32 %v14185_v26, %v1277_v57  ;;  %v965_v15 = vadd.f32 %v8401_v59, %v963_v55  ;;  %v996_v48 = vadd.f32 %v8404_v45, %v994_v36  ;;  %v8578_v39 = vpop.permute.xlu0 %1536  ;;  %v14187_v30 = vld [vmem:[#allocation36_spill] sm:$0xff]  ;;  %v14188_v55 = vld [vmem:[#allocation37_spill] sm:$0xff]  ;;  %v14195_v26 = vld [vmem:[#allocation34_spill] sm:$0xff] }
 0x26f   :  { %v1557_v21 = vmul.f32 %v1501_v28, %v14183_v52  ;;  %v1558_v14 = vmul.f32 %v1501_v28, %v14184_v22  ;;  %v1310_v40 = vadd.f32 %v14186_v37, %v1308_v2  ;;  %v968_v31 = vsel %vm616_vm0, %v937_v29, 0.0  ;;  %v14189_v29 = vld [vmem:[#allocation38_spill] sm:$0xff] }
 0x270   :  { %v999_v50 = vsel %vm616_vm0, %v938_v13, 0.0  ;;  %v1281_v38 = vadd.f32 %v8395_v42, %v1279_v0  ;;  %v1590_v46 = vsel %vm616_vm0, %v1559_v43, 0.0  ;;  %v1621_v59 = vsel %vm616_vm0, %v1560_v17, 0.0 }
 0x271   :  { %v1588_v24 = vsel %vm616_vm0, %v1557_v21, 0.0  ;;  %v1619_v23 = vsel %vm616_vm0, %v1558_v14, 0.0  ;;  %v1312_v54 = vadd.f32 %v14187_v30, %v1310_v40  ;;  %v8588_v27 = vpack.i.bf16 %v678_v60, %v647_v4 }
 0x272   :  { %v1509_v3 = vpop.permute.xlu1 %1508  ;;  %v1589_v45 = vadd.f32 %v1588_v24, %v1587_v32  ;;  %v1620_v53 = vadd.f32 %v1619_v23, %v1618_v6  ;;  %v1283_v34 = vadd.f32 %v8465_v7, %v1281_v38  ;;  %v1645_v58 = vsel %vm616_vm0, %v647_v4, 0.0  ;;  %v1513_v28 = vpop.permute.xlu0 %1512 }
 0x273   :  { %v1314_v18 = vadd.f32 %v8468_v63, %v1312_v54  ;;  %v967_v10 = vadd.f32 %v8523_v56, %v965_v15  ;;  %v998_v42 = vadd.f32 %v8526_v20, %v996_v48  ;;  %v1646_v25 = vsel %vm616_vm0, %v678_v60, 0.0  ;;  %7407 = vrot.lane.b32.xlu0 %v8588_v27, %s7479_s3  ;;  %v14192_v56 = vld [vmem:[#allocation22_spill] sm:$0xff]  ;;  %v14194_v60 = vld [vmem:[#allocation7_spill] sm:$0xff]  ;;  %v14197_v48 = vld [vmem:[#allocation8_spill] sm:$0xff] }
 0x274   :  { %v1654_v51 = vsel %vm1653_vm1, %v1645_v58, 0.0  ;;  %v1285_v36 = vadd.f32 %v14188_v55, %v1283_v34  ;;  %v1655_v7 = vsel %vm1653_vm1, %v1646_v25, 0.0  ;;  %v1561_v20 = vmul.f32 %v1509_v3, %v14192_v56  ;;  %v14199_v54 = vld [vmem:[#allocation35_spill] sm:$0xff]  ;;  %v14201_v34 = vld [vmem:[#allocation18_spill] sm:$0xff] }
 0x275   :  { %v1316_v13 = vadd.f32 %v14189_v29, %v1314_v18  ;;  %v1259_v6 = vmul.f32 %v1227_v49, %v8501_v41  ;;  %v1260_v19 = vmul.f32 %v1227_v49, %v8506_v47  ;;  %v7277_v57 = vpack.c.bf16 %v1655_v7, %v1654_v51 }
 0x276   :  { %v8607_v32 = vpop.permute.xlu1 %1532  ;;  %v1562_v2 = vmul.f32 %v1509_v3, %v14193_v35  ;;  %v1287_v43 = vadd.f32 %v8475_v61, %v1285_v36  ;;  %v1591_v52 = vadd.f32 %v1590_v46, %v1589_v45  ;;  %v1622_v21 = vadd.f32 %v1621_v59, %v1620_v53  ;;  %v14200_v46 = vld [vmem:[#allocation11_spill] sm:$0xff] }
 0x277   :  { %v1318_v17 = vadd.f32 %v8478_v62, %v1316_v13  ;;  %v969_v22 = vadd.f32 %v968_v31, %v967_v10  ;;  %v1000_v14 = vadd.f32 %v999_v50, %v998_v42  ;;  %7279 = vmatpush1.bf16.msk.msra.mxu0 %vm8602_vm3, %v7277_v57  ;;  %7356 = vmatpush1.bf16.msk.msra.mxu1 %vm8602_vm3, %v7277_v57  ;;  %v1592_v49 = vsel %vm616_vm0, %v1561_v20, 0.0 }
 0x278   :  { %v1623_v4 = vsel %vm616_vm0, %v1562_v2, 0.0  ;;  %v1567_v0 = vmul.f32 %v14195_v26, %v14194_v60  ;;  %v1289_v61 = vadd.f32 %v8547_v12, %v1287_v43  ;;  %v1563_v37 = vmul.f32 %v1513_v28, %v8357_v11  ;;  %v14198_v11 = vld [vmem:[#allocation10_spill] sm:$0xff] }
 0x279   :  { %v1320_v62 = vadd.f32 %v8550_v5, %v1318_v17  ;;  %v14196_v40 = vmov 0.0|0.0   ;;  %v1568_v24 = vmul.f32 %v14195_v26, %v14197_v48  ;;  %v1290_v23 = vsel %vm616_vm0, %v1259_v6, 0.0 }
 0x27a   :  { %7280 = vmatprep.subr.bf16.mxu0 %v14196_v40  ;;  %v8626_v15 = vpop.permute.xlu1 %1540  ;;  %v1321_v31 = vsel %vm616_vm0, %v1260_v19, 0.0  ;;  %v1564_v50 = vmul.f32 %v1513_v28, %v8362_v1  ;;  %7341 = vmatprep.subr.bf16.mxu1 %v14196_v40  ;;  %v1291_v12 = vadd.f32 %v1290_v23, %v1289_v61  ;;  %v1593_v5 = vadd.f32 %v1592_v49, %v1591_v52  ;;  %v14202_v52 = vld [vmem:[#allocation19_spill] sm:$0xff]  ;;  %v14203_v49 = vld [vmem:[#allocation28_spill] sm:$0xff]  ;;  %v14206_v23 = vld [vmem:[#allocation25_spill] sm:$0xff] }
 0x27b   :  { %v1322_v38 = vadd.f32 %v1321_v31, %v1320_v62  ;;  %v1624_v30 = vadd.f32 %v1623_v4, %v1622_v21  ;;  %v1569_v3 = vmul.f32 %v14199_v54, %v14198_v11  ;;  %v1570_v59 = vmul.f32 %v14199_v54, %v14200_v46 }
 0x27c   :  { %v7411_v45 = vpack.i.bf16 %v1000_v14, %v969_v22  ;;  %v1647_v53 = vsel %vm616_vm0, %v969_v22, 0.0  ;;  %v1571_v18 = vmul.f32 %v8558_v9, %v14201_v34  ;;  %v1594_v1 = vsel %vm616_vm0, %v1563_v37, 0.0  ;;  %v14205_v37 = vld [vmem:[#allocation24_spill] sm:$0xff] }
 0x27d   :  { %v1648_v58 = vsel %vm616_vm0, %v1000_v14, 0.0  ;;  %v1656_v10 = vsel %vm1653_vm1, %v1647_v53, 0.0  ;;  %v1625_v25 = vsel %vm616_vm0, %v1564_v50, 0.0  ;;  %v8647_v55 = vpack.i.bf16 %v1322_v38, %v1291_v12  ;;  %v1545_v50 = vpop.permute.xlu0 %1544 }
 0x27e   :  { %v1517_v42 = vpop.permute.xlu1 %1516  ;;  %7412 = vrot.lane.b32.xlu1 %v7411_v45, %s7479_s3  ;;  %v1657_v51 = vsel %vm1653_vm1, %v1648_v58, 0.0  ;;  %v1595_v29 = vadd.f32 %v1594_v1, %v1593_v5  ;;  %v1626_v13 = vadd.f32 %v1625_v25, %v1624_v30  ;;  %v1649_v6 = vsel %vm616_vm0, %v1291_v12, 0.0  ;;  %v14207_v5 = vld [vmem:[#allocation32_spill] sm:$0xff] }
 0x27f   :  { %v1565_v36 = vmul.f32 %v1517_v42, %v8415_v44  ;;  %v7281_v7 = vpack.c.bf16 %v1657_v51, %v1656_v10  ;;  %v1566_v56 = vmul.f32 %v1517_v42, %v8420_v33  ;;  %7417 = vrot.lane.b32.xlu0 %v8647_v55, %s7479_s3  ;;  %v1650_v19 = vsel %vm616_vm0, %v1322_v38, 0.0 }
 0x280   :  { %v1658_v33 = vsel %vm1653_vm1, %v1649_v6, 0.0  ;;  %v1659_v35 = vsel %vm1653_vm1, %v1650_v19, 0.0  ;;  %v1598_v2 = vsel %vm616_vm0, %v1567_v0, 0.0  ;;  %v1629_v17 = vsel %vm616_vm0, %v1568_v24, 0.0  ;;  %v14204_v0 = vld [vmem:[#allocation29_spill] sm:$0xff] }
 0x281   :  { %v1596_v20 = vsel %vm616_vm0, %v1565_v36, 0.0  ;;  %7283 = vmatpush1.bf16.msk.msra.mxu0 %vm8602_vm3, %v7281_v7  ;;  %7357 = vmatpush1.bf16.msk.msra.mxu1 %vm8602_vm3, %v7281_v7  ;;  %v1627_v57 = vsel %vm616_vm0, %v1566_v56, 0.0  ;;  %v7285_v43 = vpack.c.bf16 %v1659_v35, %v1658_v33  ;;  %v1572_v21 = vmul.f32 %v8558_v9, %v14202_v52  ;;  %v1852_v35 = vld [vmem:[%s14024_s1 + $0x1a8] sm:$0xff] }
 0x282   :  { %v1597_v44 = vadd.f32 %v1596_v20, %v1595_v29  ;;  %7427 = vrot.lane.b32.xlu1 %v7411_v45, %s7480_s0  ;;  %v1628_v28 = vadd.f32 %v1627_v57, %v1626_v13  ;;  %7284 = vmatprep.subr.bf16.mxu0 %v14196_v40  ;;  %v1600_v14 = vsel %vm616_vm0, %v1569_v3, 0.0  ;;  %v1573_v4 = vmul.f32 %v8607_v32, %v14203_v49  ;;  %v14208_v3 = vld [vmem:[#allocation33_spill] sm:$0xff] }
 0x283   :  { %7342 = vmatprep.subr.bf16.mxu1 %v14196_v40  ;;  %7422 = vrot.lane.b32.xlu0 %v8588_v27, %s7480_s0  ;;  %v1631_v26 = vsel %vm616_vm0, %v1570_v59, 0.0  ;;  %v1574_v61 = vmul.f32 %v8607_v32, %v14204_v0  ;;  %v1602_v9 = vsel %vm616_vm0, %v1571_v18, 0.0  ;;  %v1575_v48 = vmul.f32 %v8578_v39, %v14205_v37 }
 0x284   :  { %v1599_v22 = vadd.f32 %v1598_v2, %v1597_v44  ;;  %v1630_v60 = vadd.f32 %v1629_v17, %v1628_v28  ;;  %v1633_v32 = vsel %vm616_vm0, %v1572_v21, 0.0  ;;  %v1576_v31 = vmul.f32 %v8578_v39, %v14206_v23  ;;  %v1549_v39 = vpop.permute.xlu1 %1548  ;;  %2095 = vmatprep.mubr.f32.mxu1 %v1852_v35 }
 0x285   :  { %7287 = vmatpush1.bf16.msk.msra.mxu0 %vm8602_vm3, %v7285_v43  ;;  %7358 = vmatpush1.bf16.msk.msra.mxu1 %vm8602_vm3, %v7285_v43  ;;  %v1604_v38 = vsel %vm616_vm0, %v1573_v4, 0.0  ;;  %v1577_v30 = vmul.f32 %v8626_v15, %v14207_v5  ;;  %v1635_v54 = vsel %vm616_vm0, %v1574_v61, 0.0  ;;  %v1578_v46 = vmul.f32 %v8626_v15, %v14208_v3 }
 0x286   :  { %v1601_v62 = vadd.f32 %v1600_v14, %v1599_v22  ;;  %v1632_v24 = vadd.f32 %v1631_v26, %v1630_v60  ;;  %7442 = vrot.lane.b32.xlu1 %v7411_v45, %s7481_s27  ;;  %7288 = vmatprep.subr.bf16.mxu0 %v14196_v40  ;;  %v1606_v45 = vsel %vm616_vm0, %v1575_v48, 0.0  ;;  %v1579_v53 = vmul.f32 %v1545_v50, %v8441_v8 }
 0x287   :  { %7343 = vmatprep.subr.bf16.mxu1 %v14196_v40  ;;  %7432 = vrot.lane.b32.xlu0 %v8647_v55, %s7480_s0  ;;  %v1637_v18 = vsel %vm616_vm0, %v1576_v31, 0.0  ;;  %v1580_v1 = vmul.f32 %v1545_v50, %v8446_v16  ;;  %v1608_v10 = vsel %vm616_vm0, %v1577_v30, 0.0  ;;  %v1581_v25 = vmul.f32 %v1549_v39, %v8501_v41 }
 0x288   :  { %v1603_v12 = vadd.f32 %v1602_v9, %v1601_v62  ;;  %v1634_v11 = vadd.f32 %v1633_v32, %v1632_v24  ;;  %v1639_v15 = vsel %vm616_vm0, %v1578_v46, 0.0  ;;  %v1582_v36 = vmul.f32 %v1549_v39, %v8506_v47 }
 0x289   :  { %v1610_v8 = vsel %vm616_vm0, %v1579_v53, 0.0  ;;  %v1641_v13 = vsel %vm616_vm0, %v1580_v1, 0.0  ;;  %v1612_v56 = vsel %vm616_vm0, %v1581_v25, 0.0 }
 0x28a   :  { %v1605_v59 = vadd.f32 %v1604_v38, %v1603_v12  ;;  %v1636_v34 = vadd.f32 %v1635_v54, %v1634_v11 }
 0x28b   :  { %7437 = vrot.lane.b32.xlu0 %v8588_v27, %s7481_s27  ;;  %v1643_v27 = vsel %vm616_vm0, %v1582_v36, 0.0 }
 0x28c   :  { %v1607_v58 = vadd.f32 %v1606_v45, %v1605_v59  ;;  %v1638_v42 = vadd.f32 %v1637_v18, %v1636_v34 }
 0x28e   :  { %v1609_v51 = vadd.f32 %v1608_v10, %v1607_v58  ;;  %v1640_v29 = vadd.f32 %v1639_v15, %v1638_v42 }
 0x28f   :  { %7447 = vrot.lane.b32.xlu0 %v8647_v55, %s7481_s27  ;;  %v1800_v55 = vld [vmem:[%s14024_s1 + $0x8] sm:$0xff] }
 0x290   :  { %v1611_v16 = vadd.f32 %v1610_v8, %v1609_v51  ;;  %v1642_v7 = vadd.f32 %v1641_v13, %v1640_v29  ;;  %1965 = vmatprep.mubr.f32.mxu0 %v1800_v55  ;;  %v1878_v55 = vld [vmem:[%s14024_s1 + $0x278] sm:$0xff] }
 0x292   :  { %v1613_v41 = vadd.f32 %v1612_v56, %v1611_v16  ;;  %v1644_v20 = vadd.f32 %v1643_v27, %v1642_v7 }
 0x294   :  { %v1651_v6 = vsel %vm616_vm0, %v1613_v41, 0.0  ;;  %v7451_v19 = vpack.i.bf16 %v1644_v20, %v1613_v41  ;;  %v1652_v47 = vsel %vm616_vm0, %v1644_v20, 0.0 }
 0x295   :  { %v1660_v44 = vsel %vm1653_vm1, %v1651_v6, 0.0  ;;  %v1661_v57 = vsel %vm1653_vm1, %v1652_v47, 0.0 }
 0x296   :  { %7452 = vrot.lane.b32.xlu1 %v7451_v19, %s7479_s3  ;;  %v7289_v33 = vpack.c.bf16 %v1661_v57, %v1660_v44 }
 0x298   :  { %7291 = vmatpush1.bf16.msk.msra.mxu0 %vm8602_vm3, %v7289_v33  ;;  %7359 = vmatpush1.bf16.msk.msra.mxu1 %vm8602_vm3, %v7289_v33 }
 0x299   :  { %7292 = vmatprep.subr.bf16.mxu0 %v14196_v40  ;;  %7344 = vmatprep.subr.bf16.mxu1 %v14196_v40 }
 0x29a   :  { %7457 = vrot.lane.b32.xlu1 %v7451_v19, %s7480_s0 }
 0x29e   :  { %7462 = vrot.lane.b32.xlu1 %v7451_v19, %s7481_s27 }
 0x2e5   :  { %v7408_v2 = vpop.permute.xlu0 %7407 }
 0x2e6   :  { %v7410_v28 = vunpack.i.h.bf16 %v7408_v2  ;;  %v7409_v43 = vunpack.i.l.bf16 %v7408_v2 }
 0x2e8   :  { %v1704_v17 = vsel %vm616_vm0, 0.0, %v7410_v28  ;;  %v1703_v52 = vsel %vm616_vm0, 0.0, %v7409_v43 }
 0x2e9   :  { %v1712_v21 = vsel %vm1653_vm1, %v1704_v17, 0.0  ;;  %v1711_v22 = vsel %vm1653_vm1, %v1703_v52, 0.0 }
 0x2ea   :  { %v7293_v14 = vpack.c.bf16 %v1712_v21, %v1711_v22 }
 0x2ec   :  { %7295 = vmatpush1.bf16.msk.msra.mxu0 %vm8602_vm3, %v7293_v14  ;;  %7360 = vmatpush1.bf16.msk.msra.mxu1 %vm8602_vm3, %v7293_v14 }
 0x2ed   :  { %7296 = vmatprep.subr.bf16.mxu0 %v14196_v40  ;;  %7345 = vmatprep.subr.bf16.mxu1 %v14196_v40 }
 0x2f0   :  { %v7413_v49 = vpop.permute.xlu1 %7412 }
 0x2f1   :  { %v7415_v4 = vunpack.i.h.bf16 %v7413_v49  ;;  %v7414_v60 = vunpack.i.l.bf16 %v7413_v49  ;;  %v7418_v26 = vpop.permute.xlu0 %7417 }
 0x2f2   :  { %v7420_v62 = vunpack.i.h.bf16 %v7418_v26  ;;  %v7419_v9 = vunpack.i.l.bf16 %v7418_v26  ;;  %v1851_v26 = vld [vmem:[%s14024_s1 + $0x1a0] sm:$0xff] }
 0x2f3   :  { %v1706_v0 = vsel %vm616_vm0, 0.0, %v7415_v4  ;;  %v1705_v61 = vsel %vm616_vm0, 0.0, %v7414_v60  ;;  %v1799_v60 = vld [vmem:[%s14024_s1] sm:$0xff] }
 0x2f4   :  { %v1714_v37 = vsel %vm1653_vm1, %v1706_v0, 0.0  ;;  %v1713_v48 = vsel %vm1653_vm1, %v1705_v61, 0.0  ;;  %v1708_v32 = vsel %vm616_vm0, 0.0, %v7420_v62  ;;  %v1707_v31 = vsel %vm616_vm0, 0.0, %v7419_v9  ;;  %v7428_v38 = vpop.permute.xlu1 %7427  ;;  %v1802_v0 = vld [vmem:[%s14024_s1 + $0x18] sm:$0xff]  ;;  %v1801_v61 = vld [vmem:[%s14024_s1 + $0x10] sm:$0xff] }
 0x2f5   :  { %v7297_v24 = vpack.c.bf16 %v1714_v37, %v1713_v48  ;;  %v1716_v23 = vsel %vm1653_vm1, %v1708_v32, 0.0  ;;  %v1715_v50 = vsel %vm1653_vm1, %v1707_v31, 0.0  ;;  %v7423_v30 = vpop.permute.xlu0 %7422  ;;  %v7430_v1 = vunpack.i.h.bf16 %v7428_v38  ;;  %v1853_v62 = vld [vmem:[%s14024_s1 + $0x1b0] sm:$0xff]  ;;  %v1804_v9 = vld [vmem:[%s14024_s1 + $0x28] sm:$0xff]  ;;  %v1803_v48 = vld [vmem:[%s14024_s1 + $0x20] sm:$0xff] }
 0x2f6   :  { %v7301_v12 = vpack.c.bf16 %v1716_v23, %v1715_v50  ;;  %v7425_v46 = vunpack.i.h.bf16 %v7423_v30  ;;  %v7424_v59 = vunpack.i.l.bf16 %v7423_v30  ;;  %v7429_v58 = vunpack.i.l.bf16 %v7428_v38  ;;  %v1856_v37 = vld [vmem:[%s14024_s1 + $0x1c8] sm:$0xff]  ;;  %v1806_v32 = vld [vmem:[%s14024_s1 + $0x38] sm:$0xff]  ;;  %v1805_v31 = vld [vmem:[%s14024_s1 + $0x30] sm:$0xff] }
 0x2f7   :  { %7299 = vmatpush1.bf16.msk.msra.mxu0 %vm8602_vm3, %v7297_v24  ;;  %7361 = vmatpush1.bf16.msk.msra.mxu1 %vm8602_vm3, %v7297_v24  ;;  %v1754_v51 = vsel %vm1653_vm1, 0.0, %v7430_v1  ;;  %v1855_v24 = vld [vmem:[%s14024_s1 + $0x1c0] sm:$0xff]  ;;  %v1858_v23 = vld [vmem:[%s14024_s1 + $0x1d8] sm:$0xff]  ;;  %v1857_v50 = vld [vmem:[%s14024_s1 + $0x1d0] sm:$0xff] }
 0x2f8   :  { %7300 = vmatprep.subr.bf16.mxu0 %v14196_v40  ;;  %7346 = vmatprep.subr.bf16.mxu1 %v14196_v40  ;;  %v8764_v5 = vpop.permute.xlu1 %7442  ;;  %v1752_v10 = vsel %vm1653_vm1, 0.0, %v7425_v46  ;;  %v1751_v42 = vsel %vm1653_vm1, 0.0, %v7424_v59  ;;  %v1753_v36 = vsel %vm1653_vm1, 0.0, %v7429_v58  ;;  %v1860_v38 = vld [vmem:[%s14024_s1 + $0x1e8] sm:$0xff]  ;;  %v1859_v30 = vld [vmem:[%s14024_s1 + $0x1e0] sm:$0xff]  ;;  %v1861_v46 = vld [vmem:[%s14024_s1 + $0x1f0] sm:$0xff] }
 0x2f9   :  { %v7433_v25 = vpop.permute.xlu0 %7432  ;;  %v7309_v15 = vpack.c.bf16 %v1752_v10, %v1751_v42  ;;  %v7313_v16 = vpack.c.bf16 %v1754_v51, %v1753_v36  ;;  %v7445_v35 = vunpack.i.h.bf16 %v8764_v5  ;;  %v7444_v2 = vunpack.i.l.bf16 %v8764_v5  ;;  %v1807_v5 = vld [vmem:[%s14024_s1 + $0x40] sm:$0xff]  ;;  %v1812_v59 = vld [vmem:[%s14024_s1 + $0x68] sm:$0xff]  ;;  %v1813_v1 = vld [vmem:[%s14024_s1 + $0x70] sm:$0xff] }
 0x2fa   :  { %v7435_v8 = vunpack.i.h.bf16 %v7433_v25  ;;  %v7434_v29 = vunpack.i.l.bf16 %v7433_v25  ;;  %v1865_v58 = vld [vmem:[%s14024_s1 + $0x210] sm:$0xff]  ;;  %v1816_v10 = vld [vmem:[%s14024_s1 + $0x88] sm:$0xff]  ;;  %v1815_v25 = vld [vmem:[%s14024_s1 + $0x80] sm:$0xff] }
 0x2fb   :  { %7303 = vmatpush1.bf16.msk.msra.mxu0 %vm8602_vm3, %v7301_v12  ;;  %7362 = vmatpush1.bf16.msk.msra.mxu1 %vm8602_vm3, %v7301_v12  ;;  %v7329_v63 = vpack.c.bf16 %v7445_v35, %v7444_v2  ;;  %v1808_v12 = vld [vmem:[%s14024_s1 + $0x48] sm:$0xff]  ;;  %v1818_v51 = vld [vmem:[%s14024_s1 + $0x98] sm:$0xff]  ;;  %v1825_v35 = vld [vmem:[%s14024_s1 + $0xd0] sm:$0xff] }
 0x2fc   :  { %7304 = vmatprep.subr.bf16.mxu0 %v14196_v40  ;;  %7347 = vmatprep.subr.bf16.mxu1 %v14196_v40  ;;  %v1756_v7 = vsel %vm1653_vm1, 0.0, %v7435_v8  ;;  %v1755_v56 = vsel %vm1653_vm1, 0.0, %v7434_v29  ;;  %v1868_v42 = vld [vmem:[%s14024_s1 + $0x228] sm:$0xff]  ;;  %v1870_v36 = vld [vmem:[%s14024_s1 + $0x238] sm:$0xff]  ;;  %v1817_v8 = vld [vmem:[%s14024_s1 + $0x90] sm:$0xff] }
 0x2fd   :  { %v7317_v20 = vpack.c.bf16 %v1756_v7, %v1755_v56  ;;  %v7438_v6 = vpop.permute.xlu0 %7437  ;;  %v1869_v29 = vld [vmem:[%s14024_s1 + $0x230] sm:$0xff]  ;;  %v1819_v7 = vld [vmem:[%s14024_s1 + $0xa0] sm:$0xff] }
 0x2fe   :  { %v7440_v44 = vunpack.i.h.bf16 %v7438_v6  ;;  %v7439_v57 = vunpack.i.l.bf16 %v7438_v6  ;;  %v1871_v56 = vld [vmem:[%s14024_s1 + $0x240] sm:$0xff]  ;;  %v1873_v6 = vld [vmem:[%s14024_s1 + $0x250] sm:$0xff] }
 0x2ff   :  { %v1877_v2 = vld [vmem:[%s14024_s1 + $0x270] sm:$0xff] }
 0x300   :  { %v7325_v28 = vpack.c.bf16 %v7440_v44, %v7439_v57  ;;  %v1823_v44 = vld [vmem:[%s14024_s1 + $0xc0] sm:$0xff] }
 0x301   :  { %v7448_v43 = vpop.permute.xlu0 %7447  ;;  %v1875_v57 = vld [vmem:[%s14024_s1 + $0x260] sm:$0xff] }
 0x302   :  { %v7450_v17 = vunpack.i.h.bf16 %v7448_v43  ;;  %v7449_v52 = vunpack.i.l.bf16 %v7448_v43  ;;  %v1880_v43 = vld [vmem:[%s14024_s1 + $0x288] sm:$0xff] }
 0x304   :  { %v7333_v22 = vpack.c.bf16 %v7450_v17, %v7449_v52  ;;  %v1879_v17 = vld [vmem:[%s14024_s1 + $0x280] sm:$0xff]  ;;  %v1830_v52 = vld [vmem:[%s14024_s1 + $0xf8] sm:$0xff] }
 0x308   :  { %v7453_v11 = vpop.permute.xlu1 %7452 }
 0x309   :  { %v7455_v54 = vunpack.i.h.bf16 %v7453_v11  ;;  %v7454_v3 = vunpack.i.l.bf16 %v7453_v11  ;;  %v1810_v11 = vld [vmem:[%s14024_s1 + $0x58] sm:$0xff] }
 0x30b   :  { %v1710_v39 = vsel %vm616_vm0, 0.0, %v7455_v54  ;;  %v1709_v45 = vsel %vm616_vm0, 0.0, %v7454_v3  ;;  %v1862_v54 = vld [vmem:[%s14024_s1 + $0x1f8] sm:$0xff]  ;;  %v1809_v3 = vld [vmem:[%s14024_s1 + $0x50] sm:$0xff] }
 0x30c   :  { %v1718_v53 = vsel %vm1653_vm1, %v1710_v39, 0.0  ;;  %v1717_v34 = vsel %vm1653_vm1, %v1709_v45, 0.0  ;;  %v7458_v13 = vpop.permute.xlu1 %7457  ;;  %v1864_v39 = vld [vmem:[%s14024_s1 + $0x208] sm:$0xff]  ;;  %v1811_v45 = vld [vmem:[%s14024_s1 + $0x60] sm:$0xff] }
 0x30d   :  { %v7305_v18 = vpack.c.bf16 %v1718_v53, %v1717_v34  ;;  %v7460_v41 = vunpack.i.h.bf16 %v7458_v13  ;;  %v7459_v27 = vunpack.i.l.bf16 %v7458_v13  ;;  %v1863_v53 = vld [vmem:[%s14024_s1 + $0x200] sm:$0xff]  ;;  %v1814_v34 = vld [vmem:[%s14024_s1 + $0x78] sm:$0xff]  ;;  %v1820_v13 = vld [vmem:[%s14024_s1 + $0xa8] sm:$0xff] }
 0x30f   :  { %7307 = vmatpush1.bf16.msk.msra.mxu0 %vm8602_vm3, %v7305_v18  ;;  %7363 = vmatpush1.bf16.msk.msra.mxu1 %vm8602_vm3, %v7305_v18  ;;  %v1758_v19 = vsel %vm1653_vm1, 0.0, %v7460_v41  ;;  %v1757_v47 = vsel %vm1653_vm1, 0.0, %v7459_v27  ;;  %v1866_v18 = vld [vmem:[%s14024_s1 + $0x218] sm:$0xff] }
 0x310   :  { %7308 = vmatprep.subr.bf16.mxu0 %v14196_v40  ;;  %7348 = vmatprep.subr.bf16.mxu1 %v14196_v40  ;;  %v7321_v33 = vpack.c.bf16 %v1758_v19, %v1757_v47  ;;  %v7463_v21 = vpop.permute.xlu1 %7462  ;;  %v1822_v41 = vld [vmem:[%s14024_s1 + $0xb8] sm:$0xff]  ;;  %v1824_v19 = vld [vmem:[%s14024_s1 + $0xc8] sm:$0xff] }
 0x311   :  { %v7465_v14 = vunpack.i.h.bf16 %v7463_v21  ;;  %v7464_v49 = vunpack.i.l.bf16 %v7463_v21  ;;  %v1874_v27 = vld [vmem:[%s14024_s1 + $0x258] sm:$0xff]  ;;  %v1876_v47 = vld [vmem:[%s14024_s1 + $0x268] sm:$0xff] }
 0x312   :  { %v1882_v21 = vld [vmem:[%s14024_s1 + $0x298] sm:$0xff] }
 0x313   :  { %7311 = vmatpush1.bf16.msk.msra.mxu0 %vm8602_vm3, %v7309_v15  ;;  %7364 = vmatpush1.bf16.msk.msra.mxu1 %vm8602_vm3, %v7309_v15  ;;  %v7337_v4 = vpack.c.bf16 %v7465_v14, %v7464_v49  ;;  %v1867_v15 = vld [vmem:[%s14024_s1 + $0x220] sm:$0xff]  ;;  %v1881_v14 = vld [vmem:[%s14024_s1 + $0x290] sm:$0xff]  ;;  %v1832_v49 = vld [vmem:[%s14024_s1 + $0x108] sm:$0xff] }
 0x314   :  { %7312 = vmatprep.subr.bf16.mxu0 %v14196_v40  ;;  %7349 = vmatprep.subr.bf16.mxu1 %v14196_v40 }
 0x317   :  { %7315 = vmatpush1.bf16.msk.msra.mxu0 %vm8602_vm3, %v7313_v16  ;;  %7365 = vmatpush1.bf16.msk.msra.mxu1 %vm8602_vm3, %v7313_v16  ;;  %v1872_v16 = vld [vmem:[%s14024_s1 + $0x248] sm:$0xff] }
 0x318   :  { %7316 = vmatprep.subr.bf16.mxu0 %v14196_v40  ;;  %7350 = vmatprep.subr.bf16.mxu1 %v14196_v40 }
 0x31b   :  { %7319 = vmatpush1.bf16.msk.msra.mxu0 %vm8602_vm3, %v7317_v20  ;;  %7366 = vmatpush1.bf16.msk.msra.mxu1 %vm8602_vm3, %v7317_v20  ;;  %v1821_v20 = vld [vmem:[%s14024_s1 + $0xb0] sm:$0xff] }
 0x31c   :  { %7320 = vmatprep.subr.bf16.mxu0 %v14196_v40  ;;  %7351 = vmatprep.subr.bf16.mxu1 %v14196_v40 }
 0x31f   :  { %7323 = vmatpush1.bf16.msk.msra.mxu0 %vm8602_vm3, %v7321_v33  ;;  %7367 = vmatpush1.bf16.msk.msra.mxu1 %vm8602_vm3, %v7321_v33  ;;  %v1826_v33 = vld [vmem:[%s14024_s1 + $0xd8] sm:$0xff]  ;;  %vm6496_vm3 = vcmask 111616  }
 0x320   :  { %7324 = vmatprep.subr.bf16.mxu0 %v14196_v40  ;;  %7352 = vmatprep.subr.bf16.mxu1 %v14196_v40 }
 0x323   :  { %7327 = vmatpush1.bf16.msk.msra.mxu0 %vm8809_vm5, %v7325_v28  ;;  %7368 = vmatpush1.bf16.msk.msra.mxu1 %vm8809_vm5, %v7325_v28  ;;  %v1828_v28 = vld [vmem:[%s14024_s1 + $0xe8] sm:$0xff] }
 0x324   :  { %7328 = vmatprep.subr.bf16.mxu0 %v14196_v40  ;;  %7353 = vmatprep.subr.bf16.mxu1 %v14196_v40 }
 0x327   :  { %7331 = vmatpush1.bf16.msk.msra.mxu0 %vm8809_vm5, %v7329_v63  ;;  %7369 = vmatpush1.bf16.msk.msra.mxu1 %vm8809_vm5, %v7329_v63  ;;  %v1827_v63 = vld [vmem:[%s14024_s1 + $0xe0] sm:$0xff] }
 0x328   :  { %7332 = vmatprep.subr.bf16.mxu0 %v14196_v40  ;;  %7354 = vmatprep.subr.bf16.mxu1 %v14196_v40 }
 0x32b   :  { %7335 = vmatpush1.bf16.msk.msra.mxu0 %vm8809_vm5, %v7333_v22  ;;  %7370 = vmatpush1.bf16.msk.msra.mxu1 %vm8809_vm5, %v7333_v22  ;;  %v1829_v22 = vld [vmem:[%s14024_s1 + $0xf0] sm:$0xff] }
 0x32c   :  { %7336 = vmatprep.subr.bf16.mxu0 %v14196_v40  ;;  %7355 = vmatprep.subr.bf16.mxu1 %v14196_v40  ;;  %v1854_v40 = vld [vmem:[%s14024_s1 + $0x1b8] sm:$0xff] }
 0x32f   :  { %7339 = vmatpush1.bf16.msk.msra.mxu0 %vm8809_vm5, %v7337_v4  ;;  %7371 = vmatpush1.bf16.msk.msra.mxu1 %vm8809_vm5, %v7337_v4  ;;  %v1884_v4 = vld [vmem:[%s14024_s1 + $0x2a8] sm:$0xff] }
 0x332   :  { %1966 = vmatmul.mubr.f32.vlgmr.msra.gmra.mrb[0].mxu0 %v1799_v60  ;;  %2096 = vmatmul.mubr.f32.vlgmr.msra.gmra.mrb[0].mxu1 %v1851_v26  ;;  %v1831_v60 = vld [vmem:[%s14024_s1 + $0x100] sm:$0xff] }
 0x333   :  { %1970 = vmatprep.mubr.f32.mxu0 %v1802_v0  ;;  %2100 = vmatprep.mubr.f32.mxu1 %v1854_v40  ;;  %v1883_v26 = vld [vmem:[%s14024_s1 + $0x2a0] sm:$0xff]  ;;  %v1834_v0 = vld [vmem:[%s14024_s1 + $0x118] sm:$0xff] }
 0x334   :  { %v1886_v40 = vld [vmem:[%s14024_s1 + $0x2b8] sm:$0xff] }
 0x336   :  { %1971 = vmatmul.mubr.f32.gmra.mrb[2].mxu0 %v1801_v61  ;;  %2101 = vmatmul.mubr.f32.gmra.mrb[2].mxu1 %v1853_v62  ;;  %v1833_v61 = vld [vmem:[%s14024_s1 + $0x110] sm:$0xff] }
 0x337   :  { %1975 = vmatprep.mubr.f32.mxu0 %v1804_v9  ;;  %2105 = vmatprep.mubr.f32.mxu1 %v1856_v37  ;;  %v1885_v62 = vld [vmem:[%s14024_s1 + $0x2b0] sm:$0xff]  ;;  %v1836_v9 = vld [vmem:[%s14024_s1 + $0x128] sm:$0xff] }
 0x338   :  { %v1888_v37 = vld [vmem:[%s14024_s1 + $0x2c8] sm:$0xff] }
 0x33a   :  { %1976 = vmatmul.mubr.f32.gmra.mrb[4].mxu0 %v1803_v48  ;;  %2106 = vmatmul.mubr.f32.gmra.mrb[4].mxu1 %v1855_v24  ;;  %v1835_v48 = vld [vmem:[%s14024_s1 + $0x120] sm:$0xff] }
 0x33b   :  { %1980 = vmatprep.mubr.f32.mxu0 %v1806_v32  ;;  %2110 = vmatprep.mubr.f32.mxu1 %v1858_v23  ;;  %v1887_v24 = vld [vmem:[%s14024_s1 + $0x2c0] sm:$0xff]  ;;  %v1838_v32 = vld [vmem:[%s14024_s1 + $0x138] sm:$0xff] }
 0x33c   :  { %v1890_v23 = vld [vmem:[%s14024_s1 + $0x2d8] sm:$0xff] }
 0x33e   :  { %1981 = vmatmul.mubr.f32.gmra.mrb[6].mxu0 %v1805_v31  ;;  %2111 = vmatmul.mubr.f32.gmra.mrb[6].mxu1 %v1857_v50  ;;  %v1837_v31 = vld [vmem:[%s14024_s1 + $0x130] sm:$0xff] }
 0x33f   :  { %1985 = vmatprep.mubr.f32.mxu0 %v1808_v12  ;;  %2115 = vmatprep.mubr.f32.mxu1 %v1860_v38  ;;  %v1889_v50 = vld [vmem:[%s14024_s1 + $0x2d0] sm:$0xff]  ;;  %v1840_v12 = vld [vmem:[%s14024_s1 + $0x148] sm:$0xff] }
 0x340   :  { %v1892_v38 = vld [vmem:[%s14024_s1 + $0x2e8] sm:$0xff] }
 0x342   :  { %1986 = vmatmul.mubr.f32.gmra.mrb[8].mxu0 %v1807_v5  ;;  %2116 = vmatmul.mubr.f32.gmra.mrb[8].mxu1 %v1859_v30  ;;  %v1839_v5 = vld [vmem:[%s14024_s1 + $0x140] sm:$0xff] }
 0x343   :  { %1990 = vmatprep.mubr.f32.mxu0 %v1810_v11  ;;  %2120 = vmatprep.mubr.f32.mxu1 %v1862_v54  ;;  %v1891_v30 = vld [vmem:[%s14024_s1 + $0x2e0] sm:$0xff]  ;;  %v1842_v11 = vld [vmem:[%s14024_s1 + $0x158] sm:$0xff] }
 0x344   :  { %v1894_v54 = vld [vmem:[%s14024_s1 + $0x2f8] sm:$0xff] }
 0x346   :  { %1991 = vmatmul.mubr.f32.gmra.mrb[10].mxu0 %v1809_v3  ;;  %2121 = vmatmul.mubr.f32.gmra.mrb[10].mxu1 %v1861_v46  ;;  %v1841_v3 = vld [vmem:[%s14024_s1 + $0x150] sm:$0xff] }
 0x347   :  { %1995 = vmatprep.mubr.f32.mxu0 %v1812_v59  ;;  %2125 = vmatprep.mubr.f32.mxu1 %v1864_v39  ;;  %v1893_v46 = vld [vmem:[%s14024_s1 + $0x2f0] sm:$0xff]  ;;  %v1844_v59 = vld [vmem:[%s14024_s1 + $0x168] sm:$0xff] }
 0x348   :  { %v1896_v39 = vld [vmem:[%s14024_s1 + $0x308] sm:$0xff] }
 0x34a   :  { %1996 = vmatmul.mubr.f32.gmra.mrb[12].mxu0 %v1811_v45  ;;  %2126 = vmatmul.mubr.f32.gmra.mrb[12].mxu1 %v1863_v53  ;;  %v1843_v45 = vld [vmem:[%s14024_s1 + $0x160] sm:$0xff] }
 0x34b   :  { %2000 = vmatprep.mubr.f32.mxu0 %v1814_v34  ;;  %2130 = vmatprep.mubr.f32.mxu1 %v1866_v18  ;;  %v1895_v53 = vld [vmem:[%s14024_s1 + $0x300] sm:$0xff]  ;;  %v1846_v34 = vld [vmem:[%s14024_s1 + $0x178] sm:$0xff] }
 0x34c   :  { %v1898_v18 = vld [vmem:[%s14024_s1 + $0x318] sm:$0xff] }
 0x34e   :  { %2001 = vmatmul.mubr.f32.gmra.mrb[14].mxu0 %v1813_v1  ;;  %2131 = vmatmul.mubr.f32.gmra.mrb[14].mxu1 %v1865_v58  ;;  %v1845_v1 = vld [vmem:[%s14024_s1 + $0x170] sm:$0xff] }
 0x34f   :  { %2005 = vmatprep.mubr.f32.mxu0 %v1816_v10  ;;  %2135 = vmatprep.mubr.f32.mxu1 %v1868_v42  ;;  %v1897_v58 = vld [vmem:[%s14024_s1 + $0x310] sm:$0xff]  ;;  %v1848_v10 = vld [vmem:[%s14024_s1 + $0x188] sm:$0xff] }
 0x350   :  { %v1900_v42 = vld [vmem:[%s14024_s1 + $0x328] sm:$0xff] }
 0x352   :  { %2006 = vmatmul.mubr.f32.gmra.mrb[16].mxu0 %v1815_v25  ;;  %2136 = vmatmul.mubr.f32.gmra.mrb[16].mxu1 %v1867_v15  ;;  %v1847_v25 = vld [vmem:[%s14024_s1 + $0x180] sm:$0xff] }
 0x353   :  { %2010 = vmatprep.mubr.f32.mxu0 %v1818_v51  ;;  %2140 = vmatprep.mubr.f32.mxu1 %v1870_v36  ;;  %v1899_v15 = vld [vmem:[%s14024_s1 + $0x320] sm:$0xff]  ;;  %v1850_v51 = vld [vmem:[%s14024_s1 + $0x198] sm:$0xff]  ;;  %v1849_v36 = vld [vmem:[%s14024_s1 + $0x190] sm:$0xff] }
 0x356   :  { %2011 = vmatmul.mubr.f32.gmra.mrb[18].mxu0 %v1817_v8  ;;  %2141 = vmatmul.mubr.f32.gmra.mrb[18].mxu1 %v1869_v29 }
 0x357   :  { %2015 = vmatprep.mubr.f32.mxu0 %v1820_v13  ;;  %2145 = vmatprep.mubr.f32.mxu1 %v1872_v16 }
 0x35a   :  { %2016 = vmatmul.mubr.f32.gmra.mrb[20].mxu0 %v1819_v7  ;;  %2146 = vmatmul.mubr.f32.gmra.mrb[20].mxu1 %v1871_v56 }
 0x35b   :  { %2020 = vmatprep.mubr.f32.mxu0 %v1822_v41  ;;  %2150 = vmatprep.mubr.f32.mxu1 %v1874_v27 }
 0x35e   :  { %2021 = vmatmul.mubr.f32.gmra.mrb[22].mxu0 %v1821_v20  ;;  %2151 = vmatmul.mubr.f32.gmra.mrb[22].mxu1 %v1873_v6 }
 0x35f   :  { %2025 = vmatprep.mubr.f32.mxu0 %v1824_v19  ;;  %2155 = vmatprep.mubr.f32.mxu1 %v1876_v47 }
 0x362   :  { %2026 = vmatmul.mubr.f32.gmra.mrb[24].mxu0 %v1823_v44  ;;  %2156 = vmatmul.mubr.f32.gmra.mrb[24].mxu1 %v1875_v57 }
 0x363   :  { %2030 = vmatprep.mubr.f32.mxu0 %v1826_v33  ;;  %2160 = vmatprep.mubr.f32.mxu1 %v1878_v55 }
 0x366   :  { %2031 = vmatmul.mubr.f32.gmra.mrb[26].mxu0 %v1825_v35  ;;  %2161 = vmatmul.mubr.f32.gmra.mrb[26].mxu1 %v1877_v2 }
 0x367   :  { %2035 = vmatprep.mubr.f32.mxu0 %v1828_v28  ;;  %2165 = vmatprep.mubr.f32.mxu1 %v1880_v43 }
 0x36a   :  { %2036 = vmatmul.mubr.f32.gmra.mrb[28].mxu0 %v1827_v63  ;;  %2166 = vmatmul.mubr.f32.gmra.mrb[28].mxu1 %v1879_v17 }
 0x36b   :  { %2040 = vmatprep.mubr.f32.mxu0 %v1830_v52  ;;  %2170 = vmatprep.mubr.f32.mxu1 %v1882_v21 }
 0x36e   :  { %2041 = vmatmul.mubr.f32.gmra.mrb[30].mxu0 %v1829_v22  ;;  %2171 = vmatmul.mubr.f32.gmra.mrb[30].mxu1 %v1881_v14 }
 0x36f   :  { %2045 = vmatprep.mubr.f32.mxu0 %v1832_v49  ;;  %2175 = vmatprep.mubr.f32.mxu1 %v1884_v4 }
 0x372   :  { %2046 = vmatmul.mubr.f32.gmra.mrb[32].mxu0 %v1831_v60  ;;  %2176 = vmatmul.mubr.f32.gmra.mrb[32].mxu1 %v1883_v26 }
 0x373   :  { %2050 = vmatprep.mubr.f32.mxu0 %v1834_v0  ;;  %2180 = vmatprep.mubr.f32.mxu1 %v1886_v40 }
 0x376   :  { %2051 = vmatmul.mubr.f32.gmra.mrb[34].mxu0 %v1833_v61  ;;  %2181 = vmatmul.mubr.f32.gmra.mrb[34].mxu1 %v1885_v62 }
 0x377   :  { %2055 = vmatprep.mubr.f32.mxu0 %v1836_v9  ;;  %2185 = vmatprep.mubr.f32.mxu1 %v1888_v37 }
 0x37a   :  { %2056 = vmatmul.mubr.f32.gmra.mrb[36].mxu0 %v1835_v48  ;;  %2186 = vmatmul.mubr.f32.gmra.mrb[36].mxu1 %v1887_v24 }
 0x37b   :  { %2060 = vmatprep.mubr.f32.mxu0 %v1838_v32  ;;  %2190 = vmatprep.mubr.f32.mxu1 %v1890_v23 }
 0x37e   :  { %2061 = vmatmul.mubr.f32.gmra.mrb[38].mxu0 %v1837_v31  ;;  %2191 = vmatmul.mubr.f32.gmra.mrb[38].mxu1 %v1889_v50 }
 0x37f   :  { %2065 = vmatprep.mubr.f32.mxu0 %v1840_v12  ;;  %2195 = vmatprep.mubr.f32.mxu1 %v1892_v38 }
 0x382   :  { %2066 = vmatmul.mubr.f32.gmra.mrb[40].mxu0 %v1839_v5  ;;  %2196 = vmatmul.mubr.f32.gmra.mrb[40].mxu1 %v1891_v30 }
 0x383   :  { %2070 = vmatprep.mubr.f32.mxu0 %v1842_v11  ;;  %2200 = vmatprep.mubr.f32.mxu1 %v1894_v54 }
 0x386   :  { %2071 = vmatmul.mubr.f32.gmra.mrb[42].mxu0 %v1841_v3  ;;  %2201 = vmatmul.mubr.f32.gmra.mrb[42].mxu1 %v1893_v46 }
 0x387   :  { %2075 = vmatprep.mubr.f32.mxu0 %v1844_v59  ;;  %2205 = vmatprep.mubr.f32.mxu1 %v1896_v39 }
 0x38a   :  { %2076 = vmatmul.mubr.f32.gmra.mrb[44].mxu0 %v1843_v45  ;;  %2206 = vmatmul.mubr.f32.gmra.mrb[44].mxu1 %v1895_v53 }
 0x38b   :  { %2080 = vmatprep.mubr.f32.mxu0 %v1846_v34  ;;  %2210 = vmatprep.mubr.f32.mxu1 %v1898_v18 }
 0x38e   :  { %2081 = vmatmul.mubr.f32.gmra.mrb[46].mxu0 %v1845_v1  ;;  %2211 = vmatmul.mubr.f32.gmra.mrb[46].mxu1 %v1897_v58 }
 0x38f   :  { %2085 = vmatprep.mubr.f32.mxu0 %v1848_v10  ;;  %2215 = vmatprep.mubr.f32.mxu1 %v1900_v42 }
 0x392   :  { %2086 = vmatmul.mubr.f32.gmra.mrb[48].mxu0 %v1847_v25  ;;  %2216 = vmatmul.mubr.f32.gmra.mrb[48].mxu1 %v1899_v15 }
 0x393   :  { %2090 = vmatprep.mubr.f32.mxu0 %v1850_v51 }
 0x396   :  { %2091 = vmatmul.mubr.f32.gmra.mrb[50].mxu0 %v1849_v36 }
 0x405   :  { %v9137_v8 = vpop.f32.mrb[0].mxu0  ;;  %v9139_v29 = vpop.f32.mrb[0].mxu1 }
 0x406   :  { %14211 = vst [vmem:[#allocation26_spill] sm:$0xff] %v9139_v29  ;;  %v1969_v13 = vpop.f32.mrb[1].mxu0  ;;  %v2099_v16 = vpop.f32.mrb[1].mxu1  ;;  %v2277_v20 = vmul.f32 %v9137_v8, %v9137_v8 }
 0x409   :  { %v9141_v7 = vpop.f32.mrb[2].mxu0  ;;  %v9143_v56 = vpop.f32.mrb[2].mxu1 }
 0x40a   :  { %14212 = vst [vmem:[#allocation27_spill] sm:$0xff] %v9143_v56  ;;  %v1974_v41 = vpop.f32.mrb[3].mxu0  ;;  %v2221_v27 = vadd.f32 %v9141_v7, %v9137_v8  ;;  %v2278_v6 = vmul.f32 %v9141_v7, %v9141_v7  ;;  %v2104_v19 = vpop.f32.mrb[3].mxu1 }
 0x40c   :  { %v2328_v47 = vadd.f32 %v2278_v6, %v2277_v20 }
 0x40d   :  { %v9151_v44 = vpop.f32.mrb[4].mxu0  ;;  %v9153_v57 = vpop.f32.mrb[4].mxu1 }
 0x40e   :  { %14213 = vst [vmem:[#allocation12_spill] sm:$0xff] %v9153_v57  ;;  %v2222_v33 = vadd.f32 %v2221_v27, %v9151_v44  ;;  %v2279_v55 = vmul.f32 %v9151_v44, %v9151_v44  ;;  %v1979_v35 = vpop.f32.mrb[5].mxu0  ;;  %v2109_v2 = vpop.f32.mrb[5].mxu1 }
 0x410   :  { %v2329_v28 = vadd.f32 %v2328_v47, %v2279_v55 }
 0x411   :  { %v9158_v43 = vpop.f32.mrb[6].mxu0  ;;  %v9160_v63 = vpop.f32.mrb[6].mxu1 }
 0x412   :  { %14214 = vst [vmem:[#allocation13_spill] sm:$0xff] %v9160_v63  ;;  %v1984_v17 = vpop.f32.mrb[7].mxu0  ;;  %v2223_v52 = vadd.f32 %v2222_v33, %v9158_v43  ;;  %v2280_v21 = vmul.f32 %v9158_v43, %v9158_v43  ;;  %v2114_v22 = vpop.f32.mrb[7].mxu1 }
 0x414   :  { %v2330_v14 = vadd.f32 %v2329_v28, %v2280_v21 }
 0x415   :  { %v9165_v49 = vpop.f32.mrb[8].mxu0  ;;  %v9167_v4 = vpop.f32.mrb[8].mxu1 }
 0x416   :  { %14215 = vst [vmem:[#allocation20_spill] sm:$0xff] %v9167_v4  ;;  %v1989_v60 = vpop.f32.mrb[9].mxu0  ;;  %v2224_v26 = vadd.f32 %v2223_v52, %v9165_v49  ;;  %v2281_v0 = vmul.f32 %v9165_v49, %v9165_v49  ;;  %v2119_v40 = vpop.f32.mrb[9].mxu1 }
 0x418   :  { %v2331_v61 = vadd.f32 %v2330_v14, %v2281_v0 }
 0x419   :  { %v9172_v62 = vpop.f32.mrb[10].mxu0  ;;  %v9174_v9 = vpop.f32.mrb[10].mxu1 }
 0x41a   :  { %14216 = vst [vmem:[#allocation21_spill] sm:$0xff] %v9174_v9  ;;  %v2225_v37 = vadd.f32 %v2224_v26, %v9172_v62  ;;  %v2282_v48 = vmul.f32 %v9172_v62, %v9172_v62  ;;  %v1994_v24 = vpop.f32.mrb[11].mxu0  ;;  %v2124_v32 = vpop.f32.mrb[11].mxu1 }
 0x41c   :  { %v2332_v23 = vadd.f32 %v2331_v61, %v2282_v48 }
 0x41d   :  { %v9179_v31 = vpop.f32.mrb[12].mxu0  ;;  %v9181_v50 = vpop.f32.mrb[12].mxu1 }
 0x41e   :  { %14217 = vst [vmem:[#allocation9_spill] sm:$0xff] %v9181_v50  ;;  %v1999_v12 = vpop.f32.mrb[13].mxu0  ;;  %v2226_v38 = vadd.f32 %v2225_v37, %v9179_v31  ;;  %v2283_v5 = vmul.f32 %v9179_v31, %v9179_v31  ;;  %v2129_v30 = vpop.f32.mrb[13].mxu1 }
 0x420   :  { %v2333_v11 = vadd.f32 %v2332_v23, %v2283_v5 }
 0x421   :  { %v9186_v54 = vpop.f32.mrb[14].mxu0  ;;  %v9188_v3 = vpop.f32.mrb[14].mxu1 }
 0x422   :  { %14218 = vst [vmem:[#allocation16_spill] sm:$0xff] %v9188_v3  ;;  %v2004_v46 = vpop.f32.mrb[15].mxu0  ;;  %v2227_v59 = vadd.f32 %v2226_v38, %v9186_v54  ;;  %v2284_v39 = vmul.f32 %v9186_v54, %v9186_v54  ;;  %v2134_v45 = vpop.f32.mrb[15].mxu1 }
 0x424   :  { %v2334_v53 = vadd.f32 %v2333_v11, %v2284_v39 }
 0x425   :  { %v9193_v34 = vpop.f32.mrb[16].mxu0  ;;  %v9195_v18 = vpop.f32.mrb[16].mxu1 }
 0x426   :  { %14219 = vst [vmem:[#allocation17_spill] sm:$0xff] %v9195_v18  ;;  %v2228_v1 = vadd.f32 %v2227_v59, %v9193_v34  ;;  %v2285_v58 = vmul.f32 %v9193_v34, %v9193_v34  ;;  %v2009_v10 = vpop.f32.mrb[17].mxu0  ;;  %v2139_v42 = vpop.f32.mrb[17].mxu1 }
 0x428   :  { %v2335_v25 = vadd.f32 %v2334_v53, %v2285_v58 }
 0x429   :  { %v9200_v15 = vpop.f32.mrb[18].mxu0  ;;  %v9202_v51 = vpop.f32.mrb[18].mxu1 }
 0x42a   :  { %14220 = vst [vmem:[#allocation14_spill] sm:$0xff] %v9200_v15  ;;  %14221 = vst [vmem:[#allocation15_spill] sm:$0xff] %v9202_v51  ;;  %v2014_v36 = vpop.f32.mrb[19].mxu0  ;;  %v2229_v13 = vadd.f32 %v2228_v1, %v9200_v15  ;;  %v2286_v16 = vmul.f32 %v9200_v15, %v9200_v15  ;;  %v2144_v41 = vpop.f32.mrb[19].mxu1 }
 0x42c   :  { %v2336_v27 = vadd.f32 %v2335_v25, %v2286_v16 }
 0x42d   :  { %v9207_v20 = vpop.f32.mrb[20].mxu0  ;;  %v9209_v6 = vpop.f32.mrb[20].mxu1 }
 0x42e   :  { %14222 = vst [vmem:[#allocation30_spill] sm:$0xff] %v9207_v20  ;;  %14223 = vst [vmem:[#allocation31_spill] sm:$0xff] %v9209_v6  ;;  %v2019_v19 = vpop.f32.mrb[21].mxu0  ;;  %v2230_v47 = vadd.f32 %v2229_v13, %v9207_v20  ;;  %v2287_v33 = vmul.f32 %v9207_v20, %v9207_v20  ;;  %v2149_v55 = vpop.f32.mrb[21].mxu1 }
 0x430   :  { %v2337_v35 = vadd.f32 %v2336_v27, %v2287_v33 }
 0x431   :  { %v9214_v2 = vpop.f32.mrb[22].mxu0  ;;  %v9216_v28 = vpop.f32.mrb[22].mxu1 }
 0x432   :  { %14224 = vst [vmem:[#allocation36_spill] sm:$0xff] %v9214_v2  ;;  %14225 = vst [vmem:[#allocation37_spill] sm:$0xff] %v9216_v28  ;;  %v2231_v17 = vadd.f32 %v2230_v47, %v9214_v2  ;;  %v2288_v52 = vmul.f32 %v9214_v2, %v9214_v2  ;;  %v2024_v21 = vpop.f32.mrb[23].mxu0  ;;  %v2154_v22 = vpop.f32.mrb[23].mxu1 }
 0x434   :  { %v2338_v14 = vadd.f32 %v2337_v35, %v2288_v52 }
 0x435   :  { %v9221_v60 = vpop.f32.mrb[24].mxu0  ;;  %v9223_v26 = vpop.f32.mrb[24].mxu1 }
 0x436   :  { %14226 = vst [vmem:[#allocation38_spill] sm:$0xff] %v9221_v60  ;;  %14227 = vst [vmem:[#allocation22_spill] sm:$0xff] %v9223_v26  ;;  %v2029_v0 = vpop.f32.mrb[25].mxu0  ;;  %v2232_v40 = vadd.f32 %v2231_v17, %v9221_v60  ;;  %v2289_v61 = vmul.f32 %v9221_v60, %v9221_v60  ;;  %v2159_v37 = vpop.f32.mrb[25].mxu1 }
 0x438   :  { %v2339_v48 = vadd.f32 %v2338_v14, %v2289_v61 }
 0x439   :  { %v9228_v24 = vpop.f32.mrb[26].mxu0  ;;  %v9230_v32 = vpop.f32.mrb[26].mxu1 }
 0x43a   :  { %14228 = vst [vmem:[#allocation23_spill] sm:$0xff] %v9228_v24  ;;  %14229 = vst [vmem:[#allocation7_spill] sm:$0xff] %v9230_v32  ;;  %v2034_v23 = vpop.f32.mrb[27].mxu0  ;;  %v2233_v12 = vadd.f32 %v2232_v40, %v9228_v24  ;;  %v2290_v38 = vmul.f32 %v9228_v24, %v9228_v24  ;;  %v2164_v5 = vpop.f32.mrb[27].mxu1 }
 0x43c   :  { %v2340_v30 = vadd.f32 %v2339_v48, %v2290_v38 }
 0x43d   :  { %v9235_v11 = vpop.f32.mrb[28].mxu0  ;;  %v9237_v46 = vpop.f32.mrb[28].mxu1 }
 0x43e   :  { %14230 = vst [vmem:[#allocation34_spill] sm:$0xff] %v9235_v11  ;;  %14231 = vst [vmem:[#allocation8_spill] sm:$0xff] %v9237_v46  ;;  %v2234_v59 = vadd.f32 %v2233_v12, %v9235_v11  ;;  %v2291_v39 = vmul.f32 %v9235_v11, %v9235_v11  ;;  %v2039_v45 = vpop.f32.mrb[29].mxu0  ;;  %v2169_v53 = vpop.f32.mrb[29].mxu1 }
 0x440   :  { %v2341_v1 = vadd.f32 %v2340_v30, %v2291_v39 }
 0x441   :  { %v9242_v58 = vpop.f32.mrb[30].mxu0  ;;  %v9244_v10 = vpop.f32.mrb[30].mxu1 }
 0x442   :  { %14232 = vst [vmem:[#allocation10_spill] sm:$0xff] %v9242_v58  ;;  %14233 = vst [vmem:[#allocation35_spill] sm:$0xff] %v9244_v10  ;;  %v2044_v42 = vpop.f32.mrb[31].mxu0  ;;  %v2235_v25 = vadd.f32 %v2234_v59, %v9242_v58  ;;  %v2292_v36 = vmul.f32 %v9242_v58, %v9242_v58  ;;  %v2174_v13 = vpop.f32.mrb[31].mxu1 }
 0x444   :  { %v2342_v16 = vadd.f32 %v2341_v1, %v2292_v36 }
 0x445   :  { %v9249_v41 = vpop.f32.mrb[32].mxu0  ;;  %v9251_v27 = vpop.f32.mrb[32].mxu1 }
 0x446   :  { %14234 = vst [vmem:[#allocation11_spill] sm:$0xff] %v9249_v41  ;;  %14235 = vst [vmem:[#allocation18_spill] sm:$0xff] %v9251_v27  ;;  %v2049_v19 = vpop.f32.mrb[33].mxu0  ;;  %v2236_v47 = vadd.f32 %v2235_v25, %v9249_v41  ;;  %v2293_v33 = vmul.f32 %v9249_v41, %v9249_v41  ;;  %v2179_v55 = vpop.f32.mrb[33].mxu1 }
 0x448   :  { %v2343_v35 = vadd.f32 %v2342_v16, %v2293_v33 }
 0x449   :  { %v9256_v17 = vpop.f32.mrb[34].mxu0  ;;  %v9258_v52 = vpop.f32.mrb[34].mxu1 }
 0x44a   :  { %14236 = vst [vmem:[#allocation19_spill] sm:$0xff] %v9256_v17  ;;  %14237 = vst [vmem:[#allocation28_spill] sm:$0xff] %v9258_v52  ;;  %v2237_v21 = vadd.f32 %v2236_v47, %v9256_v17  ;;  %v2294_v22 = vmul.f32 %v9256_v17, %v9256_v17  ;;  %v2054_v14 = vpop.f32.mrb[35].mxu0  ;;  %v2184_v0 = vpop.f32.mrb[35].mxu1 }
 0x44c   :  { %v2344_v40 = vadd.f32 %v2343_v35, %v2294_v22 }
 0x44d   :  { %v9263_v61 = vpop.f32.mrb[36].mxu0  ;;  %v9265_v37 = vpop.f32.mrb[36].mxu1 }
 0x44e   :  { %14238 = vst [vmem:[#allocation29_spill] sm:$0xff] %v9263_v61  ;;  %14239 = vst [vmem:[#allocation24_spill] sm:$0xff] %v9265_v37  ;;  %v2059_v48 = vpop.f32.mrb[37].mxu0  ;;  %v2238_v23 = vadd.f32 %v2237_v21, %v9263_v61  ;;  %v2295_v12 = vmul.f32 %v9263_v61, %v9263_v61  ;;  %v2189_v38 = vpop.f32.mrb[37].mxu1 }
 0x450   :  { %v2345_v5 = vadd.f32 %v2344_v40, %v2295_v12 }
 0x451   :  { %v9270_v30 = vpop.f32.mrb[38].mxu0  ;;  %v9272_v59 = vpop.f32.mrb[38].mxu1 }
 0x452   :  { %14240 = vst [vmem:[#allocation25_spill] sm:$0xff] %v9270_v30  ;;  %14241 = vst [vmem:[#allocation32_spill] sm:$0xff] %v9272_v59  ;;  %v2064_v39 = vpop.f32.mrb[39].mxu0  ;;  %v2239_v45 = vadd.f32 %v2238_v23, %v9270_v30  ;;  %v2296_v53 = vmul.f32 %v9270_v30, %v9270_v30  ;;  %v2194_v1 = vpop.f32.mrb[39].mxu1 }
 0x454   :  { %v2346_v42 = vadd.f32 %v2345_v5, %v2296_v53 }
 0x455   :  { %v9277_v25 = vpop.f32.mrb[40].mxu0  ;;  %v9279_v36 = vpop.f32.mrb[40].mxu1 }
 0x456   :  { %14242 = vst [vmem:[#allocation33_spill] sm:$0xff] %v9277_v25  ;;  %14243 = vst [vmem:[#allocation39_spill] sm:$0xff] %v9279_v36  ;;  %v2240_v13 = vadd.f32 %v2239_v45, %v9277_v25  ;;  %v2297_v16 = vmul.f32 %v9277_v25, %v9277_v25  ;;  %v2069_v19 = vpop.f32.mrb[41].mxu0  ;;  %v2199_v47 = vpop.f32.mrb[41].mxu1 }
 0x458   :  { %v2347_v33 = vadd.f32 %v2346_v42, %v2297_v16 }
 0x459   :  { %v9284_v55 = vpop.f32.mrb[42].mxu0  ;;  %v9286_v35 = vpop.f32.mrb[42].mxu1 }
 0x45a   :  { %14244 = vst [vmem:[#allocation40_spill] sm:$0xff] %v9284_v55  ;;  %14245 = vst [vmem:[#allocation41_spill] sm:$0xff] %v9286_v35  ;;  %v2074_v21 = vpop.f32.mrb[43].mxu0  ;;  %v2241_v22 = vadd.f32 %v2240_v13, %v9284_v55  ;;  %v2298_v14 = vmul.f32 %v9284_v55, %v9284_v55  ;;  %v2204_v0 = vpop.f32.mrb[43].mxu1 }
 0x45c   :  { %v2348_v40 = vadd.f32 %v2347_v33, %v2298_v14 }
 0x45d   :  { %v9291_v48 = vpop.f32.mrb[44].mxu0  ;;  %v9293_v23 = vpop.f32.mrb[44].mxu1 }
 0x45e   :  { %14246 = vst [vmem:[#allocation42_spill] sm:$0xff] %v9291_v48  ;;  %14247 = vst [vmem:[#allocation43_spill] sm:$0xff] %v9293_v23  ;;  %v2079_v12 = vpop.f32.mrb[45].mxu0  ;;  %v2242_v38 = vadd.f32 %v2241_v22, %v9291_v48  ;;  %v2299_v5 = vmul.f32 %v9291_v48, %v9291_v48  ;;  %v2209_v39 = vpop.f32.mrb[45].mxu1 }
 0x460   :  { %v2349_v45 = vadd.f32 %v2348_v40, %v2299_v5 }
 0x461   :  { %v9298_v53 = vpop.f32.mrb[46].mxu0  ;;  %v9300_v1 = vpop.f32.mrb[46].mxu1 }
 0x462   :  { %14248 = vst [vmem:[#allocation44_spill] sm:$0xff] %v9298_v53  ;;  %14249 = vst [vmem:[#allocation45_spill] sm:$0xff] %v9300_v1  ;;  %v2243_v42 = vadd.f32 %v2242_v38, %v9298_v53  ;;  %v2300_v13 = vmul.f32 %v9298_v53, %v9298_v53  ;;  %v2084_v16 = vpop.f32.mrb[47].mxu0  ;;  %v2214_v19 = vpop.f32.mrb[47].mxu1 }
 0x464   :  { %v2350_v47 = vadd.f32 %v2349_v45, %v2300_v13  ;;  %v2303_v13 = vmul.f32 %v9139_v29, %v9139_v29 }
 0x465   :  { %v9305_v33 = vpop.f32.mrb[48].mxu0  ;;  %v9307_v21 = vpop.f32.mrb[48].mxu1 }
 0x466   :  { %14250 = vst [vmem:[#allocation46_spill] sm:$0xff] %v9305_v33  ;;  %14251 = vst [vmem:[#allocation47_spill] sm:$0xff] %v9307_v21  ;;  %v2089_v22 = vpop.f32.mrb[49].mxu0  ;;  %v2244_v14 = vadd.f32 %v2243_v42, %v9305_v33  ;;  %v2301_v0 = vmul.f32 %v9305_v33, %v9305_v33  ;;  %v2219_v40 = vpop.f32.mrb[49].mxu1 }
 0x467   :  { %v2304_v22 = vmul.f32 %v9143_v56, %v9143_v56 }
 0x468   :  { %v2351_v12 = vadd.f32 %v2350_v47, %v2301_v0 }
 0x469   :  { %v9312_v5 = vpop.f32.mrb[50].mxu0 }
 0x46a   :  { %14252 = vst [vmem:[#allocation48_spill] sm:$0xff] %v9312_v5  ;;  %v2094_v38 = vpop.f32.mrb[51].mxu0  ;;  %v2245_v39 = vadd.f32 %v2244_v14, %v9312_v5  ;;  %v2302_v45 = vmul.f32 %v9312_v5, %v9312_v5  ;;  %v2305_v14 = vmul.f32 %v9153_v57, %v9153_v57 }
 0x46b   :  { %v2306_v38 = vmul.f32 %v9160_v63, %v9160_v63 }
 0x46c   :  { %v2246_v16 = vadd.f32 %v2245_v39, %v9139_v29  ;;  %v2352_v19 = vadd.f32 %v2351_v12, %v2302_v45  ;;  %v2307_v39 = vmul.f32 %v9167_v4, %v9167_v4 }
 0x46e   :  { %v2247_v42 = vadd.f32 %v2246_v16, %v9143_v56  ;;  %v2353_v47 = vadd.f32 %v2352_v19, %v2303_v13  ;;  %v2308_v16 = vmul.f32 %v9174_v9, %v9174_v9 }
 0x470   :  { %v2248_v0 = vadd.f32 %v2247_v42, %v9153_v57  ;;  %v2354_v40 = vadd.f32 %v2353_v47, %v2304_v22  ;;  %v2309_v42 = vmul.f32 %v9181_v50, %v9181_v50 }
 0x472   :  { %v2249_v53 = vadd.f32 %v2248_v0, %v9160_v63  ;;  %v2355_v25 = vadd.f32 %v2354_v40, %v2305_v14  ;;  %v2311_v40 = vmul.f32 %v9195_v18, %v9195_v18 }
 0x474   :  { %v2250_v12 = vadd.f32 %v2249_v53, %v9167_v4  ;;  %v2356_v45 = vadd.f32 %v2355_v25, %v2306_v38  ;;  %v2310_v53 = vmul.f32 %v9188_v3, %v9188_v3 }
 0x476   :  { %v2251_v13 = vadd.f32 %v2250_v12, %v9174_v9  ;;  %v2357_v19 = vadd.f32 %v2356_v45, %v2307_v39  ;;  %v2312_v12 = vmul.f32 %v9202_v51, %v9202_v51 }
 0x478   :  { %v2252_v22 = vadd.f32 %v2251_v13, %v9181_v50  ;;  %v2358_v47 = vadd.f32 %v2357_v19, %v2308_v16  ;;  %v2313_v16 = vmul.f32 %v9209_v6, %v9209_v6 }
 0x47a   :  { %v2253_v0 = vadd.f32 %v2252_v22, %v9188_v3  ;;  %v2359_v14 = vadd.f32 %v2358_v47, %v2309_v42  ;;  %v2314_v22 = vmul.f32 %v9216_v28, %v9216_v28 }
 0x47c   :  { %v2254_v25 = vadd.f32 %v2253_v0, %v9195_v18  ;;  %v2360_v38 = vadd.f32 %v2359_v14, %v2310_v53  ;;  %v2315_v53 = vmul.f32 %v9223_v26, %v9223_v26 }
 0x47e   :  { %v2255_v39 = vadd.f32 %v2254_v25, %v9202_v51  ;;  %v2361_v45 = vadd.f32 %v2360_v38, %v2311_v40  ;;  %v2316_v38 = vmul.f32 %v9230_v32, %v9230_v32 }
 0x480   :  { %v2256_v13 = vadd.f32 %v2255_v39, %v9209_v6  ;;  %v2362_v19 = vadd.f32 %v2361_v45, %v2312_v12  ;;  %v2317_v39 = vmul.f32 %v9237_v46, %v9237_v46 }
 0x482   :  { %v2257_v42 = vadd.f32 %v2256_v13, %v9216_v28  ;;  %v2363_v47 = vadd.f32 %v2362_v19, %v2313_v16  ;;  %v2318_v16 = vmul.f32 %v9244_v10, %v9244_v10 }
 0x484   :  { %v2258_v0 = vadd.f32 %v2257_v42, %v9223_v26  ;;  %v2364_v14 = vadd.f32 %v2363_v47, %v2314_v22  ;;  %v2319_v47 = vmul.f32 %v9251_v27, %v9251_v27 }
 0x486   :  { %v2365_v25 = vadd.f32 %v2364_v14, %v2315_v53  ;;  %v2259_v40 = vadd.f32 %v2258_v0, %v9230_v32  ;;  %v2320_v53 = vmul.f32 %v9258_v52, %v9258_v52 }
 0x488   :  { %v2260_v12 = vadd.f32 %v2259_v40, %v9237_v46  ;;  %v2366_v45 = vadd.f32 %v2365_v25, %v2316_v38  ;;  %v2321_v40 = vmul.f32 %v9265_v37, %v9265_v37 }
 0x48a   :  { %v2261_v13 = vadd.f32 %v2260_v12, %v9244_v10  ;;  %v2367_v19 = vadd.f32 %v2366_v45, %v2317_v39  ;;  %v2322_v45 = vmul.f32 %v9272_v59, %v9272_v59 }
 0x48c   :  { %v2368_v42 = vadd.f32 %v2367_v19, %v2318_v16  ;;  %v2262_v22 = vadd.f32 %v2261_v13, %v9251_v27  ;;  %v2323_v16 = vmul.f32 %v9279_v36, %v9279_v36 }
 0x48e   :  { %v2263_v0 = vadd.f32 %v2262_v22, %v9258_v52  ;;  %v2369_v14 = vadd.f32 %v2368_v42, %v2319_v47  ;;  %v2324_v22 = vmul.f32 %v9286_v35, %v9286_v35 }
 0x490   :  { %v2264_v25 = vadd.f32 %v2263_v0, %v9265_v37  ;;  %v2370_v38 = vadd.f32 %v2369_v14, %v2320_v53  ;;  %v2325_v14 = vmul.f32 %v9293_v23, %v9293_v23 }
 0x492   :  { %v2371_v12 = vadd.f32 %v2370_v38, %v2321_v40  ;;  %v2265_v39 = vadd.f32 %v2264_v25, %v9272_v59  ;;  %v2326_v40 = vmul.f32 %v9300_v1, %v9300_v1  ;;  %v2327_v38 = vmul.f32 %v9307_v21, %v9307_v21 }
 0x494   :  { %v2266_v13 = vadd.f32 %v2265_v39, %v9279_v36  ;;  %v2372_v19 = vadd.f32 %v2371_v12, %v2322_v45 }
 0x496   :  { %v2267_v42 = vadd.f32 %v2266_v13, %v9286_v35  ;;  %v2373_v47 = vadd.f32 %v2372_v19, %v2323_v16 }
 0x498   :  { %v2374_v0 = vadd.f32 %v2373_v47, %v2324_v22  ;;  %v2268_v53 = vadd.f32 %v2267_v42, %v9293_v23 }
 0x49a   :  { %v2269_v25 = vadd.f32 %v2268_v53, %v9300_v1  ;;  %v2375_v12 = vadd.f32 %v2374_v0, %v2325_v14 }
 0x49c   :  { %v2270_v39 = vadd.f32 %v2269_v25, %v9307_v21  ;;  %v2376_v45 = vadd.f32 %v2375_v12, %v2326_v40 }
 0x49e   :  { %v2271_v13 = vrot.slane %v2270_v39, 4  ;;  %v2377_v16 = vadd.f32 %v2376_v45, %v2327_v38 }
 0x4a0   :  { %v2272_v19 = vadd.f32 %v2271_v13, %v2270_v39  ;;  %v2378_v22 = vrot.slane %v2377_v16, 4 }
 0x4a2   :  { %v2273_v42 = vrot.slane %v2272_v19, 2  ;;  %v2379_v47 = vadd.f32 %v2378_v22, %v2377_v16 }
 0x4a4   :  { %v2274_v35 = vadd.f32 %v2273_v42, %v2272_v19  ;;  %v2380_v23 = vrot.slane %v2379_v47, 2 }
 0x4a6   :  { %v2275_v36 = vrot.slane %v2274_v35, 1  ;;  %v2381_v53 = vadd.f32 %v2380_v23, %v2379_v47 }
 0x4a8   :  { %v2276_v59 = vadd.f32 %v2275_v36, %v2274_v35  ;;  %v2382_v37 = vrot.slane %v2381_v53, 1 }
 0x4aa   :  { %2389 = vrot.lane.b32.xlu1 %v2276_v59, %s7480_s0  ;;  %2385 = vrot.lane.b32.xlu0 %v2276_v59, %s7481_s27  ;;  %v2383_v0 = vadd.f32 %v2382_v37, %v2381_v53  ;;  %v2414_v53 = vld [vmem:[%s14025_s8] sm:$0x1] }
 0x4ae   :  { %2398 = vrot.lane.b32.xlu1 %v2383_v0, %s7481_s27  ;;  %2393 = vrot.lane.b32.xlu0 %v2276_v59, %s7479_s3 }
 0x4b2   :  { %2406 = vrot.lane.b32.xlu1 %v2383_v0, %s7479_s3  ;;  %2402 = vrot.lane.b32.xlu0 %v2383_v0, %s7480_s0 }
 0x51c   :  { %v2390_v14 = vpop.permute.xlu1 %2389  ;;  %v2386_v25 = vpop.permute.xlu0 %2385 }
 0x51d   :  { %v2388_v40 = vadd.f32 %v2386_v25, %v2276_v59  ;;  %v14253_v25 = vld [vmem:[#allocation6_spill] sm:$0xff] }
 0x51f   :  { %v2392_v38 = vadd.f32 %v2390_v14, %v2388_v40 }
 0x520   :  { %v2399_v23 = vpop.permute.xlu1 %2398  ;;  %v2394_v36 = vpop.permute.xlu0 %2393 }
 0x521   :  { %v2396_v35 = vadd.f32 %v2394_v36, %v2392_v38  ;;  %v2401_v12 = vadd.f32 %v2399_v23, %v2383_v0  ;;  %v2418_v38 = vld [vmem:[%s14026_s9] sm:$0x1] }
 0x523   :  { %v2410_v45 = vmul.f32 0.00091827364, %v2396_v35  ;;  %v6057_v35 = vld [vmem:[%s14027_s5 + $0x8] sm:$0x3f] }
 0x524   :  { %v2403_v39 = vpop.permute.xlu0 %2402  ;;  %v2407_v37 = vpop.permute.xlu1 %2406 }
 0x525   :  { %v2405_v13 = vadd.f32 %v2403_v39, %v2401_v12  ;;  %v2412_v19 = vmul.f32 %v2410_v45, %v2410_v45  ;;  %v6056_v12 = vld [vmem:[%s14027_s5] sm:$0xff] }
 0x527   :  { %v2409_v16 = vadd.f32 %v2407_v37, %v2405_v13  ;;  %v6059_v13 = vld [vmem:[%s14027_s5 + $0x18] sm:$0x3f]  ;;  %v6058_v37 = vld [vmem:[%s14027_s5 + $0x10] sm:$0xff] }
 0x529   :  { %v2411_v22 = vmul.f32 0.00091827364, %v2409_v16 }
 0x52b   :  { %v2413_v42 = vsub.f32 %v2411_v22, %v2412_v19 }
 0x52d   :  { %v2415_v47 = vadd.f32 1e-05, %v2413_v42 }
 0x52f   :  { %7470 = vrsqrt.f32 %v2415_v47  ;;  %v6061_v47 = vld [vmem:[%s14027_s5 + $0x28] sm:$0x3f] }
 0x539   :  { %v7471_v59 = vpop.eup %7470 }
 0x53a   :  { %v9401_v14 = vmul.f32 %v7471_v59, %v2414_v53  ;;  %v6060_v53 = vld [vmem:[%s14027_s5 + $0x20] sm:$0xff] }
 0x53c   :  { %v2492_v0 = vrot.slane %v9401_v14, %v14253_v25  ;;  %v2419_v40 = vmul.f32 %v9401_v14, %v2410_v45 }
 0x53e   :  { %2496 = vrot.lane.b32.xlu1 %v2492_v0, %s7480_s0  ;;  %2493 = vrot.lane.b32.xlu0 %v2492_v0, %s7479_s3  ;;  %v2420_v23 = vsub.f32 %v2418_v38, %v2419_v40 }
 0x540   :  { %v9413_v36 = vrot.slane %v2420_v23, %v14253_v25  ;;  %v6063_v23 = vld [vmem:[%s14027_s5 + $0x38] sm:$0x3f] }
 0x542   :  { %2499 = vrot.lane.b32.xlu0 %v2492_v0, %s7481_s27  ;;  %v6091_v39 = vmul.f32 %v9413_v36, %v6057_v35  ;;  %v6090_v45 = vmul.f32 %v9413_v36, %v6056_v12  ;;  %v6093_v19 = vmul.f32 %v9413_v36, %v6059_v13  ;;  %v6092_v42 = vmul.f32 %v9413_v36, %v6058_v37  ;;  %v6062_v35 = vld [vmem:[%s14027_s5 + $0x30] sm:$0xff]  ;;  %v6073_v37 = vld [vmem:[%s14027_s5 + $0x88] sm:$0x3f] }
 0x543   :  { %v6095_v0 = vmul.f32 %v9413_v36, %v6061_v47  ;;  %v6094_v38 = vmul.f32 %v9413_v36, %v6060_v53  ;;  %v6096_v13 = vmul.f32 %v9413_v36, %v6062_v35  ;;  %v6075_v53 = vld [vmem:[%s14027_s5 + $0x98] sm:$0x3f]  ;;  %v6065_v35 = vld [vmem:[%s14027_s5 + $0x48] sm:$0x3f] }
 0x544   :  { %v6122_v16 = vsel %vm6121_vm6, %v6091_v39, 0.0  ;;  %v6118_v22 = vsel %vm616_vm0, %v6090_v45, 0.0  ;;  %v6128_v59 = vsel %vm6121_vm6, %v6093_v19, 0.0  ;;  %v6125_v40 = vsel %vm616_vm0, %v6092_v42, 0.0 }
 0x545   :  { %v6134_v12 = vsel %vm6121_vm6, %v6095_v0, 0.0  ;;  %v6097_v39 = vmul.f32 %v9413_v36, %v6063_v23  ;;  %v6131_v45 = vsel %vm616_vm0, %v6094_v38, 0.0  ;;  %v6137_v42 = vsel %vm616_vm0, %v6096_v13, 0.0 }
 0x547   :  { %v6140_v19 = vsel %vm6121_vm6, %v6097_v39, 0.0 }
 0x561   :  { %6123 = vadd.xlane.f32.xlu0 %v6122_v16  ;;  %v6072_v16 = vld [vmem:[%s14027_s5 + $0x80] sm:$0xff] }
 0x562   :  { %6119 = vadd.xlane.f32.xlu1 %v6118_v22  ;;  %v6107_v22 = vmul.f32 %v9413_v36, %v6073_v37  ;;  %v6106_v47 = vmul.f32 %v9413_v36, %v6072_v16  ;;  %v6077_v16 = vld [vmem:[%s14027_s5 + $0xa8] sm:$0x3f] }
 0x564   :  { %v6170_v0 = vsel %vm6121_vm6, %v6107_v22, 0.0  ;;  %v6167_v38 = vsel %vm616_vm0, %v6106_v47, 0.0 }
 0x565   :  { %6129 = vadd.xlane.f32.xlu0 %v6128_v59  ;;  %v6074_v59 = vld [vmem:[%s14027_s5 + $0x90] sm:$0xff] }
 0x566   :  { %6126 = vadd.xlane.f32.xlu1 %v6125_v40  ;;  %v6109_v40 = vmul.f32 %v9413_v36, %v6075_v53  ;;  %v6108_v23 = vmul.f32 %v9413_v36, %v6074_v59  ;;  %v6067_v59 = vld [vmem:[%s14027_s5 + $0x58] sm:$0x3f] }
 0x568   :  { %v6176_v39 = vsel %vm6121_vm6, %v6109_v40, 0.0  ;;  %v6173_v13 = vsel %vm616_vm0, %v6108_v23, 0.0 }
 0x569   :  { %6135 = vadd.xlane.f32.xlu0 %v6134_v12  ;;  %v6064_v12 = vld [vmem:[%s14027_s5 + $0x40] sm:$0xff] }
 0x56a   :  { %6132 = vadd.xlane.f32.xlu1 %v6131_v45  ;;  %v6099_v45 = vmul.f32 %v9413_v36, %v6065_v35  ;;  %v6098_v37 = vmul.f32 %v9413_v36, %v6064_v12  ;;  %v6079_v12 = vld [vmem:[%s14027_s5 + $0xb8] sm:$0x3f] }
 0x56c   :  { %v6146_v22 = vsel %vm6121_vm6, %v6099_v45, 0.0  ;;  %v6143_v47 = vsel %vm616_vm0, %v6098_v37, 0.0 }
 0x56d   :  { %6141 = vadd.xlane.f32.xlu0 %v6140_v19  ;;  %v6076_v19 = vld [vmem:[%s14027_s5 + $0xa0] sm:$0xff] }
 0x56e   :  { %6138 = vadd.xlane.f32.xlu1 %v6137_v42  ;;  %v6111_v42 = vmul.f32 %v9413_v36, %v6077_v16  ;;  %v6110_v53 = vmul.f32 %v9413_v36, %v6076_v19  ;;  %v6069_v19 = vld [vmem:[%s14027_s5 + $0x68] sm:$0x3f] }
 0x570   :  { %v6182_v40 = vsel %vm6121_vm6, %v6111_v42, 0.0  ;;  %v6179_v23 = vsel %vm616_vm0, %v6110_v53, 0.0 }
 0x571   :  { %6171 = vadd.xlane.f32.xlu0 %v6170_v0  ;;  %v6066_v0 = vld [vmem:[%s14027_s5 + $0x50] sm:$0xff] }
 0x572   :  { %6168 = vadd.xlane.f32.xlu1 %v6167_v38  ;;  %v6101_v38 = vmul.f32 %v9413_v36, %v6067_v59  ;;  %v6100_v35 = vmul.f32 %v9413_v36, %v6066_v0  ;;  %v6081_v0 = vld [vmem:[%s14027_s5 + $0xc8] sm:$0x3f] }
 0x574   :  { %v6152_v45 = vsel %vm6121_vm6, %v6101_v38, 0.0  ;;  %v6149_v37 = vsel %vm616_vm0, %v6100_v35, 0.0 }
 0x575   :  { %6177 = vadd.xlane.f32.xlu0 %v6176_v39  ;;  %v6078_v39 = vld [vmem:[%s14027_s5 + $0xb0] sm:$0xff] }
 0x576   :  { %6174 = vadd.xlane.f32.xlu1 %v6173_v13  ;;  %v6113_v13 = vmul.f32 %v9413_v36, %v6079_v12  ;;  %v6112_v16 = vmul.f32 %v9413_v36, %v6078_v39  ;;  %v6071_v39 = vld [vmem:[%s14027_s5 + $0x78] sm:$0x3f] }
 0x578   :  { %v6188_v42 = vsel %vm6121_vm6, %v6113_v13, 0.0  ;;  %v6185_v53 = vsel %vm616_vm0, %v6112_v16, 0.0 }
 0x579   :  { %6147 = vadd.xlane.f32.xlu0 %v6146_v22  ;;  %v6068_v22 = vld [vmem:[%s14027_s5 + $0x60] sm:$0xff] }
 0x57a   :  { %6144 = vadd.xlane.f32.xlu1 %v6143_v47  ;;  %v6103_v47 = vmul.f32 %v9413_v36, %v6069_v19  ;;  %v6102_v59 = vmul.f32 %v9413_v36, %v6068_v22  ;;  %v6083_v22 = vld [vmem:[%s14027_s5 + $0xd8] sm:$0x3f] }
 0x57c   :  { %v6158_v38 = vsel %vm6121_vm6, %v6103_v47, 0.0  ;;  %v6155_v35 = vsel %vm616_vm0, %v6102_v59, 0.0 }
 0x57d   :  { %6183 = vadd.xlane.f32.xlu0 %v6182_v40  ;;  %v6080_v40 = vld [vmem:[%s14027_s5 + $0xc0] sm:$0xff] }
 0x57e   :  { %6180 = vadd.xlane.f32.xlu1 %v6179_v23  ;;  %v6115_v23 = vmul.f32 %v9413_v36, %v6081_v0  ;;  %v6114_v12 = vmul.f32 %v9413_v36, %v6080_v40 }
 0x580   :  { %v6194_v13 = vsel %vm6121_vm6, %v6115_v23, 0.0  ;;  %v6191_v16 = vsel %vm616_vm0, %v6114_v12, 0.0 }
 0x581   :  { %6153 = vadd.xlane.f32.xlu0 %v6152_v45  ;;  %v6070_v45 = vld [vmem:[%s14027_s5 + $0x70] sm:$0xff] }
 0x582   :  { %6150 = vadd.xlane.f32.xlu1 %v6149_v37  ;;  %v6105_v37 = vmul.f32 %v9413_v36, %v6071_v39  ;;  %v6104_v19 = vmul.f32 %v9413_v36, %v6070_v45  ;;  %v2505_v45 = vld [vmem:[%s14028_s4] sm:$0xf] }
 0x584   :  { %v6164_v47 = vsel %vm6121_vm6, %v6105_v37, 0.0  ;;  %v6161_v59 = vsel %vm616_vm0, %v6104_v19, 0.0  ;;  %v2507_v37 = vld [vmem:[%s14028_s4 + $0x8] sm:$0xf] }
 0x585   :  { %6189 = vadd.xlane.f32.xlu0 %v6188_v42  ;;  %v6082_v42 = vld [vmem:[%s14027_s5 + $0xd0] sm:$0xff]  ;;  %v14254_v19 = vld [vmem:[#allocation5_spill] sm:$0xff] }
 0x586   :  { %6186 = vadd.xlane.f32.xlu1 %v6185_v53  ;;  %v6117_v53 = vmul.f32 %v9413_v36, %v6083_v22  ;;  %v6116_v0 = vmul.f32 %v9413_v36, %v6082_v42  ;;  %v2506_v36 = vld [vmem:[%s14028_s4 + $0x4] sm:$0xf]  ;;  %v2677_v22 = vsub.s32 1, %v14254_v19  ;;  %v3107_v42 = vsub.s32 3, %v14254_v19 }
 0x588   :  { %v6200_v40 = vsel %vm6121_vm6, %v6117_v53, 0.0  ;;  %v2892_v53 = vsub.s32 2, %v14254_v19 }
 0x589   :  { %6159 = vadd.xlane.f32.xlu0 %v6158_v38  ;;  %v6197_v38 = vsel %vm616_vm0, %v6116_v0, 0.0 }
 0x58a   :  { %6156 = vadd.xlane.f32.xlu1 %v6155_v35 }
 0x58d   :  { %6195 = vadd.xlane.f32.xlu0 %v6194_v13 }
 0x58e   :  { %6192 = vadd.xlane.f32.xlu1 %v6191_v16  ;;  %v2508_v16 = vld [vmem:[%s14028_s4 + $0xc] sm:$0xf] }
 0x591   :  { %6165 = vadd.xlane.f32.xlu0 %v6164_v47 }
 0x592   :  { %6162 = vadd.xlane.f32.xlu1 %v6161_v59 }
 0x595   :  { %6201 = vadd.xlane.f32.xlu0 %v6200_v40 }
 0x596   :  { %6198 = vadd.xlane.f32.xlu1 %v6197_v38 }
 0x5b0   :  { %v2494_v23 = vpop.permute.xlu0 %2493  ;;  %v2497_v35 = vpop.permute.xlu1 %2496 }
 0x5b1   :  { %v2502_v12 = vsel %vm616_vm0, %v9401_v14, %v2494_v23  ;;  %vm6483_vm0 = vcmask 1046534  }
 0x5b2   :  { %v2503_v39 = vsel %vm1653_vm1, %v2502_v12, %v2497_v35  ;;  %vm6485_vm1 = vcmask 1047559  }
 0x5b4   :  { %v2500_v13 = vpop.permute.xlu0 %2499 }
 0x5b5   :  { %v2504_v14 = vsel %vm1662_vm2, %v2503_v39, %v2500_v13  ;;  %vm6494_vm2 = vcmask 113664  }
 0x5b6   :  { %v2512_v47 = vrot.slane %v2504_v14, %v14253_v25 }
 0x5b8   :  { %v2513_v59 = vmul.f32 %v2512_v47, %v2505_v45  ;;  %v2514_v0 = vmul.f32 %v2512_v47, %v2506_v36  ;;  %v2515_v40 = vmul.f32 %v2512_v47, %v2507_v37  ;;  %v2516_v38 = vmul.f32 %v2512_v47, %v2508_v16 }
 0x5ba   :  { %v2562_v23 = vrot.slane %v2513_v59, %v14253_v25  ;;  %v9576_v35 = vrot.slane %v2513_v59, %v2677_v22  ;;  %v9578_v12 = vrot.slane %v2513_v59, %v3107_v42  ;;  %v9580_v21 = vrot.slane %v2513_v59, %v2892_v53 }
 0x5bb   :  { %v9582_v39 = vrot.slane %v2514_v0, %v2677_v22  ;;  %v9584_v13 = vrot.slane %v2514_v0, %v2892_v53  ;;  %v9586_v1 = vrot.slane %v2514_v0, %v3107_v42  ;;  %v9589_v14 = vrot.slane %v2514_v0, %v14253_v25 }
 0x5bc   :  { %v9591_v45 = vrot.slane %v2515_v40, %v2677_v22  ;;  %v9593_v36 = vrot.slane %v2515_v40, %v2892_v53  ;;  %v9595_v37 = vrot.slane %v2515_v40, %v3107_v42  ;;  %v9598_v16 = vrot.slane %v2515_v40, %v14253_v25 }
 0x5bd   :  { %14255 = vst [vmem:[#allocation49_spill] sm:$0xff] %v9582_v39  ;;  %14256 = vst [vmem:[#allocation50_spill] sm:$0xff] %v9584_v13  ;;  %v9600_v47 = vrot.slane %v2516_v38, %v2677_v22  ;;  %v9602_v59 = vrot.slane %v2516_v38, %v2892_v53  ;;  %v9604_v19 = vrot.slane %v2516_v38, %v3107_v42 }
 0x5be   :  { %14257 = vst [vmem:[#allocation51_spill] sm:$0xff] %v9586_v1  ;;  %14258 = vst [vmem:[#allocation52_spill] sm:$0xff] %v9591_v45  ;;  %v9607_v1 = vrot.slane %v2516_v38, %v14253_v25  ;;  %v9611_v0 = vmul.f32 %v9578_v12, %v9151_v44  ;;  %v2565_v40 = vmul.f32 %v2562_v23, %v9158_v43 }
 0x5bf   :  { %14259 = vst [vmem:[#allocation53_spill] sm:$0xff] %v9593_v36  ;;  %14260 = vst [vmem:[#allocation54_spill] sm:$0xff] %v9595_v37  ;;  %v2564_v36 = vmul.f32 %v2562_v23, %v9141_v7  ;;  %v2563_v37 = vmul.f32 %v2562_v23, %v9137_v8  ;;  %v2567_v22 = vmul.f32 %v2562_v23, %v9179_v31 }
 0x5c0   :  { %14261 = vst [vmem:[#allocation55_spill] sm:$0xff] %v9598_v16  ;;  %14262 = vst [vmem:[#allocation56_spill] sm:$0xff] %v9600_v47  ;;  %v2566_v53 = vmul.f32 %v2562_v23, %v9165_v49  ;;  %v2569_v42 = vmul.f32 %v2562_v23, %v9200_v15  ;;  %v2568_v38 = vmul.f32 %v2562_v23, %v9186_v54 }
 0x5c1   :  { %14263 = vst [vmem:[#allocation57_spill] sm:$0xff] %v9602_v59  ;;  %14264 = vst [vmem:[#allocation58_spill] sm:$0xff] %v9604_v19  ;;  %2593 = vadd.xlane.f32.xlu0 %v2564_v36  ;;  %2591 = vadd.xlane.f32.xlu1 %v2563_v37  ;;  %v2571_v25 = vmul.f32 %v2562_v23, %v9221_v60  ;;  %v9622_v44 = vmul.f32 %v2562_v23, %v9207_v20 }
 0x5c2   :  { %14265 = vst [vmem:[#allocation59_spill] sm:$0xff] %v9607_v1  ;;  %14266 = vst [vmem:[#allocation60_spill] sm:$0xff] %v9611_v0  ;;  %v9625_v19 = vmul.f32 %v2562_v23, %v9242_v58  ;;  %v9628_v0 = vmul.f32 %v2562_v23, %v9228_v24  ;;  %v9631_v59 = vmul.f32 %v2562_v23, %v9263_v61 }
 0x5c3   :  { %v9634_v47 = vmul.f32 %v2562_v23, %v9249_v41  ;;  %v9637_v36 = vmul.f32 %v2562_v23, %v9284_v55  ;;  %v9640_v37 = vmul.f32 %v2562_v23, %v9270_v30  ;;  %v9643_v1 = vmul.f32 %v2562_v23, %v9305_v33 }
 0x5c4   :  { %v9646_v45 = vmul.f32 %v2562_v23, %v9291_v48  ;;  %v9649_v16 = vmul.f32 %v2562_v23, %v9143_v56  ;;  %v9652_v13 = vmul.f32 %v2562_v23, %v9312_v5  ;;  %v9655_v52 = vmul.f32 %v2562_v23, %v9167_v4 }
 0x5c5   :  { %v9658_v39 = vmul.f32 %v2562_v23, %v9153_v57  ;;  %2595 = vadd.xlane.f32.xlu0 %v2565_v40  ;;  %2599 = vadd.xlane.f32.xlu1 %v2567_v22  ;;  %v9661_v27 = vmul.f32 %v2562_v23, %v9188_v3  ;;  %v9664_v10 = vmul.f32 %v2562_v23, %v9174_v9 }
 0x5c6   :  { %14267 = vst [vmem:[#allocation61_spill] sm:$0xff] %v9646_v45  ;;  %14268 = vst [vmem:[#allocation62_spill] sm:$0xff] %v9649_v16  ;;  %v9667_v45 = vmul.f32 %v2562_v23, %v9209_v6  ;;  %v9670_v16 = vmul.f32 %v2562_v23, %v9195_v18  ;;  %v9680_v40 = vmul.f32 %v9576_v35, %v9137_v8 }
 0x5c7   :  { %14269 = vst [vmem:[#allocation63_spill] sm:$0xff] %v9652_v13  ;;  %14270 = vst [vmem:[#allocation64_spill] sm:$0xff] %v9655_v52  ;;  %v9673_v13 = vmul.f32 %v2562_v23, %v9230_v32  ;;  %v9676_v52 = vmul.f32 %v2562_v23, %v9216_v28  ;;  %v9683_v22 = vmul.f32 %v2562_v23, %v9237_v46 }
 0x5c8   :  { %14271 = vst [vmem:[#allocation65_spill] sm:$0xff] %v9664_v10  ;;  %14272 = vst [vmem:[#allocation66_spill] sm:$0xff] %v9670_v16  ;;  %v9687_v10 = vmul.f32 %v9576_v35, %v9158_v43  ;;  %v9691_v16 = vmul.f32 %v9576_v35, %v9141_v7  ;;  %v9703_v23 = vmul.f32 %v9576_v35, %v9200_v15 }
 0x5c9   :  { %14273 = vst [vmem:[#allocation67_spill] sm:$0xff] %v9673_v13  ;;  %14274 = vst [vmem:[#allocation68_spill] sm:$0xff] %v9676_v52  ;;  %v9695_v13 = vmul.f32 %v9576_v35, %v9179_v31  ;;  %v9699_v52 = vmul.f32 %v9576_v35, %v9165_v49  ;;  %2597 = vadd.xlane.f32.xlu0 %v2566_v53  ;;  %2603 = vadd.xlane.f32.xlu1 %v2569_v42 }
 0x5ca   :  { %14275 = vst [vmem:[#allocation69_spill] sm:$0xff] %v9683_v22  ;;  %14276 = vst [vmem:[#allocation70_spill] sm:$0xff] %v9687_v10  ;;  %v9707_v22 = vmul.f32 %v9576_v35, %v9186_v54  ;;  %v9711_v10 = vmul.f32 %v9576_v35, %v9221_v60  ;;  %v9731_v53 = vmul.f32 %v9576_v35, %v9249_v41 }
 0x5cb   :  { %14277 = vst [vmem:[#allocation71_spill] sm:$0xff] %v9695_v13  ;;  %14278 = vst [vmem:[#allocation72_spill] sm:$0xff] %v9699_v52  ;;  %v9715_v13 = vmul.f32 %v9576_v35, %v9207_v20  ;;  %v9719_v52 = vmul.f32 %v9576_v35, %v9242_v58  ;;  %v9735_v42 = vmul.f32 %v9576_v35, %v9284_v55 }
 0x5cc   :  { %14279 = vst [vmem:[#allocation73_spill] sm:$0xff] %v9703_v23  ;;  %14280 = vst [vmem:[#allocation74_spill] sm:$0xff] %v9707_v22  ;;  %v9723_v23 = vmul.f32 %v9576_v35, %v9228_v24  ;;  %v9727_v22 = vmul.f32 %v9576_v35, %v9263_v61 }
 0x5cd   :  { %14281 = vst [vmem:[#allocation75_spill] sm:$0xff] %v9715_v13  ;;  %14282 = vst [vmem:[#allocation76_spill] sm:$0xff] %v9719_v52  ;;  %v9739_v13 = vmul.f32 %v9576_v35, %v9270_v30  ;;  %v9743_v52 = vmul.f32 %v9576_v35, %v9305_v33  ;;  %2601 = vadd.xlane.f32.xlu0 %v2568_v38  ;;  %2607 = vadd.xlane.f32.xlu1 %v2571_v25 }
 0x5ce   :  { %14283 = vst [vmem:[#allocation77_spill] sm:$0xff] %v9723_v23  ;;  %14284 = vst [vmem:[#allocation78_spill] sm:$0xff] %v9727_v22  ;;  %v9747_v23 = vmul.f32 %v9576_v35, %v9291_v48  ;;  %v9751_v22 = vmul.f32 %v9576_v35, %v9143_v56  ;;  %v9791_v38 = vmul.f32 %v9580_v21, %v9137_v8 }
 0x5cf   :  { %14285 = vst [vmem:[#allocation79_spill] sm:$0xff] %v9731_v53  ;;  %14286 = vst [vmem:[#allocation80_spill] sm:$0xff] %v9735_v42  ;;  %v9755_v53 = vmul.f32 %v9576_v35, %v9312_v5  ;;  %v9759_v42 = vmul.f32 %v9576_v35, %v9167_v4  ;;  %v9795_v25 = vmul.f32 %v9576_v35, %v9237_v46 }
 0x5d0   :  { %14287 = vst [vmem:[#allocation81_spill] sm:$0xff] %v9739_v13  ;;  %14288 = vst [vmem:[#allocation82_spill] sm:$0xff] %v9743_v52  ;;  %v9763_v13 = vmul.f32 %v9576_v35, %v9153_v57  ;;  %v9767_v52 = vmul.f32 %v9576_v35, %v9188_v3 }
 0x5d1   :  { %14289 = vst [vmem:[#allocation83_spill] sm:$0xff] %v9747_v23  ;;  %14290 = vst [vmem:[#allocation84_spill] sm:$0xff] %v9755_v53  ;;  %v9771_v23 = vmul.f32 %v9576_v35, %v9174_v9  ;;  %v9775_v53 = vmul.f32 %v9576_v35, %v9209_v6  ;;  %2605 = vadd.xlane.f32.xlu0 %v9622_v44  ;;  %2611 = vadd.xlane.f32.xlu1 %v9625_v19 }
 0x5d2   :  { %14291 = vst [vmem:[#allocation85_spill] sm:$0xff] %v9759_v42  ;;  %14292 = vst [vmem:[#allocation86_spill] sm:$0xff] %v9763_v13  ;;  %v9779_v42 = vmul.f32 %v9576_v35, %v9195_v18  ;;  %v9783_v13 = vmul.f32 %v9576_v35, %v9230_v32  ;;  %v9853_v44 = vmul.f32 %v9580_v21, %v9270_v30 }
 0x5d3   :  { %14293 = vst [vmem:[#allocation87_spill] sm:$0xff] %v9767_v52  ;;  %14294 = vst [vmem:[#allocation88_spill] sm:$0xff] %v9775_v53  ;;  %v9787_v52 = vmul.f32 %v9576_v35, %v9216_v28  ;;  %v9799_v53 = vmul.f32 %v9580_v21, %v9158_v43  ;;  %v9815_v35 = vmul.f32 %v9580_v21, %v9200_v15 }
 0x5d4   :  { %14295 = vst [vmem:[#allocation89_spill] sm:$0xff] %v9779_v42  ;;  %14296 = vst [vmem:[#allocation90_spill] sm:$0xff] %v9783_v13  ;;  %v9803_v42 = vmul.f32 %v9580_v21, %v9141_v7  ;;  %v9807_v13 = vmul.f32 %v9580_v21, %v9179_v31  ;;  %v9857_v19 = vmul.f32 %v9580_v21, %v9305_v33 }
 0x5d5   :  { %14297 = vst [vmem:[#allocation91_spill] sm:$0xff] %v9787_v52  ;;  %14298 = vst [vmem:[#allocation92_spill] sm:$0xff] %v9795_v25  ;;  %v9811_v52 = vmul.f32 %v9580_v21, %v9165_v49  ;;  %v9819_v25 = vmul.f32 %v9580_v21, %v9186_v54  ;;  %2609 = vadd.xlane.f32.xlu0 %v9628_v0  ;;  %2615 = vadd.xlane.f32.xlu1 %v9631_v59 }
 0x5d6   :  { %14299 = vst [vmem:[#allocation93_spill] sm:$0xff] %v9799_v53  ;;  %14300 = vst [vmem:[#allocation94_spill] sm:$0xff] %v9803_v42  ;;  %v9823_v53 = vmul.f32 %v9580_v21, %v9221_v60  ;;  %v9827_v42 = vmul.f32 %v9580_v21, %v9207_v20  ;;  %v9915_v0 = vmul.f32 %v9578_v12, %v9141_v7 }
 0x5d7   :  { %14301 = vst [vmem:[#allocation95_spill] sm:$0xff] %v9807_v13  ;;  %14302 = vst [vmem:[#allocation96_spill] sm:$0xff] %v9815_v35  ;;  %v9831_v13 = vmul.f32 %v9580_v21, %v9242_v58  ;;  %v9837_v35 = vmul.f32 %v9580_v21, %v9228_v24  ;;  %v9919_v59 = vmul.f32 %v9578_v12, %v9165_v49 }
 0x5d8   :  { %14303 = vst [vmem:[#allocation97_spill] sm:$0xff] %v9819_v25  ;;  %14304 = vst [vmem:[#allocation98_spill] sm:$0xff] %v9823_v53  ;;  %v9841_v25 = vmul.f32 %v9580_v21, %v9263_v61  ;;  %v9845_v53 = vmul.f32 %v9580_v21, %v9249_v41  ;;  %v9935_v7 = vmul.f32 %v9578_v12, %v9193_v34 }
 0x5d9   :  { %14305 = vst [vmem:[#allocation99_spill] sm:$0xff] %v9827_v42  ;;  %14306 = vst [vmem:[#allocation100_spill] sm:$0xff] %v9837_v35  ;;  %v9849_v42 = vmul.f32 %v9580_v21, %v9284_v55  ;;  %v9861_v35 = vmul.f32 %v9580_v21, %v9291_v48  ;;  %2613 = vadd.xlane.f32.xlu0 %v9634_v47  ;;  %2619 = vadd.xlane.f32.xlu1 %v9637_v36 }
 0x5da   :  { %14307 = vst [vmem:[#allocation101_spill] sm:$0xff] %v9841_v25  ;;  %14308 = vst [vmem:[#allocation102_spill] sm:$0xff] %v9845_v53  ;;  %v9865_v25 = vmul.f32 %v9580_v21, %v9143_v56  ;;  %v9869_v53 = vmul.f32 %v9580_v21, %v9312_v5  ;;  %v9977_v47 = vmul.f32 %v9578_v12, %v9263_v61 }
 0x5db   :  { %14309 = vst [vmem:[#allocation103_spill] sm:$0xff] %v9849_v42  ;;  %14310 = vst [vmem:[#allocation104_spill] sm:$0xff] %v9853_v44  ;;  %v9873_v42 = vmul.f32 %v9580_v21, %v9167_v4  ;;  %v9877_v44 = vmul.f32 %v9580_v21, %v9153_v57  ;;  %v9981_v36 = vmul.f32 %v9578_v12, %v9256_v17 }
 0x5dc   :  { %14311 = vst [vmem:[#allocation105_spill] sm:$0xff] %v9857_v19  ;;  %14312 = vst [vmem:[#allocation106_spill] sm:$0xff] %v9861_v35  ;;  %v9881_v19 = vmul.f32 %v9580_v21, %v9188_v3  ;;  %v9885_v35 = vmul.f32 %v9580_v21, %v9174_v9 }
 0x5dd   :  { %14313 = vst [vmem:[#allocation107_spill] sm:$0xff] %v9865_v25  ;;  %14314 = vst [vmem:[#allocation108_spill] sm:$0xff] %v9869_v53  ;;  %v9889_v25 = vmul.f32 %v9580_v21, %v9209_v6  ;;  %v9893_v53 = vmul.f32 %v9580_v21, %v9195_v18  ;;  %2617 = vadd.xlane.f32.xlu0 %v9640_v37  ;;  %2623 = vadd.xlane.f32.xlu1 %v9643_v1 }
 0x5de   :  { %14315 = vst [vmem:[#allocation109_spill] sm:$0xff] %v9877_v44  ;;  %14316 = vst [vmem:[#allocation110_spill] sm:$0xff] %v9881_v19  ;;  %v9899_v44 = vmul.f32 %v9580_v21, %v9230_v32  ;;  %v9903_v19 = vmul.f32 %v9580_v21, %v9216_v28  ;;  %v10039_v37 = vmul.f32 %v9578_v12, %v9174_v9 }
 0x5df   :  { %14317 = vst [vmem:[#allocation111_spill] sm:$0xff] %v9885_v35  ;;  %14318 = vst [vmem:[#allocation112_spill] sm:$0xff] %v9889_v25  ;;  %v9907_v35 = vmul.f32 %v9578_v12, %v9137_v8  ;;  %v9911_v25 = vmul.f32 %v9580_v21, %v9237_v46  ;;  %v9927_v8 = vmul.f32 %v9578_v12, %v9179_v31 }
 0x5e0   :  { %14319 = vst [vmem:[#allocation113_spill] sm:$0xff] %v9899_v44  ;;  %14321 = vst [vmem:[#allocation115_spill] sm:$0xff] %v9915_v0  ;;  %v9923_v44 = vmul.f32 %v9578_v12, %v9158_v43  ;;  %v9931_v21 = vmul.f32 %v9578_v12, %v9172_v62  ;;  %v9939_v0 = vmul.f32 %v9578_v12, %v9186_v54 }
 0x5e1   :  { %14320 = vst [vmem:[#allocation114_spill] sm:$0xff] %v9911_v25  ;;  %14322 = vst [vmem:[#allocation116_spill] sm:$0xff] %v9919_v59  ;;  %v9943_v59 = vmul.f32 %v9578_v12, %v9207_v20  ;;  %v10043_v1 = vmul.f32 %v9578_v12, %v9195_v18 }
 0x5e2   :  { %14323 = vst [vmem:[#allocation117_spill] sm:$0xff] %v9923_v44  ;;  %14324 = vst [vmem:[#allocation118_spill] sm:$0xff] %v9927_v8  ;;  %v9947_v44 = vmul.f32 %v9578_v12, %v9200_v15  ;;  %v9951_v8 = vmul.f32 %v9578_v12, %v9221_v60 }
 0x5e3   :  { %14325 = vst [vmem:[#allocation119_spill] sm:$0xff] %v9931_v21  ;;  %14326 = vst [vmem:[#allocation120_spill] sm:$0xff] %v9935_v7  ;;  %v9955_v21 = vmul.f32 %v9578_v12, %v9214_v2 }
 0x5e4   :  { %14327 = vst [vmem:[#allocation121_spill] sm:$0xff] %v9939_v0  ;;  %14328 = vst [vmem:[#allocation122_spill] sm:$0xff] %v9943_v59  ;;  %v9961_v0 = vmul.f32 %v9578_v12, %v9235_v11  ;;  %v9965_v59 = vmul.f32 %v9578_v12, %v9228_v24 }
 0x5e5   :  { %14329 = vst [vmem:[#allocation123_spill] sm:$0xff] %v9947_v44  ;;  %14330 = vst [vmem:[#allocation124_spill] sm:$0xff] %v9951_v8  ;;  %v9969_v44 = vmul.f32 %v9578_v12, %v9249_v41  ;;  %v9973_v8 = vmul.f32 %v9578_v12, %v9242_v58 }
 0x5e6   :  { %14331 = vst [vmem:[#allocation125_spill] sm:$0xff] %v9955_v21  ;;  %14332 = vst [vmem:[#allocation126_spill] sm:$0xff] %v9961_v0  ;;  %v14338_v0 = vld [vmem:[#allocation33_spill] sm:$0xff] }
 0x5e7   :  { %14333 = vst [vmem:[#allocation127_spill] sm:$0xff] %v9965_v59  ;;  %14334 = vst [vmem:[#allocation128_spill] sm:$0xff] %v9969_v44  ;;  %v9985_v21 = vmul.f32 %v9578_v12, %v14338_v0  ;;  %v9989_v59 = vmul.f32 %v9578_v12, %v9270_v30  ;;  %v9993_v44 = vmul.f32 %v9578_v12, %v9291_v48 }
 0x5e8   :  { %14335 = vst [vmem:[#allocation129_spill] sm:$0xff] %v9973_v8  ;;  %14336 = vst [vmem:[#allocation130_spill] sm:$0xff] %v9977_v47  ;;  %v9997_v8 = vmul.f32 %v9578_v12, %v9284_v55  ;;  %v10001_v47 = vmul.f32 %v9578_v12, %v9305_v33 }
 0x5e9   :  { %14337 = vst [vmem:[#allocation131_spill] sm:$0xff] %v9981_v36  ;;  %14339 = vst [vmem:[#allocation132_spill] sm:$0xff] %v9985_v21  ;;  %v14344_v36 = vld [vmem:[#allocation44_spill] sm:$0xff]  ;;  %v10009_v21 = vmul.f32 %v9578_v12, %v9139_v29 }
 0x5ea   :  { %14340 = vst [vmem:[#allocation133_spill] sm:$0xff] %v9989_v59  ;;  %14341 = vst [vmem:[#allocation134_spill] sm:$0xff] %v9993_v44  ;;  %v10005_v7 = vmul.f32 %v9578_v12, %v14344_v36  ;;  %v10013_v59 = vmul.f32 %v9578_v12, %v9312_v5  ;;  %v10017_v44 = vmul.f32 %v9578_v12, %v9153_v57 }
 0x5eb   :  { %14342 = vst [vmem:[#allocation135_spill] sm:$0xff] %v9997_v8  ;;  %14343 = vst [vmem:[#allocation136_spill] sm:$0xff] %v10001_v47  ;;  %v10023_v47 = vmul.f32 %v9578_v12, %v9143_v56  ;;  %v14366_v8 = vld [vmem:[#allocation62_spill] sm:$0xff] }
 0x5ec   :  { %14345 = vst [vmem:[#allocation137_spill] sm:$0xff] %v10005_v7  ;;  %14346 = vst [vmem:[#allocation138_spill] sm:$0xff] %v10009_v21  ;;  %v10027_v7 = vmul.f32 %v9578_v12, %v9167_v4  ;;  %v10031_v21 = vmul.f32 %v9578_v12, %v9160_v63  ;;  %2627 = vadd.xlane.f32.xlu1 %v14366_v8  ;;  %v10105_v8 = vmul.f32 %v9589_v14, %v9207_v20 }
 0x5ed   :  { %14347 = vst [vmem:[#allocation139_spill] sm:$0xff] %v10013_v59  ;;  %14348 = vst [vmem:[#allocation140_spill] sm:$0xff] %v10017_v44  ;;  %v10035_v59 = vmul.f32 %v9578_v12, %v9181_v50 }
 0x5ee   :  { %14349 = vst [vmem:[#allocation141_spill] sm:$0xff] %v10023_v47  ;;  %14350 = vst [vmem:[#allocation142_spill] sm:$0xff] %v10027_v7  ;;  %v10047_v47 = vmul.f32 %v9578_v12, %v9188_v3  ;;  %v10051_v7 = vmul.f32 %v9578_v12, %v9209_v6 }
 0x5ef   :  { %14351 = vst [vmem:[#allocation143_spill] sm:$0xff] %v10031_v21  ;;  %14352 = vst [vmem:[#allocation144_spill] sm:$0xff] %v10035_v59  ;;  %v10055_v21 = vmul.f32 %v9578_v12, %v9202_v51  ;;  %v10059_v59 = vmul.f32 %v9578_v12, %v9223_v26 }
 0x5f0   :  { %14353 = vst [vmem:[#allocation145_spill] sm:$0xff] %v10039_v37  ;;  %14354 = vst [vmem:[#allocation146_spill] sm:$0xff] %v10043_v1  ;;  %v10063_v37 = vmul.f32 %v9578_v12, %v9216_v28  ;;  %v10067_v1 = vmul.f32 %v9578_v12, %v9237_v46 }
 0x5f1   :  { %14355 = vst [vmem:[#allocation147_spill] sm:$0xff] %v10047_v47  ;;  %14356 = vst [vmem:[#allocation148_spill] sm:$0xff] %v10051_v7  ;;  %v10071_v47 = vmul.f32 %v9578_v12, %v9230_v32  ;;  %v10075_v7 = vmul.f32 %v9589_v14, %v9158_v43 }
 0x5f2   :  { %14357 = vst [vmem:[#allocation149_spill] sm:$0xff] %v10055_v21  ;;  %14358 = vst [vmem:[#allocation150_spill] sm:$0xff] %v10059_v59  ;;  %v14363_v21 = vld [vmem:[#allocation35_spill] sm:$0xff]  ;;  %v14365_v59 = vld [vmem:[#allocation61_spill] sm:$0xff] }
 0x5f3   :  { %14359 = vst [vmem:[#allocation151_spill] sm:$0xff] %v10063_v37  ;;  %14360 = vst [vmem:[#allocation152_spill] sm:$0xff] %v10067_v1  ;;  %v10079_v44 = vmul.f32 %v9578_v12, %v14363_v21  ;;  %2621 = vadd.xlane.f32.xlu0 %v14365_v59  ;;  %v10085_v37 = vmul.f32 %v9589_v14, %v9179_v31  ;;  %v10089_v1 = vmul.f32 %v9589_v14, %v9165_v49 }
 0x5f4   :  { %14361 = vst [vmem:[#allocation153_spill] sm:$0xff] %v10071_v47  ;;  %14362 = vst [vmem:[#allocation154_spill] sm:$0xff] %v10075_v7  ;;  %v10093_v47 = vmul.f32 %v9589_v14, %v9200_v15  ;;  %v10097_v12 = vmul.f32 %v9589_v14, %v9186_v54  ;;  %v10101_v59 = vmul.f32 %v9589_v14, %v9221_v60 }
 0x5f5   :  { %14364 = vst [vmem:[#allocation155_spill] sm:$0xff] %v10079_v44  ;;  %14367 = vst [vmem:[#allocation61_spill] sm:$0xff] %v10085_v37  ;;  %v10109_v37 = vmul.f32 %v9589_v14, %v9242_v58  ;;  %v14383_v44 = vld [vmem:[#allocation64_spill] sm:$0xff] }
 0x5f6   :  { %14368 = vst [vmem:[#allocation62_spill] sm:$0xff] %v10089_v1  ;;  %14369 = vst [vmem:[#allocation156_spill] sm:$0xff] %v10093_v47  ;;  %v10113_v1 = vmul.f32 %v9589_v14, %v9228_v24  ;;  %v10117_v47 = vmul.f32 %v9589_v14, %v9263_v61  ;;  %2631 = vadd.xlane.f32.xlu1 %v14383_v44  ;;  %v10167_v44 = vmul.f32 %v9589_v14, %v9209_v6 }
 0x5f7   :  { %14370 = vst [vmem:[#allocation157_spill] sm:$0xff] %v10097_v12  ;;  %14371 = vst [vmem:[#allocation158_spill] sm:$0xff] %v10101_v59  ;;  %v10121_v12 = vmul.f32 %v9589_v14, %v9249_v41  ;;  %v10125_v59 = vmul.f32 %v9589_v14, %v9284_v55 }
 0x5f8   :  { %14372 = vst [vmem:[#allocation159_spill] sm:$0xff] %v10105_v8  ;;  %14373 = vst [vmem:[#allocation160_spill] sm:$0xff] %v10109_v37  ;;  %v10129_v8 = vmul.f32 %v9589_v14, %v9270_v30  ;;  %v10133_v37 = vmul.f32 %v9589_v14, %v9305_v33 }
 0x5f9   :  { %14374 = vst [vmem:[#allocation161_spill] sm:$0xff] %v10113_v1  ;;  %14375 = vst [vmem:[#allocation162_spill] sm:$0xff] %v10117_v47  ;;  %v10137_v1 = vmul.f32 %v9589_v14, %v9291_v48  ;;  %v10141_v47 = vmul.f32 %v9589_v14, %v9143_v56 }
 0x5fa   :  { %14376 = vst [vmem:[#allocation163_spill] sm:$0xff] %v10121_v12  ;;  %14377 = vst [vmem:[#allocation164_spill] sm:$0xff] %v10125_v59  ;;  %v14382_v12 = vld [vmem:[#allocation63_spill] sm:$0xff]  ;;  %v10147_v59 = vmul.f32 %v9589_v14, %v9312_v5  ;;  %2635 = vadd.xlane.f32.xlu1 %v9661_v27 }
 0x5fb   :  { %14378 = vst [vmem:[#allocation165_spill] sm:$0xff] %v10129_v8  ;;  %14379 = vst [vmem:[#allocation166_spill] sm:$0xff] %v10133_v37  ;;  %2625 = vadd.xlane.f32.xlu0 %v14382_v12  ;;  %v10151_v8 = vmul.f32 %v9589_v14, %v9167_v4  ;;  %v10155_v37 = vmul.f32 %v9589_v14, %v9153_v57  ;;  %v10163_v12 = vmul.f32 %v9589_v14, %v9174_v9 }
 0x5fc   :  { %14380 = vst [vmem:[#allocation167_spill] sm:$0xff] %v10137_v1  ;;  %14381 = vst [vmem:[#allocation168_spill] sm:$0xff] %v10141_v47  ;;  %v10159_v1 = vmul.f32 %v9589_v14, %v9188_v3 }
 0x5fd   :  { %14384 = vst [vmem:[#allocation63_spill] sm:$0xff] %v10147_v59  ;;  %14385 = vst [vmem:[#allocation64_spill] sm:$0xff] %v10151_v8  ;;  %v10171_v59 = vmul.f32 %v9589_v14, %v9195_v18  ;;  %v10175_v8 = vmul.f32 %v9589_v14, %v9230_v32 }
 0x5fe   :  { %14386 = vst [vmem:[#allocation169_spill] sm:$0xff] %v10155_v37  ;;  %14387 = vst [vmem:[#allocation170_spill] sm:$0xff] %v10159_v1  ;;  %v10179_v37 = vmul.f32 %v9589_v14, %v9216_v28  ;;  %v14393_v1 = vld [vmem:[#allocation18_spill] sm:$0xff]  ;;  %2639 = vadd.xlane.f32.xlu1 %v9667_v45 }
 0x5ff   :  { %14388 = vst [vmem:[#allocation171_spill] sm:$0xff] %v10163_v12  ;;  %14389 = vst [vmem:[#allocation172_spill] sm:$0xff] %v10167_v44  ;;  %v10183_v47 = vmul.f32 %v9589_v14, %v14393_v1  ;;  %v10187_v12 = vmul.f32 %v9589_v14, %v9237_v46  ;;  %v14395_v44 = vld [vmem:[#allocation49_spill] sm:$0xff]  ;;  %2629 = vadd.xlane.f32.xlu0 %v9658_v39 }
 0x600   :  { %14390 = vst [vmem:[#allocation173_spill] sm:$0xff] %v10171_v59  ;;  %14391 = vst [vmem:[#allocation174_spill] sm:$0xff] %v10175_v8  ;;  %v10191_v7 = vmul.f32 %v14395_v44, %v9158_v43  ;;  %v14396_v59 = vld [vmem:[#allocation28_spill] sm:$0xff]  ;;  %v10199_v8 = vmul.f32 %v14395_v44, %v9179_v31  ;;  %v10225_v39 = vmul.f32 %v14395_v44, %v9242_v58 }
 0x601   :  { %14392 = vst [vmem:[#allocation175_spill] sm:$0xff] %v10179_v37  ;;  %14394 = vst [vmem:[#allocation176_spill] sm:$0xff] %v10187_v12  ;;  %v10195_v25 = vmul.f32 %v9589_v14, %v14396_v59  ;;  %v10203_v37 = vmul.f32 %v14395_v44, %v9165_v49  ;;  %v10209_v12 = vmul.f32 %v14395_v44, %v9200_v15 }
 0x602   :  { %14398 = vst [vmem:[#allocation177_spill] sm:$0xff] %v10199_v8  ;;  %v10213_v14 = vmul.f32 %v14395_v44, %v9186_v54  ;;  %v10221_v8 = vmul.f32 %v14395_v44, %v9207_v20  ;;  %14403 = vst [vmem:[#allocation182_spill] sm:$0xff] %v10225_v39  ;;  %v10229_v27 = vmul.f32 %v14395_v44, %v9228_v24 }
 0x603   :  { %14397 = vst [vmem:[#allocation49_spill] sm:$0xff] %v10195_v25  ;;  %14399 = vst [vmem:[#allocation178_spill] sm:$0xff] %v10209_v12  ;;  %v10217_v25 = vmul.f32 %v14395_v44, %v9221_v60  ;;  %v10233_v12 = vmul.f32 %v14395_v44, %v9263_v61  ;;  %v10249_v39 = vmul.f32 %v14395_v44, %v9305_v33 }
 0x604   :  { %14400 = vst [vmem:[#allocation179_spill] sm:$0xff] %v10213_v14  ;;  %14402 = vst [vmem:[#allocation181_spill] sm:$0xff] %v10221_v8  ;;  %v10237_v14 = vmul.f32 %v14395_v44, %v9249_v41  ;;  %v10245_v8 = vmul.f32 %v14395_v44, %v9270_v30  ;;  %v10291_v45 = vmul.f32 %v14395_v44, %v9230_v32 }
 0x605   :  { %14401 = vst [vmem:[#allocation180_spill] sm:$0xff] %v10217_v25  ;;  %14404 = vst [vmem:[#allocation183_spill] sm:$0xff] %v10229_v27  ;;  %v10241_v25 = vmul.f32 %v14395_v44, %v9284_v55  ;;  %v10253_v27 = vmul.f32 %v14395_v44, %v9291_v48 }
 0x606   :  { %14405 = vst [vmem:[#allocation184_spill] sm:$0xff] %v10233_v12  ;;  %14406 = vst [vmem:[#allocation185_spill] sm:$0xff] %v10237_v14  ;;  %v10257_v12 = vmul.f32 %v14395_v44, %v9143_v56  ;;  %v10261_v14 = vmul.f32 %v14395_v44, %v9312_v5 }
 0x607   :  { %14407 = vst [vmem:[#allocation186_spill] sm:$0xff] %v10241_v25  ;;  %14408 = vst [vmem:[#allocation187_spill] sm:$0xff] %v10245_v8  ;;  %v10265_v25 = vmul.f32 %v14395_v44, %v9167_v4  ;;  %v14414_v8 = vld [vmem:[#allocation65_spill] sm:$0xff] }
 0x608   :  { %14409 = vst [vmem:[#allocation188_spill] sm:$0xff] %v10249_v39  ;;  %14410 = vst [vmem:[#allocation189_spill] sm:$0xff] %v10253_v27  ;;  %2633 = vadd.xlane.f32.xlu0 %v14414_v8  ;;  %v10271_v39 = vmul.f32 %v14395_v44, %v9153_v57  ;;  %v10275_v27 = vmul.f32 %v14395_v44, %v9188_v3  ;;  %v10287_v8 = vmul.f32 %v14395_v44, %v9195_v18 }
 0x609   :  { %14411 = vst [vmem:[#allocation190_spill] sm:$0xff] %v10257_v12  ;;  %14412 = vst [vmem:[#allocation191_spill] sm:$0xff] %v10261_v14  ;;  %v10279_v12 = vmul.f32 %v14395_v44, %v9174_v9  ;;  %v10283_v14 = vmul.f32 %v14395_v44, %v9209_v6 }
 0x60a   :  { %14413 = vst [vmem:[#allocation192_spill] sm:$0xff] %v10265_v25  ;;  %14415 = vst [vmem:[#allocation65_spill] sm:$0xff] %v10271_v39  ;;  %v10295_v39 = vmul.f32 %v14395_v44, %v9216_v28 }
 0x60b   :  { %14416 = vst [vmem:[#allocation193_spill] sm:$0xff] %v10275_v27  ;;  %14417 = vst [vmem:[#allocation194_spill] sm:$0xff] %v10279_v12  ;;  %v10299_v27 = vmul.f32 %v14395_v44, %v14393_v1  ;;  %v10303_v12 = vmul.f32 %v14395_v44, %v9237_v46 }
 0x60c   :  { %14418 = vst [vmem:[#allocation195_spill] sm:$0xff] %v10283_v14  ;;  %14419 = vst [vmem:[#allocation196_spill] sm:$0xff] %v10287_v8  ;;  %v14424_v14 = vld [vmem:[#allocation50_spill] sm:$0xff]  ;;  %v10311_v8 = vmul.f32 %v14395_v44, %v14396_v59  ;;  %v14431_v44 = vld [vmem:[#allocation67_spill] sm:$0xff] }
 0x60d   :  { %14420 = vst [vmem:[#allocation197_spill] sm:$0xff] %v10291_v45  ;;  %14421 = vst [vmem:[#allocation198_spill] sm:$0xff] %v10295_v39  ;;  %v10307_v25 = vmul.f32 %v14424_v14, %v9158_v43  ;;  %v10315_v45 = vmul.f32 %v14424_v14, %v9179_v31  ;;  %v10319_v39 = vmul.f32 %v14424_v14, %v9165_v49  ;;  %2643 = vadd.xlane.f32.xlu1 %v14431_v44 }
 0x60e   :  { %14422 = vst [vmem:[#allocation199_spill] sm:$0xff] %v10299_v27  ;;  %14423 = vst [vmem:[#allocation200_spill] sm:$0xff] %v10303_v12  ;;  %v10323_v27 = vmul.f32 %v14424_v14, %v9200_v15  ;;  %v10327_v12 = vmul.f32 %v14424_v14, %v9186_v54  ;;  %v10353_v44 = vmul.f32 %v14424_v14, %v9249_v41 }
 0x60f   :  { %14425 = vst [vmem:[#allocation50_spill] sm:$0xff] %v10307_v25  ;;  %14426 = vst [vmem:[#allocation201_spill] sm:$0xff] %v10311_v8  ;;  %v14430_v25 = vld [vmem:[#allocation66_spill] sm:$0xff]  ;;  %v10333_v8 = vmul.f32 %v14424_v14, %v9221_v60 }
 0x610   :  { %14427 = vst [vmem:[#allocation202_spill] sm:$0xff] %v10315_v45  ;;  %14428 = vst [vmem:[#allocation203_spill] sm:$0xff] %v10319_v39  ;;  %2637 = vadd.xlane.f32.xlu0 %v14430_v25  ;;  %v10337_v45 = vmul.f32 %v14424_v14, %v9207_v20  ;;  %v10341_v39 = vmul.f32 %v14424_v14, %v9242_v58  ;;  %v10349_v25 = vmul.f32 %v14424_v14, %v9263_v61 }
 0x611   :  { %14429 = vst [vmem:[#allocation204_spill] sm:$0xff] %v10323_v27  ;;  %14432 = vst [vmem:[#allocation66_spill] sm:$0xff] %v10333_v8  ;;  %v10345_v27 = vmul.f32 %v14424_v14, %v9228_v24  ;;  %v10357_v8 = vmul.f32 %v14424_v14, %v9284_v55  ;;  %2707 = vadd.xlane.f32.xlu1 %v9680_v40  ;;  %v10415_v40 = vmul.f32 %v14424_v14, %v14393_v1 }
 0x612   :  { %14433 = vst [vmem:[#allocation67_spill] sm:$0xff] %v10337_v45  ;;  %14434 = vst [vmem:[#allocation205_spill] sm:$0xff] %v10341_v39  ;;  %v10361_v45 = vmul.f32 %v14424_v14, %v9270_v30  ;;  %v10365_v39 = vmul.f32 %v14424_v14, %v9305_v33 }
 0x613   :  { %14435 = vst [vmem:[#allocation206_spill] sm:$0xff] %v10345_v27  ;;  %14436 = vst [vmem:[#allocation207_spill] sm:$0xff] %v10349_v25  ;;  %v10369_v27 = vmul.f32 %v14424_v14, %v9291_v48  ;;  %v10373_v25 = vmul.f32 %v14424_v14, %v9143_v56 }
 0x614   :  { %14437 = vst [vmem:[#allocation208_spill] sm:$0xff] %v10353_v44  ;;  %14438 = vst [vmem:[#allocation209_spill] sm:$0xff] %v10357_v8  ;;  %v10377_v44 = vmul.f32 %v14424_v14, %v9312_v5  ;;  %v10381_v8 = vmul.f32 %v14424_v14, %v9167_v4 }
 0x615   :  { %14439 = vst [vmem:[#allocation210_spill] sm:$0xff] %v10361_v45  ;;  %14440 = vst [vmem:[#allocation211_spill] sm:$0xff] %v10365_v39  ;;  %v10385_v45 = vmul.f32 %v14424_v14, %v9153_v57  ;;  %v10389_v39 = vmul.f32 %v14424_v14, %v9188_v3 }
 0x616   :  { %14441 = vst [vmem:[#allocation212_spill] sm:$0xff] %v10369_v27  ;;  %14442 = vst [vmem:[#allocation213_spill] sm:$0xff] %v10373_v25  ;;  %v14447_v27 = vld [vmem:[#allocation68_spill] sm:$0xff]  ;;  %v10395_v25 = vmul.f32 %v14424_v14, %v9174_v9 }
 0x617   :  { %14443 = vst [vmem:[#allocation214_spill] sm:$0xff] %v10377_v44  ;;  %14444 = vst [vmem:[#allocation215_spill] sm:$0xff] %v10381_v8  ;;  %2641 = vadd.xlane.f32.xlu0 %v14447_v27  ;;  %v10399_v44 = vmul.f32 %v14424_v14, %v9209_v6  ;;  %v10403_v8 = vmul.f32 %v14424_v14, %v9195_v18  ;;  %v10411_v27 = vmul.f32 %v14424_v14, %v9216_v28 }
 0x618   :  { %14445 = vst [vmem:[#allocation216_spill] sm:$0xff] %v10385_v45  ;;  %14446 = vst [vmem:[#allocation217_spill] sm:$0xff] %v10389_v39  ;;  %v10407_v45 = vmul.f32 %v14424_v14, %v9230_v32 }
 0x619   :  { %14448 = vst [vmem:[#allocation68_spill] sm:$0xff] %v10395_v25  ;;  %14449 = vst [vmem:[#allocation218_spill] sm:$0xff] %v10399_v44  ;;  %v10419_v25 = vmul.f32 %v14424_v14, %v9237_v46  ;;  %v14454_v44 = vld [vmem:[#allocation51_spill] sm:$0xff] }
 0x61a   :  { %14450 = vst [vmem:[#allocation219_spill] sm:$0xff] %v10403_v8  ;;  %14451 = vst [vmem:[#allocation220_spill] sm:$0xff] %v10407_v45  ;;  %v10423_v39 = vmul.f32 %v14454_v44, %v9158_v43  ;;  %v10427_v8 = vmul.f32 %v14424_v14, %v14396_v59  ;;  %v10431_v45 = vmul.f32 %v14454_v44, %v9172_v62 }
 0x61b   :  { %14452 = vst [vmem:[#allocation221_spill] sm:$0xff] %v10411_v27  ;;  %14453 = vst [vmem:[#allocation222_spill] sm:$0xff] %v10415_v40  ;;  %v10435_v27 = vmul.f32 %v14454_v44, %v9165_v49  ;;  %v10439_v40 = vmul.f32 %v14454_v44, %v9186_v54  ;;  %v10443_v43 = vmul.f32 %v14454_v44, %v9179_v31  ;;  %v14464_v49 = vld [vmem:[#allocation70_spill] sm:$0xff] }
 0x61c   :  { %14455 = vst [vmem:[#allocation51_spill] sm:$0xff] %v10423_v39  ;;  %14456 = vst [vmem:[#allocation223_spill] sm:$0xff] %v10427_v8  ;;  %v10447_v14 = vmul.f32 %v14454_v44, %v9200_v15  ;;  %v10451_v62 = vmul.f32 %v14454_v44, %v9193_v34  ;;  %2711 = vadd.xlane.f32.xlu1 %v14464_v49  ;;  %v10477_v49 = vmul.f32 %v14454_v44, %v9235_v11 }
 0x61d   :  { %14457 = vst [vmem:[#allocation224_spill] sm:$0xff] %v10431_v45  ;;  %14458 = vst [vmem:[#allocation225_spill] sm:$0xff] %v10435_v27  ;;  %v14463_v45 = vld [vmem:[#allocation69_spill] sm:$0xff]  ;;  %v10457_v27 = vmul.f32 %v14454_v44, %v9214_v2 }
 0x61e   :  { %14459 = vst [vmem:[#allocation226_spill] sm:$0xff] %v10439_v40  ;;  %14460 = vst [vmem:[#allocation227_spill] sm:$0xff] %v10443_v43  ;;  %2645 = vadd.xlane.f32.xlu0 %v14463_v45  ;;  %v10461_v40 = vmul.f32 %v14454_v44, %v9207_v20  ;;  %v10465_v43 = vmul.f32 %v14454_v44, %v9228_v24  ;;  %v10473_v45 = vmul.f32 %v14454_v44, %v9242_v58 }
 0x61f   :  { %14461 = vst [vmem:[#allocation228_spill] sm:$0xff] %v10447_v14  ;;  %14462 = vst [vmem:[#allocation229_spill] sm:$0xff] %v10451_v62  ;;  %v10469_v14 = vmul.f32 %v14454_v44, %v9221_v60  ;;  %v10501_v62 = vpop.xlane.xlu1 %6119 }
 0x620   :  { %14465 = vst [vmem:[#allocation69_spill] sm:$0xff] %v10457_v27  ;;  %14466 = vst [vmem:[#allocation70_spill] sm:$0xff] %v10461_v40  ;;  %v10481_v27 = vmul.f32 %v14454_v44, %v9256_v17  ;;  %v10485_v40 = vmul.f32 %v14454_v44, %v9249_v41 }
 0x621   :  { %14467 = vst [vmem:[#allocation230_spill] sm:$0xff] %v10465_v43  ;;  %14468 = vst [vmem:[#allocation231_spill] sm:$0xff] %v10469_v14  ;;  %v10489_v43 = vmul.f32 %v14454_v44, %v9270_v30  ;;  %v10493_v14 = vmul.f32 %v14454_v44, %v9263_v61 }
 0x622   :  { %14469 = vst [vmem:[#allocation232_spill] sm:$0xff] %v10473_v45  ;;  %14470 = vst [vmem:[#allocation233_spill] sm:$0xff] %v10477_v49  ;;  %v10497_v45 = vmul.f32 %v14454_v44, %v9284_v55  ;;  %v10499_v49 = vpop.xlane.xlu0 %6123  ;;  %2709 = vadd.xlane.f32.xlu0 %v9691_v16  ;;  %v10539_v16 = vmul.f32 %v14454_v44, %v9153_v57 }
 0x623   :  { %14471 = vst [vmem:[#allocation234_spill] sm:$0xff] %v10481_v27  ;;  %14472 = vst [vmem:[#allocation235_spill] sm:$0xff] %v10485_v40  ;;  %v10505_v27 = vmul.f32 %v14454_v44, %v14338_v0  ;;  %v10509_v40 = vmul.f32 %v14454_v44, %v14344_v36 }
 0x624   :  { %14473 = vst [vmem:[#allocation236_spill] sm:$0xff] %v10489_v43  ;;  %14474 = vst [vmem:[#allocation237_spill] sm:$0xff] %v10493_v14  ;;  %v10513_v43 = vmul.f32 %v14454_v44, %v9291_v48  ;;  %v10517_v14 = vmul.f32 %v14454_v44, %v9312_v5 }
 0x625   :  { %14475 = vst [vmem:[#allocation238_spill] sm:$0xff] %v10497_v45  ;;  %14476 = vst [vmem:[#allocation239_spill] sm:$0xff] %v10499_v49  ;;  %v14482_v49 = vld [vmem:[#allocation71_spill] sm:$0xff]  ;;  %v10597_v45 = vpop.xlane.xlu1 %6126 }
 0x626   :  { %14477 = vst [vmem:[#allocation240_spill] sm:$0xff] %v10501_v62  ;;  %14478 = vst [vmem:[#allocation241_spill] sm:$0xff] %v10505_v27  ;;  %2715 = vadd.xlane.f32.xlu1 %v14482_v49  ;;  %v10523_v62 = vmul.f32 %v14454_v44, %v9305_v33  ;;  %v10527_v27 = vmul.f32 %v14454_v44, %v9143_v56  ;;  %v10543_v49 = vmul.f32 %v14454_v44, %v9174_v9 }
 0x627   :  { %14479 = vst [vmem:[#allocation242_spill] sm:$0xff] %v10509_v40  ;;  %14480 = vst [vmem:[#allocation243_spill] sm:$0xff] %v10513_v43  ;;  %v10531_v40 = vmul.f32 %v14454_v44, %v9139_v29  ;;  %v10535_v43 = vmul.f32 %v14454_v44, %v9160_v63 }
 0x628   :  { %14481 = vst [vmem:[#allocation244_spill] sm:$0xff] %v10517_v14  ;;  %14483 = vst [vmem:[#allocation71_spill] sm:$0xff] %v10523_v62  ;;  %v10547_v62 = vmul.f32 %v14454_v44, %v9167_v4  ;;  %v14499_v14 = vld [vmem:[#allocation73_spill] sm:$0xff] }
 0x629   :  { %14484 = vst [vmem:[#allocation245_spill] sm:$0xff] %v10527_v27  ;;  %14485 = vst [vmem:[#allocation246_spill] sm:$0xff] %v10531_v40  ;;  %v10551_v27 = vmul.f32 %v14454_v44, %v9188_v3  ;;  %v10555_v40 = vmul.f32 %v14454_v44, %v9181_v50 }
 0x62a   :  { %14486 = vst [vmem:[#allocation247_spill] sm:$0xff] %v10535_v43  ;;  %14487 = vst [vmem:[#allocation248_spill] sm:$0xff] %v10539_v16  ;;  %v10559_v43 = vmul.f32 %v14454_v44, %v9202_v51  ;;  %v10563_v16 = vmul.f32 %v14454_v44, %v9195_v18  ;;  %2719 = vadd.xlane.f32.xlu1 %v14499_v14  ;;  %v14506_v14 = vld [vmem:[#allocation55_spill] sm:$0xff] }
 0x62b   :  { %14488 = vst [vmem:[#allocation249_spill] sm:$0xff] %v10543_v49  ;;  %14489 = vst [vmem:[#allocation250_spill] sm:$0xff] %v10547_v62  ;;  %v10567_v49 = vmul.f32 %v14454_v44, %v9216_v28  ;;  %v10571_v62 = vmul.f32 %v14454_v44, %v9209_v6 }
 0x62c   :  { %14490 = vst [vmem:[#allocation251_spill] sm:$0xff] %v10551_v27  ;;  %14491 = vst [vmem:[#allocation252_spill] sm:$0xff] %v10555_v40  ;;  %v10575_v27 = vmul.f32 %v14454_v44, %v9230_v32  ;;  %v10579_v40 = vmul.f32 %v14454_v44, %v9223_v26 }
 0x62d   :  { %14492 = vst [vmem:[#allocation253_spill] sm:$0xff] %v10559_v43  ;;  %14493 = vst [vmem:[#allocation254_spill] sm:$0xff] %v10563_v16  ;;  %v14498_v43 = vld [vmem:[#allocation72_spill] sm:$0xff]  ;;  %v10585_v16 = vmul.f32 %v14454_v44, %v14363_v21 }
 0x62e   :  { %14494 = vst [vmem:[#allocation255_spill] sm:$0xff] %v10567_v49  ;;  %14495 = vst [vmem:[#allocation256_spill] sm:$0xff] %v10571_v62  ;;  %2713 = vadd.xlane.f32.xlu0 %v14498_v43  ;;  %v10589_v49 = vmul.f32 %v14454_v44, %v9237_v46  ;;  %v10593_v62 = vmul.f32 %v14454_v44, %v14396_v59  ;;  %v10601_v43 = vmul.f32 %v14454_v44, %v14393_v1 }
 0x62f   :  { %14496 = vst [vmem:[#allocation257_spill] sm:$0xff] %v10575_v27  ;;  %14497 = vst [vmem:[#allocation258_spill] sm:$0xff] %v10579_v40  ;;  %v10595_v27 = vpop.xlane.xlu0 %6129  ;;  %v10605_v40 = vmul.f32 %v14506_v14, %v9179_v31  ;;  %2723 = vadd.xlane.f32.xlu1 %v9711_v10  ;;  %v10671_v10 = vmul.f32 %v14506_v14, %v9167_v4 }
 0x630   :  { %14500 = vst [vmem:[#allocation72_spill] sm:$0xff] %v10585_v16  ;;  %14501 = vst [vmem:[#allocation73_spill] sm:$0xff] %v10589_v49  ;;  %v14508_v16 = vld [vmem:[#allocation24_spill] sm:$0xff]  ;;  %v10613_v49 = vmul.f32 %v14506_v14, %v9200_v15 }
 0x631   :  { %14502 = vst [vmem:[#allocation259_spill] sm:$0xff] %v10593_v62  ;;  %14503 = vst [vmem:[#allocation260_spill] sm:$0xff] %v10595_v27  ;;  %v10609_v8 = vmul.f32 %v14454_v44, %v14508_v16  ;;  %v10617_v27 = vmul.f32 %v14506_v14, %v9186_v54  ;;  %v10629_v44 = vmul.f32 %v14506_v14, %v9242_v58 }
 0x632   :  { %14504 = vst [vmem:[#allocation261_spill] sm:$0xff] %v10597_v45  ;;  %14505 = vst [vmem:[#allocation262_spill] sm:$0xff] %v10601_v43  ;;  %v10621_v45 = vmul.f32 %v14506_v14, %v9221_v60  ;;  %v10625_v43 = vmul.f32 %v14506_v14, %v9207_v20 }
 0x633   :  { %14507 = vst [vmem:[#allocation55_spill] sm:$0xff] %v10605_v40  ;;  %14509 = vst [vmem:[#allocation263_spill] sm:$0xff] %v10609_v8  ;;  %v10633_v8 = vmul.f32 %v14506_v14, %v9228_v24 }
 0x634   :  { %14510 = vst [vmem:[#allocation264_spill] sm:$0xff] %v10613_v49  ;;  %14511 = vst [vmem:[#allocation265_spill] sm:$0xff] %v10617_v27  ;;  %v10637_v49 = vmul.f32 %v14506_v14, %v9263_v61  ;;  %v10641_v27 = vmul.f32 %v14506_v14, %v9249_v41 }
 0x635   :  { %14512 = vst [vmem:[#allocation266_spill] sm:$0xff] %v10621_v45  ;;  %14513 = vst [vmem:[#allocation267_spill] sm:$0xff] %v10625_v43  ;;  %v10645_v45 = vmul.f32 %v14506_v14, %v9284_v55  ;;  %v14519_v43 = vld [vmem:[#allocation74_spill] sm:$0xff] }
 0x636   :  { %14514 = vst [vmem:[#allocation268_spill] sm:$0xff] %v10629_v44  ;;  %14515 = vst [vmem:[#allocation269_spill] sm:$0xff] %v10633_v8  ;;  %2717 = vadd.xlane.f32.xlu0 %v14519_v43  ;;  %v10651_v44 = vmul.f32 %v14506_v14, %v9270_v30  ;;  %v10655_v8 = vmul.f32 %v14506_v14, %v9305_v33  ;;  %v10667_v43 = vmul.f32 %v14506_v14, %v9312_v5 }
 0x637   :  { %14516 = vst [vmem:[#allocation270_spill] sm:$0xff] %v10637_v49  ;;  %14517 = vst [vmem:[#allocation271_spill] sm:$0xff] %v10641_v27  ;;  %v10659_v49 = vmul.f32 %v14506_v14, %v9291_v48  ;;  %v10663_v27 = vmul.f32 %v14506_v14, %v9143_v56 }
 0x638   :  { %14518 = vst [vmem:[#allocation272_spill] sm:$0xff] %v10645_v45  ;;  %14520 = vst [vmem:[#allocation74_spill] sm:$0xff] %v10651_v44  ;;  %v10675_v44 = vmul.f32 %v14506_v14, %v9153_v57  ;;  %v10695_v45 = vpop.xlane.xlu1 %6132 }
 0x639   :  { %14521 = vst [vmem:[#allocation273_spill] sm:$0xff] %v10655_v8  ;;  %14522 = vst [vmem:[#allocation274_spill] sm:$0xff] %v10659_v49  ;;  %v10679_v8 = vmul.f32 %v14506_v14, %v9188_v3  ;;  %v10683_v49 = vmul.f32 %v14506_v14, %v9174_v9 }
 0x63a   :  { %14523 = vst [vmem:[#allocation275_spill] sm:$0xff] %v10663_v27  ;;  %14524 = vst [vmem:[#allocation276_spill] sm:$0xff] %v10667_v43  ;;  %v10687_v27 = vmul.f32 %v14506_v14, %v9209_v6  ;;  %v10691_v43 = vmul.f32 %v14506_v14, %v9195_v18 }
 0x63b   :  { %14525 = vst [vmem:[#allocation277_spill] sm:$0xff] %v10671_v10  ;;  %14526 = vst [vmem:[#allocation278_spill] sm:$0xff] %v10675_v44  ;;  %v10693_v10 = vpop.xlane.xlu0 %6135  ;;  %v10699_v44 = vmul.f32 %v14506_v14, %v9230_v32 }
 0x63c   :  { %14527 = vst [vmem:[#allocation279_spill] sm:$0xff] %v10679_v8  ;;  %14528 = vst [vmem:[#allocation280_spill] sm:$0xff] %v10683_v49  ;;  %v10703_v8 = vmul.f32 %v14506_v14, %v9216_v28  ;;  %v10707_v49 = vmul.f32 %v14506_v14, %v14393_v1 }
 0x63d   :  { %14529 = vst [vmem:[#allocation281_spill] sm:$0xff] %v10687_v27  ;;  %14530 = vst [vmem:[#allocation282_spill] sm:$0xff] %v10691_v43  ;;  %v10711_v27 = vmul.f32 %v14506_v14, %v9237_v46  ;;  %v14537_v43 = vld [vmem:[#allocation75_spill] sm:$0xff] }
 0x63e   :  { %14531 = vst [vmem:[#allocation283_spill] sm:$0xff] %v10693_v10  ;;  %14532 = vst [vmem:[#allocation284_spill] sm:$0xff] %v10695_v45  ;;  %2721 = vadd.xlane.f32.xlu0 %v14537_v43  ;;  %v14538_v10 = vld [vmem:[#allocation76_spill] sm:$0xff] }
 0x63f   :  { %14533 = vst [vmem:[#allocation285_spill] sm:$0xff] %v10699_v44  ;;  %14534 = vst [vmem:[#allocation286_spill] sm:$0xff] %v10703_v8  ;;  %2727 = vadd.xlane.f32.xlu1 %v14538_v10  ;;  %v14539_v45 = vld [vmem:[#allocation32_spill] sm:$0xff]  ;;  %v10721_v44 = vmul.f32 %v14506_v14, %v14396_v59 }
 0x640   :  { %14535 = vst [vmem:[#allocation287_spill] sm:$0xff] %v10707_v49  ;;  %14536 = vst [vmem:[#allocation288_spill] sm:$0xff] %v10711_v27  ;;  %v10717_v40 = vmul.f32 %v14506_v14, %v14539_v45  ;;  %v14542_v8 = vld [vmem:[#allocation52_spill] sm:$0xff]  ;;  %v14544_v49 = vld [vmem:[#allocation39_spill] sm:$0xff]  ;;  %v10791_v27 = vpop.xlane.xlu1 %6138 }
 0x641   :  { %14541 = vst [vmem:[#allocation76_spill] sm:$0xff] %v10721_v44  ;;  %v10725_v62 = vmul.f32 %v14542_v8, %v9179_v31  ;;  %v10729_v39 = vmul.f32 %v14506_v14, %v14544_v49  ;;  %v10733_v43 = vmul.f32 %v14542_v8, %v9200_v15  ;;  %v10737_v10 = vmul.f32 %v14542_v8, %v9186_v54 }
 0x642   :  { %14540 = vst [vmem:[#allocation75_spill] sm:$0xff] %v10717_v40  ;;  %v10741_v40 = vmul.f32 %v14542_v8, %v9221_v60  ;;  %v10745_v44 = vmul.f32 %v14542_v8, %v9207_v20  ;;  %v10749_v14 = vmul.f32 %v14542_v8, %v9242_v58  ;;  %14563 = vst [vmem:[#allocation303_spill] sm:$0xff] %v10791_v27 }
 0x643   :  { %14543 = vst [vmem:[#allocation52_spill] sm:$0xff] %v10725_v62  ;;  %14545 = vst [vmem:[#allocation289_spill] sm:$0xff] %v10729_v39  ;;  %v10753_v39 = vmul.f32 %v14542_v8, %v9228_v24  ;;  %v14558_v62 = vld [vmem:[#allocation78_spill] sm:$0xff]  ;;  %v10815_v27 = vmul.f32 %v14542_v8, %v9195_v18 }
 0x644   :  { %14546 = vst [vmem:[#allocation290_spill] sm:$0xff] %v10733_v43  ;;  %14547 = vst [vmem:[#allocation291_spill] sm:$0xff] %v10737_v10  ;;  %v10757_v43 = vmul.f32 %v14542_v8, %v9263_v61  ;;  %v10761_v10 = vmul.f32 %v14542_v8, %v9249_v41  ;;  %2731 = vadd.xlane.f32.xlu1 %v14558_v62  ;;  %v10799_v62 = vmul.f32 %v14542_v8, %v9153_v57 }
 0x645   :  { %14548 = vst [vmem:[#allocation292_spill] sm:$0xff] %v10741_v40  ;;  %14549 = vst [vmem:[#allocation293_spill] sm:$0xff] %v10745_v44  ;;  %v10765_v40 = vmul.f32 %v14542_v8, %v9284_v55  ;;  %v10769_v44 = vmul.f32 %v14542_v8, %v9270_v30 }
 0x646   :  { %14550 = vst [vmem:[#allocation294_spill] sm:$0xff] %v10749_v14  ;;  %14551 = vst [vmem:[#allocation295_spill] sm:$0xff] %v10753_v39  ;;  %v10773_v14 = vmul.f32 %v14542_v8, %v9305_v33  ;;  %v14557_v39 = vld [vmem:[#allocation77_spill] sm:$0xff] }
 0x647   :  { %14552 = vst [vmem:[#allocation296_spill] sm:$0xff] %v10757_v43  ;;  %14553 = vst [vmem:[#allocation297_spill] sm:$0xff] %v10761_v10  ;;  %2725 = vadd.xlane.f32.xlu0 %v14557_v39  ;;  %v10779_v43 = vmul.f32 %v14542_v8, %v9291_v48  ;;  %v10783_v10 = vmul.f32 %v14542_v8, %v9143_v56  ;;  %v10795_v39 = vmul.f32 %v14542_v8, %v9167_v4 }
 0x648   :  { %14554 = vst [vmem:[#allocation298_spill] sm:$0xff] %v10765_v40  ;;  %14555 = vst [vmem:[#allocation299_spill] sm:$0xff] %v10769_v44  ;;  %v10787_v40 = vmul.f32 %v14542_v8, %v9312_v5  ;;  %v10789_v44 = vpop.xlane.xlu0 %6141 }
 0x649   :  { %14556 = vst [vmem:[#allocation300_spill] sm:$0xff] %v10773_v14  ;;  %14559 = vst [vmem:[#allocation77_spill] sm:$0xff] %v10779_v43  ;;  %v10803_v43 = vmul.f32 %v14542_v8, %v9188_v3 }
 0x64a   :  { %14560 = vst [vmem:[#allocation78_spill] sm:$0xff] %v10783_v10  ;;  %14561 = vst [vmem:[#allocation301_spill] sm:$0xff] %v10787_v40  ;;  %v10807_v10 = vmul.f32 %v14542_v8, %v9174_v9  ;;  %v14576_v40 = vld [vmem:[#allocation80_spill] sm:$0xff] }
 0x64b   :  { %14562 = vst [vmem:[#allocation302_spill] sm:$0xff] %v10789_v44  ;;  %14564 = vst [vmem:[#allocation304_spill] sm:$0xff] %v10795_v39  ;;  %v10811_v44 = vmul.f32 %v14542_v8, %v9209_v6  ;;  %v10819_v39 = vmul.f32 %v14542_v8, %v9230_v32  ;;  %2735 = vadd.xlane.f32.xlu1 %v14576_v40 }
 0x64c   :  { %14565 = vst [vmem:[#allocation305_spill] sm:$0xff] %v10799_v62  ;;  %14566 = vst [vmem:[#allocation306_spill] sm:$0xff] %v10803_v43  ;;  %v10823_v62 = vmul.f32 %v14542_v8, %v9216_v28  ;;  %v10827_v43 = vmul.f32 %v14542_v8, %v14393_v1 }
 0x64d   :  { %14567 = vst [vmem:[#allocation307_spill] sm:$0xff] %v10807_v10  ;;  %14568 = vst [vmem:[#allocation308_spill] sm:$0xff] %v10811_v44  ;;  %v10831_v10 = vmul.f32 %v14542_v8, %v9237_v46  ;;  %v10835_v44 = vmul.f32 %v14542_v8, %v14539_v45 }
 0x64e   :  { %14569 = vst [vmem:[#allocation309_spill] sm:$0xff] %v10815_v27  ;;  %14570 = vst [vmem:[#allocation310_spill] sm:$0xff] %v10819_v39  ;;  %v10839_v27 = vmul.f32 %v14542_v8, %v14396_v59  ;;  %v14575_v39 = vld [vmem:[#allocation79_spill] sm:$0xff] }
 0x64f   :  { %14571 = vst [vmem:[#allocation311_spill] sm:$0xff] %v10823_v62  ;;  %14572 = vst [vmem:[#allocation312_spill] sm:$0xff] %v10827_v43  ;;  %2729 = vadd.xlane.f32.xlu0 %v14575_v39  ;;  %v14577_v62 = vld [vmem:[#allocation53_spill] sm:$0xff]  ;;  %v10849_v43 = vmul.f32 %v14542_v8, %v14544_v49 }
 0x650   :  { %14573 = vst [vmem:[#allocation313_spill] sm:$0xff] %v10831_v10  ;;  %14574 = vst [vmem:[#allocation314_spill] sm:$0xff] %v10835_v44  ;;  %v10845_v14 = vmul.f32 %v14577_v62, %v9179_v31  ;;  %v10853_v10 = vmul.f32 %v14577_v62, %v9200_v15  ;;  %v10857_v44 = vmul.f32 %v14577_v62, %v9186_v54 }
 0x651   :  { %14579 = vst [vmem:[#allocation80_spill] sm:$0xff] %v10849_v43  ;;  %v10861_v39 = vmul.f32 %v14577_v62, %v9221_v60  ;;  %v10865_v40 = vmul.f32 %v14577_v62, %v9207_v20  ;;  %v10869_v8 = vmul.f32 %v14577_v62, %v9242_v58  ;;  %v10873_v43 = vmul.f32 %v14577_v62, %v9228_v24 }
 0x652   :  { %14578 = vst [vmem:[#allocation79_spill] sm:$0xff] %v10845_v14  ;;  %14580 = vst [vmem:[#allocation53_spill] sm:$0xff] %v10853_v10  ;;  %v10877_v10 = vmul.f32 %v14577_v62, %v9263_v61  ;;  %v10889_v14 = vpop.xlane.xlu1 %6168 }
 0x653   :  { %14581 = vst [vmem:[#allocation315_spill] sm:$0xff] %v10857_v44  ;;  %14582 = vst [vmem:[#allocation316_spill] sm:$0xff] %v10861_v39  ;;  %v10881_v44 = vmul.f32 %v14577_v62, %v9249_v41  ;;  %v10885_v39 = vmul.f32 %v14577_v62, %v9284_v55 }
 0x654   :  { %14583 = vst [vmem:[#allocation317_spill] sm:$0xff] %v10865_v40  ;;  %14584 = vst [vmem:[#allocation318_spill] sm:$0xff] %v10869_v8  ;;  %v10887_v40 = vpop.xlane.xlu0 %6171  ;;  %v10893_v8 = vmul.f32 %v14577_v62, %v9270_v30 }
 0x655   :  { %14585 = vst [vmem:[#allocation319_spill] sm:$0xff] %v10873_v43  ;;  %14586 = vst [vmem:[#allocation320_spill] sm:$0xff] %v10877_v10  ;;  %v10897_v43 = vmul.f32 %v14577_v62, %v9305_v33  ;;  %v10901_v10 = vmul.f32 %v14577_v62, %v9291_v48 }
 0x656   :  { %14587 = vst [vmem:[#allocation321_spill] sm:$0xff] %v10881_v44  ;;  %14588 = vst [vmem:[#allocation322_spill] sm:$0xff] %v10885_v39  ;;  %v10905_v44 = vmul.f32 %v14577_v62, %v9143_v56  ;;  %v14595_v39 = vld [vmem:[#allocation81_spill] sm:$0xff] }
 0x657   :  { %14589 = vst [vmem:[#allocation323_spill] sm:$0xff] %v10887_v40  ;;  %14590 = vst [vmem:[#allocation324_spill] sm:$0xff] %v10889_v14  ;;  %2733 = vadd.xlane.f32.xlu0 %v14595_v39  ;;  %v14596_v40 = vld [vmem:[#allocation82_spill] sm:$0xff]  ;;  %v10911_v14 = vmul.f32 %v14577_v62, %v9312_v5  ;;  %v10927_v39 = vmul.f32 %v14577_v62, %v9174_v9 }
 0x658   :  { %14591 = vst [vmem:[#allocation325_spill] sm:$0xff] %v10893_v8  ;;  %14592 = vst [vmem:[#allocation326_spill] sm:$0xff] %v10897_v43  ;;  %2739 = vadd.xlane.f32.xlu1 %v14596_v40  ;;  %v10915_v8 = vmul.f32 %v14577_v62, %v9167_v4  ;;  %v10919_v43 = vmul.f32 %v14577_v62, %v9153_v57  ;;  %v10931_v40 = vmul.f32 %v14577_v62, %v9209_v6 }
 0x659   :  { %14593 = vst [vmem:[#allocation327_spill] sm:$0xff] %v10901_v10  ;;  %14594 = vst [vmem:[#allocation328_spill] sm:$0xff] %v10905_v44  ;;  %v10923_v10 = vmul.f32 %v14577_v62, %v9188_v3 }
 0x65a   :  { %14597 = vst [vmem:[#allocation81_spill] sm:$0xff] %v10911_v14  ;;  %14598 = vst [vmem:[#allocation82_spill] sm:$0xff] %v10915_v8  ;;  %v10935_v14 = vmul.f32 %v14577_v62, %v9195_v18  ;;  %v10939_v8 = vmul.f32 %v14577_v62, %v9230_v32 }
 0x65b   :  { %14599 = vst [vmem:[#allocation329_spill] sm:$0xff] %v10919_v43  ;;  %14600 = vst [vmem:[#allocation330_spill] sm:$0xff] %v10923_v10  ;;  %v10943_v43 = vmul.f32 %v14577_v62, %v9216_v28  ;;  %v10947_v10 = vmul.f32 %v14577_v62, %v14393_v1 }
 0x65c   :  { %14601 = vst [vmem:[#allocation331_spill] sm:$0xff] %v10927_v39  ;;  %14602 = vst [vmem:[#allocation332_spill] sm:$0xff] %v10931_v40  ;;  %v10951_v39 = vmul.f32 %v14577_v62, %v9237_v46  ;;  %v10955_v40 = vmul.f32 %v14577_v62, %v14539_v45  ;;  %2743 = vadd.xlane.f32.xlu1 %v9751_v22 }
 0x65d   :  { %14603 = vst [vmem:[#allocation333_spill] sm:$0xff] %v10935_v14  ;;  %14604 = vst [vmem:[#allocation334_spill] sm:$0xff] %v10939_v8  ;;  %v10959_v14 = vmul.f32 %v14577_v62, %v14396_v59  ;;  %v14609_v8 = vld [vmem:[#allocation54_spill] sm:$0xff] }
 0x65e   :  { %14605 = vst [vmem:[#allocation335_spill] sm:$0xff] %v10943_v43  ;;  %14606 = vst [vmem:[#allocation336_spill] sm:$0xff] %v10947_v10  ;;  %v10963_v44 = vmul.f32 %v14609_v8, %v9179_v31  ;;  %v10967_v43 = vmul.f32 %v14577_v62, %v14544_v49  ;;  %v14611_v10 = vld [vmem:[#allocation83_spill] sm:$0xff]  ;;  %v10981_v31 = vmul.f32 %v14609_v8, %v9207_v20  ;;  %v10985_v62 = vpop.xlane.xlu1 %6174 }
 0x65f   :  { %14607 = vst [vmem:[#allocation337_spill] sm:$0xff] %v10951_v39  ;;  %14608 = vst [vmem:[#allocation338_spill] sm:$0xff] %v10955_v40  ;;  %2737 = vadd.xlane.f32.xlu0 %v14611_v10  ;;  %v10973_v39 = vmul.f32 %v14609_v8, %v9193_v34  ;;  %v10977_v40 = vmul.f32 %v14609_v8, %v9186_v54  ;;  %v10989_v10 = vmul.f32 %v14609_v8, %v9200_v15 }
 0x660   :  { %14610 = vst [vmem:[#allocation54_spill] sm:$0xff] %v10963_v44  ;;  %v10983_v44 = vpop.xlane.xlu0 %6177  ;;  %14613 = vst [vmem:[#allocation339_spill] sm:$0xff] %v10985_v62  ;;  %v10993_v34 = vmul.f32 %v14609_v8, %v9221_v60  ;;  %v10997_v54 = vmul.f32 %v14609_v8, %v9214_v2  ;;  %v11001_v22 = vmul.f32 %v14609_v8, %v9235_v11 }
 0x661   :  { %14612 = vst [vmem:[#allocation83_spill] sm:$0xff] %v10983_v44  ;;  %14614 = vst [vmem:[#allocation340_spill] sm:$0xff] %v10989_v10  ;;  %v11005_v44 = vmul.f32 %v14609_v8, %v9228_v24  ;;  %v11009_v62 = vmul.f32 %v14609_v8, %v9249_v41  ;;  %v11013_v10 = vmul.f32 %v14609_v8, %v9242_v58 }
 0x662   :  { %14615 = vst [vmem:[#allocation341_spill] sm:$0xff] %v10997_v54  ;;  %14616 = vst [vmem:[#allocation342_spill] sm:$0xff] %v11001_v22  ;;  %v11017_v2 = vmul.f32 %v14609_v8, %v9263_v61  ;;  %v11021_v11 = vmul.f32 %v14609_v8, %v9256_v17  ;;  %v11025_v22 = vmul.f32 %v14609_v8, %v14338_v0  ;;  %v14623_v54 = vld [vmem:[#allocation85_spill] sm:$0xff] }
 0x663   :  { %14617 = vst [vmem:[#allocation343_spill] sm:$0xff] %v11005_v44  ;;  %14618 = vst [vmem:[#allocation344_spill] sm:$0xff] %v11009_v62  ;;  %v11029_v44 = vmul.f32 %v14609_v8, %v9270_v30  ;;  %v11033_v62 = vmul.f32 %v14609_v8, %v9291_v48  ;;  %2747 = vadd.xlane.f32.xlu1 %v14623_v54  ;;  %v11039_v17 = vmul.f32 %v14609_v8, %v9284_v55 }
 0x664   :  { %14619 = vst [vmem:[#allocation345_spill] sm:$0xff] %v11013_v10  ;;  %14620 = vst [vmem:[#allocation346_spill] sm:$0xff] %v11025_v22  ;;  %v14622_v10 = vld [vmem:[#allocation84_spill] sm:$0xff]  ;;  %v11043_v0 = vmul.f32 %v14609_v8, %v9305_v33  ;;  %v11047_v22 = vmul.f32 %v14609_v8, %v14344_v36  ;;  %v11059_v54 = vmul.f32 %v14609_v8, %v9153_v57 }
 0x665   :  { %14621 = vst [vmem:[#allocation347_spill] sm:$0xff] %v11029_v44  ;;  %2741 = vadd.xlane.f32.xlu0 %v14622_v10  ;;  %14624 = vst [vmem:[#allocation84_spill] sm:$0xff] %v11039_v17  ;;  %v11051_v44 = vmul.f32 %v14609_v8, %v9139_v29  ;;  %v11055_v10 = vmul.f32 %v14609_v8, %v9312_v5  ;;  %v11063_v17 = vmul.f32 %v14609_v8, %v9143_v56 }
 0x666   :  { %14625 = vst [vmem:[#allocation85_spill] sm:$0xff] %v11047_v22  ;;  %14628 = vst [vmem:[#allocation350_spill] sm:$0xff] %v11059_v54  ;;  %v11067_v36 = vmul.f32 %v14609_v8, %v9167_v4  ;;  %v11071_v29 = vmul.f32 %v14609_v8, %v9160_v63  ;;  %v11081_v54 = vpop.xlane.xlu0 %6147  ;;  %v11083_v22 = vpop.xlane.xlu1 %6144  ;;  %v11091_v63 = vmul.f32 %v14609_v8, %v9188_v3 }
 0x667   :  { %14626 = vst [vmem:[#allocation348_spill] sm:$0xff] %v11051_v44  ;;  %14627 = vst [vmem:[#allocation349_spill] sm:$0xff] %v11055_v10  ;;  %v11075_v44 = vmul.f32 %v14609_v8, %v9181_v50  ;;  %v11079_v10 = vmul.f32 %v14609_v8, %v9174_v9  ;;  %v11095_v50 = vmul.f32 %v14609_v8, %v9209_v6 }
 0x668   :  { %14629 = vst [vmem:[#allocation351_spill] sm:$0xff] %v11063_v17  ;;  %14632 = vst [vmem:[#allocation354_spill] sm:$0xff] %v11081_v54  ;;  %v11087_v17 = vmul.f32 %v14609_v8, %v9195_v18  ;;  %v14638_v54 = vld [vmem:[#allocation87_spill] sm:$0xff] }
 0x669   :  { %14630 = vst [vmem:[#allocation352_spill] sm:$0xff] %v11075_v44  ;;  %14631 = vst [vmem:[#allocation353_spill] sm:$0xff] %v11079_v10  ;;  %v11099_v44 = vmul.f32 %v14609_v8, %v9202_v51  ;;  %v14637_v10 = vld [vmem:[#allocation86_spill] sm:$0xff]  ;;  %2751 = vadd.xlane.f32.xlu1 %v14638_v54  ;;  %v11117_v51 = vmul.f32 %v14609_v8, %v9230_v32  ;;  %v11125_v54 = vmul.f32 %v14609_v8, %v14363_v21 }
 0x66a   :  { %14633 = vst [vmem:[#allocation355_spill] sm:$0xff] %v11083_v22  ;;  %14634 = vst [vmem:[#allocation356_spill] sm:$0xff] %v11087_v17  ;;  %2745 = vadd.xlane.f32.xlu0 %v14637_v10  ;;  %v11105_v22 = vmul.f32 %v14609_v8, %v9223_v26  ;;  %v11109_v17 = vmul.f32 %v14609_v8, %v9216_v28  ;;  %v11121_v10 = vmul.f32 %v14609_v8, %v14393_v1 }
 0x66b   :  { %14635 = vst [vmem:[#allocation357_spill] sm:$0xff] %v11091_v63  ;;  %14636 = vst [vmem:[#allocation358_spill] sm:$0xff] %v11099_v44  ;;  %v11113_v63 = vmul.f32 %v14609_v8, %v9237_v46  ;;  %v11129_v26 = vmul.f32 %v14609_v8, %v14508_v16 }
 0x66c   :  { %14639 = vst [vmem:[#allocation86_spill] sm:$0xff] %v11105_v22  ;;  %14640 = vst [vmem:[#allocation87_spill] sm:$0xff] %v11109_v17  ;;  %v11133_v17 = vmul.f32 %v14609_v8, %v14396_v59 }
 0x66d   :  { %14641 = vst [vmem:[#allocation359_spill] sm:$0xff] %v11113_v63  ;;  %14642 = vst [vmem:[#allocation360_spill] sm:$0xff] %v11117_v51  ;;  %v11137_v63 = vmul.f32 %v14609_v8, %v14544_v49  ;;  %v11141_v51 = vmul.f32 %v14609_v8, %v14539_v45 }
 0x66e   :  { %14643 = vst [vmem:[#allocation361_spill] sm:$0xff] %v11121_v10  ;;  %14644 = vst [vmem:[#allocation362_spill] sm:$0xff] %v11125_v54  ;;  %v14649_v10 = vld [vmem:[#allocation59_spill] sm:$0xff]  ;;  %v14651_v54 = vld [vmem:[#allocation41_spill] sm:$0xff]  ;;  %2749 = vadd.xlane.f32.xlu0 %v9771_v23 }
 0x66f   :  { %14645 = vst [vmem:[#allocation363_spill] sm:$0xff] %v11129_v26  ;;  %14646 = vst [vmem:[#allocation364_spill] sm:$0xff] %v11133_v17  ;;  %v11145_v21 = vmul.f32 %v14649_v10, %v9200_v15  ;;  %v11149_v16 = vmul.f32 %v14609_v8, %v14651_v54  ;;  %v11153_v26 = vmul.f32 %v14649_v10, %v9221_v60 }
 0x670   :  { %14647 = vst [vmem:[#allocation365_spill] sm:$0xff] %v11137_v63  ;;  %14648 = vst [vmem:[#allocation366_spill] sm:$0xff] %v11141_v51  ;;  %v11157_v17 = vmul.f32 %v14649_v10, %v9207_v20  ;;  %v14655_v63 = vld [vmem:[#allocation56_spill] sm:$0xff] }
 0x671   :  { %14650 = vst [vmem:[#allocation59_spill] sm:$0xff] %v11145_v21  ;;  %14652 = vst [vmem:[#allocation367_spill] sm:$0xff] %v11149_v16  ;;  %v11161_v22 = vmul.f32 %v14655_v63, %v9207_v20  ;;  %v14657_v51 = vld [vmem:[#allocation88_spill] sm:$0xff]  ;;  %v11167_v8 = vmul.f32 %v14655_v63, %v9200_v15  ;;  %v11171_v54 = vmul.f32 %v14655_v63, %v9228_v24  ;;  %v11179_v16 = vpop.xlane.xlu1 %6180 }
 0x672   :  { %14653 = vst [vmem:[#allocation368_spill] sm:$0xff] %v11153_v26  ;;  %14654 = vst [vmem:[#allocation369_spill] sm:$0xff] %v11157_v17  ;;  %2755 = vadd.xlane.f32.xlu1 %v14657_v51  ;;  %v11175_v26 = vmul.f32 %v14655_v63, %v9221_v60  ;;  %v11177_v17 = vpop.xlane.xlu0 %6183  ;;  %v11183_v23 = vmul.f32 %v14655_v63, %v9242_v58  ;;  %v11187_v51 = vmul.f32 %v14649_v10, %v9228_v24 }
 0x673   :  { %14656 = vst [vmem:[#allocation56_spill] sm:$0xff] %v11161_v22  ;;  %14658 = vst [vmem:[#allocation88_spill] sm:$0xff] %v11167_v8  ;;  %v11191_v8 = vmul.f32 %v14649_v10, %v9242_v58  ;;  %v14677_v22 = vld [vmem:[#allocation90_spill] sm:$0xff] }
 0x674   :  { %14659 = vst [vmem:[#allocation370_spill] sm:$0xff] %v11171_v54  ;;  %14660 = vst [vmem:[#allocation371_spill] sm:$0xff] %v11175_v26  ;;  %v11195_v54 = vmul.f32 %v14655_v63, %v9249_v41 }
 0x675   :  { %14661 = vst [vmem:[#allocation372_spill] sm:$0xff] %v11177_v17  ;;  %14662 = vst [vmem:[#allocation373_spill] sm:$0xff] %v11179_v16  ;;  %v11199_v17 = vmul.f32 %v14655_v63, %v9263_v61  ;;  %v11203_v16 = vmul.f32 %v14649_v10, %v9249_v41 }
 0x676   :  { %14663 = vst [vmem:[#allocation374_spill] sm:$0xff] %v11183_v23  ;;  %14664 = vst [vmem:[#allocation375_spill] sm:$0xff] %v11187_v51  ;;  %v11207_v23 = vmul.f32 %v14655_v63, %v9188_v3  ;;  %v11211_v51 = vmul.f32 %v14655_v63, %v9270_v30  ;;  %2759 = vadd.xlane.f32.xlu1 %v14677_v22  ;;  %v11253_v22 = vmul.f32 %v14649_v10, %v9270_v30 }
 0x677   :  { %14665 = vst [vmem:[#allocation376_spill] sm:$0xff] %v11191_v8  ;;  %14666 = vst [vmem:[#allocation377_spill] sm:$0xff] %v11195_v54  ;;  %v11215_v8 = vmul.f32 %v14655_v63, %v9209_v6  ;;  %v11219_v54 = vmul.f32 %v14655_v63, %v9195_v18 }
 0x678   :  { %14667 = vst [vmem:[#allocation378_spill] sm:$0xff] %v11199_v17  ;;  %14668 = vst [vmem:[#allocation379_spill] sm:$0xff] %v11203_v16  ;;  %v14673_v17 = vld [vmem:[#allocation57_spill] sm:$0xff]  ;;  %v11227_v16 = vmul.f32 %v14655_v63, %v9216_v28 }
 0x679   :  { %14669 = vst [vmem:[#allocation380_spill] sm:$0xff] %v11207_v23  ;;  %14670 = vst [vmem:[#allocation381_spill] sm:$0xff] %v11211_v51  ;;  %v11223_v26 = vmul.f32 %v14673_v17, %v9200_v15  ;;  %v14676_v23 = vld [vmem:[#allocation89_spill] sm:$0xff]  ;;  %v11233_v51 = vmul.f32 %v14673_v17, %v9221_v60  ;;  %v11241_v15 = vmul.f32 %v14649_v10, %v9263_v61 }
 0x67a   :  { %14671 = vst [vmem:[#allocation382_spill] sm:$0xff] %v11215_v8  ;;  %14672 = vst [vmem:[#allocation383_spill] sm:$0xff] %v11219_v54  ;;  %2753 = vadd.xlane.f32.xlu0 %v14676_v23  ;;  %v11237_v8 = vmul.f32 %v14673_v17, %v9207_v20  ;;  %v11249_v23 = vmul.f32 %v14649_v10, %v9188_v3  ;;  %v11257_v60 = vmul.f32 %v14649_v10, %v9209_v6 }
 0x67b   :  { %14674 = vst [vmem:[#allocation57_spill] sm:$0xff] %v11223_v26  ;;  %14675 = vst [vmem:[#allocation384_spill] sm:$0xff] %v11227_v16  ;;  %v11245_v26 = vmul.f32 %v14673_v17, %v9228_v24  ;;  %v11261_v20 = vmul.f32 %v14649_v10, %v9195_v18  ;;  %v11265_v24 = vmul.f32 %v14655_v63, %v9284_v55  ;;  %2922 = vadd.xlane.f32.xlu1 %v9791_v38 }
 0x67c   :  { %14678 = vst [vmem:[#allocation89_spill] sm:$0xff] %v11233_v51  ;;  %14679 = vst [vmem:[#allocation90_spill] sm:$0xff] %v11237_v8  ;;  %v11319_v38 = vmul.f32 %v14655_v63, %v14393_v1 }
 0x67d   :  { %14680 = vst [vmem:[#allocation385_spill] sm:$0xff] %v11241_v15  ;;  %14681 = vst [vmem:[#allocation386_spill] sm:$0xff] %v11245_v26  ;;  %v11269_v26 = vmul.f32 %v14649_v10, %v9216_v28  ;;  %v11277_v15 = vpop.xlane.xlu1 %6150 }
 0x67e   :  { %14682 = vst [vmem:[#allocation387_spill] sm:$0xff] %v11249_v23  ;;  %14683 = vst [vmem:[#allocation388_spill] sm:$0xff] %v11253_v22  ;;  %v11273_v23 = vmul.f32 %v14655_v63, %v9230_v32  ;;  %v11275_v22 = vpop.xlane.xlu0 %6153 }
 0x67f   :  { %14684 = vst [vmem:[#allocation389_spill] sm:$0xff] %v11257_v60  ;;  %14685 = vst [vmem:[#allocation390_spill] sm:$0xff] %v11261_v20  ;;  %v11281_v60 = vmul.f32 %v14655_v63, %v9291_v48  ;;  %v11285_v20 = vmul.f32 %v14673_v17, %v9242_v58  ;;  %v11307_v58 = vmul.f32 %v14649_v10, %v9291_v48 }
 0x680   :  { %14686 = vst [vmem:[#allocation391_spill] sm:$0xff] %v11265_v24  ;;  %14687 = vst [vmem:[#allocation392_spill] sm:$0xff] %v11269_v26  ;;  %v11289_v24 = vmul.f32 %v14655_v63, %v9237_v46  ;;  %v11293_v26 = vmul.f32 %v14649_v10, %v9284_v55 }
 0x681   :  { %14688 = vst [vmem:[#allocation393_spill] sm:$0xff] %v11273_v23  ;;  %14689 = vst [vmem:[#allocation394_spill] sm:$0xff] %v11275_v22  ;;  %v14695_v23 = vld [vmem:[#allocation91_spill] sm:$0xff]  ;;  %v11299_v22 = vmul.f32 %v14673_v17, %v9249_v41  ;;  %v11323_v41 = vmul.f32 %v14655_v63, %v9312_v5 }
 0x682   :  { %14690 = vst [vmem:[#allocation395_spill] sm:$0xff] %v11277_v15  ;;  %14691 = vst [vmem:[#allocation396_spill] sm:$0xff] %v11281_v60  ;;  %2757 = vadd.xlane.f32.xlu0 %v14695_v23  ;;  %v11303_v15 = vmul.f32 %v14649_v10, %v9230_v32  ;;  %v11315_v23 = vmul.f32 %v14649_v10, %v9237_v46 }
 0x683   :  { %14692 = vst [vmem:[#allocation397_spill] sm:$0xff] %v11285_v20  ;;  %14693 = vst [vmem:[#allocation398_spill] sm:$0xff] %v11289_v24  ;;  %v11311_v24 = vmul.f32 %v14655_v63, %v9305_v33 }
 0x684   :  { %14694 = vst [vmem:[#allocation399_spill] sm:$0xff] %v11293_v26  ;;  %14696 = vst [vmem:[#allocation91_spill] sm:$0xff] %v11299_v22  ;;  %v14796_v22 = vld [vmem:[#allocation129_spill] sm:$0xff] }
 0x685   :  { %14697 = vst [vmem:[#allocation400_spill] sm:$0xff] %v11303_v15  ;;  %14698 = vst [vmem:[#allocation401_spill] sm:$0xff] %v11307_v58  ;;  %v11327_v15 = vmul.f32 %v14673_v17, %v9263_v61  ;;  %v11331_v58 = vmul.f32 %v14655_v63, %v14396_v59  ;;  %v11347_v61 = vmul.f32 %v14673_v17, %v9195_v18 }
 0x686   :  { %14699 = vst [vmem:[#allocation402_spill] sm:$0xff] %v11311_v24  ;;  %14700 = vst [vmem:[#allocation403_spill] sm:$0xff] %v11315_v23  ;;  %v11335_v24 = vmul.f32 %v14673_v17, %v9188_v3  ;;  %v11339_v23 = vmul.f32 %v14673_v17, %v9270_v30  ;;  %v14711_v3 = vld [vmem:[#allocation93_spill] sm:$0xff]  ;;  %v11357_v30 = vpop.xlane.xlu1 %6186  ;;  %v11365_v18 = vmul.f32 %v14649_v10, %v14393_v1 }
 0x687   :  { %14701 = vst [vmem:[#allocation404_spill] sm:$0xff] %v11319_v38  ;;  %14702 = vst [vmem:[#allocation405_spill] sm:$0xff] %v11323_v41  ;;  %v11343_v38 = vmul.f32 %v14673_v17, %v9209_v6  ;;  %2926 = vadd.xlane.f32.xlu1 %v14711_v3  ;;  %v11361_v6 = vmul.f32 %v14649_v10, %v9305_v33  ;;  %v11377_v3 = vmul.f32 %v14649_v10, %v14396_v59 }
 0x688   :  { %14703 = vst [vmem:[#allocation406_spill] sm:$0xff] %v11327_v15  ;;  %14704 = vst [vmem:[#allocation407_spill] sm:$0xff] %v11331_v58  ;;  %v11351_v15 = vmul.f32 %v14673_v17, %v9216_v28  ;;  %v14710_v58 = vld [vmem:[#allocation92_spill] sm:$0xff]  ;;  %v11369_v28 = vmul.f32 %v14649_v10, %v9312_v5 }
 0x689   :  { %14705 = vst [vmem:[#allocation408_spill] sm:$0xff] %v11335_v24  ;;  %14706 = vst [vmem:[#allocation409_spill] sm:$0xff] %v11339_v23  ;;  %2761 = vadd.xlane.f32.xlu0 %v14710_v58  ;;  %v11355_v24 = vpop.xlane.xlu0 %6189  ;;  %v11373_v58 = vmul.f32 %v14655_v63, %v9143_v56  ;;  %v14795_v23 = vld [vmem:[#allocation128_spill] sm:$0xff] }
 0x68a   :  { %14707 = vst [vmem:[#allocation410_spill] sm:$0xff] %v11343_v38  ;;  %14708 = vst [vmem:[#allocation411_spill] sm:$0xff] %v11347_v61  ;;  %v14793_v61 = vld [vmem:[#allocation126_spill] sm:$0xff] }
 0x68b   :  { %14709 = vst [vmem:[#allocation412_spill] sm:$0xff] %v11351_v15  ;;  %14712 = vst [vmem:[#allocation92_spill] sm:$0xff] %v11355_v24  ;;  %v11381_v24 = vmul.f32 %v14655_v63, %v14539_v45 }
 0x68c   :  { %14713 = vst [vmem:[#allocation93_spill] sm:$0xff] %v11357_v30  ;;  %14714 = vst [vmem:[#allocation413_spill] sm:$0xff] %v11361_v6  ;;  %v11385_v30 = vmul.f32 %v14655_v63, %v9153_v57  ;;  %v14725_v6 = vld [vmem:[#allocation95_spill] sm:$0xff] }
 0x68d   :  { %14715 = vst [vmem:[#allocation414_spill] sm:$0xff] %v11365_v18  ;;  %14716 = vst [vmem:[#allocation415_spill] sm:$0xff] %v11369_v28  ;;  %v11389_v18 = vmul.f32 %v14673_v17, %v9284_v55  ;;  %v11393_v28 = vmul.f32 %v14655_v63, %v14544_v49  ;;  %2930 = vadd.xlane.f32.xlu1 %v14725_v6  ;;  %v11407_v55 = vmul.f32 %v14673_v17, %v9237_v46 }
 0x68e   :  { %14717 = vst [vmem:[#allocation416_spill] sm:$0xff] %v11373_v58  ;;  %14718 = vst [vmem:[#allocation417_spill] sm:$0xff] %v11377_v3  ;;  %v11397_v58 = vmul.f32 %v14673_v17, %v9230_v32  ;;  %v14724_v3 = vld [vmem:[#allocation94_spill] sm:$0xff]  ;;  %v11415_v32 = vmul.f32 %v14649_v10, %v9143_v56  ;;  %v11423_v6 = vmul.f32 %v14649_v10, %v14539_v45 }
 0x68f   :  { %14719 = vst [vmem:[#allocation418_spill] sm:$0xff] %v11381_v24  ;;  %14720 = vst [vmem:[#allocation419_spill] sm:$0xff] %v11385_v30  ;;  %2924 = vadd.xlane.f32.xlu0 %v14724_v3  ;;  %v11403_v24 = vmul.f32 %v14673_v17, %v9291_v48  ;;  %v11419_v3 = vmul.f32 %v14649_v10, %v14544_v49  ;;  %v11427_v46 = vmul.f32 %v14655_v63, %v9174_v9  ;;  %v14791_v30 = vld [vmem:[#allocation124_spill] sm:$0xff] }
 0x690   :  { %14721 = vst [vmem:[#allocation420_spill] sm:$0xff] %v11389_v18  ;;  %14722 = vst [vmem:[#allocation421_spill] sm:$0xff] %v11393_v28  ;;  %v11411_v18 = vmul.f32 %v14649_v10, %v9153_v57  ;;  %v11431_v48 = vmul.f32 %v14655_v63, %v9167_v4 }
 0x691   :  { %14723 = vst [vmem:[#allocation422_spill] sm:$0xff] %v11397_v58  ;;  %14726 = vst [vmem:[#allocation94_spill] sm:$0xff] %v11403_v24 }
 0x692   :  { %14727 = vst [vmem:[#allocation95_spill] sm:$0xff] %v11407_v55  ;;  %14728 = vst [vmem:[#allocation423_spill] sm:$0xff] %v11411_v18  ;;  %v11433_v18 = vpop.xlane.xlu0 %6159  ;;  %v11435_v55 = vpop.xlane.xlu1 %6156 }
 0x693   :  { %14729 = vst [vmem:[#allocation424_spill] sm:$0xff] %v11415_v32  ;;  %14730 = vst [vmem:[#allocation425_spill] sm:$0xff] %v11419_v3  ;;  %v14736_v32 = vld [vmem:[#allocation45_spill] sm:$0xff]  ;;  %v14738_v3 = vld [vmem:[#allocation43_spill] sm:$0xff]  ;;  %2928 = vadd.xlane.f32.xlu0 %v9811_v52  ;;  %v11473_v52 = vmul.f32 %v14649_v10, %v9174_v9 }
 0x694   :  { %14731 = vst [vmem:[#allocation426_spill] sm:$0xff] %v11423_v6  ;;  %14732 = vst [vmem:[#allocation427_spill] sm:$0xff] %v11427_v46  ;;  %v11439_v24 = vmul.f32 %v14655_v63, %v14736_v32  ;;  %v11443_v58 = vmul.f32 %v14655_v63, %v14738_v3  ;;  %v11447_v6 = vmul.f32 %v14673_v17, %v9312_v5 }
 0x695   :  { %14733 = vst [vmem:[#allocation428_spill] sm:$0xff] %v11431_v48  ;;  %14734 = vst [vmem:[#allocation429_spill] sm:$0xff] %v11433_v18  ;;  %v11451_v46 = vmul.f32 %v14673_v17, %v9305_v33  ;;  %v14742_v18 = vld [vmem:[#allocation96_spill] sm:$0xff]  ;;  %v11461_v63 = vmul.f32 %v14673_v17, %v14393_v1  ;;  %v11465_v5 = vmul.f32 %v14649_v10, %v9167_v4  ;;  %v14750_v1 = vld [vmem:[#allocation98_spill] sm:$0xff] }
 0x696   :  { %14735 = vst [vmem:[#allocation430_spill] sm:$0xff] %v11435_v55  ;;  %14737 = vst [vmem:[#allocation431_spill] sm:$0xff] %v11439_v24  ;;  %2934 = vadd.xlane.f32.xlu1 %v14742_v18  ;;  %v11457_v55 = vmul.f32 %v14673_v17, %v14396_v59  ;;  %v11469_v33 = vmul.f32 %v14649_v10, %v14738_v3  ;;  %v11477_v18 = vmul.f32 %v14673_v17, %v9143_v56  ;;  %v14749_v59 = vld [vmem:[#allocation97_spill] sm:$0xff]  ;;  %v11495_v56 = vpop.xlane.xlu1 %6192  ;;  %v14789_v48 = vld [vmem:[#allocation122_spill] sm:$0xff] }
 0x697   :  { %14739 = vst [vmem:[#allocation432_spill] sm:$0xff] %v11443_v58  ;;  %14740 = vst [vmem:[#allocation433_spill] sm:$0xff] %v11447_v6  ;;  %2932 = vadd.xlane.f32.xlu0 %v14749_v59  ;;  %v11499_v59 = vmul.f32 %v14673_v17, %v14544_v49  ;;  %v14787_v58 = vld [vmem:[#allocation120_spill] sm:$0xff] }
 0x698   :  { %14741 = vst [vmem:[#allocation434_spill] sm:$0xff] %v11451_v46  ;;  %14743 = vst [vmem:[#allocation96_spill] sm:$0xff] %v11457_v55  ;;  %v14785_v46 = vld [vmem:[#allocation118_spill] sm:$0xff] }
 0x699   :  { %14744 = vst [vmem:[#allocation435_spill] sm:$0xff] %v11461_v63  ;;  %14745 = vst [vmem:[#allocation436_spill] sm:$0xff] %v11465_v5  ;;  %v11483_v63 = vmul.f32 %v14649_v10, %v14736_v32  ;;  %v11487_v5 = vmul.f32 %v14673_v17, %v14539_v45  ;;  %v11507_v10 = vmul.f32 %v14673_v17, %v14738_v3  ;;  %v14765_v3 = vld [vmem:[#allocation101_spill] sm:$0xff] }
 0x69a   :  { %14746 = vst [vmem:[#allocation437_spill] sm:$0xff] %v11469_v33  ;;  %14747 = vst [vmem:[#allocation438_spill] sm:$0xff] %v11473_v52  ;;  %2938 = vadd.xlane.f32.xlu1 %v14750_v1  ;;  %v11491_v33 = vmul.f32 %v14673_v17, %v9153_v57  ;;  %v11493_v52 = vpop.xlane.xlu0 %6195  ;;  %v11503_v1 = vmul.f32 %v14673_v17, %v9167_v4  ;;  %v11511_v45 = vmul.f32 %v14673_v17, %v9174_v9  ;;  %v11521_v4 = vpop.xlane.xlu1 %6162  ;;  %v14764_v57 = vld [vmem:[#allocation100_spill] sm:$0xff]  ;;  %v14767_v9 = vld [vmem:[#allocation103_spill] sm:$0xff] }
 0x69b   :  { %14748 = vst [vmem:[#allocation439_spill] sm:$0xff] %v11477_v18  ;;  %14751 = vst [vmem:[#allocation97_spill] sm:$0xff] %v11483_v63  ;;  %v14783_v18 = vld [vmem:[#allocation116_spill] sm:$0xff] }
 0x69c   :  { %14752 = vst [vmem:[#allocation98_spill] sm:$0xff] %v11487_v5  ;;  %14753 = vst [vmem:[#allocation440_spill] sm:$0xff] %v11491_v33  ;;  %v14781_v5 = vld [vmem:[#allocation60_spill] sm:$0xff] }
 0x69d   :  { %14754 = vst [vmem:[#allocation441_spill] sm:$0xff] %v11493_v52  ;;  %14755 = vst [vmem:[#allocation442_spill] sm:$0xff] %v11495_v56  ;;  %v11515_v52 = vmul.f32 %v14673_v17, %v14736_v32  ;;  %v14761_v56 = vld [vmem:[#allocation99_spill] sm:$0xff]  ;;  %v14770_v32 = vld [vmem:[#allocation104_spill] sm:$0xff] }
 0x69e   :  { %14756 = vst [vmem:[#allocation443_spill] sm:$0xff] %v11499_v59  ;;  %14757 = vst [vmem:[#allocation444_spill] sm:$0xff] %v11503_v1  ;;  %2936 = vadd.xlane.f32.xlu0 %v14761_v56  ;;  %2942 = vadd.xlane.f32.xlu1 %v9831_v13  ;;  %v11519_v49 = vpop.xlane.xlu0 %6165  ;;  %v11529_v17 = vpop.xlane.xlu1 %6198  ;;  %v14771_v56 = vld [vmem:[#allocation105_spill] sm:$0xff]  ;;  %v14778_v1 = vld [vmem:[#allocation112_spill] sm:$0xff] }
 0x69f   :  { %14758 = vst [vmem:[#allocation445_spill] sm:$0xff] %v11507_v10  ;;  %14759 = vst [vmem:[#allocation446_spill] sm:$0xff] %v11511_v45  ;;  %v14766_v10 = vld [vmem:[#allocation102_spill] sm:$0xff] }
 0x6a0   :  { %14760 = vst [vmem:[#allocation447_spill] sm:$0xff] %v11515_v52  ;;  %14762 = vst [vmem:[#allocation99_spill] sm:$0xff] %v11519_v49 }
 0x6a1   :  { %14763 = vst [vmem:[#allocation448_spill] sm:$0xff] %v11521_v4  ;;  %14769 = vst [vmem:[#allocation101_spill] sm:$0xff] %v11529_v17  ;;  %v14772_v4 = vld [vmem:[#allocation106_spill] sm:$0xff] }
 0x6a2   :  { %2940 = vadd.xlane.f32.xlu0 %v14764_v57  ;;  %2946 = vadd.xlane.f32.xlu1 %v14765_v3  ;;  %v11527_v45 = vpop.xlane.xlu0 %6201  ;;  %v11535_v49 = vpop.xlane.xlu1 %2591  ;;  %v14773_v57 = vld [vmem:[#allocation107_spill] sm:$0xff]  ;;  %v14776_v17 = vld [vmem:[#allocation110_spill] sm:$0xff] }
 0x6a3   :  { %14768 = vst [vmem:[#allocation100_spill] sm:$0xff] %v11527_v45 }
 0x6a6   :  { %2944 = vadd.xlane.f32.xlu0 %v14766_v10  ;;  %2950 = vadd.xlane.f32.xlu1 %v14767_v9  ;;  %v11533_v13 = vpop.xlane.xlu0 %2593  ;;  %v11541_v10 = vpop.xlane.xlu1 %2599  ;;  %v14774_v9 = vld [vmem:[#allocation108_spill] sm:$0xff] }
 0x6aa   :  { %2948 = vadd.xlane.f32.xlu0 %v14770_v32  ;;  %2954 = vadd.xlane.f32.xlu1 %v14771_v56  ;;  %v11539_v3 = vpop.xlane.xlu0 %2595  ;;  %v11547_v32 = vpop.xlane.xlu1 %2603  ;;  %v14775_v56 = vld [vmem:[#allocation109_spill] sm:$0xff] }
 0x6ae   :  { %2952 = vadd.xlane.f32.xlu0 %v14772_v4  ;;  %2958 = vadd.xlane.f32.xlu1 %v14773_v57  ;;  %v11545_v45 = vpop.xlane.xlu0 %2597  ;;  %v11553_v4 = vpop.xlane.xlu1 %2607  ;;  %v14777_v57 = vld [vmem:[#allocation111_spill] sm:$0xff] }
 0x6b2   :  { %2956 = vadd.xlane.f32.xlu0 %v14774_v9  ;;  %2962 = vadd.xlane.f32.xlu1 %v9873_v42  ;;  %v11551_v52 = vpop.xlane.xlu0 %2601  ;;  %v11559_v9 = vpop.xlane.xlu1 %2611  ;;  %v14779_v42 = vld [vmem:[#allocation113_spill] sm:$0xff] }
 0x6b6   :  { %2960 = vadd.xlane.f32.xlu0 %v14775_v56  ;;  %2966 = vadd.xlane.f32.xlu1 %v14776_v17  ;;  %v11557_v59 = vpop.xlane.xlu0 %2605  ;;  %v11565_v56 = vpop.xlane.xlu1 %2615 }
 0x6ba   :  { %2964 = vadd.xlane.f32.xlu0 %v14777_v57  ;;  %2970 = vadd.xlane.f32.xlu1 %v14778_v1  ;;  %v11563_v33 = vpop.xlane.xlu0 %2609  ;;  %v11571_v57 = vpop.xlane.xlu1 %2619  ;;  %v14780_v1 = vld [vmem:[#allocation114_spill] sm:$0xff] }
 0x6be   :  { %2968 = vadd.xlane.f32.xlu0 %v9893_v53  ;;  %2974 = vadd.xlane.f32.xlu1 %v14779_v42  ;;  %v11569_v17 = vpop.xlane.xlu0 %2613  ;;  %v11577_v53 = vpop.xlane.xlu1 %2623  ;;  %v14782_v42 = vld [vmem:[#allocation115_spill] sm:$0xff] }
 0x6c2   :  { %2972 = vadd.xlane.f32.xlu0 %v9903_v19  ;;  %3151 = vadd.xlane.f32.xlu1 %v9907_v35  ;;  %v11575_v63 = vpop.xlane.xlu0 %2617  ;;  %v11583_v19 = vpop.xlane.xlu1 %2627  ;;  %v14784_v35 = vld [vmem:[#allocation117_spill] sm:$0xff] }
 0x6c6   :  { %2976 = vadd.xlane.f32.xlu0 %v14780_v1  ;;  %3155 = vadd.xlane.f32.xlu1 %v14781_v5  ;;  %v11581_v55 = vpop.xlane.xlu0 %2621  ;;  %v11589_v1 = vpop.xlane.xlu1 %2631  ;;  %v14786_v5 = vld [vmem:[#allocation119_spill] sm:$0xff] }
 0x6ca   :  { %3153 = vadd.xlane.f32.xlu0 %v14782_v42  ;;  %3159 = vadd.xlane.f32.xlu1 %v14783_v18  ;;  %v11587_v6 = vpop.xlane.xlu0 %2625  ;;  %v11595_v42 = vpop.xlane.xlu1 %2635  ;;  %v14788_v18 = vld [vmem:[#allocation121_spill] sm:$0xff] }
 0x6ce   :  { %3157 = vadd.xlane.f32.xlu0 %v14784_v35  ;;  %3163 = vadd.xlane.f32.xlu1 %v14785_v46  ;;  %v11593_v24 = vpop.xlane.xlu0 %2629  ;;  %v11601_v35 = vpop.xlane.xlu1 %2639  ;;  %v14790_v46 = vld [vmem:[#allocation123_spill] sm:$0xff] }
 0x6d2   :  { %3161 = vadd.xlane.f32.xlu0 %v14786_v5  ;;  %3167 = vadd.xlane.f32.xlu1 %v14787_v58  ;;  %v11599_v28 = vpop.xlane.xlu0 %2633  ;;  %v11607_v5 = vpop.xlane.xlu1 %2643  ;;  %v14792_v58 = vld [vmem:[#allocation125_spill] sm:$0xff] }
 0x6d6   :  { %3165 = vadd.xlane.f32.xlu0 %v14788_v18  ;;  %3171 = vadd.xlane.f32.xlu1 %v14789_v48  ;;  %v11605_v15 = vpop.xlane.xlu0 %2637  ;;  %v2708_v18 = vpop.xlane.xlu1 %2707  ;;  %v14794_v48 = vld [vmem:[#allocation127_spill] sm:$0xff] }
 0x6da   :  { %3169 = vadd.xlane.f32.xlu0 %v14790_v46  ;;  %3175 = vadd.xlane.f32.xlu1 %v14791_v30  ;;  %v11611_v38 = vpop.xlane.xlu0 %2641  ;;  %v2712_v46 = vpop.xlane.xlu1 %2711  ;;  %v14797_v30 = vld [vmem:[#allocation130_spill] sm:$0xff] }
 0x6de   :  { %3173 = vadd.xlane.f32.xlu0 %v14792_v58  ;;  %3179 = vadd.xlane.f32.xlu1 %v14793_v61  ;;  %v11615_v41 = vpop.xlane.xlu0 %2645  ;;  %v2716_v20 = vpop.xlane.xlu1 %2715  ;;  %v2792_v58 = vrot.slane %v2708_v18, 1  ;;  %v14800_v18 = vld [vmem:[#allocation133_spill] sm:$0xff] }
 0x6e2   :  { %3177 = vadd.xlane.f32.xlu0 %v14794_v48  ;;  %3183 = vadd.xlane.f32.xlu1 %v14795_v23  ;;  %v2710_v26 = vpop.xlane.xlu0 %2709  ;;  %v14798_v48 = vld [vmem:[#allocation131_spill] sm:$0xff]  ;;  %v14799_v23 = vld [vmem:[#allocation132_spill] sm:$0xff]  ;;  %v2720_v16 = vpop.xlane.xlu1 %2719 }
 0x6e3   :  { %v2793_v60 = vrot.slane %v2710_v26, 1 }
 0x6e5   :  { %v2794_v61 = vsel %vm2791_vm7, %v2792_v58, %v2793_v60  ;;  %v11621_v8 = vadd.f32 %v2793_v60, %v11533_v13  ;;  %v14801_v60 = vld [vmem:[#allocation134_spill] sm:$0xff] }
 0x6e6   :  { %3181 = vadd.xlane.f32.xlu0 %v14796_v22  ;;  %3187 = vadd.xlane.f32.xlu1 %v14797_v30  ;;  %v11626_v51 = vadd.f32 %v2794_v61, %v11535_v49  ;;  %v2714_v22 = vpop.xlane.xlu0 %2713  ;;  %v2795_v30 = vrot.slane %v2712_v46, 1  ;;  %v2798_v49 = vrot.slane %v2716_v20, 1 }
 0x6e7   :  { %v2796_v54 = vrot.slane %v2714_v22, 1  ;;  %v14802_v22 = vld [vmem:[#allocation135_spill] sm:$0xff] }
 0x6e9   :  { %v2797_v21 = vsel %vm2791_vm7, %v2795_v30, %v2796_v54  ;;  %v11630_v26 = vadd.f32 %v2796_v54, %v11545_v45  ;;  %v14803_v45 = vld [vmem:[#allocation136_spill] sm:$0xff] }
 0x6ea   :  { %3185 = vadd.xlane.f32.xlu0 %v14798_v48  ;;  %3191 = vadd.xlane.f32.xlu1 %v14799_v23  ;;  %v11635_v13 = vadd.f32 %v2797_v21, %v11539_v3  ;;  %v2718_v58 = vpop.xlane.xlu0 %2717  ;;  %v2724_v48 = vpop.xlane.xlu1 %2723  ;;  %v2801_v21 = vrot.slane %v2720_v16, 1 }
 0x6eb   :  { %v2799_v61 = vrot.slane %v2718_v58, 1  ;;  %v14804_v58 = vld [vmem:[#allocation137_spill] sm:$0xff] }
 0x6ed   :  { %v2800_v23 = vsel %vm2791_vm7, %v2798_v49, %v2799_v61  ;;  %v11639_v46 = vadd.f32 %v2799_v61, %v11551_v52  ;;  %v14805_v52 = vld [vmem:[#allocation138_spill] sm:$0xff] }
 0x6ee   :  { %3189 = vadd.xlane.f32.xlu0 %v14800_v18  ;;  %3195 = vadd.xlane.f32.xlu1 %v14801_v60  ;;  %v11644_v54 = vadd.f32 %v2800_v23, %v11541_v10  ;;  %v2722_v30 = vpop.xlane.xlu0 %2721  ;;  %v2728_v18 = vpop.xlane.xlu1 %2727  ;;  %v2804_v10 = vrot.slane %v2724_v48, 1 }
 0x6ef   :  { %v2802_v3 = vrot.slane %v2722_v30, 1  ;;  %v14806_v30 = vld [vmem:[#allocation139_spill] sm:$0xff] }
 0x6f1   :  { %v2803_v60 = vsel %vm2791_vm7, %v2801_v21, %v2802_v3  ;;  %v11648_v20 = vadd.f32 %v2802_v3, %v11557_v59  ;;  %v14807_v59 = vld [vmem:[#allocation140_spill] sm:$0xff] }
 0x6f2   :  { %3193 = vadd.xlane.f32.xlu0 %v14802_v22  ;;  %3199 = vadd.xlane.f32.xlu1 %v14803_v45  ;;  %v11653_v49 = vadd.f32 %v2803_v60, %v11547_v32  ;;  %v2726_v61 = vpop.xlane.xlu0 %2725  ;;  %v2732_v22 = vpop.xlane.xlu1 %2731  ;;  %v2807_v32 = vrot.slane %v2728_v18, 1 }
 0x6f3   :  { %v2805_v23 = vrot.slane %v2726_v61, 1  ;;  %v14808_v61 = vld [vmem:[#allocation141_spill] sm:$0xff] }
 0x6f5   :  { %v2806_v45 = vsel %vm2791_vm7, %v2804_v10, %v2805_v23  ;;  %v11657_v16 = vadd.f32 %v2805_v23, %v11563_v33  ;;  %v14809_v33 = vld [vmem:[#allocation142_spill] sm:$0xff] }
 0x6f6   :  { %3197 = vadd.xlane.f32.xlu0 %v14804_v58  ;;  %3203 = vadd.xlane.f32.xlu1 %v14805_v52  ;;  %v11662_v21 = vadd.f32 %v2806_v45, %v11553_v4  ;;  %v2730_v3 = vpop.xlane.xlu0 %2729  ;;  %v2736_v58 = vpop.xlane.xlu1 %2735  ;;  %v2810_v4 = vrot.slane %v2732_v22, 1 }
 0x6f7   :  { %v2808_v60 = vrot.slane %v2730_v3, 1  ;;  %v14810_v3 = vld [vmem:[#allocation143_spill] sm:$0xff] }
 0x6f9   :  { %v2809_v52 = vsel %vm2791_vm7, %v2807_v32, %v2808_v60  ;;  %v11666_v48 = vadd.f32 %v2808_v60, %v11569_v17  ;;  %v14811_v17 = vld [vmem:[#allocation144_spill] sm:$0xff] }
 0x6fa   :  { %3201 = vadd.xlane.f32.xlu0 %v14806_v30  ;;  %3207 = vadd.xlane.f32.xlu1 %v14807_v59  ;;  %v11671_v10 = vadd.f32 %v2809_v52, %v11559_v9  ;;  %v2734_v23 = vpop.xlane.xlu0 %2733  ;;  %v2740_v30 = vpop.xlane.xlu1 %2739  ;;  %v2813_v9 = vrot.slane %v2736_v58, 1 }
 0x6fb   :  { %v2811_v45 = vrot.slane %v2734_v23, 1  ;;  %v14812_v23 = vld [vmem:[#allocation145_spill] sm:$0xff] }
 0x6fd   :  { %v2812_v59 = vsel %vm2791_vm7, %v2810_v4, %v2811_v45  ;;  %v11675_v18 = vadd.f32 %v2811_v45, %v11575_v63  ;;  %v14813_v63 = vld [vmem:[#allocation146_spill] sm:$0xff] }
 0x6fe   :  { %3205 = vadd.xlane.f32.xlu0 %v14808_v61  ;;  %3211 = vadd.xlane.f32.xlu1 %v14809_v33  ;;  %v11680_v32 = vadd.f32 %v2812_v59, %v11565_v56  ;;  %v2738_v60 = vpop.xlane.xlu0 %2737  ;;  %v2744_v61 = vpop.xlane.xlu1 %2743  ;;  %v2816_v56 = vrot.slane %v2740_v30, 1 }
 0x6ff   :  { %v2814_v52 = vrot.slane %v2738_v60, 1  ;;  %v14814_v60 = vld [vmem:[#allocation147_spill] sm:$0xff] }
 0x701   :  { %v2815_v33 = vsel %vm2791_vm7, %v2813_v9, %v2814_v52  ;;  %v11684_v22 = vadd.f32 %v2814_v52, %v11581_v55  ;;  %v14815_v55 = vld [vmem:[#allocation148_spill] sm:$0xff] }
 0x702   :  { %3209 = vadd.xlane.f32.xlu0 %v14810_v3  ;;  %3215 = vadd.xlane.f32.xlu1 %v14811_v17  ;;  %v11689_v4 = vadd.f32 %v2815_v33, %v11571_v57  ;;  %v2742_v45 = vpop.xlane.xlu0 %2741  ;;  %v2748_v3 = vpop.xlane.xlu1 %2747  ;;  %v2819_v57 = vrot.slane %v2744_v61, 1 }
 0x703   :  { %v2817_v59 = vrot.slane %v2742_v45, 1  ;;  %v14816_v45 = vld [vmem:[#allocation149_spill] sm:$0xff] }
 0x705   :  { %v2818_v17 = vsel %vm2791_vm7, %v2816_v56, %v2817_v59  ;;  %v11693_v58 = vadd.f32 %v2817_v59, %v11587_v6  ;;  %v14817_v6 = vld [vmem:[#allocation150_spill] sm:$0xff] }
 0x706   :  { %3213 = vadd.xlane.f32.xlu0 %v14812_v23  ;;  %3219 = vadd.xlane.f32.xlu1 %v14813_v63  ;;  %v11698_v9 = vadd.f32 %v2818_v17, %v11577_v53  ;;  %v2746_v52 = vpop.xlane.xlu0 %2745  ;;  %v2752_v23 = vpop.xlane.xlu1 %2751  ;;  %v2822_v53 = vrot.slane %v2748_v3, 1 }
 0x707   :  { %v2820_v33 = vrot.slane %v2746_v52, 1  ;;  %v14818_v52 = vld [vmem:[#allocation151_spill] sm:$0xff] }
 0x709   :  { %v2821_v63 = vsel %vm2791_vm7, %v2819_v57, %v2820_v33  ;;  %v11702_v30 = vadd.f32 %v2820_v33, %v11593_v24  ;;  %v14819_v24 = vld [vmem:[#allocation152_spill] sm:$0xff] }
 0x70a   :  { %3217 = vadd.xlane.f32.xlu0 %v14814_v60  ;;  %3223 = vadd.xlane.f32.xlu1 %v14815_v55  ;;  %v11707_v56 = vadd.f32 %v2821_v63, %v11583_v19  ;;  %v2750_v59 = vpop.xlane.xlu0 %2749  ;;  %v2756_v60 = vpop.xlane.xlu1 %2755  ;;  %v2825_v19 = vrot.slane %v2752_v23, 1 }
 0x70b   :  { %v2823_v17 = vrot.slane %v2750_v59, 1  ;;  %v14820_v59 = vld [vmem:[#allocation153_spill] sm:$0xff] }
 0x70d   :  { %v2824_v55 = vsel %vm2791_vm7, %v2822_v53, %v2823_v17  ;;  %v11711_v61 = vadd.f32 %v2823_v17, %v11599_v28  ;;  %v14821_v28 = vld [vmem:[#allocation154_spill] sm:$0xff] }
 0x70e   :  { %3221 = vadd.xlane.f32.xlu0 %v14816_v45  ;;  %3227 = vadd.xlane.f32.xlu1 %v14817_v6  ;;  %v11716_v57 = vadd.f32 %v2824_v55, %v11589_v1  ;;  %v2754_v33 = vpop.xlane.xlu0 %2753  ;;  %v2760_v45 = vpop.xlane.xlu1 %2759  ;;  %v2828_v1 = vrot.slane %v2756_v60, 1 }
 0x70f   :  { %v2826_v63 = vrot.slane %v2754_v33, 1  ;;  %v14822_v33 = vld [vmem:[#allocation155_spill] sm:$0xff] }
 0x711   :  { %v2827_v6 = vsel %vm2791_vm7, %v2825_v19, %v2826_v63  ;;  %v11720_v3 = vadd.f32 %v2826_v63, %v11605_v15  ;;  %v14823_v15 = vld [vmem:[#allocation61_spill] sm:$0xff] }
 0x712   :  { %3225 = vadd.xlane.f32.xlu0 %v14818_v52  ;;  %3231 = vadd.xlane.f32.xlu1 %v14819_v24  ;;  %v11725_v53 = vadd.f32 %v2827_v6, %v11595_v42  ;;  %v2758_v17 = vpop.xlane.xlu0 %2757  ;;  %v2923_v52 = vpop.xlane.xlu1 %2922  ;;  %v2831_v42 = vrot.slane %v2760_v45, 1 }
 0x713   :  { %v2829_v55 = vrot.slane %v2758_v17, 1  ;;  %v14824_v17 = vld [vmem:[#allocation62_spill] sm:$0xff] }
 0x715   :  { %v2830_v24 = vsel %vm2791_vm7, %v2828_v1, %v2829_v55  ;;  %v11729_v23 = vadd.f32 %v2829_v55, %v11611_v38  ;;  %v14825_v38 = vld [vmem:[#allocation156_spill] sm:$0xff] }
 0x716   :  { %3229 = vadd.xlane.f32.xlu0 %v14820_v59  ;;  %3478 = vadd.xlane.f32.xlu1 %v14821_v28  ;;  %v11734_v19 = vadd.f32 %v2830_v24, %v11601_v35  ;;  %v2762_v63 = vpop.xlane.xlu0 %2761  ;;  %v2927_v59 = vpop.xlane.xlu1 %2926  ;;  %v3007_v24 = vrot.slane %v2923_v52, 2 }
 0x717   :  { %v2832_v6 = vrot.slane %v2762_v63, 1  ;;  %v14826_v63 = vld [vmem:[#allocation157_spill] sm:$0xff] }
 0x719   :  { %v2833_v28 = vsel %vm2791_vm7, %v2831_v42, %v2832_v6  ;;  %v11738_v60 = vadd.f32 %v2832_v6, %v11615_v41  ;;  %v14827_v41 = vld [vmem:[#allocation158_spill] sm:$0xff] }
 0x71a   :  { %3233 = vadd.xlane.f32.xlu0 %v14822_v33  ;;  %3482 = vadd.xlane.f32.xlu1 %v14823_v15  ;;  %v11743_v1 = vadd.f32 %v2833_v28, %v11607_v5  ;;  %v2931_v35 = vpop.xlane.xlu1 %2930  ;;  %v3010_v5 = vrot.slane %v2927_v59, 2 }
 0x71c   :  { %v2925_v55 = vpop.xlane.xlu0 %2924 }
 0x71d   :  { %v3008_v33 = vrot.slane %v2925_v55, 2  ;;  %v14828_v55 = vld [vmem:[#allocation159_spill] sm:$0xff] }
 0x71e   :  { %3480 = vadd.xlane.f32.xlu0 %v14824_v17  ;;  %3486 = vadd.xlane.f32.xlu1 %v14825_v38 }
 0x71f   :  { %v3009_v45 = vsel %vm3006_vm8, %v3007_v24, %v3008_v33  ;;  %v11747_v15 = vadd.f32 %v3008_v33, %v11621_v8  ;;  %v14829_v8 = vld [vmem:[#allocation160_spill] sm:$0xff] }
 0x720   :  { %v2929_v42 = vpop.xlane.xlu0 %2928  ;;  %v11752_v17 = vadd.f32 %v3009_v45, %v11626_v51  ;;  %v14830_v45 = vld [vmem:[#allocation161_spill] sm:$0xff] }
 0x721   :  { %v3011_v28 = vrot.slane %v2929_v42, 2 }
 0x722   :  { %3484 = vadd.xlane.f32.xlu0 %v14826_v63  ;;  %3490 = vadd.xlane.f32.xlu1 %v14827_v41  ;;  %v3013_v41 = vrot.slane %v2931_v35, 2 }
 0x723   :  { %v2935_v6 = vpop.xlane.xlu1 %2934  ;;  %v3012_v38 = vsel %vm3006_vm8, %v3010_v5, %v3011_v28  ;;  %v11756_v52 = vadd.f32 %v3011_v28, %v11630_v26  ;;  %v14831_v26 = vld [vmem:[#allocation162_spill] sm:$0xff] }
 0x724   :  { %v2933_v24 = vpop.xlane.xlu0 %2932  ;;  %v11761_v63 = vadd.f32 %v3012_v38, %v11635_v13  ;;  %v14832_v38 = vld [vmem:[#allocation163_spill] sm:$0xff] }
 0x725   :  { %v3014_v44 = vrot.slane %v2933_v24, 2 }
 0x726   :  { %3488 = vadd.xlane.f32.xlu0 %v14828_v55  ;;  %3494 = vadd.xlane.f32.xlu1 %v14829_v8  ;;  %v3016_v55 = vrot.slane %v2935_v6, 2 }
 0x727   :  { %v2939_v33 = vpop.xlane.xlu1 %2938  ;;  %v3015_v51 = vsel %vm3006_vm8, %v3013_v41, %v3014_v44  ;;  %v11765_v59 = vadd.f32 %v3014_v44, %v11639_v46  ;;  %v14833_v44 = vld [vmem:[#allocation164_spill] sm:$0xff] }
 0x728   :  { %v11770_v28 = vadd.f32 %v3015_v51, %v11644_v54  ;;  %v14834_v51 = vld [vmem:[#allocation165_spill] sm:$0xff] }
 0x72a   :  { %3492 = vadd.xlane.f32.xlu0 %v14830_v45  ;;  %3498 = vadd.xlane.f32.xlu1 %v14831_v26  ;;  %v3019_v45 = vrot.slane %v2939_v33, 2 }
 0x72b   :  { %v2937_v42 = vpop.xlane.xlu0 %2936  ;;  %v2943_v5 = vpop.xlane.xlu1 %2942 }
 0x72c   :  { %v3017_v8 = vrot.slane %v2937_v42, 2 }
 0x72e   :  { %v3018_v13 = vsel %vm3006_vm8, %v3016_v55, %v3017_v8  ;;  %v11774_v35 = vadd.f32 %v3017_v8, %v11648_v20  ;;  %3496 = vadd.xlane.f32.xlu0 %v14832_v38  ;;  %3502 = vadd.xlane.f32.xlu1 %v14833_v44  ;;  %v14835_v20 = vld [vmem:[#allocation166_spill] sm:$0xff]  ;;  %v3022_v38 = vrot.slane %v2943_v5, 2 }
 0x72f   :  { %v2941_v46 = vpop.xlane.xlu0 %2940  ;;  %v2947_v24 = vpop.xlane.xlu1 %2946  ;;  %v11779_v41 = vadd.f32 %v3018_v13, %v11653_v49  ;;  %v14836_v13 = vld [vmem:[#allocation167_spill] sm:$0xff] }
 0x730   :  { %v3020_v26 = vrot.slane %v2941_v46, 2 }
 0x732   :  { %v3021_v54 = vsel %vm3006_vm8, %v3019_v45, %v3020_v26  ;;  %v11783_v6 = vadd.f32 %v3020_v26, %v11657_v16  ;;  %3500 = vadd.xlane.f32.xlu0 %v14834_v51  ;;  %3506 = vadd.xlane.f32.xlu1 %v14835_v20  ;;  %v14837_v16 = vld [vmem:[#allocation168_spill] sm:$0xff]  ;;  %v3025_v51 = vrot.slane %v2947_v24, 2 }
 0x733   :  { %v2945_v42 = vpop.xlane.xlu0 %2944  ;;  %v2951_v55 = vpop.xlane.xlu1 %2950  ;;  %v11788_v8 = vadd.f32 %v3021_v54, %v11662_v21  ;;  %v14838_v54 = vld [vmem:[#allocation63_spill] sm:$0xff] }
 0x734   :  { %v3023_v44 = vrot.slane %v2945_v42, 2 }
 0x736   :  { %v3024_v49 = vsel %vm3006_vm8, %v3022_v38, %v3023_v44  ;;  %v11792_v33 = vadd.f32 %v3023_v44, %v11666_v48  ;;  %3504 = vadd.xlane.f32.xlu0 %v14836_v13  ;;  %3510 = vadd.xlane.f32.xlu1 %v14837_v16  ;;  %v14839_v48 = vld [vmem:[#allocation64_spill] sm:$0xff]  ;;  %v3028_v13 = vrot.slane %v2951_v55, 2 }
 0x737   :  { %v2949_v46 = vpop.xlane.xlu0 %2948  ;;  %v2955_v45 = vpop.xlane.xlu1 %2954  ;;  %v11797_v26 = vadd.f32 %v3024_v49, %v11671_v10  ;;  %v14840_v49 = vld [vmem:[#allocation169_spill] sm:$0xff] }
 0x738   :  { %v3026_v20 = vrot.slane %v2949_v46, 2 }
 0x73a   :  { %v3027_v21 = vsel %vm3006_vm8, %v3025_v51, %v3026_v20  ;;  %v11801_v5 = vadd.f32 %v3026_v20, %v11675_v18  ;;  %3508 = vadd.xlane.f32.xlu0 %v14838_v54  ;;  %3514 = vadd.xlane.f32.xlu1 %v14839_v48  ;;  %v14841_v18 = vld [vmem:[#allocation170_spill] sm:$0xff]  ;;  %v3031_v54 = vrot.slane %v2955_v45, 2 }
 0x73b   :  { %v2953_v42 = vpop.xlane.xlu0 %2952  ;;  %v2959_v38 = vpop.xlane.xlu1 %2958  ;;  %v11806_v44 = vadd.f32 %v3027_v21, %v11680_v32  ;;  %v14842_v21 = vld [vmem:[#allocation171_spill] sm:$0xff] }
 0x73c   :  { %v3029_v16 = vrot.slane %v2953_v42, 2 }
 0x73e   :  { %v3030_v10 = vsel %vm3006_vm8, %v3028_v13, %v3029_v16  ;;  %v11810_v24 = vadd.f32 %v3029_v16, %v11684_v22  ;;  %3512 = vadd.xlane.f32.xlu0 %v14840_v49  ;;  %3518 = vadd.xlane.f32.xlu1 %v14841_v18  ;;  %v14843_v22 = vld [vmem:[#allocation172_spill] sm:$0xff]  ;;  %v3034_v49 = vrot.slane %v2959_v38, 2 }
 0x73f   :  { %v2957_v46 = vpop.xlane.xlu0 %2956  ;;  %v2963_v51 = vpop.xlane.xlu1 %2962  ;;  %v11815_v20 = vadd.f32 %v3030_v10, %v11689_v4  ;;  %v14844_v10 = vld [vmem:[#allocation173_spill] sm:$0xff] }
 0x740   :  { %v3032_v48 = vrot.slane %v2957_v46, 2 }
 0x742   :  { %v3033_v32 = vsel %vm3006_vm8, %v3031_v54, %v3032_v48  ;;  %v11819_v55 = vadd.f32 %v3032_v48, %v11693_v58  ;;  %3516 = vadd.xlane.f32.xlu0 %v14842_v21  ;;  %3522 = vadd.xlane.f32.xlu1 %v14843_v22  ;;  %v14845_v58 = vld [vmem:[#allocation174_spill] sm:$0xff]  ;;  %v3037_v21 = vrot.slane %v2963_v51, 2 }
 0x743   :  { %v2961_v42 = vpop.xlane.xlu0 %2960  ;;  %v2967_v13 = vpop.xlane.xlu1 %2966  ;;  %v11824_v16 = vadd.f32 %v3033_v32, %v11698_v9  ;;  %v14846_v32 = vld [vmem:[#allocation175_spill] sm:$0xff] }
 0x744   :  { %v3035_v18 = vrot.slane %v2961_v42, 2 }
 0x746   :  { %v3036_v4 = vsel %vm3006_vm8, %v3034_v49, %v3035_v18  ;;  %v11828_v45 = vadd.f32 %v3035_v18, %v11702_v30  ;;  %3520 = vadd.xlane.f32.xlu0 %v14844_v10  ;;  %3526 = vadd.xlane.f32.xlu1 %v14845_v58  ;;  %v3040_v18 = vrot.slane %v2967_v13, 2 }
 0x747   :  { %v2965_v46 = vpop.xlane.xlu0 %2964  ;;  %v2971_v54 = vpop.xlane.xlu1 %2970  ;;  %v11833_v48 = vadd.f32 %v3036_v4, %v11707_v56  ;;  %v14847_v4 = vld [vmem:[#allocation176_spill] sm:$0xff] }
 0x748   :  { %v3038_v22 = vrot.slane %v2965_v46, 2  ;;  %v3043_v46 = vrot.slane %v2971_v54, 2 }
 0x74a   :  { %v3039_v9 = vsel %vm3006_vm8, %v3037_v21, %v3038_v22  ;;  %v11837_v38 = vadd.f32 %v3038_v22, %v11711_v61  ;;  %3524 = vadd.xlane.f32.xlu0 %v14846_v32  ;;  %3530 = vadd.xlane.f32.xlu1 %v10183_v47  ;;  %v14848_v22 = vld [vmem:[#allocation49_spill] sm:$0xff] }
 0x74b   :  { %v2969_v30 = vpop.xlane.xlu0 %2968  ;;  %v2975_v42 = vpop.xlane.xlu1 %2974  ;;  %v11842_v49 = vadd.f32 %v3039_v9, %v11716_v57 }
 0x74c   :  { %v3041_v10 = vrot.slane %v2969_v30, 2  ;;  %v3046_v30 = vrot.slane %v2975_v42, 2  ;;  %v14851_v42 = vld [vmem:[#allocation179_spill] sm:$0xff] }
 0x74e   :  { %v3042_v56 = vsel %vm3006_vm8, %v3040_v18, %v3041_v10  ;;  %v11846_v51 = vadd.f32 %v3041_v10, %v11720_v3  ;;  %3528 = vadd.xlane.f32.xlu0 %v14847_v4  ;;  %3594 = vadd.xlane.f32.xlu1 %v10191_v7  ;;  %v14849_v3 = vld [vmem:[#allocation177_spill] sm:$0xff] }
 0x74f   :  { %v2973_v61 = vpop.xlane.xlu0 %2972  ;;  %v3152_v58 = vpop.xlane.xlu1 %3151  ;;  %v11851_v47 = vadd.f32 %v3042_v56, %v11725_v53 }
 0x750   :  { %v3044_v21 = vrot.slane %v2973_v61, 2  ;;  %v3278_v61 = vrot.slane %v3152_v58, 3 }
 0x752   :  { %v3045_v57 = vsel %vm3006_vm8, %v3043_v46, %v3044_v21  ;;  %v11855_v13 = vadd.f32 %v3044_v21, %v11729_v23  ;;  %3532 = vadd.xlane.f32.xlu0 %v14848_v22  ;;  %3598 = vadd.xlane.f32.xlu1 %v14849_v3  ;;  %v14850_v23 = vld [vmem:[#allocation178_spill] sm:$0xff]  ;;  %v14852_v21 = vld [vmem:[#allocation180_spill] sm:$0xff] }
 0x753   :  { %v2977_v9 = vpop.xlane.xlu0 %2976  ;;  %v3156_v32 = vpop.xlane.xlu1 %3155  ;;  %v11860_v7 = vadd.f32 %v3045_v57, %v11734_v19 }
 0x754   :  { %v3047_v18 = vrot.slane %v2977_v9, 2  ;;  %v3281_v19 = vrot.slane %v3156_v32, 3  ;;  %v14853_v32 = vld [vmem:[#allocation181_spill] sm:$0xff] }
 0x756   :  { %v3048_v53 = vsel %vm3006_vm8, %v3046_v30, %v3047_v18  ;;  %v11864_v54 = vadd.f32 %v3047_v18, %v11738_v60  ;;  %3596 = vadd.xlane.f32.xlu0 %v10203_v37  ;;  %3602 = vadd.xlane.f32.xlu1 %v14850_v23  ;;  %v14854_v30 = vld [vmem:[#allocation182_spill] sm:$0xff] }
 0x757   :  { %v3154_v10 = vpop.xlane.xlu0 %3153  ;;  %v3160_v56 = vpop.xlane.xlu1 %3159  ;;  %v11869_v4 = vadd.f32 %v3048_v53, %v11743_v1 }
 0x758   :  { %v3279_v46 = vrot.slane %v3154_v10, 3  ;;  %v3284_v1 = vrot.slane %v3160_v56, 3 }
 0x75a   :  { %3600 = vadd.xlane.f32.xlu0 %v14851_v42  ;;  %3606 = vadd.xlane.f32.xlu1 %v14852_v21  ;;  %v3280_v60 = vsel %vm3277_vm9, %v3278_v61, %v3279_v46  ;;  %v3282_v57 = vsel %vm3277_vm9, %v3279_v46, %v3281_v19  ;;  %v14855_v19 = vld [vmem:[#allocation183_spill] sm:$0xff] }
 0x75b   :  { %v3158_v37 = vpop.xlane.xlu0 %3157  ;;  %v3164_v22 = vpop.xlane.xlu1 %3163  ;;  %v11876_v3 = vadd.f32 %v3280_v60, %v11752_v17  ;;  %v11879_v9 = vadd.f32 %v3282_v57, %v11747_v15  ;;  %v14856_v17 = vld [vmem:[#allocation184_spill] sm:$0xff] }
 0x75c   :  { %v3283_v58 = vrot.slane %v3158_v37, 3  ;;  %v3288_v21 = vrot.slane %v3164_v22, 3  ;;  %v14857_v37 = vld [vmem:[#allocation185_spill] sm:$0xff] }
 0x75e   :  { %3604 = vadd.xlane.f32.xlu0 %v14853_v32  ;;  %3610 = vadd.xlane.f32.xlu1 %v14854_v30  ;;  %v3285_v18 = vsel %vm3277_vm9, %v3283_v58, %v3284_v1  ;;  %v14858_v58 = vld [vmem:[#allocation186_spill] sm:$0xff] }
 0x75f   :  { %v3162_v53 = vpop.xlane.xlu0 %3161  ;;  %v3168_v23 = vpop.xlane.xlu1 %3167  ;;  %v11885_v10 = vadd.f32 %v3285_v18, %v11761_v63 }
 0x760   :  { %v3286_v61 = vrot.slane %v3162_v53, 3  ;;  %v3291_v60 = vrot.slane %v3168_v23, 3  ;;  %v14859_v23 = vld [vmem:[#allocation187_spill] sm:$0xff] }
 0x762   :  { %3608 = vadd.xlane.f32.xlu0 %v14855_v19  ;;  %3614 = vadd.xlane.f32.xlu1 %v14856_v17  ;;  %v3287_v15 = vsel %vm3277_vm9, %v3284_v1, %v3286_v61  ;;  %v14860_v61 = vld [vmem:[#allocation188_spill] sm:$0xff] }
 0x763   :  { %v3166_v56 = vpop.xlane.xlu0 %3165  ;;  %v3172_v46 = vpop.xlane.xlu1 %3171  ;;  %v11891_v42 = vadd.f32 %v3287_v15, %v11756_v52 }
 0x764   :  { %v3289_v57 = vrot.slane %v3166_v56, 3  ;;  %v3294_v52 = vrot.slane %v3172_v46, 3 }
 0x766   :  { %3612 = vadd.xlane.f32.xlu0 %v14857_v37  ;;  %3618 = vadd.xlane.f32.xlu1 %v14858_v58  ;;  %v3290_v63 = vsel %vm3277_vm9, %v3288_v21, %v3289_v57  ;;  %v3292_v32 = vsel %vm3277_vm9, %v3289_v57, %v3291_v60  ;;  %v14861_v60 = vld [vmem:[#allocation189_spill] sm:$0xff] }
 0x767   :  { %v3170_v30 = vpop.xlane.xlu0 %3169  ;;  %v3176_v18 = vpop.xlane.xlu1 %3175  ;;  %v11898_v1 = vadd.f32 %v3290_v63, %v11770_v28  ;;  %v11901_v53 = vadd.f32 %v3292_v32, %v11765_v59  ;;  %v14862_v28 = vld [vmem:[#allocation190_spill] sm:$0xff] }
 0x768   :  { %v3293_v22 = vrot.slane %v3170_v30, 3  ;;  %v3298_v58 = vrot.slane %v3176_v18, 3  ;;  %v14863_v30 = vld [vmem:[#allocation191_spill] sm:$0xff] }
 0x76a   :  { %3616 = vadd.xlane.f32.xlu0 %v14859_v23  ;;  %3622 = vadd.xlane.f32.xlu1 %v14860_v61  ;;  %v3295_v19 = vsel %vm3277_vm9, %v3293_v22, %v3294_v52  ;;  %v14864_v22 = vld [vmem:[#allocation192_spill] sm:$0xff] }
 0x76b   :  { %v3174_v17 = vpop.xlane.xlu0 %3173  ;;  %v3180_v15 = vpop.xlane.xlu1 %3179  ;;  %v11907_v56 = vadd.f32 %v3295_v19, %v11779_v41 }
 0x76c   :  { %v3296_v21 = vrot.slane %v3174_v17, 3  ;;  %v3301_v63 = vrot.slane %v3180_v15, 3  ;;  %v14865_v15 = vld [vmem:[#allocation65_spill] sm:$0xff] }
 0x76e   :  { %3620 = vadd.xlane.f32.xlu0 %v14861_v60  ;;  %3626 = vadd.xlane.f32.xlu1 %v14862_v28  ;;  %v3297_v59 = vsel %vm3277_vm9, %v3294_v52, %v3296_v21  ;;  %v14866_v21 = vld [vmem:[#allocation193_spill] sm:$0xff] }
 0x76f   :  { %v3178_v46 = vpop.xlane.xlu0 %3177  ;;  %v3184_v57 = vpop.xlane.xlu1 %3183  ;;  %v11913_v37 = vadd.f32 %v3297_v59, %v11774_v35 }
 0x770   :  { %v3299_v32 = vrot.slane %v3178_v46, 3  ;;  %v3304_v35 = vrot.slane %v3184_v57, 3 }
 0x772   :  { %3624 = vadd.xlane.f32.xlu0 %v14863_v30  ;;  %3630 = vadd.xlane.f32.xlu1 %v14864_v22  ;;  %v3300_v41 = vsel %vm3277_vm9, %v3298_v58, %v3299_v32  ;;  %v3302_v23 = vsel %vm3277_vm9, %v3299_v32, %v3301_v63  ;;  %v14867_v63 = vld [vmem:[#allocation194_spill] sm:$0xff] }
 0x773   :  { %v3182_v61 = vpop.xlane.xlu0 %3181  ;;  %v3188_v19 = vpop.xlane.xlu1 %3187  ;;  %v11920_v52 = vadd.f32 %v3300_v41, %v11788_v8  ;;  %v11923_v17 = vadd.f32 %v3302_v23, %v11783_v6  ;;  %v14868_v8 = vld [vmem:[#allocation195_spill] sm:$0xff] }
 0x774   :  { %v3303_v18 = vrot.slane %v3182_v61, 3  ;;  %v3308_v22 = vrot.slane %v3188_v19, 3  ;;  %v14869_v61 = vld [vmem:[#allocation196_spill] sm:$0xff] }
 0x776   :  { %3628 = vadd.xlane.f32.xlu0 %v14865_v15  ;;  %3634 = vadd.xlane.f32.xlu1 %v14866_v21  ;;  %v3305_v60 = vsel %vm3277_vm9, %v3303_v18, %v3304_v35  ;;  %v14870_v18 = vld [vmem:[#allocation197_spill] sm:$0xff] }
 0x777   :  { %v3186_v28 = vpop.xlane.xlu0 %3185  ;;  %v3192_v59 = vpop.xlane.xlu1 %3191  ;;  %v11929_v46 = vadd.f32 %v3305_v60, %v11797_v26 }
 0x778   :  { %v3306_v58 = vrot.slane %v3186_v28, 3  ;;  %v3311_v41 = vrot.slane %v3192_v59, 3  ;;  %v14871_v59 = vld [vmem:[#allocation198_spill] sm:$0xff] }
 0x77a   :  { %3632 = vadd.xlane.f32.xlu0 %v14867_v63  ;;  %3638 = vadd.xlane.f32.xlu1 %v14868_v8  ;;  %v3307_v6 = vsel %vm3277_vm9, %v3304_v35, %v3306_v58  ;;  %v14872_v58 = vld [vmem:[#allocation199_spill] sm:$0xff] }
 0x77b   :  { %v3190_v57 = vpop.xlane.xlu0 %3189  ;;  %v3196_v32 = vpop.xlane.xlu1 %3195  ;;  %v11935_v30 = vadd.f32 %v3307_v6, %v11792_v33 }
 0x77c   :  { %v3309_v23 = vrot.slane %v3190_v57, 3  ;;  %v3314_v33 = vrot.slane %v3196_v32, 3 }
 0x77e   :  { %3636 = vadd.xlane.f32.xlu0 %v14869_v61  ;;  %3642 = vadd.xlane.f32.xlu1 %v14870_v18  ;;  %v3310_v26 = vsel %vm3277_vm9, %v3308_v22, %v3309_v23  ;;  %v3312_v15 = vsel %vm3277_vm9, %v3309_v23, %v3311_v41  ;;  %v14873_v41 = vld [vmem:[#allocation200_spill] sm:$0xff] }
 0x77f   :  { %v3194_v21 = vpop.xlane.xlu0 %3193  ;;  %v3200_v60 = vpop.xlane.xlu1 %3199  ;;  %v11942_v35 = vadd.f32 %v3310_v26, %v11806_v44  ;;  %v11945_v28 = vadd.f32 %v3312_v15, %v11801_v5  ;;  %v14874_v44 = vld [vmem:[#allocation50_spill] sm:$0xff] }
 0x780   :  { %v3313_v19 = vrot.slane %v3194_v21, 3  ;;  %v3318_v18 = vrot.slane %v3200_v60, 3  ;;  %v14875_v21 = vld [vmem:[#allocation201_spill] sm:$0xff] }
 0x782   :  { %3640 = vadd.xlane.f32.xlu0 %v14871_v59  ;;  %3646 = vadd.xlane.f32.xlu1 %v14872_v58  ;;  %v3315_v63 = vsel %vm3277_vm9, %v3313_v19, %v3314_v33  ;;  %v14876_v19 = vld [vmem:[#allocation202_spill] sm:$0xff] }
 0x783   :  { %v3198_v8 = vpop.xlane.xlu0 %3197  ;;  %v3204_v6 = vpop.xlane.xlu1 %3203  ;;  %v11951_v57 = vadd.f32 %v3315_v63, %v11815_v20 }
 0x784   :  { %v3316_v22 = vrot.slane %v3198_v8, 3  ;;  %v3321_v26 = vrot.slane %v3204_v6, 3  ;;  %v14877_v6 = vld [vmem:[#allocation203_spill] sm:$0xff] }
 0x786   :  { %3644 = vadd.xlane.f32.xlu0 %v14873_v41  ;;  %3808 = vadd.xlane.f32.xlu1 %v14874_v44  ;;  %v3317_v5 = vsel %vm3277_vm9, %v3314_v33, %v3316_v22  ;;  %v14878_v22 = vld [vmem:[#allocation204_spill] sm:$0xff] }
 0x787   :  { %v3202_v32 = vpop.xlane.xlu0 %3201  ;;  %v3208_v23 = vpop.xlane.xlu1 %3207  ;;  %v11957_v61 = vadd.f32 %v3317_v5, %v11810_v24 }
 0x788   :  { %v3319_v15 = vrot.slane %v3202_v32, 3  ;;  %v3324_v24 = vrot.slane %v3208_v23, 3 }
 0x78a   :  { %3648 = vadd.xlane.f32.xlu0 %v14875_v21  ;;  %3812 = vadd.xlane.f32.xlu1 %v14876_v19  ;;  %v3320_v20 = vsel %vm3277_vm9, %v3318_v18, %v3319_v15  ;;  %v3322_v59 = vsel %vm3277_vm9, %v3319_v15, %v3321_v26 }
 0x78b   :  { %v3206_v58 = vpop.xlane.xlu0 %3205  ;;  %v3212_v63 = vpop.xlane.xlu1 %3211  ;;  %v11964_v33 = vadd.f32 %v3320_v20, %v11824_v16  ;;  %v11967_v8 = vadd.f32 %v3322_v59, %v11819_v55  ;;  %v14879_v16 = vld [vmem:[#allocation66_spill] sm:$0xff]  ;;  %v14880_v59 = vld [vmem:[#allocation67_spill] sm:$0xff] }
 0x78c   :  { %v3323_v60 = vrot.slane %v3206_v58, 3  ;;  %v3328_v21 = vrot.slane %v3212_v63, 3  ;;  %v14881_v58 = vld [vmem:[#allocation205_spill] sm:$0xff] }
 0x78e   :  { %3810 = vadd.xlane.f32.xlu0 %v14877_v6  ;;  %3816 = vadd.xlane.f32.xlu1 %v14878_v22  ;;  %v3325_v41 = vsel %vm3277_vm9, %v3323_v60, %v3324_v24 }
 0x78f   :  { %v3210_v44 = vpop.xlane.xlu0 %3209  ;;  %v3216_v5 = vpop.xlane.xlu1 %3215  ;;  %v11973_v32 = vadd.f32 %v3325_v41, %v11833_v48  ;;  %v14882_v41 = vld [vmem:[#allocation206_spill] sm:$0xff] }
 0x790   :  { %v3326_v18 = vrot.slane %v3210_v44, 3  ;;  %v3331_v19 = vrot.slane %v3216_v5, 3  ;;  %v14883_v44 = vld [vmem:[#allocation207_spill] sm:$0xff] }
 0x792   :  { %3814 = vadd.xlane.f32.xlu0 %v10327_v12  ;;  %3820 = vadd.xlane.f32.xlu1 %v14879_v16  ;;  %v3327_v55 = vsel %vm3277_vm9, %v3324_v24, %v3326_v18 }
 0x793   :  { %v3214_v23 = vpop.xlane.xlu0 %3213  ;;  %v3220_v26 = vpop.xlane.xlu1 %3219  ;;  %v11979_v15 = vadd.f32 %v3327_v55, %v11828_v45 }
 0x794   :  { %v3329_v20 = vrot.slane %v3214_v23, 3  ;;  %v3334_v45 = vrot.slane %v3220_v26, 3 }
 0x796   :  { %3818 = vadd.xlane.f32.xlu0 %v14880_v59  ;;  %3824 = vadd.xlane.f32.xlu1 %v14881_v58  ;;  %v3330_v48 = vsel %vm3277_vm9, %v3328_v21, %v3329_v20  ;;  %v3332_v12 = vsel %vm3277_vm9, %v3329_v20, %v3331_v19  ;;  %v14884_v21 = vld [vmem:[#allocation208_spill] sm:$0xff] }
 0x797   :  { %v3218_v60 = vpop.xlane.xlu0 %3217  ;;  %v3224_v6 = vpop.xlane.xlu1 %3223  ;;  %v11986_v24 = vadd.f32 %v3330_v48, %v11842_v49  ;;  %v11989_v22 = vadd.f32 %v3332_v12, %v11837_v38  ;;  %v14885_v49 = vld [vmem:[#allocation209_spill] sm:$0xff]  ;;  %v14886_v12 = vld [vmem:[#allocation210_spill] sm:$0xff] }
 0x798   :  { %v3333_v63 = vrot.slane %v3218_v60, 3  ;;  %v3338_v59 = vrot.slane %v3224_v6, 3  ;;  %v14887_v60 = vld [vmem:[#allocation211_spill] sm:$0xff] }
 0x79a   :  { %3822 = vadd.xlane.f32.xlu0 %v14882_v41  ;;  %3828 = vadd.xlane.f32.xlu1 %v14883_v44  ;;  %v3335_v5 = vsel %vm3277_vm9, %v3333_v63, %v3334_v45 }
 0x79b   :  { %v3222_v18 = vpop.xlane.xlu0 %3221  ;;  %v3228_v16 = vpop.xlane.xlu1 %3227  ;;  %v11995_v55 = vadd.f32 %v3335_v5, %v11851_v47 }
 0x79c   :  { %v3336_v23 = vrot.slane %v3222_v18, 3  ;;  %v3341_v58 = vrot.slane %v3228_v16, 3  ;;  %v14888_v16 = vld [vmem:[#allocation212_spill] sm:$0xff] }
 0x79e   :  { %3826 = vadd.xlane.f32.xlu0 %v14884_v21  ;;  %3832 = vadd.xlane.f32.xlu1 %v14885_v49  ;;  %v3337_v38 = vsel %vm3277_vm9, %v3334_v45, %v3336_v23  ;;  %v14889_v23 = vld [vmem:[#allocation213_spill] sm:$0xff] }
 0x79f   :  { %v3226_v26 = vpop.xlane.xlu0 %3225  ;;  %v3232_v19 = vpop.xlane.xlu1 %3231  ;;  %v12001_v20 = vadd.f32 %v3337_v38, %v11846_v51 }
 0x7a0   :  { %v3339_v48 = vrot.slane %v3226_v26, 3  ;;  %v3344_v51 = vrot.slane %v3232_v19, 3  ;;  %v14890_v19 = vld [vmem:[#allocation214_spill] sm:$0xff] }
 0x7a2   :  { %3830 = vadd.xlane.f32.xlu0 %v14886_v12  ;;  %3836 = vadd.xlane.f32.xlu1 %v14887_v60  ;;  %v3340_v47 = vsel %vm3277_vm9, %v3338_v59, %v3339_v48  ;;  %v3342_v63 = vsel %vm3277_vm9, %v3339_v48, %v3341_v58  ;;  %v14891_v59 = vld [vmem:[#allocation215_spill] sm:$0xff] }
 0x7a3   :  { %v3230_v41 = vpop.xlane.xlu0 %3229  ;;  %v3479_v44 = vpop.xlane.xlu1 %3478  ;;  %v12008_v45 = vadd.f32 %v3340_v47, %v11860_v7  ;;  %v12011_v5 = vadd.f32 %v3342_v63, %v11855_v13  ;;  %v14892_v47 = vld [vmem:[#allocation216_spill] sm:$0xff] }
 0x7a4   :  { %v3343_v6 = vrot.slane %v3230_v41, 3  ;;  %v12014_v18 = vadd.f32 %v3479_v44, %v11876_v3 }
 0x7a6   :  { %3834 = vadd.xlane.f32.xlu0 %v14888_v16  ;;  %3840 = vadd.xlane.f32.xlu1 %v14889_v23  ;;  %v3345_v21 = vsel %vm3277_vm9, %v3343_v6, %v3344_v51  ;;  %v14895_v6 = vld [vmem:[#allocation218_spill] sm:$0xff] }
 0x7a7   :  { %v3234_v49 = vpop.xlane.xlu0 %3233  ;;  %v3483_v38 = vpop.xlane.xlu1 %3482  ;;  %v12020_v26 = vadd.f32 %v3345_v21, %v11869_v4  ;;  %v14896_v21 = vld [vmem:[#allocation219_spill] sm:$0xff] }
 0x7a8   :  { %v3346_v7 = vrot.slane %v3234_v49, 3  ;;  %v12023_v13 = vadd.f32 %v3483_v38, %v11885_v10  ;;  %v14893_v10 = vld [vmem:[#allocation217_spill] sm:$0xff]  ;;  %v14897_v49 = vld [vmem:[#allocation220_spill] sm:$0xff] }
 0x7aa   :  { %3838 = vadd.xlane.f32.xlu0 %v14890_v19  ;;  %3844 = vadd.xlane.f32.xlu1 %v14891_v59  ;;  %v3347_v3 = vsel %vm3277_vm9, %v3344_v51, %v3346_v7  ;;  %v14898_v19 = vld [vmem:[#allocation221_spill] sm:$0xff]  ;;  %v14899_v59 = vld [vmem:[#allocation222_spill] sm:$0xff] }
 0x7ab   :  { %v3481_v58 = vpop.xlane.xlu0 %3480  ;;  %v3487_v48 = vpop.xlane.xlu1 %3486  ;;  %v12029_v12 = vadd.f32 %v3347_v3, %v11864_v54  ;;  %v14894_v54 = vld [vmem:[#allocation68_spill] sm:$0xff] }
 0x7ac   :  { %v12032_v60 = vadd.f32 %v3481_v58, %v11879_v9  ;;  %v12035_v4 = vadd.f32 %v3487_v48, %v11898_v1  ;;  %v14900_v48 = vld [vmem:[#allocation51_spill] sm:$0xff] }
 0x7ae   :  { %3842 = vadd.xlane.f32.xlu0 %v14892_v47  ;;  %3848 = vadd.xlane.f32.xlu1 %v14893_v10 }
 0x7af   :  { %v3485_v63 = vpop.xlane.xlu0 %3484  ;;  %v3491_v41 = vpop.xlane.xlu1 %3490 }
 0x7b0   :  { %v12040_v44 = vadd.f32 %v3485_v63, %v11891_v42  ;;  %v12043_v51 = vadd.f32 %v3491_v41, %v11907_v56  ;;  %v14901_v63 = vld [vmem:[#allocation223_spill] sm:$0xff]  ;;  %v14902_v41 = vld [vmem:[#allocation224_spill] sm:$0xff] }
 0x7b2   :  { %3846 = vadd.xlane.f32.xlu0 %v14894_v54  ;;  %3852 = vadd.xlane.f32.xlu1 %v14895_v6  ;;  %v14903_v6 = vld [vmem:[#allocation225_spill] sm:$0xff] }
 0x7b3   :  { %v3489_v9 = vpop.xlane.xlu0 %3488  ;;  %v3495_v16 = vpop.xlane.xlu1 %3494 }
 0x7b4   :  { %v12048_v1 = vadd.f32 %v3489_v9, %v11901_v53  ;;  %v12051_v23 = vadd.f32 %v3495_v16, %v11920_v52  ;;  %v14904_v9 = vld [vmem:[#allocation226_spill] sm:$0xff] }
 0x7b6   :  { %3850 = vadd.xlane.f32.xlu0 %v14896_v21  ;;  %3856 = vadd.xlane.f32.xlu1 %v14897_v49  ;;  %v14905_v49 = vld [vmem:[#allocation227_spill] sm:$0xff] }
 0x7b7   :  { %v3493_v42 = vpop.xlane.xlu0 %3492  ;;  %v3499_v38 = vpop.xlane.xlu1 %3498 }
 0x7b8   :  { %v12056_v56 = vadd.f32 %v3493_v42, %v11913_v37  ;;  %v12059_v7 = vadd.f32 %v3499_v38, %v11929_v46  ;;  %v14906_v42 = vld [vmem:[#allocation228_spill] sm:$0xff] }
 0x7ba   :  { %3854 = vadd.xlane.f32.xlu0 %v14898_v19  ;;  %3860 = vadd.xlane.f32.xlu1 %v14899_v59  ;;  %v14907_v59 = vld [vmem:[#allocation229_spill] sm:$0xff] }
 0x7bb   :  { %v3497_v53 = vpop.xlane.xlu0 %3496  ;;  %v3503_v3 = vpop.xlane.xlu1 %3502 }
 0x7bc   :  { %v12064_v52 = vadd.f32 %v3497_v53, %v11923_v17  ;;  %v12067_v58 = vadd.f32 %v3503_v3, %v11942_v35  ;;  %v14908_v53 = vld [vmem:[#allocation69_spill] sm:$0xff] }
 0x7be   :  { %3858 = vadd.xlane.f32.xlu0 %v10419_v25  ;;  %4036 = vadd.xlane.f32.xlu1 %v14900_v48 }
 0x7bf   :  { %v3501_v37 = vpop.xlane.xlu0 %3500  ;;  %v3507_v47 = vpop.xlane.xlu1 %3506 }
 0x7c0   :  { %v12072_v46 = vadd.f32 %v3501_v37, %v11935_v30  ;;  %v12075_v10 = vadd.f32 %v3507_v47, %v11951_v57  ;;  %v14909_v37 = vld [vmem:[#allocation70_spill] sm:$0xff] }
 0x7c1   :  { %v14910_v47 = vld [vmem:[#allocation230_spill] sm:$0xff] }
 0x7c2   :  { %3862 = vadd.xlane.f32.xlu0 %v14901_v63  ;;  %4040 = vadd.xlane.f32.xlu1 %v14902_v41 }
 0x7c3   :  { %v3505_v17 = vpop.xlane.xlu0 %3504  ;;  %v3511_v54 = vpop.xlane.xlu1 %3510 }
 0x7c4   :  { %v12080_v35 = vadd.f32 %v3505_v17, %v11945_v28  ;;  %v12083_v25 = vadd.f32 %v3511_v54, %v11964_v33  ;;  %v14911_v17 = vld [vmem:[#allocation231_spill] sm:$0xff]  ;;  %v14912_v54 = vld [vmem:[#allocation232_spill] sm:$0xff] }
 0x7c6   :  { %4038 = vadd.xlane.f32.xlu0 %v14903_v6  ;;  %4044 = vadd.xlane.f32.xlu1 %v14904_v9 }
 0x7c7   :  { %v3509_v30 = vpop.xlane.xlu0 %3508  ;;  %v3515_v16 = vpop.xlane.xlu1 %3514 }
 0x7c8   :  { %v12088_v57 = vadd.f32 %v3509_v30, %v11957_v61  ;;  %v12091_v21 = vadd.f32 %v3515_v16, %v11973_v32  ;;  %v14913_v30 = vld [vmem:[#allocation233_spill] sm:$0xff]  ;;  %v14914_v16 = vld [vmem:[#allocation234_spill] sm:$0xff] }
 0x7ca   :  { %4042 = vadd.xlane.f32.xlu0 %v14905_v49  ;;  %4048 = vadd.xlane.f32.xlu1 %v14906_v42  ;;  %v14915_v42 = vld [vmem:[#allocation235_spill] sm:$0xff] }
 0x7cb   :  { %v3513_v28 = vpop.xlane.xlu0 %3512  ;;  %v3519_v38 = vpop.xlane.xlu1 %3518 }
 0x7cc   :  { %v12096_v33 = vadd.f32 %v3513_v28, %v11967_v8  ;;  %v12099_v19 = vadd.f32 %v3519_v38, %v11986_v24  ;;  %v14916_v28 = vld [vmem:[#allocation236_spill] sm:$0xff] }
 0x7ce   :  { %4046 = vadd.xlane.f32.xlu0 %v14907_v59  ;;  %4052 = vadd.xlane.f32.xlu1 %v14908_v53  ;;  %v14918_v53 = vld [vmem:[#allocation238_spill] sm:$0xff] }
 0x7cf   :  { %v3517_v61 = vpop.xlane.xlu0 %3516  ;;  %v3523_v3 = vpop.xlane.xlu1 %3522 }
 0x7d0   :  { %v12104_v32 = vadd.f32 %v3517_v61, %v11979_v15  ;;  %v12107_v48 = vadd.f32 %v3523_v3, %v11995_v55 }
 0x7d2   :  { %4050 = vadd.xlane.f32.xlu0 %v14909_v37  ;;  %4056 = vadd.xlane.f32.xlu1 %v14910_v47 }
 0x7d3   :  { %v3521_v8 = vpop.xlane.xlu0 %3520  ;;  %v3527_v63 = vpop.xlane.xlu1 %3526 }
 0x7d4   :  { %v12112_v24 = vadd.f32 %v3521_v8, %v11989_v22  ;;  %v12115_v41 = vadd.f32 %v3527_v63, %v12008_v45  ;;  %v14919_v63 = vld [vmem:[#allocation241_spill] sm:$0xff] }
 0x7d6   :  { %4054 = vadd.xlane.f32.xlu0 %v14911_v17  ;;  %4060 = vadd.xlane.f32.xlu1 %v14912_v54  ;;  %v14920_v17 = vld [vmem:[#allocation242_spill] sm:$0xff] }
 0x7d7   :  { %v3525_v15 = vpop.xlane.xlu0 %3524  ;;  %v3531_v6 = vpop.xlane.xlu1 %3530 }
 0x7d8   :  { %v12120_v55 = vadd.f32 %v3525_v15, %v12001_v20  ;;  %v12123_v9 = vadd.f32 %v3531_v6, %v12020_v26  ;;  %v14917_v26 = vld [vmem:[#allocation237_spill] sm:$0xff] }
 0x7da   :  { %4058 = vadd.xlane.f32.xlu0 %v14913_v30  ;;  %4064 = vadd.xlane.f32.xlu1 %v14914_v16 }
 0x7db   :  { %v3529_v22 = vpop.xlane.xlu0 %3528  ;;  %v3595_v49 = vpop.xlane.xlu1 %3594 }
 0x7dc   :  { %v12128_v45 = vadd.f32 %v3529_v22, %v12011_v5  ;;  %v3678_v37 = vrot.slane %v3595_v49, 1  ;;  %v14921_v49 = vld [vmem:[#allocation243_spill] sm:$0xff] }
 0x7de   :  { %4062 = vadd.xlane.f32.xlu0 %v14915_v42  ;;  %4068 = vadd.xlane.f32.xlu1 %v14916_v28 }
 0x7df   :  { %v3533_v38 = vpop.xlane.xlu0 %3532  ;;  %v3599_v59 = vpop.xlane.xlu1 %3598 }
 0x7e0   :  { %v12133_v20 = vadd.f32 %v3533_v38, %v12029_v12  ;;  %v3681_v6 = vrot.slane %v3599_v59, 1 }
 0x7e2   :  { %4066 = vadd.xlane.f32.xlu0 %v14917_v26  ;;  %4072 = vadd.xlane.f32.xlu1 %v14918_v53 }
 0x7e3   :  { %v3597_v61 = vpop.xlane.xlu0 %3596  ;;  %v3603_v3 = vpop.xlane.xlu1 %3602 }
 0x7e4   :  { %v3679_v47 = vrot.slane %v3597_v61, 1  ;;  %v14923_v61 = vld [vmem:[#allocation71_spill] sm:$0xff] }
 0x7e6   :  { %v3680_v5 = vsel %vm2791_vm7, %v3678_v37, %v3679_v47  ;;  %v12139_v8 = vadd.f32 %v3679_v47, %v12032_v60  ;;  %4070 = vadd.xlane.f32.xlu0 %v14919_v63  ;;  %4076 = vadd.xlane.f32.xlu1 %v14920_v17  ;;  %v14922_v60 = vld [vmem:[#allocation244_spill] sm:$0xff] }
 0x7e7   :  { %v12144_v12 = vadd.f32 %v3680_v5, %v12014_v18  ;;  %v3601_v54 = vpop.xlane.xlu0 %3600  ;;  %v3607_v15 = vpop.xlane.xlu1 %3606  ;;  %v3684_v18 = vrot.slane %v3603_v3, 1 }
 0x7e8   :  { %v3682_v30 = vrot.slane %v3601_v54, 1  ;;  %v14925_v54 = vld [vmem:[#allocation246_spill] sm:$0xff] }
 0x7ea   :  { %v3683_v16 = vsel %vm2791_vm7, %v3681_v6, %v3682_v30  ;;  %v12148_v22 = vadd.f32 %v3682_v30, %v12040_v44  ;;  %4074 = vadd.xlane.f32.xlu0 %v14921_v49  ;;  %4080 = vadd.xlane.f32.xlu1 %v14922_v60  ;;  %v14924_v44 = vld [vmem:[#allocation245_spill] sm:$0xff] }
 0x7eb   :  { %v12153_v42 = vadd.f32 %v3683_v16, %v12023_v13  ;;  %v3605_v28 = vpop.xlane.xlu0 %3604  ;;  %v3611_v38 = vpop.xlane.xlu1 %3610  ;;  %v3687_v13 = vrot.slane %v3607_v15, 1 }
 0x7ec   :  { %v3685_v26 = vrot.slane %v3605_v28, 1  ;;  %v14927_v28 = vld [vmem:[#allocation248_spill] sm:$0xff] }
 0x7ee   :  { %v3686_v53 = vsel %vm2791_vm7, %v3684_v18, %v3685_v26  ;;  %v12157_v59 = vadd.f32 %v3685_v26, %v12048_v1  ;;  %4078 = vadd.xlane.f32.xlu0 %v14923_v61  ;;  %4084 = vadd.xlane.f32.xlu1 %v14924_v44  ;;  %v14926_v1 = vld [vmem:[#allocation247_spill] sm:$0xff] }
 0x7ef   :  { %v12162_v37 = vadd.f32 %v3686_v53, %v12035_v4  ;;  %v3609_v47 = vpop.xlane.xlu0 %3608  ;;  %v3615_v5 = vpop.xlane.xlu1 %3614  ;;  %v3690_v4 = vrot.slane %v3611_v38, 1 }
 0x7f0   :  { %v3688_v63 = vrot.slane %v3609_v47, 1  ;;  %v14929_v47 = vld [vmem:[#allocation250_spill] sm:$0xff] }
 0x7f2   :  { %v3689_v17 = vsel %vm2791_vm7, %v3687_v13, %v3688_v63  ;;  %v12166_v3 = vadd.f32 %v3688_v63, %v12056_v56  ;;  %4082 = vadd.xlane.f32.xlu0 %v14925_v54  ;;  %4088 = vadd.xlane.f32.xlu1 %v14926_v1  ;;  %v14928_v56 = vld [vmem:[#allocation249_spill] sm:$0xff] }
 0x7f3   :  { %v12171_v6 = vadd.f32 %v3689_v17, %v12043_v51  ;;  %v3613_v30 = vpop.xlane.xlu0 %3612  ;;  %v3619_v16 = vpop.xlane.xlu1 %3618  ;;  %v3693_v51 = vrot.slane %v3615_v5, 1 }
 0x7f4   :  { %v3691_v49 = vrot.slane %v3613_v30, 1  ;;  %v14931_v30 = vld [vmem:[#allocation252_spill] sm:$0xff] }
 0x7f6   :  { %v3692_v60 = vsel %vm2791_vm7, %v3690_v4, %v3691_v49  ;;  %v12175_v15 = vadd.f32 %v3691_v49, %v12064_v52  ;;  %4086 = vadd.xlane.f32.xlu0 %v14927_v28  ;;  %4092 = vadd.xlane.f32.xlu1 %v14928_v56  ;;  %v14930_v52 = vld [vmem:[#allocation251_spill] sm:$0xff] }
 0x7f7   :  { %v12180_v18 = vadd.f32 %v3692_v60, %v12051_v23  ;;  %v3617_v26 = vpop.xlane.xlu0 %3616  ;;  %v3623_v53 = vpop.xlane.xlu1 %3622  ;;  %v3696_v23 = vrot.slane %v3619_v16, 1 }
 0x7f8   :  { %v3694_v61 = vrot.slane %v3617_v26, 1  ;;  %v14933_v26 = vld [vmem:[#allocation254_spill] sm:$0xff] }
 0x7fa   :  { %v3695_v44 = vsel %vm2791_vm7, %v3693_v51, %v3694_v61  ;;  %v12184_v38 = vadd.f32 %v3694_v61, %v12072_v46  ;;  %4090 = vadd.xlane.f32.xlu0 %v14929_v47  ;;  %4096 = vadd.xlane.f32.xlu1 %v14930_v52  ;;  %v14932_v46 = vld [vmem:[#allocation253_spill] sm:$0xff] }
 0x7fb   :  { %v12189_v13 = vadd.f32 %v3695_v44, %v12059_v7  ;;  %v3621_v63 = vpop.xlane.xlu0 %3620  ;;  %v3627_v17 = vpop.xlane.xlu1 %3626  ;;  %v3699_v7 = vrot.slane %v3623_v53, 1 }
 0x7fc   :  { %v3697_v54 = vrot.slane %v3621_v63, 1  ;;  %v14935_v63 = vld [vmem:[#allocation256_spill] sm:$0xff] }
 0x7fe   :  { %v3698_v1 = vsel %vm2791_vm7, %v3696_v23, %v3697_v54  ;;  %v12193_v5 = vadd.f32 %v3697_v54, %v12080_v35  ;;  %4094 = vadd.xlane.f32.xlu0 %v14931_v30  ;;  %4100 = vadd.xlane.f32.xlu1 %v14932_v46  ;;  %v14934_v35 = vld [vmem:[#allocation255_spill] sm:$0xff] }
 0x7ff   :  { %v12198_v4 = vadd.f32 %v3698_v1, %v12067_v58  ;;  %v3625_v49 = vpop.xlane.xlu0 %3624  ;;  %v3631_v60 = vpop.xlane.xlu1 %3630  ;;  %v3702_v58 = vrot.slane %v3627_v17, 1 }
 0x800   :  { %v3700_v28 = vrot.slane %v3625_v49, 1  ;;  %v14937_v49 = vld [vmem:[#allocation258_spill] sm:$0xff] }
 0x802   :  { %v3701_v56 = vsel %vm2791_vm7, %v3699_v7, %v3700_v28  ;;  %v12202_v16 = vadd.f32 %v3700_v28, %v12088_v57  ;;  %4098 = vadd.xlane.f32.xlu0 %v14933_v26  ;;  %4104 = vadd.xlane.f32.xlu1 %v14934_v35  ;;  %v14936_v57 = vld [vmem:[#allocation257_spill] sm:$0xff] }
 0x803   :  { %v12207_v51 = vadd.f32 %v3701_v56, %v12075_v10  ;;  %v3629_v61 = vpop.xlane.xlu0 %3628  ;;  %v3635_v44 = vpop.xlane.xlu1 %3634  ;;  %v3705_v10 = vrot.slane %v3631_v60, 1 }
 0x804   :  { %v3703_v47 = vrot.slane %v3629_v61, 1  ;;  %v14939_v61 = vld [vmem:[#allocation73_spill] sm:$0xff] }
 0x806   :  { %v3704_v52 = vsel %vm2791_vm7, %v3702_v58, %v3703_v47  ;;  %v12211_v53 = vadd.f32 %v3703_v47, %v12096_v33  ;;  %4102 = vadd.xlane.f32.xlu0 %v14935_v63  ;;  %4108 = vadd.xlane.f32.xlu1 %v14936_v57  ;;  %v14938_v33 = vld [vmem:[#allocation72_spill] sm:$0xff] }
 0x807   :  { %v12216_v23 = vadd.f32 %v3704_v52, %v12083_v25  ;;  %v3633_v54 = vpop.xlane.xlu0 %3632  ;;  %v3639_v1 = vpop.xlane.xlu1 %3638  ;;  %v3708_v25 = vrot.slane %v3635_v44, 1 }
 0x808   :  { %v3706_v30 = vrot.slane %v3633_v54, 1  ;;  %v14941_v54 = vld [vmem:[#allocation262_spill] sm:$0xff] }
 0x80a   :  { %v3707_v46 = vsel %vm2791_vm7, %v3705_v10, %v3706_v30  ;;  %v12220_v17 = vadd.f32 %v3706_v30, %v12104_v32  ;;  %4106 = vadd.xlane.f32.xlu0 %v14937_v49  ;;  %4112 = vadd.xlane.f32.xlu1 %v14938_v33  ;;  %v14940_v32 = vld [vmem:[#allocation259_spill] sm:$0xff] }
 0x80b   :  { %v12225_v7 = vadd.f32 %v3707_v46, %v12091_v21  ;;  %v3637_v28 = vpop.xlane.xlu0 %3636  ;;  %v3643_v56 = vpop.xlane.xlu1 %3642  ;;  %v3711_v21 = vrot.slane %v3639_v1, 1 }
 0x80c   :  { %v3709_v26 = vrot.slane %v3637_v28, 1  ;;  %v14943_v28 = vld [vmem:[#allocation263_spill] sm:$0xff] }
 0x80e   :  { %v3710_v35 = vsel %vm2791_vm7, %v3708_v25, %v3709_v26  ;;  %v12229_v60 = vadd.f32 %v3709_v26, %v12112_v24  ;;  %4110 = vadd.xlane.f32.xlu0 %v14939_v61  ;;  %4116 = vadd.xlane.f32.xlu1 %v14940_v32  ;;  %v14942_v24 = vld [vmem:[#allocation55_spill] sm:$0xff] }
 0x80f   :  { %v12234_v58 = vadd.f32 %v3710_v35, %v12099_v19  ;;  %v3641_v47 = vpop.xlane.xlu0 %3640  ;;  %v3647_v52 = vpop.xlane.xlu1 %3646  ;;  %v3714_v19 = vrot.slane %v3643_v56, 1 }
 0x810   :  { %v3712_v63 = vrot.slane %v3641_v47, 1  ;;  %v14945_v47 = vld [vmem:[#allocation265_spill] sm:$0xff] }
 0x812   :  { %v3713_v57 = vsel %vm2791_vm7, %v3711_v21, %v3712_v63  ;;  %v12238_v44 = vadd.f32 %v3712_v63, %v12120_v55  ;;  %4114 = vadd.xlane.f32.xlu0 %v14941_v54  ;;  %4362 = vadd.xlane.f32.xlu1 %v14942_v24  ;;  %v14944_v55 = vld [vmem:[#allocation264_spill] sm:$0xff] }
 0x813   :  { %v12243_v10 = vadd.f32 %v3713_v57, %v12107_v48  ;;  %v3645_v30 = vpop.xlane.xlu0 %3644  ;;  %v3809_v46 = vpop.xlane.xlu1 %3808  ;;  %v3717_v48 = vrot.slane %v3647_v52, 1 }
 0x814   :  { %v3715_v49 = vrot.slane %v3645_v30, 1  ;;  %v14947_v30 = vld [vmem:[#allocation267_spill] sm:$0xff] }
 0x816   :  { %v3716_v33 = vsel %vm2791_vm7, %v3714_v19, %v3715_v49  ;;  %v12247_v1 = vadd.f32 %v3715_v49, %v12128_v45  ;;  %4118 = vadd.xlane.f32.xlu0 %v14943_v28  ;;  %4366 = vadd.xlane.f32.xlu1 %v14944_v55  ;;  %v14946_v45 = vld [vmem:[#allocation266_spill] sm:$0xff] }
 0x817   :  { %v12252_v25 = vadd.f32 %v3716_v33, %v12115_v41  ;;  %v3649_v26 = vpop.xlane.xlu0 %3648  ;;  %v3813_v35 = vpop.xlane.xlu1 %3812  ;;  %v3892_v41 = vrot.slane %v3809_v46, 2 }
 0x818   :  { %v3718_v61 = vrot.slane %v3649_v26, 1  ;;  %v14949_v26 = vld [vmem:[#allocation269_spill] sm:$0xff] }
 0x81a   :  { %v3719_v32 = vsel %vm2791_vm7, %v3717_v48, %v3718_v61  ;;  %v12256_v56 = vadd.f32 %v3718_v61, %v12133_v20  ;;  %4364 = vadd.xlane.f32.xlu0 %v14945_v47  ;;  %4370 = vadd.xlane.f32.xlu1 %v14946_v45  ;;  %v14948_v20 = vld [vmem:[#allocation268_spill] sm:$0xff] }
 0x81b   :  { %v12261_v21 = vadd.f32 %v3719_v32, %v12123_v9  ;;  %v3811_v63 = vpop.xlane.xlu0 %3810  ;;  %v3817_v57 = vpop.xlane.xlu1 %3816  ;;  %v3895_v9 = vrot.slane %v3813_v35, 2 }
 0x81c   :  { %v3893_v54 = vrot.slane %v3811_v63, 2  ;;  %v3898_v47 = vrot.slane %v3817_v57, 2  ;;  %v14951_v63 = vld [vmem:[#allocation271_spill] sm:$0xff] }
 0x81e   :  { %v3894_v24 = vsel %vm3006_vm8, %v3892_v41, %v3893_v54  ;;  %v12265_v52 = vadd.f32 %v3893_v54, %v12139_v8  ;;  %4368 = vadd.xlane.f32.xlu0 %v14947_v30  ;;  %4374 = vadd.xlane.f32.xlu1 %v14948_v20  ;;  %v14950_v8 = vld [vmem:[#allocation270_spill] sm:$0xff] }
 0x81f   :  { %v3815_v19 = vpop.xlane.xlu0 %3814  ;;  %v3821_v49 = vpop.xlane.xlu1 %3820  ;;  %v12270_v33 = vadd.f32 %v3894_v24, %v12144_v12 }
 0x820   :  { %v3896_v28 = vrot.slane %v3815_v19, 2  ;;  %v3901_v30 = vrot.slane %v3821_v49, 2  ;;  %v14953_v19 = vld [vmem:[#allocation74_spill] sm:$0xff] }
 0x822   :  { %v3897_v55 = vsel %vm3006_vm8, %v3895_v9, %v3896_v28  ;;  %v12274_v46 = vadd.f32 %v3896_v28, %v12148_v22  ;;  %4372 = vadd.xlane.f32.xlu0 %v14949_v26  ;;  %4378 = vadd.xlane.f32.xlu1 %v14950_v8  ;;  %v14952_v22 = vld [vmem:[#allocation272_spill] sm:$0xff] }
 0x823   :  { %v3819_v48 = vpop.xlane.xlu0 %3818  ;;  %v3825_v61 = vpop.xlane.xlu1 %3824  ;;  %v12279_v32 = vadd.f32 %v3897_v55, %v12153_v42 }
 0x824   :  { %v3899_v45 = vrot.slane %v3819_v48, 2  ;;  %v3904_v26 = vrot.slane %v3825_v61, 2  ;;  %v14955_v48 = vld [vmem:[#allocation274_spill] sm:$0xff] }
 0x826   :  { %v3900_v12 = vsel %vm3006_vm8, %v3898_v47, %v3899_v45  ;;  %v12283_v35 = vadd.f32 %v3899_v45, %v12157_v59  ;;  %4376 = vadd.xlane.f32.xlu0 %v14951_v63  ;;  %4382 = vadd.xlane.f32.xlu1 %v14952_v22  ;;  %v14954_v59 = vld [vmem:[#allocation273_spill] sm:$0xff] }
 0x827   :  { %v3823_v41 = vpop.xlane.xlu0 %3822  ;;  %v3829_v54 = vpop.xlane.xlu1 %3828  ;;  %v12288_v24 = vadd.f32 %v3900_v12, %v12162_v37 }
 0x828   :  { %v3902_v20 = vrot.slane %v3823_v41, 2  ;;  %v3907_v63 = vrot.slane %v3829_v54, 2  ;;  %v14957_v41 = vld [vmem:[#allocation276_spill] sm:$0xff] }
 0x82a   :  { %v3903_v42 = vsel %vm3006_vm8, %v3901_v30, %v3902_v20  ;;  %v12292_v57 = vadd.f32 %v3902_v20, %v12166_v3  ;;  %4380 = vadd.xlane.f32.xlu0 %v14953_v19  ;;  %4386 = vadd.xlane.f32.xlu1 %v14954_v59  ;;  %v14956_v3 = vld [vmem:[#allocation275_spill] sm:$0xff] }
 0x82b   :  { %v3827_v9 = vpop.xlane.xlu0 %3826  ;;  %v3833_v28 = vpop.xlane.xlu1 %3832  ;;  %v12297_v55 = vadd.f32 %v3903_v42, %v12171_v6 }
 0x82c   :  { %v3905_v8 = vrot.slane %v3827_v9, 2  ;;  %v3910_v19 = vrot.slane %v3833_v28, 2  ;;  %v14959_v9 = vld [vmem:[#allocation278_spill] sm:$0xff] }
 0x82e   :  { %v3906_v37 = vsel %vm3006_vm8, %v3904_v26, %v3905_v8  ;;  %v12301_v49 = vadd.f32 %v3905_v8, %v12175_v15  ;;  %4384 = vadd.xlane.f32.xlu0 %v14955_v48  ;;  %4390 = vadd.xlane.f32.xlu1 %v14956_v3  ;;  %v14958_v15 = vld [vmem:[#allocation277_spill] sm:$0xff] }
 0x82f   :  { %v3831_v47 = vpop.xlane.xlu0 %3830  ;;  %v3837_v45 = vpop.xlane.xlu1 %3836  ;;  %v12306_v12 = vadd.f32 %v3906_v37, %v12180_v18 }
 0x830   :  { %v3908_v22 = vrot.slane %v3831_v47, 2  ;;  %v3913_v48 = vrot.slane %v3837_v45, 2  ;;  %v14961_v47 = vld [vmem:[#allocation280_spill] sm:$0xff] }
 0x832   :  { %v3909_v6 = vsel %vm3006_vm8, %v3907_v63, %v3908_v22  ;;  %v12310_v61 = vadd.f32 %v3908_v22, %v12184_v38  ;;  %4388 = vadd.xlane.f32.xlu0 %v14957_v41  ;;  %4394 = vadd.xlane.f32.xlu1 %v14958_v15  ;;  %v14960_v38 = vld [vmem:[#allocation279_spill] sm:$0xff] }
 0x833   :  { %v3835_v30 = vpop.xlane.xlu0 %3834  ;;  %v3841_v20 = vpop.xlane.xlu1 %3840  ;;  %v12315_v42 = vadd.f32 %v3909_v6, %v12189_v13 }
 0x834   :  { %v3911_v59 = vrot.slane %v3835_v30, 2  ;;  %v3916_v41 = vrot.slane %v3841_v20, 2  ;;  %v14963_v30 = vld [vmem:[#allocation282_spill] sm:$0xff] }
 0x836   :  { %v3912_v18 = vsel %vm3006_vm8, %v3910_v19, %v3911_v59  ;;  %v12319_v54 = vadd.f32 %v3911_v59, %v12193_v5  ;;  %4392 = vadd.xlane.f32.xlu0 %v14959_v9  ;;  %4398 = vadd.xlane.f32.xlu1 %v14960_v38  ;;  %v14962_v5 = vld [vmem:[#allocation281_spill] sm:$0xff] }
 0x837   :  { %v3839_v26 = vpop.xlane.xlu0 %3838  ;;  %v3845_v8 = vpop.xlane.xlu1 %3844  ;;  %v12324_v37 = vadd.f32 %v3912_v18, %v12198_v4 }
 0x838   :  { %v3914_v3 = vrot.slane %v3839_v26, 2  ;;  %v3919_v9 = vrot.slane %v3845_v8, 2  ;;  %v14965_v26 = vld [vmem:[#allocation286_spill] sm:$0xff] }
 0x83a   :  { %v3915_v13 = vsel %vm3006_vm8, %v3913_v48, %v3914_v3  ;;  %v12328_v28 = vadd.f32 %v3914_v3, %v12202_v16  ;;  %4396 = vadd.xlane.f32.xlu0 %v14961_v47  ;;  %4402 = vadd.xlane.f32.xlu1 %v14962_v5  ;;  %v14964_v16 = vld [vmem:[#allocation285_spill] sm:$0xff] }
 0x83b   :  { %v3843_v63 = vpop.xlane.xlu0 %3842  ;;  %v3849_v22 = vpop.xlane.xlu1 %3848  ;;  %v12333_v6 = vadd.f32 %v3915_v13, %v12207_v51 }
 0x83c   :  { %v3917_v15 = vrot.slane %v3843_v63, 2  ;;  %v3922_v47 = vrot.slane %v3849_v22, 2  ;;  %v14967_v63 = vld [vmem:[#allocation288_spill] sm:$0xff] }
 0x83e   :  { %v3918_v4 = vsel %vm3006_vm8, %v3916_v41, %v3917_v15  ;;  %v12337_v45 = vadd.f32 %v3917_v15, %v12211_v53  ;;  %4400 = vadd.xlane.f32.xlu0 %v14963_v30  ;;  %4406 = vadd.xlane.f32.xlu1 %v14964_v16  ;;  %v14966_v53 = vld [vmem:[#allocation287_spill] sm:$0xff] }
 0x83f   :  { %v3847_v19 = vpop.xlane.xlu0 %3846  ;;  %v3853_v59 = vpop.xlane.xlu1 %3852  ;;  %v12342_v18 = vadd.f32 %v3918_v4, %v12216_v23 }
 0x840   :  { %v3920_v38 = vrot.slane %v3847_v19, 2  ;;  %v3925_v30 = vrot.slane %v3853_v59, 2  ;;  %v14969_v19 = vld [vmem:[#allocation76_spill] sm:$0xff] }
 0x842   :  { %v3921_v51 = vsel %vm3006_vm8, %v3919_v9, %v3920_v38  ;;  %v12346_v20 = vadd.f32 %v3920_v38, %v12220_v17  ;;  %4404 = vadd.xlane.f32.xlu0 %v14965_v26  ;;  %4410 = vadd.xlane.f32.xlu1 %v14966_v53  ;;  %v14968_v17 = vld [vmem:[#allocation75_spill] sm:$0xff] }
 0x843   :  { %v3851_v48 = vpop.xlane.xlu0 %3850  ;;  %v3857_v3 = vpop.xlane.xlu1 %3856  ;;  %v12351_v13 = vadd.f32 %v3921_v51, %v12225_v7 }
 0x844   :  { %v3923_v5 = vrot.slane %v3851_v48, 2  ;;  %v3928_v26 = vrot.slane %v3857_v3, 2  ;;  %v14971_v48 = vld [vmem:[#allocation289_spill] sm:$0xff] }
 0x846   :  { %v3924_v23 = vsel %vm3006_vm8, %v3922_v47, %v3923_v5  ;;  %v12355_v8 = vadd.f32 %v3923_v5, %v12229_v60  ;;  %4408 = vadd.xlane.f32.xlu0 %v14967_v63  ;;  %4414 = vadd.xlane.f32.xlu1 %v14968_v17  ;;  %v14970_v60 = vld [vmem:[#allocation52_spill] sm:$0xff] }
 0x847   :  { %v3855_v41 = vpop.xlane.xlu0 %3854  ;;  %v3861_v15 = vpop.xlane.xlu1 %3860  ;;  %v12360_v4 = vadd.f32 %v3924_v23, %v12234_v58 }
 0x848   :  { %v3926_v16 = vrot.slane %v3855_v41, 2  ;;  %v3931_v63 = vrot.slane %v3861_v15, 2  ;;  %v14973_v41 = vld [vmem:[#allocation291_spill] sm:$0xff]  ;;  %v14976_v15 = vld [vmem:[#allocation294_spill] sm:$0xff] }
 0x84a   :  { %v3927_v7 = vsel %vm3006_vm8, %v3925_v30, %v3926_v16  ;;  %v12364_v22 = vadd.f32 %v3926_v16, %v12238_v44  ;;  %4412 = vadd.xlane.f32.xlu0 %v14969_v19  ;;  %4478 = vadd.xlane.f32.xlu1 %v14970_v60  ;;  %v14972_v44 = vld [vmem:[#allocation290_spill] sm:$0xff] }
 0x84b   :  { %v3859_v9 = vpop.xlane.xlu0 %3858  ;;  %v4037_v38 = vpop.xlane.xlu1 %4036  ;;  %v12369_v51 = vadd.f32 %v3927_v7, %v12243_v10 }
 0x84c   :  { %v3929_v53 = vrot.slane %v3859_v9, 2  ;;  %v4162_v19 = vrot.slane %v4037_v38, 3  ;;  %v14975_v9 = vld [vmem:[#allocation293_spill] sm:$0xff] }
 0x84e   :  { %v3930_v58 = vsel %vm3006_vm8, %v3928_v26, %v3929_v53  ;;  %v12373_v59 = vadd.f32 %v3929_v53, %v12247_v1  ;;  %4416 = vadd.xlane.f32.xlu0 %v14971_v48  ;;  %4482 = vadd.xlane.f32.xlu1 %v14972_v44  ;;  %v14974_v1 = vld [vmem:[#allocation292_spill] sm:$0xff] }
 0x84f   :  { %v3863_v47 = vpop.xlane.xlu0 %3862  ;;  %v4041_v5 = vpop.xlane.xlu1 %4040  ;;  %v12378_v23 = vadd.f32 %v3930_v58, %v12252_v25 }
 0x850   :  { %v3932_v17 = vrot.slane %v3863_v47, 2  ;;  %v4165_v60 = vrot.slane %v4041_v5, 3  ;;  %v14977_v47 = vld [vmem:[#allocation295_spill] sm:$0xff]  ;;  %v14978_v5 = vld [vmem:[#allocation296_spill] sm:$0xff] }
 0x852   :  { %v3933_v10 = vsel %vm3006_vm8, %v3931_v63, %v3932_v17  ;;  %v12382_v3 = vadd.f32 %v3932_v17, %v12256_v56  ;;  %4480 = vadd.xlane.f32.xlu0 %v14973_v41  ;;  %4486 = vadd.xlane.f32.xlu1 %v14974_v1 }
 0x853   :  { %v4039_v30 = vpop.xlane.xlu0 %4038  ;;  %v4045_v16 = vpop.xlane.xlu1 %4044  ;;  %v12387_v7 = vadd.f32 %v3933_v10, %v12261_v21 }
 0x854   :  { %v4163_v25 = vrot.slane %v4039_v30, 3  ;;  %v4168_v21 = vrot.slane %v4045_v16, 3  ;;  %v14979_v30 = vld [vmem:[#allocation297_spill] sm:$0xff] }
 0x856   :  { %4484 = vadd.xlane.f32.xlu0 %v14975_v9  ;;  %4490 = vadd.xlane.f32.xlu1 %v14976_v15  ;;  %v4164_v26 = vsel %vm3277_vm9, %v4162_v19, %v4163_v25  ;;  %v4166_v56 = vsel %vm3277_vm9, %v4163_v25, %v4165_v60 }
 0x857   :  { %v4043_v53 = vpop.xlane.xlu0 %4042  ;;  %v4049_v58 = vpop.xlane.xlu1 %4048  ;;  %v12394_v48 = vadd.f32 %v4164_v26, %v12270_v33  ;;  %v12397_v44 = vadd.f32 %v4166_v56, %v12265_v52  ;;  %v14980_v33 = vld [vmem:[#allocation298_spill] sm:$0xff]  ;;  %v14981_v26 = vld [vmem:[#allocation299_spill] sm:$0xff]  ;;  %v14982_v56 = vld [vmem:[#allocation300_spill] sm:$0xff] }
 0x858   :  { %v4167_v38 = vrot.slane %v4043_v53, 3  ;;  %v4172_v25 = vrot.slane %v4049_v58, 3 }
 0x85a   :  { %4488 = vadd.xlane.f32.xlu0 %v14977_v47  ;;  %4494 = vadd.xlane.f32.xlu1 %v14978_v5  ;;  %v4169_v63 = vsel %vm3277_vm9, %v4167_v38, %v4168_v21 }
 0x85b   :  { %v4047_v17 = vpop.xlane.xlu0 %4046  ;;  %v4053_v10 = vpop.xlane.xlu1 %4052  ;;  %v12403_v41 = vadd.f32 %v4169_v63, %v12279_v32  ;;  %v14983_v63 = vld [vmem:[#allocation77_spill] sm:$0xff] }
 0x85c   :  { %v4170_v1 = vrot.slane %v4047_v17, 3  ;;  %v4175_v9 = vrot.slane %v4053_v10, 3  ;;  %v14984_v17 = vld [vmem:[#allocation78_spill] sm:$0xff] }
 0x85e   :  { %4492 = vadd.xlane.f32.xlu0 %v14979_v30  ;;  %4498 = vadd.xlane.f32.xlu1 %v14980_v33  ;;  %v4171_v52 = vsel %vm3277_vm9, %v4168_v21, %v4170_v1 }
 0x85f   :  { %v4051_v16 = vpop.xlane.xlu0 %4050  ;;  %v4057_v19 = vpop.xlane.xlu1 %4056  ;;  %v12409_v60 = vadd.f32 %v4171_v52, %v12274_v46 }
 0x860   :  { %v4173_v15 = vrot.slane %v4051_v16, 3  ;;  %v4178_v46 = vrot.slane %v4057_v19, 3  ;;  %v14985_v16 = vld [vmem:[#allocation301_spill] sm:$0xff] }
 0x862   :  { %4496 = vadd.xlane.f32.xlu0 %v14981_v26  ;;  %4502 = vadd.xlane.f32.xlu1 %v14982_v56  ;;  %v4174_v32 = vsel %vm3277_vm9, %v4172_v25, %v4173_v15  ;;  %v4176_v53 = vsel %vm3277_vm9, %v4173_v15, %v4175_v9 }
 0x863   :  { %v4055_v38 = vpop.xlane.xlu0 %4054  ;;  %v4061_v47 = vpop.xlane.xlu1 %4060  ;;  %v12416_v21 = vadd.f32 %v4174_v32, %v12288_v24  ;;  %v12419_v5 = vadd.f32 %v4176_v53, %v12283_v35  ;;  %v14986_v24 = vld [vmem:[#allocation304_spill] sm:$0xff]  ;;  %v14987_v32 = vld [vmem:[#allocation305_spill] sm:$0xff]  ;;  %v14988_v53 = vld [vmem:[#allocation306_spill] sm:$0xff] }
 0x864   :  { %v4177_v58 = vrot.slane %v4055_v38, 3  ;;  %v4182_v15 = vrot.slane %v4061_v47, 3 }
 0x866   :  { %4500 = vadd.xlane.f32.xlu0 %v14983_v63  ;;  %4506 = vadd.xlane.f32.xlu1 %v14984_v17  ;;  %v4179_v10 = vsel %vm3277_vm9, %v4177_v58, %v4178_v46 }
 0x867   :  { %v4059_v1 = vpop.xlane.xlu0 %4058  ;;  %v4065_v30 = vpop.xlane.xlu1 %4064  ;;  %v12425_v33 = vadd.f32 %v4179_v10, %v12297_v55  ;;  %v14989_v10 = vld [vmem:[#allocation307_spill] sm:$0xff] }
 0x868   :  { %v4180_v52 = vrot.slane %v4059_v1, 3  ;;  %v4185_v26 = vrot.slane %v4065_v30, 3  ;;  %v14990_v1 = vld [vmem:[#allocation308_spill] sm:$0xff] }
 0x86a   :  { %4504 = vadd.xlane.f32.xlu0 %v14985_v16  ;;  %4510 = vadd.xlane.f32.xlu1 %v14986_v24  ;;  %v4181_v35 = vsel %vm3277_vm9, %v4178_v46, %v4180_v52 }
 0x86b   :  { %v4063_v19 = vpop.xlane.xlu0 %4062  ;;  %v4069_v25 = vpop.xlane.xlu1 %4068  ;;  %v12431_v9 = vadd.f32 %v4181_v35, %v12292_v57 }
 0x86c   :  { %v4183_v56 = vrot.slane %v4063_v19, 3  ;;  %v4188_v57 = vrot.slane %v4069_v25, 3  ;;  %v14991_v19 = vld [vmem:[#allocation309_spill] sm:$0xff] }
 0x86e   :  { %4508 = vadd.xlane.f32.xlu0 %v14987_v32  ;;  %4514 = vadd.xlane.f32.xlu1 %v14988_v53  ;;  %v4184_v55 = vsel %vm3277_vm9, %v4182_v15, %v4183_v56  ;;  %v4186_v38 = vsel %vm3277_vm9, %v4183_v56, %v4185_v26 }
 0x86f   :  { %v4067_v58 = vpop.xlane.xlu0 %4066  ;;  %v4073_v63 = vpop.xlane.xlu1 %4072  ;;  %v12438_v46 = vadd.f32 %v4184_v55, %v12306_v12  ;;  %v12441_v17 = vadd.f32 %v4186_v38, %v12301_v49  ;;  %v14992_v12 = vld [vmem:[#allocation310_spill] sm:$0xff]  ;;  %v14993_v55 = vld [vmem:[#allocation311_spill] sm:$0xff]  ;;  %v14994_v38 = vld [vmem:[#allocation312_spill] sm:$0xff] }
 0x870   :  { %v4187_v47 = vrot.slane %v4067_v58, 3  ;;  %v4192_v56 = vrot.slane %v4073_v63, 3 }
 0x872   :  { %4512 = vadd.xlane.f32.xlu0 %v14989_v10  ;;  %4518 = vadd.xlane.f32.xlu1 %v14990_v1  ;;  %v4189_v30 = vsel %vm3277_vm9, %v4187_v47, %v4188_v57 }
 0x873   :  { %v4071_v52 = vpop.xlane.xlu0 %4070  ;;  %v4077_v16 = vpop.xlane.xlu1 %4076  ;;  %v12447_v24 = vadd.f32 %v4189_v30, %v12315_v42  ;;  %v14995_v30 = vld [vmem:[#allocation313_spill] sm:$0xff] }
 0x874   :  { %v4190_v35 = vrot.slane %v4071_v52, 3  ;;  %v4195_v32 = vrot.slane %v4077_v16, 3  ;;  %v14996_v52 = vld [vmem:[#allocation314_spill] sm:$0xff] }
 0x876   :  { %4516 = vadd.xlane.f32.xlu0 %v14991_v19  ;;  %4522 = vadd.xlane.f32.xlu1 %v14992_v12  ;;  %v4191_v49 = vsel %vm3277_vm9, %v4188_v57, %v4190_v35 }
 0x877   :  { %v4075_v25 = vpop.xlane.xlu0 %4074  ;;  %v4081_v15 = vpop.xlane.xlu1 %4080  ;;  %v12453_v26 = vadd.f32 %v4191_v49, %v12310_v61 }
 0x878   :  { %v4193_v53 = vrot.slane %v4075_v25, 3  ;;  %v4198_v61 = vrot.slane %v4081_v15, 3 }
 0x87a   :  { %4520 = vadd.xlane.f32.xlu0 %v14993_v55  ;;  %4526 = vadd.xlane.f32.xlu1 %v14994_v38  ;;  %v4194_v42 = vsel %vm3277_vm9, %v4192_v56, %v4193_v53  ;;  %v4196_v58 = vsel %vm3277_vm9, %v4193_v53, %v4195_v32  ;;  %v14998_v38 = vld [vmem:[#allocation80_spill] sm:$0xff] }
 0x87b   :  { %v4079_v47 = vpop.xlane.xlu0 %4078  ;;  %v4085_v10 = vpop.xlane.xlu1 %4084  ;;  %v12460_v57 = vadd.f32 %v4194_v42, %v12324_v37  ;;  %v12463_v1 = vadd.f32 %v4196_v58, %v12319_v54  ;;  %v14997_v37 = vld [vmem:[#allocation79_spill] sm:$0xff]  ;;  %v14999_v42 = vld [vmem:[#allocation53_spill] sm:$0xff] }
 0x87c   :  { %v4197_v63 = vrot.slane %v4079_v47, 3  ;;  %v4202_v32 = vrot.slane %v4085_v10, 3 }
 0x87e   :  { %4524 = vadd.xlane.f32.xlu0 %v14995_v30  ;;  %4530 = vadd.xlane.f32.xlu1 %v14996_v52  ;;  %v4199_v16 = vsel %vm3277_vm9, %v4197_v63, %v4198_v61  ;;  %v15000_v30 = vld [vmem:[#allocation315_spill] sm:$0xff]  ;;  %v15001_v52 = vld [vmem:[#allocation316_spill] sm:$0xff] }
 0x87f   :  { %v4083_v35 = vpop.xlane.xlu0 %4082  ;;  %v4089_v19 = vpop.xlane.xlu1 %4088  ;;  %v12469_v12 = vadd.f32 %v4199_v16, %v12333_v6 }
 0x880   :  { %v4200_v49 = vrot.slane %v4083_v35, 3  ;;  %v4205_v53 = vrot.slane %v4089_v19, 3 }
 0x882   :  { %4528 = vadd.xlane.f32.xlu0 %v10839_v27  ;;  %4692 = vadd.xlane.f32.xlu1 %v14997_v37  ;;  %v4201_v54 = vsel %vm3277_vm9, %v4198_v61, %v4200_v49 }
 0x883   :  { %v4087_v25 = vpop.xlane.xlu0 %4086  ;;  %v4093_v15 = vpop.xlane.xlu1 %4092  ;;  %v12475_v56 = vadd.f32 %v4201_v54, %v12328_v28  ;;  %v15002_v54 = vld [vmem:[#allocation317_spill] sm:$0xff] }
 0x884   :  { %v4203_v55 = vrot.slane %v4087_v25, 3  ;;  %v4208_v28 = vrot.slane %v4093_v15, 3 }
 0x886   :  { %4532 = vadd.xlane.f32.xlu0 %v14998_v38  ;;  %4696 = vadd.xlane.f32.xlu1 %v14999_v42  ;;  %v4204_v6 = vsel %vm3277_vm9, %v4202_v32, %v4203_v55  ;;  %v4206_v27 = vsel %vm3277_vm9, %v4203_v55, %v4205_v53  ;;  %v15004_v42 = vld [vmem:[#allocation319_spill] sm:$0xff] }
 0x887   :  { %v4091_v58 = vpop.xlane.xlu0 %4090  ;;  %v4097_v47 = vpop.xlane.xlu1 %4096  ;;  %v12482_v61 = vadd.f32 %v4204_v6, %v12342_v18  ;;  %v12485_v63 = vadd.f32 %v4206_v27, %v12337_v45  ;;  %v15003_v18 = vld [vmem:[#allocation318_spill] sm:$0xff]  ;;  %v15005_v6 = vld [vmem:[#allocation320_spill] sm:$0xff] }
 0x888   :  { %v4207_v10 = vrot.slane %v4091_v58, 3  ;;  %v4212_v53 = vrot.slane %v4097_v47, 3 }
 0x88a   :  { %4694 = vadd.xlane.f32.xlu0 %v15000_v30  ;;  %4700 = vadd.xlane.f32.xlu1 %v15001_v52  ;;  %v4209_v16 = vsel %vm3277_vm9, %v4207_v10, %v4208_v28  ;;  %v15006_v52 = vld [vmem:[#allocation321_spill] sm:$0xff] }
 0x88b   :  { %v4095_v35 = vpop.xlane.xlu0 %4094  ;;  %v4101_v19 = vpop.xlane.xlu1 %4100  ;;  %v12491_v49 = vadd.f32 %v4209_v16, %v12351_v13  ;;  %v15007_v16 = vld [vmem:[#allocation322_spill] sm:$0xff] }
 0x88c   :  { %v4210_v37 = vrot.slane %v4095_v35, 3  ;;  %v4215_v55 = vrot.slane %v4101_v19, 3 }
 0x88e   :  { %4698 = vadd.xlane.f32.xlu0 %v15002_v54  ;;  %4704 = vadd.xlane.f32.xlu1 %v15003_v18  ;;  %v4211_v45 = vsel %vm3277_vm9, %v4208_v28, %v4210_v37 }
 0x88f   :  { %v4099_v25 = vpop.xlane.xlu0 %4098  ;;  %v4105_v15 = vpop.xlane.xlu1 %4104  ;;  %v12497_v32 = vadd.f32 %v4211_v45, %v12346_v20  ;;  %v15008_v45 = vld [vmem:[#allocation325_spill] sm:$0xff] }
 0x890   :  { %v4213_v38 = vrot.slane %v4099_v25, 3  ;;  %v4218_v20 = vrot.slane %v4105_v15, 3 }
 0x892   :  { %4702 = vadd.xlane.f32.xlu0 %v15004_v42  ;;  %4708 = vadd.xlane.f32.xlu1 %v15005_v6  ;;  %v4214_v13 = vsel %vm3277_vm9, %v4212_v53, %v4213_v38  ;;  %v4216_v27 = vsel %vm3277_vm9, %v4213_v38, %v4215_v55  ;;  %v15010_v6 = vld [vmem:[#allocation327_spill] sm:$0xff] }
 0x893   :  { %v4103_v58 = vpop.xlane.xlu0 %4102  ;;  %v4109_v10 = vpop.xlane.xlu1 %4108  ;;  %v12504_v28 = vadd.f32 %v4214_v13, %v12360_v4  ;;  %v12507_v30 = vadd.f32 %v4216_v27, %v12355_v8  ;;  %v15009_v4 = vld [vmem:[#allocation326_spill] sm:$0xff]  ;;  %v15011_v13 = vld [vmem:[#allocation328_spill] sm:$0xff] }
 0x894   :  { %v4217_v47 = vrot.slane %v4103_v58, 3  ;;  %v4222_v55 = vrot.slane %v4109_v10, 3 }
 0x896   :  { %4706 = vadd.xlane.f32.xlu0 %v15006_v52  ;;  %4712 = vadd.xlane.f32.xlu1 %v15007_v16  ;;  %v4219_v35 = vsel %vm3277_vm9, %v4217_v47, %v4218_v20 }
 0x897   :  { %v4107_v19 = vpop.xlane.xlu0 %4106  ;;  %v4113_v37 = vpop.xlane.xlu1 %4112  ;;  %v12513_v54 = vadd.f32 %v4219_v35, %v12369_v51  ;;  %v15012_v35 = vld [vmem:[#allocation81_spill] sm:$0xff] }
 0x898   :  { %v4220_v18 = vrot.slane %v4107_v19, 3  ;;  %v4225_v38 = vrot.slane %v4113_v37, 3  ;;  %v15013_v19 = vld [vmem:[#allocation82_spill] sm:$0xff] }
 0x89a   :  { %4710 = vadd.xlane.f32.xlu0 %v15008_v45  ;;  %4716 = vadd.xlane.f32.xlu1 %v15009_v4  ;;  %v4221_v8 = vsel %vm3277_vm9, %v4218_v20, %v4220_v18 }
 0x89b   :  { %v4111_v25 = vpop.xlane.xlu0 %4110  ;;  %v4117_v15 = vpop.xlane.xlu1 %4116  ;;  %v12519_v53 = vadd.f32 %v4221_v8, %v12364_v22  ;;  %v15014_v8 = vld [vmem:[#allocation329_spill] sm:$0xff] }
 0x89c   :  { %v4223_v42 = vrot.slane %v4111_v25, 3  ;;  %v4228_v22 = vrot.slane %v4117_v15, 3  ;;  %v15015_v25 = vld [vmem:[#allocation330_spill] sm:$0xff] }
 0x89e   :  { %4714 = vadd.xlane.f32.xlu0 %v15010_v6  ;;  %4720 = vadd.xlane.f32.xlu1 %v15011_v13  ;;  %v4224_v51 = vsel %vm3277_vm9, %v4222_v55, %v4223_v42  ;;  %v4226_v27 = vsel %vm3277_vm9, %v4223_v42, %v4225_v38  ;;  %v15016_v6 = vld [vmem:[#allocation331_spill] sm:$0xff] }
 0x89f   :  { %v4115_v58 = vpop.xlane.xlu0 %4114  ;;  %v4363_v47 = vpop.xlane.xlu1 %4362  ;;  %v12526_v20 = vadd.f32 %v4224_v51, %v12378_v23  ;;  %v12529_v52 = vadd.f32 %v4226_v27, %v12373_v59 }
 0x8a0   :  { %v4227_v10 = vrot.slane %v4115_v58, 3  ;;  %v12532_v16 = vadd.f32 %v4363_v47, %v12394_v48  ;;  %v15019_v47 = vld [vmem:[#allocation334_spill] sm:$0xff] }
 0x8a2   :  { %4718 = vadd.xlane.f32.xlu0 %v15012_v35  ;;  %4724 = vadd.xlane.f32.xlu1 %v15013_v19  ;;  %v4229_v37 = vsel %vm3277_vm9, %v4227_v10, %v4228_v22  ;;  %v15020_v35 = vld [vmem:[#allocation335_spill] sm:$0xff]  ;;  %v15021_v19 = vld [vmem:[#allocation336_spill] sm:$0xff] }
 0x8a3   :  { %v4119_v18 = vpop.xlane.xlu0 %4118  ;;  %v4367_v45 = vpop.xlane.xlu1 %4366  ;;  %v12538_v4 = vadd.f32 %v4229_v37, %v12387_v7 }
 0x8a4   :  { %v4230_v23 = vrot.slane %v4119_v18, 3  ;;  %v12541_v59 = vadd.f32 %v4367_v45, %v12403_v41  ;;  %v15017_v41 = vld [vmem:[#allocation332_spill] sm:$0xff]  ;;  %v15022_v45 = vld [vmem:[#allocation337_spill] sm:$0xff] }
 0x8a6   :  { %4722 = vadd.xlane.f32.xlu0 %v15014_v8  ;;  %4728 = vadd.xlane.f32.xlu1 %v15015_v25  ;;  %v4231_v48 = vsel %vm3277_vm9, %v4228_v22, %v4230_v23  ;;  %v15023_v23 = vld [vmem:[#allocation338_spill] sm:$0xff] }
 0x8a7   :  { %v4365_v15 = vpop.xlane.xlu0 %4364  ;;  %v4371_v55 = vpop.xlane.xlu1 %4370  ;;  %v12547_v38 = vadd.f32 %v4231_v48, %v12382_v3  ;;  %v15018_v3 = vld [vmem:[#allocation333_spill] sm:$0xff]  ;;  %v15024_v48 = vld [vmem:[#allocation54_spill] sm:$0xff] }
 0x8a8   :  { %v12550_v42 = vadd.f32 %v4365_v15, %v12397_v44  ;;  %v12553_v7 = vadd.f32 %v4371_v55, %v12416_v21 }
 0x8aa   :  { %4726 = vadd.xlane.f32.xlu0 %v15016_v6  ;;  %4732 = vadd.xlane.f32.xlu1 %v15017_v41 }
 0x8ab   :  { %v4369_v13 = vpop.xlane.xlu0 %4368  ;;  %v4375_v51 = vpop.xlane.xlu1 %4374 }
 0x8ac   :  { %v12558_v27 = vadd.f32 %v4369_v13, %v12409_v60  ;;  %v12561_v58 = vadd.f32 %v4375_v51, %v12425_v33  ;;  %v15027_v51 = vld [vmem:[#allocation342_spill] sm:$0xff] }
 0x8ae   :  { %4730 = vadd.xlane.f32.xlu0 %v15018_v3  ;;  %4736 = vadd.xlane.f32.xlu1 %v15019_v47 }
 0x8af   :  { %v4373_v44 = vpop.xlane.xlu0 %4372  ;;  %v4379_v22 = vpop.xlane.xlu1 %4378 }
 0x8b0   :  { %v12566_v21 = vadd.f32 %v4373_v44, %v12419_v5  ;;  %v12569_v10 = vadd.f32 %v4379_v22, %v12438_v46  ;;  %v15029_v44 = vld [vmem:[#allocation344_spill] sm:$0xff] }
 0x8b2   :  { %4734 = vadd.xlane.f32.xlu0 %v15020_v35  ;;  %4740 = vadd.xlane.f32.xlu1 %v15021_v19  ;;  %v15030_v19 = vld [vmem:[#allocation345_spill] sm:$0xff] }
 0x8b3   :  { %v4377_v60 = vpop.xlane.xlu0 %4376  ;;  %v4383_v37 = vpop.xlane.xlu1 %4382 }
 0x8b4   :  { %v12574_v33 = vadd.f32 %v4377_v60, %v12431_v9  ;;  %v12577_v18 = vadd.f32 %v4383_v37, %v12447_v24 }
 0x8b6   :  { %4738 = vadd.xlane.f32.xlu0 %v15022_v45  ;;  %4744 = vadd.xlane.f32.xlu1 %v15023_v23  ;;  %v15031_v45 = vld [vmem:[#allocation346_spill] sm:$0xff] }
 0x8b7   :  { %v4381_v5 = vpop.xlane.xlu0 %4380  ;;  %v4387_v8 = vpop.xlane.xlu1 %4386 }
 0x8b8   :  { %v12582_v46 = vadd.f32 %v4381_v5, %v12441_v17  ;;  %v12585_v25 = vadd.f32 %v4387_v8, %v12460_v57  ;;  %v15032_v5 = vld [vmem:[#allocation347_spill] sm:$0xff] }
 0x8ba   :  { %4742 = vadd.xlane.f32.xlu0 %v10959_v14  ;;  %4920 = vadd.xlane.f32.xlu1 %v15024_v48 }
 0x8bb   :  { %v4385_v9 = vpop.xlane.xlu0 %4384  ;;  %v4391_v15 = vpop.xlane.xlu1 %4390 }
 0x8bc   :  { %v12590_v24 = vadd.f32 %v4385_v9, %v12453_v26  ;;  %v12593_v55 = vadd.f32 %v4391_v15, %v12469_v12 }
 0x8be   :  { %4746 = vadd.xlane.f32.xlu0 %v10967_v43  ;;  %4924 = vadd.xlane.f32.xlu1 %v10973_v39  ;;  %v15025_v39 = vld [vmem:[#allocation340_spill] sm:$0xff] }
 0x8bf   :  { %v4389_v17 = vpop.xlane.xlu0 %4388  ;;  %v4395_v6 = vpop.xlane.xlu1 %4394 }
 0x8c0   :  { %v12598_v57 = vadd.f32 %v4389_v17, %v12463_v1  ;;  %v12601_v14 = vadd.f32 %v4395_v6, %v12482_v61  ;;  %v15034_v6 = vld [vmem:[#allocation85_spill] sm:$0xff] }
 0x8c2   :  { %4922 = vadd.xlane.f32.xlu0 %v10977_v40  ;;  %4928 = vadd.xlane.f32.xlu1 %v10981_v31  ;;  %v15026_v31 = vld [vmem:[#allocation341_spill] sm:$0xff] }
 0x8c3   :  { %v4393_v26 = vpop.xlane.xlu0 %4392  ;;  %v4399_v41 = vpop.xlane.xlu1 %4398 }
 0x8c4   :  { %v12606_v12 = vadd.f32 %v4393_v26, %v12475_v56  ;;  %v12609_v43 = vadd.f32 %v4399_v41, %v12491_v49 }
 0x8c6   :  { %4926 = vadd.xlane.f32.xlu0 %v15025_v39  ;;  %4932 = vadd.xlane.f32.xlu1 %v10993_v34  ;;  %v15028_v34 = vld [vmem:[#allocation343_spill] sm:$0xff] }
 0x8c7   :  { %v4397_v1 = vpop.xlane.xlu0 %4396  ;;  %v4403_v13 = vpop.xlane.xlu1 %4402 }
 0x8c8   :  { %v12614_v61 = vadd.f32 %v4397_v1, %v12485_v63  ;;  %v12617_v40 = vadd.f32 %v4403_v13, %v12504_v28 }
 0x8ca   :  { %4930 = vadd.xlane.f32.xlu0 %v15026_v31  ;;  %4936 = vadd.xlane.f32.xlu1 %v15027_v51  ;;  %v15036_v31 = vld [vmem:[#allocation349_spill] sm:$0xff] }
 0x8cb   :  { %v4401_v56 = vpop.xlane.xlu0 %4400  ;;  %v4407_v3 = vpop.xlane.xlu1 %4406 }
 0x8cc   :  { %v12622_v49 = vadd.f32 %v4401_v56, %v12497_v32  ;;  %v12625_v47 = vadd.f32 %v4407_v3, %v12513_v54 }
 0x8ce   :  { %4934 = vadd.xlane.f32.xlu0 %v15028_v34  ;;  %4940 = vadd.xlane.f32.xlu1 %v15029_v44 }
 0x8cf   :  { %v4405_v63 = vpop.xlane.xlu0 %4404  ;;  %v4411_v22 = vpop.xlane.xlu1 %4410 }
 0x8d0   :  { %v12630_v28 = vadd.f32 %v4405_v63, %v12507_v30  ;;  %v12633_v35 = vadd.f32 %v4411_v22, %v12526_v20  ;;  %v15038_v22 = vld [vmem:[#allocation351_spill] sm:$0xff] }
 0x8d2   :  { %4938 = vadd.xlane.f32.xlu0 %v15030_v19  ;;  %4944 = vadd.xlane.f32.xlu1 %v11017_v2 }
 0x8d3   :  { %v4409_v32 = vpop.xlane.xlu0 %4408  ;;  %v4415_v60 = vpop.xlane.xlu1 %4414 }
 0x8d4   :  { %v12638_v54 = vadd.f32 %v4409_v32, %v12519_v53  ;;  %v12641_v37 = vadd.f32 %v4415_v60, %v12538_v4  ;;  %v15033_v4 = vld [vmem:[#allocation84_spill] sm:$0xff] }
 0x8d6   :  { %4942 = vadd.xlane.f32.xlu0 %v11021_v11  ;;  %4948 = vadd.xlane.f32.xlu1 %v15031_v45 }
 0x8d7   :  { %v4413_v30 = vpop.xlane.xlu0 %4412  ;;  %v4479_v23 = vpop.xlane.xlu1 %4478 }
 0x8d8   :  { %v12646_v20 = vadd.f32 %v4413_v30, %v12529_v52  ;;  %v4562_v9 = vrot.slane %v4479_v23, 1 }
 0x8da   :  { %4946 = vadd.xlane.f32.xlu0 %v15032_v5  ;;  %4952 = vadd.xlane.f32.xlu1 %v11033_v62  ;;  %v15035_v62 = vld [vmem:[#allocation348_spill] sm:$0xff] }
 0x8db   :  { %v4417_v2 = vpop.xlane.xlu0 %4416  ;;  %v4483_v8 = vpop.xlane.xlu1 %4482 }
 0x8dc   :  { %v12651_v53 = vadd.f32 %v4417_v2, %v12547_v38  ;;  %v4565_v39 = vrot.slane %v4483_v8, 1 }
 0x8de   :  { %4950 = vadd.xlane.f32.xlu0 %v15033_v4  ;;  %4956 = vadd.xlane.f32.xlu1 %v11043_v0 }
 0x8df   :  { %v4481_v11 = vpop.xlane.xlu0 %4480  ;;  %v4487_v48 = vpop.xlane.xlu1 %4486 }
 0x8e0   :  { %v4563_v15 = vrot.slane %v4481_v11, 1  ;;  %v15040_v11 = vld [vmem:[#allocation353_spill] sm:$0xff] }
 0x8e2   :  { %v4564_v52 = vsel %vm2791_vm7, %v4562_v9, %v4563_v15  ;;  %v12657_v17 = vadd.f32 %v4563_v15, %v12550_v42  ;;  %4954 = vadd.xlane.f32.xlu0 %v15034_v6  ;;  %4960 = vadd.xlane.f32.xlu1 %v15035_v62  ;;  %v15037_v42 = vld [vmem:[#allocation350_spill] sm:$0xff]  ;;  %v15042_v62 = vld [vmem:[#allocation357_spill] sm:$0xff] }
 0x8e3   :  { %v12662_v38 = vadd.f32 %v4564_v52, %v12532_v16  ;;  %v4485_v26 = vpop.xlane.xlu0 %4484  ;;  %v4491_v41 = vpop.xlane.xlu1 %4490  ;;  %v4568_v16 = vrot.slane %v4487_v48, 1 }
 0x8e4   :  { %v4566_v0 = vrot.slane %v4485_v26, 1 }
 0x8e6   :  { %v4567_v1 = vsel %vm2791_vm7, %v4565_v39, %v4566_v0  ;;  %v12666_v13 = vadd.f32 %v4566_v0, %v12558_v27  ;;  %4958 = vadd.xlane.f32.xlu0 %v15036_v31  ;;  %4964 = vadd.xlane.f32.xlu1 %v15037_v42  ;;  %v15043_v31 = vld [vmem:[#allocation358_spill] sm:$0xff] }
 0x8e7   :  { %v12671_v51 = vadd.f32 %v4567_v1, %v12541_v59  ;;  %v4489_v56 = vpop.xlane.xlu0 %4488  ;;  %v4495_v3 = vpop.xlane.xlu1 %4494  ;;  %v4571_v59 = vrot.slane %v4491_v41, 1 }
 0x8e8   :  { %v4569_v34 = vrot.slane %v4489_v56, 1 }
 0x8ea   :  { %v4570_v44 = vsel %vm2791_vm7, %v4568_v16, %v4569_v34  ;;  %v12675_v63 = vadd.f32 %v4569_v34, %v12566_v21  ;;  %4962 = vadd.xlane.f32.xlu0 %v15038_v22  ;;  %4968 = vadd.xlane.f32.xlu1 %v11067_v36  ;;  %v15039_v21 = vld [vmem:[#allocation352_spill] sm:$0xff] }
 0x8eb   :  { %v12680_v27 = vadd.f32 %v4570_v44, %v12553_v7  ;;  %v4493_v19 = vpop.xlane.xlu0 %4492  ;;  %v4499_v32 = vpop.xlane.xlu1 %4498  ;;  %v4574_v7 = vrot.slane %v4495_v3, 1  ;;  %v15045_v44 = vld [vmem:[#allocation87_spill] sm:$0xff] }
 0x8ec   :  { %v4572_v60 = vrot.slane %v4493_v19, 1 }
 0x8ee   :  { %v4573_v45 = vsel %vm2791_vm7, %v4571_v59, %v4572_v60  ;;  %v12684_v30 = vadd.f32 %v4572_v60, %v12574_v33  ;;  %4966 = vadd.xlane.f32.xlu0 %v11071_v29  ;;  %4972 = vadd.xlane.f32.xlu1 %v15039_v21  ;;  %v15041_v33 = vld [vmem:[#allocation356_spill] sm:$0xff] }
 0x8ef   :  { %v12689_v23 = vadd.f32 %v4573_v45, %v12561_v58  ;;  %v4497_v36 = vpop.xlane.xlu0 %4496  ;;  %v4503_v5 = vpop.xlane.xlu1 %4502  ;;  %v4577_v58 = vrot.slane %v4499_v32, 1  ;;  %v15047_v21 = vld [vmem:[#allocation360_spill] sm:$0xff] }
 0x8f0   :  { %v4575_v2 = vrot.slane %v4497_v36, 1 }
 0x8f2   :  { %v4576_v8 = vsel %vm2791_vm7, %v4574_v7, %v4575_v2  ;;  %v12693_v4 = vadd.f32 %v4575_v2, %v12582_v46  ;;  %4970 = vadd.xlane.f32.xlu0 %v15040_v11  ;;  %4976 = vadd.xlane.f32.xlu1 %v15041_v33  ;;  %v15049_v33 = vld [vmem:[#allocation362_spill] sm:$0xff] }
 0x8f3   :  { %v12698_v29 = vadd.f32 %v4576_v8, %v12569_v10  ;;  %v4501_v48 = vpop.xlane.xlu0 %4500  ;;  %v4507_v9 = vpop.xlane.xlu1 %4506  ;;  %v4580_v10 = vrot.slane %v4503_v5, 1 }
 0x8f4   :  { %v4578_v15 = vrot.slane %v4501_v48, 1 }
 0x8f6   :  { %v4579_v52 = vsel %vm2791_vm7, %v4577_v58, %v4578_v15  ;;  %v12702_v6 = vadd.f32 %v4578_v15, %v12590_v24  ;;  %4974 = vadd.xlane.f32.xlu0 %v15042_v62  ;;  %4980 = vadd.xlane.f32.xlu1 %v11095_v50  ;;  %v15044_v24 = vld [vmem:[#allocation86_spill] sm:$0xff] }
 0x8f7   :  { %v12707_v46 = vadd.f32 %v4579_v52, %v12577_v18  ;;  %v4505_v26 = vpop.xlane.xlu0 %4504  ;;  %v4511_v41 = vpop.xlane.xlu1 %4510  ;;  %v4583_v18 = vrot.slane %v4507_v9, 1 }
 0x8f8   :  { %v4581_v39 = vrot.slane %v4505_v26, 1  ;;  %v15051_v26 = vld [vmem:[#allocation364_spill] sm:$0xff] }
 0x8fa   :  { %v4582_v0 = vsel %vm2791_vm7, %v4580_v10, %v4581_v39  ;;  %v12711_v1 = vadd.f32 %v4581_v39, %v12598_v57  ;;  %4978 = vadd.xlane.f32.xlu0 %v15043_v31  ;;  %4984 = vadd.xlane.f32.xlu1 %v15044_v24  ;;  %v15046_v57 = vld [vmem:[#allocation359_spill] sm:$0xff] }
 0x8fb   :  { %v12716_v42 = vadd.f32 %v4582_v0, %v12585_v25  ;;  %v4509_v50 = vpop.xlane.xlu0 %4508  ;;  %v4515_v56 = vpop.xlane.xlu1 %4514  ;;  %v4586_v25 = vrot.slane %v4511_v41, 1 }
 0x8fc   :  { %v4584_v3 = vrot.slane %v4509_v50, 1  ;;  %v15053_v50 = vld [vmem:[#allocation366_spill] sm:$0xff] }
 0x8fe   :  { %v4585_v16 = vsel %vm2791_vm7, %v4583_v18, %v4584_v3  ;;  %v12720_v34 = vadd.f32 %v4584_v3, %v12606_v12  ;;  %4982 = vadd.xlane.f32.xlu0 %v15045_v44  ;;  %4988 = vadd.xlane.f32.xlu1 %v15046_v57  ;;  %v15048_v12 = vld [vmem:[#allocation361_spill] sm:$0xff] }
 0x8ff   :  { %v12725_v22 = vadd.f32 %v4585_v16, %v12593_v55  ;;  %v4513_v19 = vpop.xlane.xlu0 %4512  ;;  %v4519_v32 = vpop.xlane.xlu1 %4518  ;;  %v4589_v55 = vrot.slane %v4515_v56, 1 }
 0x900   :  { %v4587_v59 = vrot.slane %v4513_v19, 1  ;;  %v15055_v19 = vld [vmem:[#allocation367_spill] sm:$0xff] }
 0x902   :  { %v4588_v60 = vsel %vm2791_vm7, %v4586_v25, %v4587_v59  ;;  %v12729_v45 = vadd.f32 %v4587_v59, %v12614_v61  ;;  %4986 = vadd.xlane.f32.xlu0 %v15047_v21  ;;  %4992 = vadd.xlane.f32.xlu1 %v15048_v12  ;;  %v15050_v61 = vld [vmem:[#allocation363_spill] sm:$0xff] }
 0x903   :  { %v12734_v36 = vadd.f32 %v4588_v60, %v12601_v14  ;;  %v4517_v5 = vpop.xlane.xlu0 %4516  ;;  %v4523_v7 = vpop.xlane.xlu1 %4522  ;;  %v4592_v14 = vrot.slane %v4519_v32, 1 }
 0x904   :  { %v4590_v2 = vrot.slane %v4517_v5, 1  ;;  %v15057_v5 = vld [vmem:[#allocation369_spill] sm:$0xff] }
 0x906   :  { %v4591_v8 = vsel %vm2791_vm7, %v4589_v55, %v4590_v2  ;;  %v12738_v11 = vadd.f32 %v4590_v2, %v12622_v49  ;;  %4990 = vadd.xlane.f32.xlu0 %v15049_v33  ;;  %4996 = vadd.xlane.f32.xlu1 %v15050_v61  ;;  %v15052_v49 = vld [vmem:[#allocation365_spill] sm:$0xff] }
 0x907   :  { %v12743_v48 = vadd.f32 %v4591_v8, %v12609_v43  ;;  %v4521_v9 = vpop.xlane.xlu0 %4520  ;;  %v4527_v58 = vpop.xlane.xlu1 %4526  ;;  %v4595_v43 = vrot.slane %v4523_v7, 1 }
 0x908   :  { %v4593_v15 = vrot.slane %v4521_v9, 1  ;;  %v15059_v9 = vld [vmem:[#allocation88_spill] sm:$0xff] }
 0x90a   :  { %v4594_v52 = vsel %vm2791_vm7, %v4592_v14, %v4593_v15  ;;  %v12747_v62 = vadd.f32 %v4593_v15, %v12630_v28  ;;  %4994 = vadd.xlane.f32.xlu0 %v15051_v26  ;;  %5000 = vadd.xlane.f32.xlu1 %v15052_v49  ;;  %v15054_v28 = vld [vmem:[#allocation59_spill] sm:$0xff] }
 0x90b   :  { %v12752_v41 = vadd.f32 %v4594_v52, %v12617_v40  ;;  %v4525_v10 = vpop.xlane.xlu0 %4524  ;;  %v4531_v39 = vpop.xlane.xlu1 %4530  ;;  %v4598_v40 = vrot.slane %v4527_v58, 1 }
 0x90c   :  { %v4596_v0 = vrot.slane %v4525_v10, 1  ;;  %v15061_v10 = vld [vmem:[#allocation371_spill] sm:$0xff] }
 0x90e   :  { %v4597_v31 = vsel %vm2791_vm7, %v4595_v43, %v4596_v0  ;;  %v12756_v24 = vadd.f32 %v4596_v0, %v12638_v54  ;;  %4998 = vadd.xlane.f32.xlu0 %v15053_v50  ;;  %5246 = vadd.xlane.f32.xlu1 %v15054_v28  ;;  %v15056_v54 = vld [vmem:[#allocation368_spill] sm:$0xff] }
 0x90f   :  { %v12761_v56 = vadd.f32 %v4597_v31, %v12625_v47  ;;  %v4529_v18 = vpop.xlane.xlu0 %4528  ;;  %v4693_v3 = vpop.xlane.xlu1 %4692  ;;  %v4601_v47 = vrot.slane %v4531_v39, 1 }
 0x910   :  { %v4599_v16 = vrot.slane %v4529_v18, 1  ;;  %v15063_v18 = vld [vmem:[#allocation375_spill] sm:$0xff] }
 0x912   :  { %v4600_v44 = vsel %vm2791_vm7, %v4598_v40, %v4599_v16  ;;  %v12765_v57 = vadd.f32 %v4599_v16, %v12646_v20  ;;  %5002 = vadd.xlane.f32.xlu0 %v15055_v19  ;;  %5250 = vadd.xlane.f32.xlu1 %v15056_v54  ;;  %v15058_v20 = vld [vmem:[#allocation56_spill] sm:$0xff] }
 0x913   :  { %v12770_v32 = vadd.f32 %v4600_v44, %v12633_v35  ;;  %v4533_v25 = vpop.xlane.xlu0 %4532  ;;  %v4697_v59 = vpop.xlane.xlu1 %4696  ;;  %v4776_v35 = vrot.slane %v4693_v3, 2 }
 0x914   :  { %v4602_v60 = vrot.slane %v4533_v25, 1  ;;  %v15065_v25 = vld [vmem:[#allocation377_spill] sm:$0xff] }
 0x916   :  { %v4603_v21 = vsel %vm2791_vm7, %v4601_v47, %v4602_v60  ;;  %v12774_v12 = vadd.f32 %v4602_v60, %v12651_v53  ;;  %5248 = vadd.xlane.f32.xlu0 %v15057_v5  ;;  %5364 = vadd.xlane.f32.xlu1 %v15058_v20  ;;  %v15060_v53 = vld [vmem:[#allocation370_spill] sm:$0xff] }
 0x917   :  { %v12779_v7 = vadd.f32 %v4603_v21, %v12641_v37  ;;  %v4695_v55 = vpop.xlane.xlu0 %4694  ;;  %v4701_v2 = vpop.xlane.xlu1 %4700  ;;  %v4779_v37 = vrot.slane %v4697_v59, 2 }
 0x918   :  { %v4777_v8 = vrot.slane %v4695_v55, 2  ;;  %v4782_v31 = vrot.slane %v4701_v2, 2  ;;  %v15067_v55 = vld [vmem:[#allocation379_spill] sm:$0xff] }
 0x91a   :  { %v4778_v33 = vsel %vm3006_vm8, %v4776_v35, %v4777_v8  ;;  %v12783_v61 = vadd.f32 %v4777_v8, %v12657_v17  ;;  %5362 = vadd.xlane.f32.xlu0 %v15059_v9  ;;  %5368 = vadd.xlane.f32.xlu1 %v15060_v53  ;;  %v15062_v17 = vld [vmem:[#allocation374_spill] sm:$0xff] }
 0x91b   :  { %v4699_v58 = vpop.xlane.xlu0 %4698  ;;  %v4705_v14 = vpop.xlane.xlu1 %4704  ;;  %v12788_v15 = vadd.f32 %v4778_v33, %v12662_v38 }
 0x91c   :  { %v4780_v52 = vrot.slane %v4699_v58, 2  ;;  %v4785_v44 = vrot.slane %v4705_v14, 2  ;;  %v15069_v58 = vld [vmem:[#allocation381_spill] sm:$0xff] }
 0x91e   :  { %v4781_v26 = vsel %vm3006_vm8, %v4779_v37, %v4780_v52  ;;  %v12792_v49 = vadd.f32 %v4780_v52, %v12666_v13  ;;  %5366 = vadd.xlane.f32.xlu0 %v15061_v10  ;;  %5370 = vadd.xlane.f32.xlu1 %v15062_v17  ;;  %v15064_v13 = vld [vmem:[#allocation376_spill] sm:$0xff]  ;;  %v15071_v17 = vld [vmem:[#allocation383_spill] sm:$0xff] }
 0x91f   :  { %v4703_v39 = vpop.xlane.xlu0 %4702  ;;  %v4709_v43 = vpop.xlane.xlu1 %4708  ;;  %v12797_v0 = vadd.f32 %v4781_v26, %v12671_v51 }
 0x920   :  { %v4783_v50 = vrot.slane %v4703_v39, 2  ;;  %v4788_v21 = vrot.slane %v4709_v43, 2  ;;  %v15072_v39 = vld [vmem:[#allocation57_spill] sm:$0xff] }
 0x922   :  { %v4784_v38 = vsel %vm3006_vm8, %v4782_v31, %v4783_v50  ;;  %v12801_v28 = vadd.f32 %v4783_v50, %v12675_v63  ;;  %5252 = vadd.xlane.f32.xlu0 %v15063_v18  ;;  %5254 = vadd.xlane.f32.xlu1 %v15064_v13  ;;  %v15066_v63 = vld [vmem:[#allocation378_spill] sm:$0xff] }
 0x923   :  { %v4707_v3 = vpop.xlane.xlu0 %4706  ;;  %v4713_v40 = vpop.xlane.xlu1 %4712  ;;  %v12806_v16 = vadd.f32 %v4784_v38, %v12680_v27 }
 0x924   :  { %v4786_v19 = vrot.slane %v4707_v3, 2  ;;  %v4791_v33 = vrot.slane %v4713_v40, 2  ;;  %v15073_v3 = vld [vmem:[#allocation384_spill] sm:$0xff] }
 0x926   :  { %v4787_v51 = vsel %vm3006_vm8, %v4785_v44, %v4786_v19  ;;  %v12810_v54 = vadd.f32 %v4786_v19, %v12684_v30  ;;  %5372 = vadd.xlane.f32.xlu0 %v15065_v25  ;;  %5374 = vadd.xlane.f32.xlu1 %v15066_v63  ;;  %v15068_v30 = vld [vmem:[#allocation380_spill] sm:$0xff] }
 0x927   :  { %v4711_v59 = vpop.xlane.xlu0 %4710  ;;  %v4717_v47 = vpop.xlane.xlu1 %4716  ;;  %v12815_v60 = vadd.f32 %v4787_v51, %v12689_v23 }
 0x928   :  { %v4789_v5 = vrot.slane %v4711_v59, 2  ;;  %v4794_v52 = vrot.slane %v4717_v47, 2  ;;  %v15075_v59 = vld [vmem:[#allocation90_spill] sm:$0xff] }
 0x92a   :  { %v4790_v27 = vsel %vm3006_vm8, %v4788_v21, %v4789_v5  ;;  %v12819_v20 = vadd.f32 %v4789_v5, %v12693_v4  ;;  %5256 = vadd.xlane.f32.xlu0 %v15067_v55  ;;  %5394 = vadd.xlane.f32.xlu1 %v15068_v30  ;;  %v15070_v4 = vld [vmem:[#allocation382_spill] sm:$0xff] }
 0x92b   :  { %v4715_v2 = vpop.xlane.xlu0 %4714  ;;  %v4721_v35 = vpop.xlane.xlu1 %4720  ;;  %v12824_v8 = vadd.f32 %v4790_v27, %v12698_v29 }
 0x92c   :  { %v4792_v9 = vrot.slane %v4715_v2, 2  ;;  %v4797_v31 = vrot.slane %v4721_v35, 2  ;;  %v15078_v35 = vld [vmem:[#allocation387_spill] sm:$0xff] }
 0x92e   :  { %v4793_v23 = vsel %vm3006_vm8, %v4791_v33, %v4792_v9  ;;  %v12828_v53 = vadd.f32 %v4792_v9, %v12702_v6  ;;  %5376 = vadd.xlane.f32.xlu0 %v15069_v58  ;;  %5398 = vadd.xlane.f32.xlu1 %v15070_v4 }
 0x92f   :  { %v4719_v14 = vpop.xlane.xlu0 %4718  ;;  %v4725_v37 = vpop.xlane.xlu1 %4724  ;;  %v12839_v38 = vadd.f32 %v4793_v23, %v12707_v46 }
 0x930   :  { %v4795_v26 = vrot.slane %v4719_v14, 2  ;;  %v4800_v19 = vrot.slane %v4725_v37, 2  ;;  %v15079_v14 = vld [vmem:[#allocation388_spill] sm:$0xff] }
 0x932   :  { %v4796_v10 = vsel %vm3006_vm8, %v4794_v52, %v4795_v26  ;;  %v12834_v29 = vadd.f32 %v4795_v26, %v12711_v1  ;;  %5396 = vadd.xlane.f32.xlu0 %v15071_v17  ;;  %5576 = vadd.xlane.f32.xlu1 %v15072_v39  ;;  %v15074_v1 = vld [vmem:[#allocation89_spill] sm:$0xff] }
 0x933   :  { %v4723_v43 = vpop.xlane.xlu0 %4722  ;;  %v4729_v6 = vpop.xlane.xlu1 %4728  ;;  %v12848_v25 = vadd.f32 %v4796_v10, %v12716_v42 }
 0x934   :  { %v4798_v50 = vrot.slane %v4723_v43, 2  ;;  %v4803_v27 = vrot.slane %v4729_v6, 2  ;;  %v15081_v43 = vld [vmem:[#allocation390_spill] sm:$0xff] }
 0x936   :  { %v4799_v18 = vsel %vm3006_vm8, %v4797_v31, %v4798_v50  ;;  %v12843_v13 = vadd.f32 %v4798_v50, %v12720_v34  ;;  %5400 = vadd.xlane.f32.xlu0 %v15073_v3  ;;  %5580 = vadd.xlane.f32.xlu1 %v15074_v1  ;;  %v15076_v34 = vld [vmem:[#allocation385_spill] sm:$0xff] }
 0x937   :  { %v4727_v40 = vpop.xlane.xlu0 %4726  ;;  %v4733_v44 = vpop.xlane.xlu1 %4732  ;;  %v12860_v30 = vadd.f32 %v4799_v18, %v12725_v22 }
 0x938   :  { %v4801_v51 = vrot.slane %v4727_v40, 2  ;;  %v15084_v40 = vld [vmem:[#allocation393_spill] sm:$0xff] }
 0x93a   :  { %v4802_v63 = vsel %vm3006_vm8, %v4800_v19, %v4801_v51  ;;  %v12852_v46 = vadd.f32 %v4801_v51, %v12729_v45  ;;  %5578 = vadd.xlane.f32.xlu0 %v15075_v59  ;;  %5258 = vadd.xlane.f32.xlu1 %v15076_v34  ;;  %v15077_v45 = vld [vmem:[#allocation386_spill] sm:$0xff] }
 0x93b   :  { %v4731_v47 = vpop.xlane.xlu0 %4730  ;;  %v4737_v21 = vpop.xlane.xlu1 %4736  ;;  %v12857_v5 = vadd.f32 %v4802_v63, %v12734_v36  ;;  %v4806_v36 = vrot.slane %v4733_v44, 2 }
 0x93c   :  { %v4804_v55 = vrot.slane %v4731_v47, 2  ;;  %v4809_v26 = vrot.slane %v4737_v21, 2  ;;  %v15085_v47 = vld [vmem:[#allocation396_spill] sm:$0xff] }
 0x93e   :  { %v4805_v42 = vsel %vm3006_vm8, %v4803_v27, %v4804_v55  ;;  %v12864_v2 = vadd.f32 %v4804_v55, %v12738_v11  ;;  %5582 = vadd.xlane.f32.xlu0 %v15077_v45  ;;  %5278 = vadd.xlane.f32.xlu1 %v15078_v35  ;;  %v15080_v11 = vld [vmem:[#allocation389_spill] sm:$0xff] }
 0x93f   :  { %v4735_v33 = vpop.xlane.xlu0 %4734  ;;  %v4741_v9 = vpop.xlane.xlu1 %4740  ;;  %v12869_v23 = vadd.f32 %v4805_v42, %v12743_v48 }
 0x940   :  { %v4807_v58 = vrot.slane %v4735_v33, 2  ;;  %v4812_v50 = vrot.slane %v4741_v9, 2  ;;  %v15087_v33 = vld [vmem:[#allocation398_spill] sm:$0xff] }
 0x942   :  { %v4808_v4 = vsel %vm3006_vm8, %v4806_v36, %v4807_v58  ;;  %v12873_v22 = vadd.f32 %v4807_v58, %v12747_v62  ;;  %5260 = vadd.xlane.f32.xlu0 %v15079_v14  ;;  %5282 = vadd.xlane.f32.xlu1 %v15080_v11  ;;  %v15082_v62 = vld [vmem:[#allocation391_spill] sm:$0xff] }
 0x943   :  { %v4739_v37 = vpop.xlane.xlu0 %4738  ;;  %v4745_v52 = vpop.xlane.xlu1 %4744  ;;  %v12878_v17 = vadd.f32 %v4808_v4, %v12752_v41  ;;  %v15083_v41 = vld [vmem:[#allocation392_spill] sm:$0xff] }
 0x944   :  { %v4810_v10 = vrot.slane %v4739_v37, 2  ;;  %v4815_v19 = vrot.slane %v4745_v52, 2  ;;  %v15089_v52 = vld [vmem:[#allocation91_spill] sm:$0xff] }
 0x946   :  { %v4811_v48 = vsel %vm3006_vm8, %v4809_v26, %v4810_v10  ;;  %v12882_v39 = vadd.f32 %v4810_v10, %v12756_v24  ;;  %5280 = vadd.xlane.f32.xlu0 %v15081_v43  ;;  %5378 = vadd.xlane.f32.xlu1 %v15082_v62  ;;  %v15090_v26 = vld [vmem:[#allocation400_spill] sm:$0xff] }
 0x947   :  { %v4743_v6 = vpop.xlane.xlu0 %4742  ;;  %v4921_v31 = vpop.xlane.xlu1 %4920  ;;  %v12893_v63 = vadd.f32 %v4811_v48, %v12761_v56  ;;  %v15088_v56 = vld [vmem:[#allocation399_spill] sm:$0xff] }
 0x948   :  { %v4813_v18 = vrot.slane %v4743_v6, 2  ;;  %v5046_v55 = vrot.slane %v4921_v31, 3  ;;  %v15091_v6 = vld [vmem:[#allocation401_spill] sm:$0xff] }
 0x94a   :  { %v4814_v3 = vsel %vm3006_vm8, %v4812_v50, %v4813_v18  ;;  %v12888_v1 = vadd.f32 %v4813_v18, %v12765_v57  ;;  %5284 = vadd.xlane.f32.xlu0 %v15083_v41  ;;  %5402 = vadd.xlane.f32.xlu1 %v15084_v40  ;;  %v15086_v57 = vld [vmem:[#allocation397_spill] sm:$0xff] }
 0x94b   :  { %v4747_v44 = vpop.xlane.xlu0 %4746  ;;  %v4925_v24 = vpop.xlane.xlu1 %4924  ;;  %v12902_v35 = vadd.f32 %v4814_v3, %v12770_v32 }
 0x94c   :  { %v4816_v51 = vrot.slane %v4747_v44, 2  ;;  %v5049_v42 = vrot.slane %v4925_v24, 3  ;;  %v15093_v44 = vld [vmem:[#allocation403_spill] sm:$0xff]  ;;  %v15094_v24 = vld [vmem:[#allocation404_spill] sm:$0xff] }
 0x94e   :  { %v4817_v59 = vsel %vm3006_vm8, %v4815_v19, %v4816_v51  ;;  %v12897_v34 = vadd.f32 %v4816_v51, %v12774_v12  ;;  %5380 = vadd.xlane.f32.xlu0 %v15085_v47  ;;  %5584 = vadd.xlane.f32.xlu1 %v15086_v57 }
 0x94f   :  { %v4923_v21 = vpop.xlane.xlu0 %4922  ;;  %v4929_v27 = vpop.xlane.xlu1 %4928  ;;  %v12915_v32 = vadd.f32 %v4817_v59, %v12779_v7 }
 0x950   :  { %v5047_v45 = vrot.slane %v4923_v21, 3  ;;  %v5052_v11 = vrot.slane %v4929_v27, 3  ;;  %v15095_v27 = vld [vmem:[#allocation405_spill] sm:$0xff] }
 0x952   :  { %5404 = vadd.xlane.f32.xlu0 %v15087_v33  ;;  %5262 = vadd.xlane.f32.xlu1 %v15088_v56  ;;  %v5048_v9 = vsel %vm3277_vm9, %v5046_v55, %v5047_v45  ;;  %v5050_v12 = vsel %vm3277_vm9, %v5047_v45, %v5049_v42  ;;  %v15096_v55 = vld [vmem:[#allocation406_spill] sm:$0xff] }
 0x953   :  { %v4927_v36 = vpop.xlane.xlu0 %4926  ;;  %v4933_v58 = vpop.xlane.xlu1 %4932  ;;  %v12909_v4 = vadd.f32 %v5048_v9, %v12788_v15  ;;  %v12912_v14 = vadd.f32 %v5050_v12, %v12783_v61  ;;  %v15092_v61 = vld [vmem:[#allocation402_spill] sm:$0xff]  ;;  %v15097_v12 = vld [vmem:[#allocation407_spill] sm:$0xff] }
 0x954   :  { %v5051_v37 = vrot.slane %v4927_v36, 3  ;;  %v5056_v3 = vrot.slane %v4933_v58, 3 }
 0x956   :  { %5586 = vadd.xlane.f32.xlu0 %v15089_v52  ;;  %5286 = vadd.xlane.f32.xlu1 %v15090_v26  ;;  %v5053_v10 = vsel %vm3277_vm9, %v5051_v37, %v5052_v11 }
 0x957   :  { %v4931_v48 = vpop.xlane.xlu0 %4930  ;;  %v4937_v43 = vpop.xlane.xlu1 %4936  ;;  %v12921_v62 = vadd.f32 %v5053_v10, %v12797_v0  ;;  %v15099_v10 = vld [vmem:[#allocation409_spill] sm:$0xff] }
 0x958   :  { %v5054_v15 = vrot.slane %v4931_v48, 3  ;;  %v5059_v41 = vrot.slane %v4937_v43, 3  ;;  %v15100_v48 = vld [vmem:[#allocation410_spill] sm:$0xff] }
 0x95a   :  { %5264 = vadd.xlane.f32.xlu0 %v15091_v6  ;;  %5382 = vadd.xlane.f32.xlu1 %v15092_v61  ;;  %v5055_v31 = vsel %vm3277_vm9, %v5052_v11, %v5054_v15 }
 0x95b   :  { %v4935_v7 = vpop.xlane.xlu0 %4934  ;;  %v4941_v50 = vpop.xlane.xlu1 %4940  ;;  %v12927_v18 = vadd.f32 %v5055_v31, %v12792_v49 }
 0x95c   :  { %v5057_v40 = vrot.slane %v4935_v7, 3  ;;  %v5062_v49 = vrot.slane %v4941_v50, 3  ;;  %v15102_v7 = vld [vmem:[#allocation58_spill] sm:$0xff] }
 0x95e   :  { %5288 = vadd.xlane.f32.xlu0 %v15093_v44  ;;  %5406 = vadd.xlane.f32.xlu1 %v15094_v24  ;;  %v5058_v0 = vsel %vm3277_vm9, %v5056_v3, %v5057_v40  ;;  %v5060_v19 = vsel %vm3277_vm9, %v5057_v40, %v5059_v41  ;;  %v15103_v3 = vld [vmem:[#allocation411_spill] sm:$0xff]  ;;  %v15104_v24 = vld [vmem:[#allocation36_spill] sm:$0xff] }
 0x95f   :  { %v4939_v51 = vpop.xlane.xlu0 %4938  ;;  %v4945_v59 = vpop.xlane.xlu1 %4944  ;;  %v12934_v47 = vadd.f32 %v5058_v0, %v12806_v16  ;;  %v12937_v57 = vadd.f32 %v5060_v19, %v12801_v28  ;;  %v15098_v16 = vld [vmem:[#allocation408_spill] sm:$0xff]  ;;  %v5764_v0 = vmul.f32 %v15102_v7, %v15104_v24 }
 0x960   :  { %v5061_v21 = vrot.slane %v4939_v51, 3  ;;  %v5066_v37 = vrot.slane %v4945_v59, 3  ;;  %v15105_v51 = vld [vmem:[#allocation412_spill] sm:$0xff] }
 0x962   :  { %5384 = vadd.xlane.f32.xlu0 %v15095_v27  ;;  %5588 = vadd.xlane.f32.xlu1 %v15096_v55  ;;  %v5063_v42 = vsel %vm3277_vm9, %v5061_v21, %v5062_v49  ;;  %v15107_v27 = vld [vmem:[#allocation23_spill] sm:$0xff] }
 0x963   :  { %v4943_v45 = vpop.xlane.xlu0 %4942  ;;  %v4949_v33 = vpop.xlane.xlu1 %4948  ;;  %v12943_v56 = vadd.f32 %v5063_v42, %v12815_v60  ;;  %v5766_v55 = vmul.f32 %v15102_v7, %v15107_v27 }
 0x964   :  { %v5064_v9 = vrot.slane %v4943_v45, 3  ;;  %v5069_v52 = vrot.slane %v4949_v33, 3 }
 0x966   :  { %5408 = vadd.xlane.f32.xlu0 %v15097_v12  ;;  %5608 = vadd.xlane.f32.xlu1 %v15098_v16  ;;  %v5065_v28 = vsel %vm3277_vm9, %v5062_v49, %v5064_v9  ;;  %v15106_v49 = vld [vmem:[#allocation30_spill] sm:$0xff] }
 0x967   :  { %v4947_v36 = vpop.xlane.xlu0 %4946  ;;  %v4953_v58 = vpop.xlane.xlu1 %4952  ;;  %v12949_v11 = vadd.f32 %v5065_v28, %v12810_v54  ;;  %v15101_v54 = vld [vmem:[#allocation14_spill] sm:$0xff]  ;;  %v5763_v21 = vmul.f32 %v15102_v7, %v15106_v49 }
 0x968   :  { %v5067_v26 = vrot.slane %v4947_v36, 3  ;;  %v5762_v50 = vmul.f32 %v15102_v7, %v15101_v54  ;;  %v5072_v19 = vrot.slane %v4953_v58, 3  ;;  %v15108_v16 = vld [vmem:[#allocation38_spill] sm:$0xff] }
 0x969   :  { %v5765_v28 = vmul.f32 %v15102_v7, %v15108_v16  ;;  %v15118_v16 = vld [vmem:[#allocation418_spill] sm:$0xff] }
 0x96a   :  { %5590 = vadd.xlane.f32.xlu0 %v15099_v10  ;;  %5612 = vadd.xlane.f32.xlu1 %v15100_v48  ;;  %v5068_v60 = vsel %vm3277_vm9, %v5066_v37, %v5067_v26  ;;  %v5070_v43 = vsel %vm3277_vm9, %v5067_v26, %v5069_v52  ;;  %v15109_v26 = vld [vmem:[#allocation413_spill] sm:$0xff] }
 0x96b   :  { %v4951_v15 = vpop.xlane.xlu0 %4950  ;;  %v4957_v6 = vpop.xlane.xlu1 %4956  ;;  %v12956_v61 = vadd.f32 %v5068_v60, %v12824_v8  ;;  %v12959_v31 = vadd.f32 %v5070_v43, %v12819_v20  ;;  %v15110_v60 = vld [vmem:[#allocation34_spill] sm:$0xff] }
 0x96c   :  { %v5071_v44 = vrot.slane %v4951_v15, 3  ;;  %v5076_v37 = vrot.slane %v4957_v6, 3  ;;  %v5767_v43 = vmul.f32 %v15102_v7, %v15110_v60 }
 0x96e   :  { %5610 = vadd.xlane.f32.xlu0 %v15103_v3  ;;  %5804 = vadd.xlane.f32.xlu1 %v5762_v50  ;;  %v5073_v42 = vsel %vm3277_vm9, %v5071_v44, %v5072_v19  ;;  %v15112_v3 = vld [vmem:[#allocation414_spill] sm:$0xff] }
 0x96f   :  { %v4955_v41 = vpop.xlane.xlu0 %4954  ;;  %v4961_v40 = vpop.xlane.xlu1 %4960  ;;  %v12973_v45 = vadd.f32 %v5073_v42, %v12839_v38 }
 0x970   :  { %v5074_v20 = vrot.slane %v4955_v41, 3  ;;  %v5079_v52 = vrot.slane %v4961_v40, 3 }
 0x972   :  { %5614 = vadd.xlane.f32.xlu0 %v15105_v51  ;;  %5808 = vadd.xlane.f32.xlu1 %v5764_v0  ;;  %v5075_v36 = vsel %vm3277_vm9, %v5072_v19, %v5074_v20  ;;  %v15115_v20 = vld [vmem:[#allocation416_spill] sm:$0xff] }
 0x973   :  { %v4959_v8 = vpop.xlane.xlu0 %4958  ;;  %v4965_v59 = vpop.xlane.xlu1 %4964  ;;  %v12979_v58 = vadd.f32 %v5075_v36, %v12828_v53 }
 0x974   :  { %v5077_v12 = vrot.slane %v4959_v8, 3  ;;  %v5082_v6 = vrot.slane %v4965_v59, 3 }
 0x976   :  { %5806 = vadd.xlane.f32.xlu0 %v5763_v21  ;;  %5812 = vadd.xlane.f32.xlu1 %v5766_v55  ;;  %v5080_v15 = vsel %vm3277_vm9, %v5077_v12, %v5079_v52  ;;  %v5078_v54 = vsel %vm3277_vm9, %v5076_v37, %v5077_v12  ;;  %v15117_v12 = vld [vmem:[#allocation417_spill] sm:$0xff]  ;;  %v15119_v52 = vld [vmem:[#allocation419_spill] sm:$0xff] }
 0x977   :  { %v4963_v33 = vpop.xlane.xlu0 %4962  ;;  %v4969_v9 = vpop.xlane.xlu1 %4968  ;;  %v12987_v50 = vadd.f32 %v5080_v15, %v12834_v29  ;;  %v12990_v53 = vadd.f32 %v5078_v54, %v12848_v25  ;;  %v15114_v29 = vld [vmem:[#allocation415_spill] sm:$0xff]  ;;  %v15121_v54 = vld [vmem:[#allocation421_spill] sm:$0xff] }
 0x978   :  { %v5081_v48 = vrot.slane %v4963_v33, 3  ;;  %v5086_v41 = vrot.slane %v4969_v9, 3 }
 0x979   :  { %15111 = vst [vmem:[#allocation102_spill] sm:$0xff] %v12990_v53 }
 0x97a   :  { %5810 = vadd.xlane.f32.xlu0 %v5765_v28  ;;  %5266 = vadd.xlane.f32.xlu1 %v15109_v26  ;;  %v5083_v51 = vsel %vm3277_vm9, %v5081_v48, %v5082_v6  ;;  %v15120_v26 = vld [vmem:[#allocation420_spill] sm:$0xff] }
 0x97b   :  { %v4967_v38 = vpop.xlane.xlu0 %4966  ;;  %v4973_v10 = vpop.xlane.xlu1 %4972  ;;  %v12995_v8 = vadd.f32 %v5083_v51, %v12860_v30 }
 0x97c   :  { %v5084_v24 = vrot.slane %v4967_v38, 3  ;;  %v5089_v0 = vrot.slane %v4973_v10, 3 }
 0x97d   :  { %15113 = vst [vmem:[#allocation103_spill] sm:$0xff] %v12995_v8 }
 0x97e   :  { %5814 = vadd.xlane.f32.xlu0 %v5767_v43  ;;  %5290 = vadd.xlane.f32.xlu1 %v15112_v3  ;;  %v5085_v30 = vsel %vm3277_vm9, %v5082_v6, %v5084_v24  ;;  %v15122_v6 = vld [vmem:[#allocation422_spill] sm:$0xff] }
 0x97f   :  { %v4971_v40 = vpop.xlane.xlu0 %4970  ;;  %v4977_v44 = vpop.xlane.xlu1 %4976  ;;  %v13009_v9 = vadd.f32 %v5085_v30, %v12843_v13 }
 0x980   :  { %v5087_v19 = vrot.slane %v4971_v40, 3  ;;  %v5092_v42 = vrot.slane %v4977_v44, 3 }
 0x981   :  { %15116 = vst [vmem:[#allocation104_spill] sm:$0xff] %v13009_v9 }
 0x982   :  { %5268 = vadd.xlane.f32.xlu0 %v15114_v29  ;;  %5386 = vadd.xlane.f32.xlu1 %v15115_v20  ;;  %v5088_v25 = vsel %vm3277_vm9, %v5086_v41, %v5087_v19  ;;  %v5090_v59 = vsel %vm3277_vm9, %v5087_v19, %v5089_v0  ;;  %v15123_v19 = vld [vmem:[#allocation10_spill] sm:$0xff] }
 0x983   :  { %v4975_v49 = vpop.xlane.xlu0 %4974  ;;  %v4981_v21 = vpop.xlane.xlu1 %4980  ;;  %v13002_v27 = vadd.f32 %v5088_v25, %v12857_v5  ;;  %v13005_v55 = vadd.f32 %v5090_v59, %v12852_v46  ;;  %v5768_v51 = vmul.f32 %v15102_v7, %v15123_v19  ;;  %v15124_v29 = vld [vmem:[#allocation94_spill] sm:$0xff] }
 0x984   :  { %v5091_v33 = vrot.slane %v4975_v49, 3  ;;  %v5096_v60 = vrot.slane %v4981_v21, 3  ;;  %v15125_v21 = vld [vmem:[#allocation19_spill] sm:$0xff] }
 0x986   :  { %5292 = vadd.xlane.f32.xlu0 %v15117_v12  ;;  %5410 = vadd.xlane.f32.xlu1 %v15118_v16  ;;  %v5093_v28 = vsel %vm3277_vm9, %v5091_v33, %v5092_v42 }
 0x987   :  { %v4979_v36 = vpop.xlane.xlu0 %4978  ;;  %v4985_v37 = vpop.xlane.xlu1 %4984  ;;  %v13015_v5 = vadd.f32 %v5093_v28, %v12869_v23  ;;  %v15127_v28 = vld [vmem:[#allocation11_spill] sm:$0xff] }
 0x988   :  { %v5094_v46 = vrot.slane %v4979_v36, 3  ;;  %v5099_v43 = vrot.slane %v4985_v37, 3  ;;  %v5769_v36 = vmul.f32 %v15102_v7, %v15127_v28 }
 0x98a   :  { %5388 = vadd.xlane.f32.xlu0 %v15119_v52  ;;  %5592 = vadd.xlane.f32.xlu1 %v15120_v26  ;;  %v5095_v38 = vsel %vm3277_vm9, %v5092_v42, %v5094_v46  ;;  %v15126_v42 = vld [vmem:[#allocation95_spill] sm:$0xff] }
 0x98b   :  { %v4983_v13 = vpop.xlane.xlu0 %4982  ;;  %v4989_v10 = vpop.xlane.xlu1 %4988  ;;  %v13021_v48 = vadd.f32 %v5095_v38, %v12864_v2 }
 0x98c   :  { %v5097_v15 = vrot.slane %v4983_v13, 3  ;;  %v5102_v2 = vrot.slane %v4989_v10, 3  ;;  %v15129_v10 = vld [vmem:[#allocation424_spill] sm:$0xff] }
 0x98e   :  { %5412 = vadd.xlane.f32.xlu0 %v15121_v54  ;;  %5616 = vadd.xlane.f32.xlu1 %v15122_v6  ;;  %v5098_v23 = vsel %vm3277_vm9, %v5096_v60, %v5097_v15  ;;  %v5100_v3 = vsel %vm3277_vm9, %v5097_v15, %v5099_v43  ;;  %v15130_v60 = vld [vmem:[#allocation425_spill] sm:$0xff] }
 0x98f   :  { %v4987_v41 = vpop.xlane.xlu0 %4986  ;;  %v4993_v40 = vpop.xlane.xlu1 %4992  ;;  %v13028_v44 = vadd.f32 %v5098_v23, %v12878_v17  ;;  %v13031_v24 = vadd.f32 %v5100_v3, %v12873_v22  ;;  %v5770_v22 = vmul.f32 %v15102_v7, %v15125_v21 }
 0x990   :  { %v5101_v0 = vrot.slane %v4987_v41, 3  ;;  %v5106_v38 = vrot.slane %v4993_v40, 3  ;;  %v15133_v40 = vld [vmem:[#allocation426_spill] sm:$0xff] }
 0x992   :  { %5594 = vadd.xlane.f32.xlu0 %v15124_v29  ;;  %5816 = vadd.xlane.f32.xlu1 %v5768_v51  ;;  %v5103_v20 = vsel %vm3277_vm9, %v5101_v0, %v5102_v2 }
 0x993   :  { %v4991_v25 = vpop.xlane.xlu0 %4990  ;;  %v4997_v59 = vpop.xlane.xlu1 %4996  ;;  %v13038_v49 = vadd.f32 %v5103_v20, %v12893_v63  ;;  %v15128_v63 = vld [vmem:[#allocation423_spill] sm:$0xff] }
 0x994   :  { %v5104_v17 = vrot.slane %v4991_v25, 3  ;;  %v5109_v13 = vrot.slane %v4997_v59, 3  ;;  %v15137_v59 = vld [vmem:[#allocation431_spill] sm:$0xff] }
 0x996   :  { %5618 = vadd.xlane.f32.xlu0 %v15126_v42  ;;  %5820 = vadd.xlane.f32.xlu1 %v5770_v22  ;;  %v5105_v33 = vsel %vm3277_vm9, %v5102_v2, %v5104_v17  ;;  %v15134_v2 = vld [vmem:[#allocation427_spill] sm:$0xff] }
 0x997   :  { %v4995_v30 = vpop.xlane.xlu0 %4994  ;;  %v5001_v12 = vpop.xlane.xlu1 %5000  ;;  %v13045_v16 = vadd.f32 %v5105_v33, %v12882_v39 }
 0x998   :  { %v5107_v52 = vrot.slane %v4995_v30, 3  ;;  %v5112_v41 = vrot.slane %v5001_v12, 3  ;;  %v15139_v30 = vld [vmem:[#allocation432_spill] sm:$0xff] }
 0x99a   :  { %5818 = vadd.xlane.f32.xlu0 %v5769_v36  ;;  %5272 = vadd.xlane.f32.xlu1 %v15128_v63  ;;  %v5110_v6 = vsel %vm3277_vm9, %v5107_v52, %v5109_v13  ;;  %v5108_v23 = vsel %vm3277_vm9, %v5106_v38, %v5107_v52  ;;  %v15141_v52 = vld [vmem:[#allocation434_spill] sm:$0xff]  ;;  %v15142_v38 = vld [vmem:[#allocation96_spill] sm:$0xff] }
 0x99b   :  { %v4999_v37 = vpop.xlane.xlu0 %4998  ;;  %v5247_v46 = vpop.xlane.xlu1 %5246  ;;  %v13057_v3 = vadd.f32 %v5110_v6, %v12888_v1  ;;  %v15144_v6 = vld [vmem:[#allocation435_spill] sm:$0xff] }
 0x99c   :  { %v5302_v26 = vadd.f32 %v5247_v46, %v12909_v4  ;;  %v5111_v15 = vrot.slane %v4999_v37, 3  ;;  %v13060_v4 = vadd.f32 %v5108_v23, %v12902_v35  ;;  %v15136_v35 = vld [vmem:[#allocation428_spill] sm:$0xff] }
 0x99d   :  { %15131 = vst [vmem:[#allocation105_spill] sm:$0xff] %v13057_v3 }
 0x99e   :  { %5270 = vadd.xlane.f32.xlu0 %v15129_v10  ;;  %5296 = vadd.xlane.f32.xlu1 %v15130_v60  ;;  %15132 = vst [vmem:[#allocation106_spill] sm:$0xff] %v13060_v4  ;;  %v5113_v20 = vsel %vm3277_vm9, %v5111_v15, %v5112_v41 }
 0x99f   :  { %v5003_v43 = vpop.xlane.xlu0 %5002  ;;  %v5251_v39 = vpop.xlane.xlu1 %5250  ;;  %v13067_v25 = vadd.f32 %v5113_v20, %v12915_v32  ;;  %v15140_v32 = vld [vmem:[#allocation433_spill] sm:$0xff] }
 0x9a0   :  { %v5304_v54 = vadd.f32 %v5251_v39, %v12921_v62  ;;  %v5114_v51 = vrot.slane %v5003_v43, 3 }
 0x9a1   :  { %15135 = vst [vmem:[#allocation107_spill] sm:$0xff] %v13067_v25 }
 0x9a2   :  { %5294 = vadd.xlane.f32.xlu0 %v15133_v40  ;;  %5392 = vadd.xlane.f32.xlu1 %v15134_v2  ;;  %v5115_v42 = vsel %vm3277_vm9, %v5112_v41, %v5114_v51 }
 0x9a3   :  { %v5249_v0 = vpop.xlane.xlu0 %5248  ;;  %v5365_v19 = vpop.xlane.xlu1 %5364  ;;  %v13075_v33 = vadd.f32 %v5115_v42, %v12897_v34 }
 0x9a4   :  { %v5303_v62 = vadd.f32 %v5249_v0, %v12912_v14  ;;  %v5447_v29 = vrot.slane %v5365_v19, 1  ;;  %v15146_v19 = vld [vmem:[#allocation16_spill] sm:$0xff] }
 0x9a5   :  { %15138 = vst [vmem:[#allocation108_spill] sm:$0xff] %v13075_v33 }
 0x9a6   :  { %v13069_v1 = vadd.f32 %v5447_v29, %v5303_v62  ;;  %5390 = vadd.xlane.f32.xlu0 %v15136_v35  ;;  %5416 = vadd.xlane.f32.xlu1 %v15137_v59  ;;  %v15147_v35 = vld [vmem:[#allocation33_spill] sm:$0xff] }
 0x9a7   :  { %v5363_v17 = vpop.xlane.xlu0 %5362  ;;  %v5369_v21 = vpop.xlane.xlu1 %5368  ;;  %v5773_v59 = vmul.f32 %v15102_v7, %v15147_v35 }
 0x9a8   :  { %v5446_v22 = vrot.slane %v5363_v17, 1  ;;  %v5450_v63 = vrot.slane %v5369_v21, 1  ;;  %v15148_v17 = vld [vmem:[#allocation15_spill] sm:$0xff] }
 0x9a9   :  { %v5788_v21 = vmul.f32 %v15102_v7, %v15148_v17  ;;  %v15155_v17 = vld [vmem:[#allocation438_spill] sm:$0xff] }
 0x9aa   :  { %v5448_v14 = vsel %vm2791_vm7, %v5446_v22, %v5447_v29  ;;  %5414 = vadd.xlane.f32.xlu0 %v15139_v30  ;;  %5598 = vadd.xlane.f32.xlu1 %v15140_v32 }
 0x9ab   :  { %v13080_v12 = vadd.f32 %v5448_v14, %v5302_v26  ;;  %v5367_v28 = vpop.xlane.xlu0 %5366  ;;  %v5371_v36 = vpop.xlane.xlu1 %5370  ;;  %v15143_v26 = vld [vmem:[#allocation25_spill] sm:$0xff] }
 0x9ac   :  { %v5449_v37 = vrot.slane %v5367_v28, 1  ;;  %v5772_v39 = vmul.f32 %v15102_v7, %v15143_v26  ;;  %v5452_v40 = vrot.slane %v5371_v36, 1  ;;  %v15149_v28 = vld [vmem:[#allocation17_spill] sm:$0xff] }
 0x9ad   :  { %v5787_v36 = vmul.f32 %v15102_v7, %v15149_v28 }
 0x9ae   :  { %v5451_v46 = vsel %vm2791_vm7, %v5449_v37, %v5450_v63  ;;  %5596 = vadd.xlane.f32.xlu0 %v15141_v52  ;;  %5622 = vadd.xlane.f32.xlu1 %v15142_v38 }
 0x9af   :  { %v13085_v34 = vadd.f32 %v5451_v46, %v5304_v54  ;;  %v5253_v13 = vpop.xlane.xlu0 %5252  ;;  %v5255_v10 = vpop.xlane.xlu1 %5254  ;;  %v15145_v54 = vld [vmem:[#allocation29_spill] sm:$0xff] }
 0x9b0   :  { %v5305_v60 = vadd.f32 %v5253_v13, %v12927_v18  ;;  %v5306_v43 = vadd.f32 %v5255_v10, %v12934_v47  ;;  %v5771_v0 = vmul.f32 %v15102_v7, %v15145_v54  ;;  %v5786_v18 = vmul.f32 %v15102_v7, %v15146_v19  ;;  %v15151_v10 = vld [vmem:[#allocation31_spill] sm:$0xff]  ;;  %v15154_v54 = vld [vmem:[#allocation437_spill] sm:$0xff] }
 0x9b2   :  { %v13091_v15 = vadd.f32 %v5450_v63, %v5305_v60  ;;  %5620 = vadd.xlane.f32.xlu0 %v15144_v6  ;;  %5824 = vadd.xlane.f32.xlu1 %v5772_v39  ;;  %v15150_v63 = vld [vmem:[#allocation37_spill] sm:$0xff]  ;;  %v5789_v60 = vmul.f32 %v15102_v7, %v15151_v10 }
 0x9b3   :  { %v5373_v23 = vpop.xlane.xlu0 %5372  ;;  %v5375_v41 = vpop.xlane.xlu1 %5374 }
 0x9b4   :  { %v5453_v2 = vrot.slane %v5373_v23, 1  ;;  %v5455_v30 = vrot.slane %v5375_v41, 1 }
 0x9b6   :  { %v5454_v47 = vsel %vm2791_vm7, %v5452_v40, %v5453_v2  ;;  %5822 = vadd.xlane.f32.xlu0 %v5771_v0  ;;  %5852 = vadd.xlane.f32.xlu1 %v5786_v18  ;;  %v15153_v40 = vld [vmem:[#allocation22_spill] sm:$0xff] }
 0x9b7   :  { %v13099_v51 = vadd.f32 %v5454_v47, %v5306_v43  ;;  %v5257_v62 = vpop.xlane.xlu0 %5256  ;;  %v5395_v29 = vpop.xlane.xlu1 %5394  ;;  %v15152_v43 = vld [vmem:[#allocation436_spill] sm:$0xff] }
 0x9b8   :  { %v5307_v20 = vadd.f32 %v5257_v62, %v12937_v57  ;;  %v5790_v57 = vmul.f32 %v15102_v7, %v15150_v63  ;;  %v5470_v38 = vrot.slane %v5395_v29, 1 }
 0x9ba   :  { %v13106_v22 = vadd.f32 %v5453_v2, %v5307_v20  ;;  %5826 = vadd.xlane.f32.xlu0 %v5773_v59  ;;  %5856 = vadd.xlane.f32.xlu1 %v5788_v21  ;;  %v5791_v2 = vmul.f32 %v15102_v7, %v15153_v40  ;;  %v15156_v21 = vld [vmem:[#allocation439_spill] sm:$0xff]  ;;  %v15161_v40 = vld [vmem:[#allocation44_spill] sm:$0xff] }
 0x9bb   :  { %v5377_v42 = vpop.xlane.xlu0 %5376  ;;  %v5399_v14 = vpop.xlane.xlu1 %5398 }
 0x9bc   :  { %v5456_v32 = vrot.slane %v5377_v42, 1  ;;  %v5473_v23 = vrot.slane %v5399_v14, 1 }
 0x9be   :  { %5854 = vadd.xlane.f32.xlu0 %v5787_v36  ;;  %5860 = vadd.xlane.f32.xlu1 %v5790_v57  ;;  %v5457_v37 = vsel %vm2791_vm7, %v5455_v30, %v5456_v32 }
 0x9bf   :  { %v5397_v46 = vpop.xlane.xlu0 %5396  ;;  %v5577_v52 = vpop.xlane.xlu1 %5576 }
 0x9c0   :  { %v5471_v13 = vrot.slane %v5397_v46, 1  ;;  %v5660_v47 = vrot.slane %v5577_v52, 2  ;;  %v15158_v46 = vld [vmem:[#allocation98_spill] sm:$0xff] }
 0x9c2   :  { %5858 = vadd.xlane.f32.xlu0 %v5789_v60  ;;  %5274 = vadd.xlane.f32.xlu1 %v15152_v43  ;;  %v5472_v26 = vsel %vm2791_vm7, %v5470_v38, %v5471_v13  ;;  %v15159_v60 = vld [vmem:[#allocation40_spill] sm:$0xff] }
 0x9c3   :  { %v5401_v39 = vpop.xlane.xlu0 %5400  ;;  %v5581_v6 = vpop.xlane.xlu1 %5580  ;;  %v5774_v43 = vmul.f32 %v15102_v7, %v15159_v60  ;;  %v15172_v60 = vld [vmem:[#allocation447_spill] sm:$0xff] }
 0x9c4   :  { %v5474_v41 = vrot.slane %v5401_v39, 1  ;;  %v5663_v28 = vrot.slane %v5581_v6, 2  ;;  %v15160_v39 = vld [vmem:[#allocation440_spill] sm:$0xff] }
 0x9c6   :  { %5862 = vadd.xlane.f32.xlu0 %v5791_v2  ;;  %5298 = vadd.xlane.f32.xlu1 %v15154_v54  ;;  %v5475_v0 = vsel %vm2791_vm7, %v5473_v23, %v5474_v41 }
 0x9c7   :  { %v5579_v19 = vpop.xlane.xlu0 %5578  ;;  %v5259_v18 = vpop.xlane.xlu1 %5258 }
 0x9c8   :  { %v5661_v62 = vrot.slane %v5579_v19, 2  ;;  %v5308_v29 = vadd.f32 %v5259_v18, %v12943_v56  ;;  %v15163_v19 = vld [vmem:[#allocation42_spill] sm:$0xff] }
 0x9c9   :  { %v5775_v18 = vmul.f32 %v15102_v7, %v15163_v19 }
 0x9ca   :  { %v5662_v20 = vsel %vm3006_vm8, %v5660_v47, %v5661_v62  ;;  %v13124_v35 = vadd.f32 %v5661_v62, %v13069_v1  ;;  %v13126_v59 = vadd.f32 %v5457_v37, %v5308_v29  ;;  %5276 = vadd.xlane.f32.xlu0 %v15155_v17  ;;  %5600 = vadd.xlane.f32.xlu1 %v15156_v21  ;;  %v15157_v37 = vld [vmem:[#allocation97_spill] sm:$0xff]  ;;  %v15164_v47 = vld [vmem:[#allocation8_spill] sm:$0xff] }
 0x9cb   :  { %v13131_v42 = vadd.f32 %v5662_v20, %v13080_v12  ;;  %v5583_v14 = vpop.xlane.xlu0 %5582  ;;  %v5279_v30 = vpop.xlane.xlu1 %5278  ;;  %v5793_v62 = vmul.f32 %v15102_v7, %v15164_v47  ;;  %v15165_v20 = vld [vmem:[#allocation7_spill] sm:$0xff]  ;;  %v15166_v21 = vld [vmem:[#allocation444_spill] sm:$0xff] }
 0x9cc   :  { %v5664_v36 = vrot.slane %v5583_v14, 2  ;;  %v5318_v56 = vadd.f32 %v5279_v30, %v13002_v27  ;;  %v5792_v17 = vmul.f32 %v15102_v7, %v15165_v20  ;;  %v15167_v30 = vld [vmem:[#allocation35_spill] sm:$0xff] }
 0x9ce   :  { %v5665_v63 = vsel %vm3006_vm8, %v5663_v28, %v5664_v36  ;;  %v13136_v1 = vadd.f32 %v5664_v36, %v13091_v15  ;;  %v13138_v57 = vadd.f32 %v5472_v26, %v5318_v56  ;;  %5300 = vadd.xlane.f32.xlu0 %v15157_v37  ;;  %5624 = vadd.xlane.f32.xlu1 %v15158_v46  ;;  %v15168_v28 = vld [vmem:[#allocation445_spill] sm:$0xff]  ;;  %v15170_v46 = vld [vmem:[#allocation446_spill] sm:$0xff] }
 0x9cf   :  { %v13143_v12 = vadd.f32 %v5665_v63, %v13085_v34  ;;  %v5261_v52 = vpop.xlane.xlu0 %5260  ;;  %v5283_v38 = vpop.xlane.xlu1 %5282  ;;  %v15169_v63 = vld [vmem:[#allocation46_spill] sm:$0xff] }
 0x9d0   :  { %v5309_v10 = vadd.f32 %v5261_v52, %v12949_v11  ;;  %v5320_v27 = vadd.f32 %v5283_v38, %v13015_v5  ;;  %v5776_v11 = vmul.f32 %v15102_v7, %v15161_v40  ;;  %v15162_v5 = vld [vmem:[#allocation443_spill] sm:$0xff]  ;;  %v5777_v37 = vmul.f32 %v15102_v7, %v15169_v63  ;;  %v15174_v40 = vld [vmem:[#allocation28_spill] sm:$0xff] }
 0x9d2   :  { %v13149_v15 = vadd.f32 %v5456_v32, %v5309_v10  ;;  %v13151_v26 = vadd.f32 %v5475_v0, %v5320_v27  ;;  %5602 = vadd.xlane.f32.xlu0 %v15160_v39  ;;  %5828 = vadd.xlane.f32.xlu1 %v5774_v43  ;;  %v15171_v10 = vld [vmem:[#allocation26_spill] sm:$0xff] }
 0x9d3   :  { %v5281_v6 = vpop.xlane.xlu0 %5280  ;;  %v13154_v23 = vpop.xlane.xlu1 %5378  ;;  %v5779_v27 = vmul.f32 %v15102_v7, %v15171_v10  ;;  %v15180_v10 = vld [vmem:[#allocation39_spill] sm:$0xff] }
 0x9d4   :  { %v5319_v34 = vadd.f32 %v5281_v6, %v13005_v55  ;;  %v15173_v6 = vld [vmem:[#allocation48_spill] sm:$0xff] }
 0x9d6   :  { %v13159_v2 = vadd.f32 %v5471_v13, %v5319_v34  ;;  %5626 = vadd.xlane.f32.xlu0 %v15162_v5  ;;  %5832 = vadd.xlane.f32.xlu1 %v5776_v11  ;;  %v5778_v34 = vmul.f32 %v15102_v7, %v15173_v6  ;;  %v5796_v11 = vmul.f32 %v15102_v7, %v15174_v40 }
 0x9d7   :  { %v5285_v32 = vpop.xlane.xlu0 %5284  ;;  %v13162_v54 = vpop.xlane.xlu1 %5402 }
 0x9d8   :  { %v5321_v0 = vadd.f32 %v5285_v32, %v13021_v48 }
 0x9da   :  { %v13169_v55 = vadd.f32 %v5474_v41, %v5321_v0  ;;  %5830 = vadd.xlane.f32.xlu0 %v5775_v18  ;;  %5866 = vadd.xlane.f32.xlu1 %v5793_v62  ;;  %v5794_v41 = vmul.f32 %v15102_v7, %v15167_v30  ;;  %v15175_v0 = vld [vmem:[#allocation18_spill] sm:$0xff]  ;;  %v15176_v18 = vld [vmem:[#allocation27_spill] sm:$0xff]  ;;  %v15178_v30 = vld [vmem:[#allocation13_spill] sm:$0xff] }
 0x9db   :  { %v13171_v13 = vpop.xlane.xlu0 %5380  ;;  %v13173_v29 = vpop.xlane.xlu1 %5584  ;;  %v5795_v19 = vmul.f32 %v15102_v7, %v15175_v0  ;;  %v5780_v47 = vmul.f32 %v15102_v7, %v15176_v18 }
 0x9de   :  { %5864 = vadd.xlane.f32.xlu0 %v5792_v17  ;;  %5604 = vadd.xlane.f32.xlu1 %v15166_v21  ;;  %v15177_v17 = vld [vmem:[#allocation24_spill] sm:$0xff] }
 0x9df   :  { %v13178_v48 = vpop.xlane.xlu0 %5404  ;;  %v13180_v14 = vpop.xlane.xlu1 %5262  ;;  %v5797_v21 = vmul.f32 %v15102_v7, %v15177_v17 }
 0x9e2   :  { %5868 = vadd.xlane.f32.xlu0 %v5794_v41  ;;  %5628 = vadd.xlane.f32.xlu1 %v15168_v28  ;;  %v5782_v41 = vmul.f32 %v15102_v7, %v15178_v30 }
 0x9e3   :  { %v13185_v36 = vpop.xlane.xlu0 %5586  ;;  %v13187_v56 = vpop.xlane.xlu1 %5286 }
 0x9e6   :  { %5606 = vadd.xlane.f32.xlu0 %v15170_v46  ;;  %5834 = vadd.xlane.f32.xlu1 %v5777_v37  ;;  %v15179_v37 = vld [vmem:[#allocation12_spill] sm:$0xff] }
 0x9e7   :  { %v13192_v52 = vpop.xlane.xlu0 %5264  ;;  %v13194_v38 = vpop.xlane.xlu1 %5382  ;;  %v5781_v46 = vmul.f32 %v15102_v7, %v15179_v37 }
 0x9ea   :  { %5630 = vadd.xlane.f32.xlu0 %v15172_v60  ;;  %5838 = vadd.xlane.f32.xlu1 %v5779_v27  ;;  %v5799_v27 = vmul.f32 %v15102_v7, %v15180_v10 }
 0x9eb   :  { %v13199_v43 = vpop.xlane.xlu0 %5288  ;;  %v13201_v39 = vpop.xlane.xlu1 %5406 }
 0x9ee   :  { %5836 = vadd.xlane.f32.xlu0 %v5778_v34  ;;  %5872 = vadd.xlane.f32.xlu1 %v5796_v11  ;;  %v15181_v34 = vld [vmem:[#allocation32_spill] sm:$0xff] }
 0x9ef   :  { %v13207_v5 = vpop.xlane.xlu0 %5384  ;;  %v13209_v32 = vpop.xlane.xlu1 %5588  ;;  %v5798_v40 = vmul.f32 %v15102_v7, %v15181_v34  ;;  %v15182_v11 = vld [vmem:[#allocation20_spill] sm:$0xff] }
 0x9f0   :  { %v5783_v0 = vmul.f32 %v15102_v7, %v15182_v11 }
 0x9f2   :  { %5870 = vadd.xlane.f32.xlu0 %v5795_v19  ;;  %5840 = vadd.xlane.f32.xlu1 %v5780_v47  ;;  %v15183_v47 = vld [vmem:[#allocation41_spill] sm:$0xff] }
 0x9f3   :  { %v13215_v62 = vpop.xlane.xlu0 %5408  ;;  %v13217_v20 = vpop.xlane.xlu1 %5608  ;;  %v5800_v17 = vmul.f32 %v15102_v7, %v15183_v47 }
 0x9f6   :  { %5874 = vadd.xlane.f32.xlu0 %v5797_v21  ;;  %5844 = vadd.xlane.f32.xlu1 %v5782_v41  ;;  %v15184_v21 = vld [vmem:[#allocation9_spill] sm:$0xff] }
 0x9f7   :  { %v13223_v28 = vpop.xlane.xlu0 %5590  ;;  %v13225_v63 = vpop.xlane.xlu1 %5612  ;;  %v5785_v30 = vmul.f32 %v15102_v7, %v15184_v21 }
 0x9fa   :  { %5842 = vadd.xlane.f32.xlu0 %v5781_v46  ;;  %5878 = vadd.xlane.f32.xlu1 %v5799_v27  ;;  %v15185_v46 = vld [vmem:[#allocation21_spill] sm:$0xff] }
 0x9fb   :  { %v13231_v60 = vpop.xlane.xlu0 %5610  ;;  %v5805_v6 = vpop.xlane.xlu1 %5804  ;;  %v5784_v10 = vmul.f32 %v15102_v7, %v15185_v46  ;;  %v15186_v27 = vld [vmem:[#allocation45_spill] sm:$0xff] }
 0x9fc   :  { %v5802_v34 = vmul.f32 %v15102_v7, %v15186_v27  ;;  %v5930_v8 = vrot.slane %v5805_v6, 3 }
 0x9fe   :  { %5876 = vadd.xlane.f32.xlu0 %v5798_v40  ;;  %5846 = vadd.xlane.f32.xlu1 %v5783_v0  ;;  %v15187_v0 = vld [vmem:[#allocation43_spill] sm:$0xff] }
 0x9ff   :  { %v13237_v19 = vpop.xlane.xlu0 %5614  ;;  %v5809_v18 = vpop.xlane.xlu1 %5808  ;;  %v5801_v47 = vmul.f32 %v15102_v7, %v15187_v0 }
 0xa02   :  { %5880 = vadd.xlane.f32.xlu0 %v5800_v17  ;;  %5850 = vadd.xlane.f32.xlu1 %v5785_v30  ;;  %v15188_v30 = vld [vmem:[#allocation47_spill] sm:$0xff] }
 0xa03   :  { %v5807_v41 = vpop.xlane.xlu0 %5806  ;;  %v5813_v37 = vpop.xlane.xlu1 %5812  ;;  %v5803_v33 = vmul.f32 %v15102_v7, %v15188_v30 }
 0xa04   :  { %v5936_v25 = vrot.slane %v5813_v37, 3  ;;  %v5931_v9 = vrot.slane %v5807_v41, 3  ;;  %v15191_v41 = vld [vmem:[#allocation260_spill] sm:$0xff] }
 0xa06   :  { %5848 = vadd.xlane.f32.xlu0 %v5784_v10  ;;  %5884 = vadd.xlane.f32.xlu1 %v5802_v34 }
 0xa07   :  { %v5811_v40 = vpop.xlane.xlu0 %5810  ;;  %v13247_v11 = vpop.xlane.xlu1 %5266 }
 0xa08   :  { %v5935_v3 = vrot.slane %v5811_v40, 3  ;;  %v15193_v40 = vld [vmem:[#allocation240_spill] sm:$0xff] }
 0xa0a   :  { %5882 = vadd.xlane.f32.xlu0 %v5801_v47  ;;  %v5932_v47 = vsel %vm3277_vm9, %v5930_v8, %v5931_v9 }
 0xa0b   :  { %v5815_v21 = vpop.xlane.xlu0 %5814  ;;  %v13251_v17 = vpop.xlane.xlu1 %5290  ;;  %v6028_v7 = vadd.f32 %v5932_v47, %v13131_v42 }
 0xa0c   :  { %v5938_v46 = vrot.slane %v5815_v21, 3 }
 0xa0d   :  { %v13278_v30 = vadd.f32 %v15193_v40, %v6028_v7  ;;  %v15198_v7 = vld [vmem:[#allocation239_spill] sm:$0xff] }
 0xa0e   :  { %v5939_v27 = vsel %vm3277_vm9, %v5936_v25, %v5938_v46  ;;  %5886 = vadd.xlane.f32.xlu0 %v5803_v33  ;;  %v5937_v33 = vsel %vm3277_vm9, %v5935_v3, %v5936_v25  ;;  %v15196_v3 = vld [vmem:[#allocation261_spill] sm:$0xff] }
 0xa0f   :  { %v13256_v10 = vpop.xlane.xlu0 %5268  ;;  %v13258_v34 = vpop.xlane.xlu1 %5386  ;;  %v6031_v0 = vadd.f32 %v5939_v27, %v13136_v1  ;;  %v5933_v1 = vrot.slane %v5809_v18, 3  ;;  %v6030_v8 = vadd.f32 %v5937_v33, %v13143_v12  ;;  %15194 = vst [vmem:[#allocation112_spill] sm:$0xff] %v13278_v30  ;;  %v5667_v18 = vrot.slane %v13185_v36, 2 }
 0xa10   :  { %15189 = vst [vmem:[#allocation109_spill] sm:$0xff] %v13258_v34  ;;  %v15210_v34 = vld [vmem:[#allocation303_spill] sm:$0xff] }
 0xa11   :  { %v13268_v37 = vadd.f32 %v15191_v41, %v6031_v0  ;;  %v5934_v46 = vsel %vm3277_vm9, %v5931_v9, %v5933_v1  ;;  %v13287_v25 = vadd.f32 %v15196_v3, %v6030_v8  ;;  %v5666_v1 = vrot.slane %v13173_v29, 2 }
 0xa12   :  { %v6029_v0 = vadd.f32 %v5934_v46, %v13124_v35 }
 0xa13   :  { %v13262_v4 = vpop.xlane.xlu0 %5292  ;;  %v13264_v53 = vpop.xlane.xlu1 %5410  ;;  %15192 = vst [vmem:[#allocation111_spill] sm:$0xff] %v13268_v37  ;;  %15197 = vst [vmem:[#allocation114_spill] sm:$0xff] %v13287_v25  ;;  %v5668_v8 = vsel %vm3006_vm8, %v5666_v1, %v5667_v18  ;;  %v15201_v1 = vld [vmem:[#allocation284_spill] sm:$0xff] }
 0xa14   :  { %15190 = vst [vmem:[#allocation110_spill] sm:$0xff] %v13264_v53  ;;  %v13295_v9 = vadd.f32 %v15198_v7, %v6029_v0  ;;  %v5734_v36 = vadd.f32 %v5668_v8, %v13099_v51  ;;  %v5735_v0 = vadd.f32 %v5667_v18, %v13106_v22 }
 0xa16   :  { %15199 = vst [vmem:[#allocation60_spill] sm:$0xff] %v13295_v9 }
 0xa17   :  { %v13271_v21 = vpop.xlane.xlu0 %5388  ;;  %6269 = vperm.xlu1 %7404, %v13268_v37   ;;  %v13274_v6 = vpop.xlane.xlu1 %5592 }
 0xa1b   :  { %v13281_v42 = vpop.xlane.xlu0 %5412  ;;  %6260 = vperm.xlu1 %7404, %v13278_v30   ;;  %v13284_v27 = vpop.xlane.xlu1 %5616 }
 0xa1c   :  { %15195 = vst [vmem:[#allocation113_spill] sm:$0xff] %v13281_v42 }
 0xa1f   :  { %v13290_v47 = vpop.xlane.xlu0 %5594  ;;  %6266 = vperm.xlu1 %7404, %v13287_v25   ;;  %v5817_v12 = vpop.xlane.xlu1 %5816 }
 0xa20   :  { %v5940_v46 = vrot.slane %v5817_v12, 3  ;;  %v15203_v12 = vld [vmem:[#allocation283_spill] sm:$0xff] }
 0xa23   :  { %v13297_v41 = vpop.xlane.xlu0 %5618  ;;  %v5821_v33 = vpop.xlane.xlu1 %5820 }
 0xa24   :  { %6263 = vperm.xlu0 %7405, %v13295_v9   ;;  %v5943_v3 = vrot.slane %v5821_v33, 3 }
 0xa27   :  { %v5819_v35 = vpop.xlane.xlu0 %5818  ;;  %v13302_v40 = vpop.xlane.xlu1 %5272 }
 0xa28   :  { %v5941_v37 = vrot.slane %v5819_v35, 3 }
 0xa2a   :  { %v5942_v7 = vsel %vm3277_vm9, %v5940_v46, %v5941_v37  ;;  %v5944_v25 = vsel %vm3277_vm9, %v5941_v37, %v5943_v3  ;;  %v5670_v46 = vrot.slane %v13223_v28, 2 }
 0xa2b   :  { %v6032_v30 = vadd.f32 %v5942_v7, %v5734_v36  ;;  %v6033_v29 = vadd.f32 %v5944_v25, %v5735_v0  ;;  %v13308_v42 = vpop.xlane.xlu0 %5270  ;;  %v13310_v9 = vpop.xlane.xlu1 %5296  ;;  %v5669_v0 = vrot.slane %v13209_v32, 2 }
 0xa2c   :  { %15200 = vst [vmem:[#allocation115_spill] sm:$0xff] %v13310_v9  ;;  %v5684_v9 = vrot.slane %v13217_v20, 2  ;;  %v5737_v32 = vadd.f32 %v5670_v46, %v13149_v15 }
 0xa2d   :  { %v13313_v53 = vadd.f32 %v15201_v1, %v6032_v30  ;;  %v13316_v33 = vadd.f32 %v15203_v12, %v6033_v29  ;;  %v5671_v7 = vsel %vm3006_vm8, %v5669_v0, %v5670_v46 }
 0xa2f   :  { %15202 = vst [vmem:[#allocation116_spill] sm:$0xff] %v13313_v53  ;;  %15204 = vst [vmem:[#allocation117_spill] sm:$0xff] %v13316_v33  ;;  %v13318_v35 = vpop.xlane.xlu0 %5294  ;;  %6272 = vperm.xlu1 %7404, %v13313_v53   ;;  %6275 = vperm.xlu0 %7405, %v13316_v33   ;;  %v13322_v51 = vpop.xlane.xlu1 %5392  ;;  %v5736_v53 = vadd.f32 %v5671_v7, %v13126_v59 }
 0xa30   :  { %15205 = vst [vmem:[#allocation118_spill] sm:$0xff] %v13318_v35  ;;  %15206 = vst [vmem:[#allocation119_spill] sm:$0xff] %v13322_v51 }
 0xa33   :  { %v13324_v22 = vpop.xlane.xlu0 %5390  ;;  %v13326_v37 = vpop.xlane.xlu1 %5416 }
 0xa34   :  { %15207 = vst [vmem:[#allocation120_spill] sm:$0xff] %v13324_v22  ;;  %15208 = vst [vmem:[#allocation121_spill] sm:$0xff] %v13326_v37 }
 0xa37   :  { %v13328_v25 = vpop.xlane.xlu0 %5414  ;;  %v13330_v18 = vpop.xlane.xlu1 %5598 }
 0xa38   :  { %15209 = vst [vmem:[#allocation122_spill] sm:$0xff] %v13328_v25  ;;  %v5685_v25 = vrot.slane %v13231_v60, 2 }
 0xa3b   :  { %v13332_v30 = vpop.xlane.xlu0 %5596  ;;  %v13334_v8 = vpop.xlane.xlu1 %5622 }
 0xa3f   :  { %v13337_v3 = vpop.xlane.xlu0 %5620  ;;  %v5825_v36 = vpop.xlane.xlu1 %5824 }
 0xa40   :  { %v5946_v12 = vrot.slane %v5825_v36, 3  ;;  %v5686_v36 = vsel %vm3006_vm8, %v5684_v9, %v5685_v25 }
 0xa41   :  { %v5746_v15 = vadd.f32 %v5686_v36, %v13138_v57  ;;  %v15213_v36 = vld [vmem:[#allocation323_spill] sm:$0xff] }
 0xa43   :  { %v5823_v29 = vpop.xlane.xlu0 %5822  ;;  %v5853_v1 = vpop.xlane.xlu1 %5852 }
 0xa44   :  { %v5945_v33 = vrot.slane %v5823_v29, 3  ;;  %v5688_v29 = vrot.slane %v13237_v19, 2  ;;  %v5970_v20 = vrot.slane %v5853_v1, 3 }
 0xa46   :  { %v5947_v37 = vsel %vm3277_vm9, %v5945_v33, %v5946_v12  ;;  %v5687_v33 = vrot.slane %v13225_v63, 2 }
 0xa47   :  { %v6034_v51 = vadd.f32 %v5947_v37, %v5736_v53  ;;  %v5827_v22 = vpop.xlane.xlu0 %5826  ;;  %v5857_v28 = vpop.xlane.xlu1 %5856 }
 0xa48   :  { %v5948_v35 = vrot.slane %v5827_v22, 3  ;;  %v5973_v22 = vrot.slane %v5857_v28, 3  ;;  %v5689_v19 = vsel %vm3006_vm8, %v5687_v33, %v5688_v29 }
 0xa49   :  { %v13347_v0 = vadd.f32 %v15210_v34, %v6034_v51  ;;  %v5747_v34 = vadd.f32 %v5685_v25, %v13159_v2  ;;  %v15211_v51 = vld [vmem:[#allocation302_spill] sm:$0xff]  ;;  %v5748_v2 = vadd.f32 %v5689_v19, %v13151_v26  ;;  %v15212_v25 = vld [vmem:[#allocation324_spill] sm:$0xff]  ;;  %v15214_v26 = vld [vmem:[#allocation339_spill] sm:$0xff] }
 0xa4a   :  { %v5949_v59 = vsel %vm3277_vm9, %v5946_v12, %v5948_v35 }
 0xa4b   :  { %v6035_v60 = vadd.f32 %v5949_v59, %v5737_v32  ;;  %v5855_v7 = vpop.xlane.xlu0 %5854  ;;  %6278 = vperm.xlu1 %7404, %v13347_v0   ;;  %v5861_v53 = vpop.xlane.xlu1 %5860 }
 0xa4c   :  { %v5971_v37 = vrot.slane %v5855_v7, 3  ;;  %v5976_v1 = vrot.slane %v5861_v53, 3 }
 0xa4d   :  { %v13357_v9 = vadd.f32 %v15211_v51, %v6035_v60 }
 0xa4e   :  { %v5972_v35 = vsel %vm3277_vm9, %v5970_v20, %v5971_v37  ;;  %v5974_v46 = vsel %vm3277_vm9, %v5971_v37, %v5973_v22  ;;  %v5749_v37 = vadd.f32 %v5688_v29, %v13169_v55 }
 0xa4f   :  { %v6044_v12 = vadd.f32 %v5972_v35, %v5746_v15  ;;  %v6045_v32 = vadd.f32 %v5974_v46, %v5747_v34  ;;  %v5859_v59 = vpop.xlane.xlu0 %5858  ;;  %6281 = vperm.xlu0 %7405, %v13357_v9   ;;  %v13363_v63 = vpop.xlane.xlu1 %5274  ;;  %v15215_v46 = vld [vmem:[#allocation83_spill] sm:$0xff] }
 0xa50   :  { %v5975_v57 = vrot.slane %v5859_v59, 3 }
 0xa51   :  { %v13367_v28 = vadd.f32 %v15212_v25, %v6044_v12  ;;  %v13370_v60 = vadd.f32 %v15213_v36, %v6045_v32  ;;  %v5311_v25 = vadd.f32 %v13192_v52, %v12959_v31  ;;  %v5322_v31 = vadd.f32 %v13187_v56, %v13028_v44 }
 0xa52   :  { %v5977_v7 = vsel %vm3277_vm9, %v5975_v57, %v5976_v1  ;;  %v5673_v57 = vrot.slane %v13290_v47, 2  ;;  %v5691_v47 = vrot.slane %v13297_v41, 2  ;;  %v5323_v44 = vadd.f32 %v13199_v43, %v13031_v24 }
 0xa53   :  { %v6046_v33 = vadd.f32 %v5977_v7, %v5748_v2  ;;  %v5863_v20 = vpop.xlane.xlu0 %5862  ;;  %6308 = vperm.xlu1 %7404, %v13367_v28   ;;  %6311 = vperm.xlu0 %7405, %v13370_v60   ;;  %v13375_v22 = vpop.xlane.xlu1 %5298  ;;  %v5310_v2 = vadd.f32 %v13180_v14, %v12956_v61  ;;  %v5476_v61 = vrot.slane %v13162_v54, 1 }
 0xa54   :  { %v5978_v53 = vrot.slane %v5863_v20, 3  ;;  %v5672_v20 = vrot.slane %v13274_v6, 2 }
 0xa55   :  { %v13379_v15 = vadd.f32 %v15214_v26, %v6046_v33  ;;  %v5458_v33 = vrot.slane %v13154_v23, 1  ;;  %v5690_v23 = vrot.slane %v13284_v27, 2 }
 0xa56   :  { %v5979_v34 = vsel %vm3277_vm9, %v5976_v1, %v5978_v53  ;;  %v5459_v1 = vrot.slane %v13171_v13, 1  ;;  %v5477_v53 = vrot.slane %v13178_v48, 1  ;;  %v5674_v13 = vsel %vm3006_vm8, %v5672_v20, %v5673_v57 }
 0xa57   :  { %v6047_v51 = vadd.f32 %v5979_v34, %v5749_v37  ;;  %v13382_v19 = vpop.xlane.xlu0 %5276  ;;  %6314 = vperm.xlu1 %7404, %v13379_v15   ;;  %v13385_v35 = vpop.xlane.xlu1 %5600  ;;  %v5692_v41 = vsel %vm3006_vm8, %v5690_v23, %v5691_v47 }
 0xa58   :  { %v5460_v37 = vsel %vm2791_vm7, %v5458_v33, %v5459_v1  ;;  %v5525_v52 = vadd.f32 %v5459_v1, %v5311_v25  ;;  %v5478_v20 = vsel %vm2791_vm7, %v5476_v61, %v5477_v53 }
 0xa59   :  { %v13388_v12 = vadd.f32 %v15215_v46, %v6047_v51  ;;  %v5524_v14 = vadd.f32 %v5460_v37, %v5310_v2  ;;  %v5536_v37 = vadd.f32 %v5478_v20, %v5322_v31  ;;  %v5537_v31 = vadd.f32 %v5477_v53, %v5323_v44 }
 0xa5a   :  { %v5739_v33 = vadd.f32 %v5673_v57, %v5525_v52  ;;  %v5313_v44 = vadd.f32 %v13256_v10, %v12979_v58  ;;  %v5324_v10 = vadd.f32 %v13251_v17, %v13038_v49 }
 0xa5b   :  { %v13390_v32 = vpop.xlane.xlu0 %5300  ;;  %6317 = vperm.xlu0 %7405, %v13388_v12   ;;  %v13393_v55 = vpop.xlane.xlu1 %5624  ;;  %v5738_v46 = vadd.f32 %v5674_v13, %v5524_v14  ;;  %v5750_v57 = vadd.f32 %v5692_v41, %v5536_v37  ;;  %v15216_v13 = vld [vmem:[#allocation355_spill] sm:$0xff]  ;;  %v15217_v14 = vld [vmem:[#allocation354_spill] sm:$0xff]  ;;  %v15219_v41 = vld [vmem:[#allocation372_spill] sm:$0xff]  ;;  %v5675_v37 = vrot.slane %v13332_v30, 2 }
 0xa5f   :  { %v13395_v29 = vpop.xlane.xlu0 %5602  ;;  %v5829_v59 = vpop.xlane.xlu1 %5828 }
 0xa60   :  { %v5950_v6 = vrot.slane %v5829_v59, 3 }
 0xa63   :  { %v13403_v36 = vpop.xlane.xlu0 %5626  ;;  %v5833_v7 = vpop.xlane.xlu1 %5832 }
 0xa64   :  { %v5953_v51 = vrot.slane %v5833_v7, 3 }
 0xa67   :  { %v5831_v26 = vpop.xlane.xlu0 %5830  ;;  %v5867_v34 = vpop.xlane.xlu1 %5866 }
 0xa68   :  { %v5951_v48 = vrot.slane %v5831_v26, 3  ;;  %v5981_v25 = vrot.slane %v5867_v34, 3  ;;  %v5751_v34 = vadd.f32 %v5691_v47, %v5537_v31  ;;  %v5312_v47 = vadd.f32 %v13247_v11, %v12973_v45 }
 0xa69   :  { %v5693_v45 = vrot.slane %v13337_v3, 2  ;;  %v5479_v11 = vrot.slane %v13201_v39, 1  ;;  %v5325_v3 = vadd.f32 %v13262_v4, %v13045_v16  ;;  %v5465_v4 = vrot.slane %v13271_v21, 1 }
 0xa6a   :  { %v5952_v54 = vsel %vm3277_vm9, %v5950_v6, %v5951_v48  ;;  %v5954_v2 = vsel %vm3277_vm9, %v5951_v48, %v5953_v51  ;;  %v15218_v51 = vld [vmem:[#allocation373_spill] sm:$0xff]  ;;  %v5678_v21 = vrot.slane %v13385_v35, 2  ;;  %v15227_v35 = vld [vmem:[#allocation106_spill] sm:$0xff] }
 0xa6b   :  { %v6036_v56 = vadd.f32 %v5952_v54, %v5738_v46  ;;  %v6037_v1 = vadd.f32 %v5954_v2, %v5739_v33  ;;  %v5865_v27 = vpop.xlane.xlu0 %5864  ;;  %v13421_v59 = vpop.xlane.xlu1 %5604  ;;  %v5462_v2 = vrot.slane %v13207_v5, 1 }
 0xa6c   :  { %v5980_v7 = vrot.slane %v5865_v27, 3  ;;  %v5461_v27 = vrot.slane %v13194_v38, 1  ;;  %v5694_v38 = vrot.slane %v13334_v8, 2 }
 0xa6d   :  { %v13424_v61 = vadd.f32 %v15216_v13, %v6036_v56  ;;  %v13427_v52 = vadd.f32 %v15217_v14, %v6037_v1 }
 0xa6e   :  { %v5982_v26 = vsel %vm3277_vm9, %v5980_v7, %v5981_v25  ;;  %v5480_v7 = vrot.slane %v13215_v62, 1  ;;  %v5463_v5 = vsel %vm2791_vm7, %v5461_v27, %v5462_v2  ;;  %v5695_v39 = vsel %vm3006_vm8, %v5693_v45, %v5694_v38 }
 0xa6f   :  { %v6048_v23 = vadd.f32 %v5982_v26, %v5750_v57  ;;  %v5869_v6 = vpop.xlane.xlu0 %5868  ;;  %6284 = vperm.xlu1 %7404, %v13424_v61   ;;  %6287 = vperm.xlu0 %7405, %v13427_v52   ;;  %v13432_v24 = vpop.xlane.xlu1 %5628  ;;  %v5526_v58 = vadd.f32 %v5463_v5, %v5312_v47  ;;  %v5527_v57 = vadd.f32 %v5462_v2, %v5313_v44  ;;  %v15220_v2 = vld [vmem:[#allocation395_spill] sm:$0xff]  ;;  %v15221_v47 = vld [vmem:[#allocation394_spill] sm:$0xff] }
 0xa70   :  { %v5983_v43 = vrot.slane %v5869_v6, 3  ;;  %v5481_v31 = vsel %vm2791_vm7, %v5479_v11, %v5480_v7  ;;  %v5539_v16 = vadd.f32 %v5480_v7, %v5325_v3  ;;  %v15222_v5 = vld [vmem:[#allocation102_spill] sm:$0xff]  ;;  %v15223_v7 = vld [vmem:[#allocation109_spill] sm:$0xff] }
 0xa71   :  { %v13435_v48 = vadd.f32 %v15218_v51, %v6048_v23  ;;  %v5538_v17 = vadd.f32 %v5481_v31, %v5324_v10  ;;  %v5464_v10 = vrot.slane %v15223_v7, 1  ;;  %v5697_v31 = vrot.slane %v13403_v36, 2 }
 0xa72   :  { %v5984_v46 = vsel %vm3277_vm9, %v5981_v25, %v5983_v43  ;;  %v5676_v25 = vrot.slane %v13330_v18, 2 }
 0xa73   :  { %v6049_v33 = vadd.f32 %v5984_v46, %v5751_v34  ;;  %v13438_v20 = vpop.xlane.xlu0 %5606  ;;  %6320 = vperm.xlu1 %7404, %v13435_v48   ;;  %v5835_v53 = vpop.xlane.xlu1 %5834 }
 0xa74   :  { %v5677_v30 = vsel %vm3006_vm8, %v5675_v37, %v5676_v25  ;;  %v5955_v18 = vrot.slane %v5835_v53, 3  ;;  %v5741_v23 = vadd.f32 %v5676_v25, %v5527_v57  ;;  %v5315_v25 = vadd.f32 %v13302_v40, %v12987_v50  ;;  %v15224_v57 = vld [vmem:[#allocation110_spill] sm:$0xff]  ;;  %v15226_v40 = vld [vmem:[#allocation93_spill] sm:$0xff] }
 0xa75   :  { %v13442_v54 = vadd.f32 %v15219_v41, %v6049_v33  ;;  %v5740_v6 = vadd.f32 %v5677_v30, %v5526_v58  ;;  %v5752_v41 = vadd.f32 %v5695_v39, %v5538_v17  ;;  %v5314_v30 = vadd.f32 %v13308_v42, %v15222_v5  ;;  %v15228_v39 = vld [vmem:[#allocation118_spill] sm:$0xff] }
 0xa76   :  { %v5753_v50 = vadd.f32 %v5694_v38, %v5539_v16  ;;  %v5466_v42 = vsel %vm2791_vm7, %v5464_v10, %v5465_v4  ;;  %v15230_v16 = vld [vmem:[#allocation105_spill] sm:$0xff]  ;;  %v15232_v10 = vld [vmem:[#allocation120_spill] sm:$0xff] }
 0xa77   :  { %v13450_v56 = vpop.xlane.xlu0 %5630  ;;  %6323 = vperm.xlu0 %7405, %v13442_v54   ;;  %v5839_v1 = vpop.xlane.xlu1 %5838  ;;  %v5528_v3 = vadd.f32 %v5466_v42, %v5314_v30  ;;  %v5682_v42 = vrot.slane %v13438_v20, 2 }
 0xa78   :  { %v5958_v26 = vrot.slane %v5839_v1, 3  ;;  %v5679_v1 = vrot.slane %v13395_v29, 2 }
 0xa7b   :  { %v5837_v13 = vpop.xlane.xlu0 %5836  ;;  %v5873_v14 = vpop.xlane.xlu1 %5872 }
 0xa7c   :  { %v5956_v62 = vrot.slane %v5837_v13, 3  ;;  %v5986_v33 = vrot.slane %v5873_v14, 3  ;;  %v5482_v13 = vrot.slane %v15224_v57, 1  ;;  %v15225_v14 = vld [vmem:[#allocation113_spill] sm:$0xff]  ;;  %v15233_v57 = vld [vmem:[#allocation430_spill] sm:$0xff] }
 0xa7e   :  { %v5957_v43 = vsel %vm3277_vm9, %v5955_v18, %v5956_v62  ;;  %v5959_v49 = vsel %vm3277_vm9, %v5956_v62, %v5958_v26  ;;  %v5483_v18 = vrot.slane %v15225_v14, 1  ;;  %v5680_v62 = vsel %vm3006_vm8, %v5678_v21, %v5679_v1  ;;  %v15234_v14 = vld [vmem:[#allocation429_spill] sm:$0xff] }
 0xa7f   :  { %v6038_v34 = vadd.f32 %v5957_v43, %v5740_v6  ;;  %v6039_v51 = vadd.f32 %v5959_v49, %v5741_v23  ;;  %v5871_v8 = vpop.xlane.xlu0 %5870  ;;  %v5841_v46 = vpop.xlane.xlu1 %5840  ;;  %v5529_v6 = vadd.f32 %v5465_v4, %v5315_v25  ;;  %v5326_v43 = vadd.f32 %v15228_v39, %v15227_v35  ;;  %v15231_v4 = vld [vmem:[#allocation115_spill] sm:$0xff]  ;;  %v15237_v39 = vld [vmem:[#allocation104_spill] sm:$0xff] }
 0xa80   :  { %v5985_v53 = vrot.slane %v5871_v8, 3  ;;  %v5742_v36 = vadd.f32 %v5680_v62, %v5528_v3  ;;  %v5467_v21 = vrot.slane %v15232_v10, 1  ;;  %v15236_v3 = vld [vmem:[#allocation103_spill] sm:$0xff] }
 0xa81   :  { %v13470_v37 = vadd.f32 %v15220_v2, %v6038_v34  ;;  %v13473_v44 = vadd.f32 %v15221_v47, %v6039_v51  ;;  %v5696_v34 = vrot.slane %v13393_v55, 2  ;;  %v5960_v51 = vrot.slane %v5841_v46, 3 }
 0xa82   :  { %v5987_v27 = vsel %vm3277_vm9, %v5985_v53, %v5986_v33  ;;  %v5743_v2 = vadd.f32 %v5679_v1, %v5529_v6  ;;  %v5316_v35 = vadd.f32 %v13363_v63, %v15236_v3 }
 0xa83   :  { %v6050_v45 = vadd.f32 %v5987_v27, %v5752_v41  ;;  %v5875_v11 = vpop.xlane.xlu0 %5874  ;;  %6290 = vperm.xlu1 %7404, %v13470_v37   ;;  %6293 = vperm.xlu0 %7405, %v13473_v44   ;;  %v5845_v58 = vpop.xlane.xlu1 %5844  ;;  %v5484_v41 = vsel %vm2791_vm7, %v5482_v13, %v5483_v18  ;;  %v5327_v27 = vadd.f32 %v15231_v4, %v15230_v16 }
 0xa84   :  { %v5988_v29 = vrot.slane %v5875_v11, 3  ;;  %v5963_v8 = vrot.slane %v5845_v58, 3  ;;  %v5698_v25 = vsel %vm3006_vm8, %v5696_v34, %v5697_v31  ;;  %v5540_v55 = vadd.f32 %v5484_v41, %v5326_v43  ;;  %v15238_v34 = vld [vmem:[#allocation121_spill] sm:$0xff]  ;;  %v15239_v41 = vld [vmem:[#allocation442_spill] sm:$0xff] }
 0xa85   :  { %v13489_v26 = vadd.f32 %v15226_v40, %v6050_v45  ;;  %v5541_v40 = vadd.f32 %v5483_v18, %v5327_v27  ;;  %v5317_v43 = vadd.f32 %v13382_v19, %v15237_v39  ;;  %v5681_v18 = vrot.slane %v13421_v59, 2  ;;  %v15241_v27 = vld [vmem:[#allocation107_spill] sm:$0xff] }
 0xa86   :  { %v5989_v23 = vsel %vm3277_vm9, %v5986_v33, %v5988_v29  ;;  %v15229_v33 = vld [vmem:[#allocation92_spill] sm:$0xff]  ;;  %v5754_v29 = vadd.f32 %v5698_v25, %v5540_v55  ;;  %v5328_v59 = vadd.f32 %v13375_v22, %v15241_v27 }
 0xa87   :  { %v6051_v49 = vadd.f32 %v5989_v23, %v5753_v50  ;;  %v5843_v17 = vpop.xlane.xlu0 %5842  ;;  %6326 = vperm.xlu1 %7404, %v13489_v26   ;;  %v5879_v38 = vpop.xlane.xlu1 %5878  ;;  %v15235_v23 = vld [vmem:[#allocation119_spill] sm:$0xff] }
 0xa88   :  { %v5961_v53 = vrot.slane %v5843_v17, 3  ;;  %v5991_v1 = vrot.slane %v5879_v38, 3  ;;  %v5468_v6 = vrot.slane %v15235_v23, 1 }
 0xa89   :  { %v13501_v47 = vadd.f32 %v15229_v33, %v6051_v49  ;;  %v5700_v33 = vrot.slane %v13450_v56, 2  ;;  %v15242_v56 = vld [vmem:[#allocation441_spill] sm:$0xff] }
 0xa8a   :  { %v5962_v5 = vsel %vm3277_vm9, %v5960_v51, %v5961_v53  ;;  %v5964_v30 = vsel %vm3277_vm9, %v5961_v53, %v5963_v8  ;;  %v5486_v51 = vrot.slane %v15238_v34, 1  ;;  %v5469_v8 = vsel %vm2791_vm7, %v5467_v21, %v5468_v6 }
 0xa8b   :  { %v6040_v46 = vadd.f32 %v5962_v5, %v5742_v36  ;;  %v6041_v45 = vadd.f32 %v5964_v30, %v5743_v2  ;;  %v5877_v11 = vpop.xlane.xlu0 %5876  ;;  %6329 = vperm.xlu0 %7405, %v13501_v47   ;;  %v5847_v58 = vpop.xlane.xlu1 %5846  ;;  %v5755_v53 = vadd.f32 %v5697_v31, %v5541_v40  ;;  %v15240_v36 = vld [vmem:[#allocation122_spill] sm:$0xff]  ;;  %v5683_v2 = vsel %vm3006_vm8, %v5681_v18, %v5682_v42  ;;  %v15243_v40 = vld [vmem:[#allocation108_spill] sm:$0xff] }
 0xa8c   :  { %v5990_v7 = vrot.slane %v5877_v11, 3  ;;  %v5485_v19 = vrot.slane %v15240_v36, 1  ;;  %v5530_v4 = vadd.f32 %v5469_v8, %v5316_v35  ;;  %v5531_v25 = vadd.f32 %v5468_v6, %v5317_v43  ;;  %v15244_v35 = vld [vmem:[#allocation448_spill] sm:$0xff]  ;;  %v15245_v43 = vld [vmem:[#allocation99_spill] sm:$0xff]  ;;  %v15246_v8 = vld [vmem:[#allocation101_spill] sm:$0xff] }
 0xa8d   :  { %v13511_v13 = vadd.f32 %v15233_v57, %v6040_v46  ;;  %v13514_v50 = vadd.f32 %v15234_v14, %v6041_v45  ;;  %v5699_v31 = vrot.slane %v13432_v24, 2  ;;  %v5965_v55 = vrot.slane %v5847_v58, 3 }
 0xa8e   :  { %v5992_v62 = vsel %vm3277_vm9, %v5990_v7, %v5991_v1  ;;  %v5744_v11 = vadd.f32 %v5683_v2, %v5530_v4  ;;  %v5745_v7 = vadd.f32 %v5682_v42, %v5531_v25  ;;  %v5329_v24 = vadd.f32 %v13390_v32, %v15243_v40 }
 0xa8f   :  { %v6052_v49 = vadd.f32 %v5992_v62, %v5754_v29  ;;  %v5881_v17 = vpop.xlane.xlu0 %5880  ;;  %6296 = vperm.xlu1 %7404, %v13511_v13   ;;  %6299 = vperm.xlu0 %7405, %v13514_v50   ;;  %v5851_v38 = vpop.xlane.xlu1 %5850  ;;  %v5701_v22 = vsel %vm3006_vm8, %v5699_v31, %v5700_v33 }
 0xa90   :  { %v5993_v20 = vrot.slane %v5881_v17, 3  ;;  %v5968_v46 = vrot.slane %v5851_v38, 3  ;;  %v5543_v38 = vadd.f32 %v5486_v51, %v5329_v24 }
 0xa91   :  { %v13529_v63 = vadd.f32 %v15239_v41, %v6052_v49 }
 0xa92   :  { %v5994_v16 = vsel %vm3277_vm9, %v5991_v1, %v5993_v20  ;;  %v5487_v1 = vsel %vm2791_vm7, %v5485_v19, %v5486_v51  ;;  %v5757_v34 = vadd.f32 %v5700_v33, %v5543_v38  ;;  %v15247_v19 = vld [vmem:[#allocation100_spill] sm:$0xff] }
 0xa93   :  { %v6053_v5 = vadd.f32 %v5994_v16, %v5755_v53  ;;  %v5849_v30 = vpop.xlane.xlu0 %5848  ;;  %6332 = vperm.xlu1 %7404, %v13529_v63   ;;  %v5885_v10 = vpop.xlane.xlu1 %5884  ;;  %v5542_v14 = vadd.f32 %v5487_v1, %v5328_v59 }
 0xa94   :  { %v5966_v45 = vrot.slane %v5849_v30, 3  ;;  %v5996_v42 = vrot.slane %v5885_v10, 3 }
 0xa95   :  { %v13540_v21 = vadd.f32 %v15242_v56, %v6053_v5  ;;  %v5756_v3 = vadd.f32 %v5701_v22, %v5542_v14  ;;  %v15248_v22 = vlaneseq }
 0xa96   :  { %v5967_v29 = vsel %vm3277_vm9, %v5965_v55, %v5966_v45  ;;  %v5969_v57 = vsel %vm3277_vm9, %v5966_v45, %v5968_v46 }
 0xa97   :  { %v6042_v58 = vadd.f32 %v5967_v29, %v5744_v11  ;;  %v6043_v62 = vadd.f32 %v5969_v57, %v5745_v7  ;;  %v5883_v23 = vpop.xlane.xlu0 %5882  ;;  %6335 = vperm.xlu0 %7405, %v13540_v21   ;;  %v6270_v51 = vpop.permute.xlu1 %6269  ;;  %v6344_v29 = vand.u32 127, %v15248_v22 }
 0xa98   :  { %v5995_v6 = vrot.slane %v5883_v23, 3 }
 0xa99   :  { %v13550_v39 = vadd.f32 %v15244_v35, %v6042_v58  ;;  %v13553_v49 = vadd.f32 %v15245_v43, %v6043_v62  ;;  %v6349_v40 = vadd.s32 4294967288, %v6344_v29  ;;  %v15249_v62 = vld [vmem:[#allocation5_spill] sm:$0xff] }
 0xa9a   :  { %v5997_v17 = vsel %vm3277_vm9, %v5995_v6, %v5996_v42 }
 0xa9b   :  { %v6054_v18 = vadd.f32 %v5997_v17, %v5756_v3  ;;  %v5887_v20 = vpop.xlane.xlu0 %5886  ;;  %6302 = vperm.xlu1 %7404, %v13550_v39   ;;  %6305 = vperm.xlu0 %7405, %v13553_v49   ;;  %v6261_v16 = vpop.permute.xlu1 %6260  ;;  %v13573_v23 = vsub.s32 %v6349_v40, %v15249_v62 }
 0xa9c   :  { %v5998_v32 = vrot.slane %v5887_v20, 3 }
 0xa9d   :  { %v13559_v53 = vadd.f32 %v15246_v8, %v6054_v18  ;;  %v6363_v20 = vrot.slane %v6270_v51, %v13573_v23 }
 0xa9e   :  { %v5999_v41 = vsel %vm3277_vm9, %v5996_v42, %v5998_v32  ;;  %v13576_v42 = vsub.s32 %v6344_v29, %v15249_v62 }
 0xa9f   :  { %v6055_v36 = vadd.f32 %v5999_v41, %v5757_v34  ;;  %6338 = vperm.xlu1 %7404, %v13559_v53   ;;  %v6267_v4 = vpop.permute.xlu1 %6266 }
 0xaa0   :  { %v6359_v6 = vrot.slane %v6267_v4, %v13576_v42  ;;  %v6348_v32 = vrot.slane %v6261_v16, %v13576_v42 }
 0xaa1   :  { %v13564_v2 = vadd.f32 %v15247_v19, %v6055_v36 }
 0xaa2   :  { %v6364_v8 = vsel %vm6354_vm10, %v6363_v20, %v6359_v6 }
 0xaa3   :  { %6341 = vperm.xlu0 %7405, %v13564_v2   ;;  %v6264_v27 = vpop.permute.xlu0 %6263 }
 0xaa4   :  { %v6353_v3 = vrot.slane %v6264_v27, %v13573_v23 }
 0xaa6   :  { %v6355_v41 = vsel %vm6354_vm10, %v6353_v3, %v6348_v32 }
 0xaae   :  { %v6273_v59 = vpop.permute.xlu1 %6272  ;;  %v6276_v25 = vpop.permute.xlu0 %6275 }
 0xaaf   :  { %v6372_v35 = vrot.slane %v6276_v25, %v13573_v23  ;;  %v6368_v43 = vrot.slane %v6273_v59, %v13576_v42 }
 0xab1   :  { %v6373_v36 = vsel %vm6354_vm10, %v6372_v35, %v6368_v43 }
 0xaca   :  { %v6279_v33 = vpop.permute.xlu1 %6278 }
 0xacb   :  { %v6377_v34 = vrot.slane %v6279_v33, %v13576_v42 }
 0xace   :  { %v6282_v5 = vpop.permute.xlu0 %6281 }
 0xacf   :  { %v6381_v17 = vrot.slane %v6282_v5, %v13573_v23 }
 0xad1   :  { %v6382_v19 = vsel %vm6354_vm10, %v6381_v17, %v6377_v34 }
 0xad2   :  { %v13567_v30 = vpop.permute.xlu1 %6308  ;;  %v13569_v31 = vpop.permute.xlu0 %6311 }
 0xad3   :  { %v6426_v59 = vrot.slane %v13569_v31, %v13573_v23  ;;  %v6422_v22 = vrot.slane %v13567_v30, %v13576_v42 }
 0xad6   :  { %v6315_v55 = vpop.permute.xlu1 %6314 }
 0xad7   :  { %v6431_v40 = vrot.slane %v6315_v55, %v13576_v42 }
 0xada   :  { %v6318_v46 = vpop.permute.xlu0 %6317 }
 0xadb   :  { %v6435_v25 = vrot.slane %v6318_v46, %v13573_v23 }
 0xaee   :  { %v6285_v45 = vpop.permute.xlu1 %6284  ;;  %v6288_v11 = vpop.permute.xlu0 %6287 }
 0xaef   :  { %v6390_v51 = vrot.slane %v6288_v11, %v13573_v23  ;;  %v6386_v16 = vrot.slane %v6285_v45, %v13576_v42 }
 0xaf2   :  { %v6321_v7 = vpop.permute.xlu1 %6320 }
 0xaf3   :  { %v6440_v30 = vrot.slane %v6321_v7, %v13576_v42  ;;  %v6427_v7 = vsel %vm6354_vm10, %v6426_v59, %v6422_v22 }
 0xaf6   :  { %v6324_v10 = vpop.permute.xlu0 %6323 }
 0xaf7   :  { %v6444_v29 = vrot.slane %v6324_v10, %v13573_v23 }
 0xaf9   :  { %v6445_v3 = vsel %vm6354_vm10, %v6444_v29, %v6440_v30  ;;  %v15250_v30 = vld [vmem:[#allocation112_spill] sm:$0xff] }
 0xb02   :  { %v6291_v56 = vpop.permute.xlu1 %6290  ;;  %v6294_v1 = vpop.permute.xlu0 %6293 }
 0xb03   :  { %v6399_v33 = vrot.slane %v6294_v1, %v13573_v23  ;;  %v6395_v5 = vrot.slane %v6291_v56, %v13576_v42  ;;  %v6474_v1 = vsel %vm6473_vm11, %v6364_v8, %v6355_v41  ;;  %v6391_v56 = vsel %vm6354_vm10, %v6390_v51, %v6386_v16 }
 0xb05   :  { %v6400_v55 = vsel %vm6354_vm10, %v6399_v33, %v6395_v5 }
 0xb06   :  { %v6327_v57 = vpop.permute.xlu1 %6326 }
 0xb0a   :  { %v6330_v14 = vpop.permute.xlu0 %6329 }
 0xb0b   :  { %v6453_v62 = vrot.slane %v6330_v14, %v13573_v23  ;;  %v6449_v14 = vrot.slane %v6327_v57, %v13576_v42 }
 0xb0d   :  { %v6454_v20 = vsel %vm6354_vm10, %v6453_v62, %v6449_v14  ;;  %v15251_v14 = vld [vmem:[#allocation60_spill] sm:$0xff] }
 0xb0e   :  { %v6297_v24 = vpop.permute.xlu1 %6296  ;;  %v6300_v58 = vpop.permute.xlu0 %6299 }
 0xb0f   :  { %v6408_v11 = vrot.slane %v6300_v58, %v13573_v23  ;;  %v6404_v45 = vrot.slane %v6297_v24, %v13576_v42  ;;  %v6476_v58 = vsel %vm6475_vm12, %v6373_v36, %v6474_v1  ;;  %v6436_v24 = vsel %vm6354_vm10, %v6435_v25, %v6431_v40 }
 0xb10   :  { %v6478_v6 = vsel %vm6477_vm13, %v6382_v19, %v6476_v58  ;;  %v6487_v34 = vsel %vm6473_vm11, %v6436_v24, %v6427_v7 }
 0xb11   :  { %v6409_v35 = vsel %vm6354_vm10, %v6408_v11, %v6404_v45  ;;  %v6488_v36 = vsel %vm6475_vm12, %v6445_v3, %v6487_v34 }
 0xb12   :  { %v6333_v38 = vpop.permute.xlu1 %6332  ;;  %v6489_v16 = vsel %vm6477_vm13, %v6454_v20, %v6488_v36  ;;  %v15253_v20 = vld [vmem:[#allocation111_spill] sm:$0xff] }
 0xb13   :  { %v6458_v43 = vrot.slane %v6333_v38, %v13576_v42 }
 0xb16   :  { %v6336_v18 = vpop.permute.xlu0 %6335 }
 0xb17   :  { %v6462_v10 = vrot.slane %v6336_v18, %v13573_v23  ;;  %v6480_v18 = vsel %vm6479_vm14, %v6391_v56, %v6478_v6 }
 0xb18   :  { %v6482_v57 = vsel %vm6481_vm15, %v6400_v55, %v6480_v18 }
 0xb19   :  { %v6463_v8 = vsel %vm6354_vm10, %v6462_v10, %v6458_v43  ;;  %v6484_v38 = vsel %vm6483_vm0, %v6409_v35, %v6482_v57  ;;  %v15252_v43 = vld [vmem:[#allocation114_spill] sm:$0xff] }
 0xb1a   :  { %v6306_v4 = vpop.permute.xlu0 %6305  ;;  %v6303_v27 = vpop.permute.xlu1 %6302 }
 0xb1b   :  { %v6417_v31 = vrot.slane %v6306_v4, %v13573_v23  ;;  %v6413_v46 = vrot.slane %v6303_v27, %v13576_v42  ;;  %v6490_v27 = vsel %vm6479_vm14, %v6463_v8, %v6489_v16  ;;  %v15254_v8 = vld [vmem:[#allocation116_spill] sm:$0xff] }
 0xb1d   :  { %v6418_v32 = vsel %vm6354_vm10, %v6417_v31, %v6413_v46 }
 0xb1e   :  { %v6339_v17 = vpop.permute.xlu1 %6338  ;;  %v6486_v4 = vsel %vm6485_vm1, %v6418_v32, %v6484_v38 }
 0xb1f   :  { %v6467_v19 = vrot.slane %v6339_v17, %v13576_v42  ;;  %v6495_v33 = vsel %vm6494_vm2, %v6486_v4, 0.0 }
 0xb22   :  { %v6342_v41 = vpop.permute.xlu0 %6341 }
 0xb23   :  { %v6471_v51 = vrot.slane %v6342_v41, %v13573_v23 }
 0xb25   :  { %v6472_v59 = vsel %vm6354_vm10, %v6471_v51, %v6467_v19  ;;  %v15255_v19 = vld [vmem:[#allocation117_spill] sm:$0xff] }
 0xb26   :  { %v6491_v25 = vsel %vm6481_vm15, %v6472_v59, %v6490_v27 }
 0xb27   :  { %v6497_v5 = vsel %vm6496_vm3, %v6491_v25, 0.0 }
 0xb28   :  { %v6498_v22 = vadd.f32 %v6497_v5, %v6495_v33 }
 0xb2a   :  { %6499 = vadd.xlane.f32.xlu1 %v6498_v22 }
 0xbb7   :  { %v6500_v29 = vpop.xlane.xlu1 %6499 }
 0xbb8   :  { %v6501_v11 = vrot.slane %v6500_v29, 4 }
 0xbba   :  { %v6502_v45 = vadd.f32 %v6501_v11, %v6500_v29 }
 0xbbc   :  { %v6503_v40 = vrot.slane %v6502_v45, 2 }
 0xbbe   :  { %v6504_v62 = vadd.f32 %v6503_v40, %v6502_v45 }
 0xbc0   :  { %v6505_v31 = vrot.slane %v6504_v62, 1 }
 0xbc2   :  { %v6506_v46 = vadd.f32 %v6505_v31, %v6504_v62 }
 0xbc4   :  { %7390 = vpush %v6506_v46 }
 0xbf5   :  { %s7391_s4 = spop %7390 }
 0xbf6   :  { %s6508_s21 = smul.f32 0.0051020407, %s7391_s4 }
 0xbf8   :  { %v13636_v1 = vstv %s6508_s21 }
 0xbf9   :  { %v13640_v56 = vsub.f32 %v13370_v60, %v13636_v1  ;;  %v13644_v10 = vsub.f32 %v15250_v30, %v13636_v1  ;;  %v13652_v55 = vsub.f32 %v13442_v54, %v13636_v1  ;;  %v13656_v6 = vsub.f32 %v15251_v14, %v13636_v1 }
 0xbfa   :  { %v13664_v35 = vsub.f32 %v13473_v44, %v13636_v1  ;;  %v13668_v54 = vsub.f32 %v15252_v43, %v13636_v1  ;;  %v13676_v18 = vsub.f32 %v13501_v47, %v13636_v1  ;;  %v13680_v44 = vsub.f32 %v15253_v20, %v13636_v1 }
 0xbfb   :  { %v6555_v58 = vmul.f32 %v13640_v56, %v13640_v56  ;;  %v6538_v24 = vmul.f32 %v13644_v10, %v13644_v10  ;;  %v6559_v60 = vmul.f32 %v13652_v55, %v13652_v55  ;;  %v6539_v3 = vmul.f32 %v13656_v6, %v13656_v6 }
 0xbfc   :  { %v6549_v17 = vmul.f32 %v13664_v35, %v13664_v35  ;;  %v6540_v7 = vmul.f32 %v13668_v54, %v13668_v54  ;;  %v6561_v32 = vmul.f32 %v13676_v18, %v13676_v18  ;;  %v6541_v34 = vmul.f32 %v13680_v44, %v13680_v44 }
 0xbfd   :  { %6646 = vperm.xlu1 %7404, %v6555_v58   ;;  %6595 = vperm.xlu0 %7405, %v6538_v24   ;;  %v13688_v57 = vsub.f32 %v13514_v50, %v13636_v1  ;;  %v13692_v47 = vsub.f32 %v15254_v8, %v13636_v1  ;;  %v13700_v38 = vsub.f32 %v13540_v21, %v13636_v1 }
 0xbfe   :  { %v13704_v50 = vsub.f32 %v15255_v19, %v13636_v1  ;;  %v13712_v4 = vsub.f32 %v13553_v49, %v13636_v1  ;;  %v13716_v21 = vsub.f32 %v13347_v0, %v13636_v1  ;;  %v13724_v25 = vsub.f32 %v13564_v2, %v13636_v1 }
 0xbff   :  { %v6551_v41 = vmul.f32 %v13688_v57, %v13688_v57  ;;  %v6542_v36 = vmul.f32 %v13692_v47, %v13692_v47  ;;  %v6563_v51 = vmul.f32 %v13700_v38, %v13700_v38  ;;  %v13728_v49 = vsub.f32 %v13357_v9, %v13636_v1 }
 0xc00   :  { %v6543_v16 = vmul.f32 %v13704_v50, %v13704_v50  ;;  %v6553_v27 = vmul.f32 %v13712_v4, %v13712_v4  ;;  %v6544_v59 = vmul.f32 %v13716_v21, %v13716_v21  ;;  %v6565_v0 = vmul.f32 %v13724_v25, %v13724_v25 }
 0xc01   :  { %6658 = vperm.xlu1 %7404, %v6559_v60   ;;  %6598 = vperm.xlu0 %7405, %v6539_v3   ;;  %v6545_v33 = vmul.f32 %v13728_v49, %v13728_v49  ;;  %v13736_v5 = vsub.f32 %v13367_v28, %v13636_v1  ;;  %v13742_v9 = vsub.f32 %v13379_v15, %v13636_v1 }
 0xc02   :  { %v13748_v29 = vsub.f32 %v13388_v12, %v13636_v1  ;;  %v13754_v11 = vsub.f32 %v13424_v61, %v13636_v1  ;;  %v13760_v45 = vsub.f32 %v13427_v52, %v13636_v1  ;;  %v13766_v40 = vsub.f32 %v13435_v48, %v13636_v1 }
 0xc03   :  { %v6554_v2 = vmul.f32 %v13736_v5, %v13736_v5  ;;  %v6556_v22 = vmul.f32 %v13742_v9, %v13742_v9  ;;  %v13772_v62 = vsub.f32 %v13470_v37, %v13636_v1  ;;  %v13778_v31 = vsub.f32 %v13489_v26, %v13636_v1 }
 0xc04   :  { %v6557_v28 = vmul.f32 %v13748_v29, %v13748_v29  ;;  %v6546_v15 = vmul.f32 %v13754_v11, %v13754_v11  ;;  %v6547_v12 = vmul.f32 %v13760_v45, %v13760_v45  ;;  %v6558_v61 = vmul.f32 %v13766_v40, %v13766_v40 }
 0xc05   :  { %6628 = vperm.xlu1 %7404, %v6549_v17   ;;  %6601 = vperm.xlu0 %7405, %v6540_v7   ;;  %v6548_v52 = vmul.f32 %v13772_v62, %v13772_v62  ;;  %v6560_v48 = vmul.f32 %v13778_v31, %v13778_v31  ;;  %v13784_v46 = vsub.f32 %v13511_v13, %v13636_v1 }
 0xc06   :  { %v13790_v30 = vsub.f32 %v13529_v63, %v13636_v1  ;;  %v13796_v58 = vsub.f32 %v13550_v39, %v13636_v1  ;;  %v13802_v24 = vsub.f32 %v13559_v53, %v13636_v1 }
 0xc07   :  { %v6550_v37 = vmul.f32 %v13784_v46, %v13784_v46 }
 0xc08   :  { %v6562_v26 = vmul.f32 %v13790_v30, %v13790_v30  ;;  %v6552_v13 = vmul.f32 %v13796_v58, %v13796_v58  ;;  %v6564_v63 = vmul.f32 %v13802_v24, %v13802_v24 }
 0xc09   :  { %6664 = vperm.xlu1 %7404, %v6561_v32   ;;  %6604 = vperm.xlu0 %7405, %v6541_v34  }
 0xc0d   :  { %6634 = vperm.xlu1 %7404, %v6551_v41   ;;  %6607 = vperm.xlu0 %7405, %v6542_v36  }
 0xc11   :  { %6670 = vperm.xlu1 %7404, %v6563_v51   ;;  %6610 = vperm.xlu0 %7405, %v6543_v16  }
 0xc15   :  { %6640 = vperm.xlu1 %7404, %v6553_v27   ;;  %6613 = vperm.xlu0 %7405, %v6544_v59  }
 0xc19   :  { %6676 = vperm.xlu1 %7404, %v6565_v0   ;;  %6616 = vperm.xlu0 %7405, %v6545_v33  }
 0xc1d   :  { %6643 = vperm.xlu0 %7405, %v6554_v2  }
 0xc21   :  { %6649 = vperm.xlu0 %7405, %v6556_v22  }
 0xc25   :  { %6652 = vperm.xlu0 %7405, %v6557_v28  }
 0xc29   :  { %6619 = vperm.xlu0 %7405, %v6546_v15  }
 0xc2d   :  { %6622 = vperm.xlu0 %7405, %v6547_v12  }
 0xc31   :  { %6655 = vperm.xlu0 %7405, %v6558_v61  }
 0xc35   :  { %6625 = vperm.xlu0 %7405, %v6548_v52  }
 0xc39   :  { %6661 = vperm.xlu0 %7405, %v6560_v48  }
 0xc3d   :  { %6631 = vperm.xlu0 %7405, %v6550_v37  }
 0xc41   :  { %6667 = vperm.xlu0 %7405, %v6562_v26  }
 0xc45   :  { %6637 = vperm.xlu0 %7405, %v6552_v13  }
 0xc49   :  { %6673 = vperm.xlu0 %7405, %v6564_v63  }
 0xc7c   :  { %v6596_v14 = vpop.permute.xlu0 %6595  ;;  %v6647_v1 = vpop.permute.xlu1 %6646 }
 0xc7d   :  { %v6681_v3 = vrot.slane %v6596_v14, %v13576_v42  ;;  %v6757_v48 = vrot.slane %v6647_v1, %v13573_v23 }
 0xc80   :  { %v6599_v60 = vpop.permute.xlu0 %6598  ;;  %v6659_v36 = vpop.permute.xlu1 %6658 }
 0xc81   :  { %v6685_v39 = vrot.slane %v6599_v60, %v13573_v23  ;;  %v6775_v63 = vrot.slane %v6659_v36, %v13573_v23 }
 0xc83   :  { %v6686_v43 = vsel %vm6354_vm10, %v6685_v39, %v6681_v3 }
 0xc84   :  { %v6602_v17 = vpop.permute.xlu0 %6601  ;;  %v6629_v51 = vpop.permute.xlu1 %6628 }
 0xc85   :  { %v6690_v61 = vrot.slane %v6602_v17, %v13576_v42  ;;  %v6730_v14 = vrot.slane %v6629_v51, %v13573_v23 }
 0xc88   :  { %v6605_v7 = vpop.permute.xlu0 %6604  ;;  %v6665_v59 = vpop.permute.xlu1 %6664 }
 0xc89   :  { %v6694_v15 = vrot.slane %v6605_v7, %v13573_v23  ;;  %v6784_v60 = vrot.slane %v6665_v59, %v13573_v23 }
 0xc8b   :  { %v6695_v37 = vsel %vm6354_vm10, %v6694_v15, %v6690_v61 }
 0xc8c   :  { %v6608_v20 = vpop.permute.xlu0 %6607  ;;  %v6635_v33 = vpop.permute.xlu1 %6634 }
 0xc8d   :  { %v6699_v26 = vrot.slane %v6608_v20, %v13576_v42 }
 0xc90   :  { %v6611_v32 = vpop.permute.xlu0 %6610  ;;  %v6671_v28 = vpop.permute.xlu1 %6670 }
 0xc91   :  { %v6703_v52 = vrot.slane %v6611_v32, %v13573_v23 }
 0xc93   :  { %v6704_v7 = vsel %vm6354_vm10, %v6703_v52, %v6699_v26 }
 0xc94   :  { %v6614_v34 = vpop.permute.xlu0 %6613  ;;  %v6641_v3 = vpop.permute.xlu1 %6640 }
 0xc95   :  { %v6708_v32 = vrot.slane %v6614_v34, %v13576_v42 }
 0xc98   :  { %v6617_v53 = vpop.permute.xlu0 %6616 }
 0xc99   :  { %v6712_v13 = vrot.slane %v6617_v53, %v13573_v23  ;;  %v6804_v53 = vsel %vm6473_vm11, %v6695_v37, %v6686_v43 }
 0xc9b   :  { %v6713_v15 = vsel %vm6354_vm10, %v6712_v13, %v6708_v32 }
 0xc9c   :  { %v6644_v8 = vpop.permute.xlu0 %6643 }
 0xca0   :  { %v6650_v41 = vpop.permute.xlu0 %6649 }
 0xca1   :  { %v6762_v61 = vrot.slane %v6650_v41, %v13576_v42  ;;  %v6793_v41 = vrot.slane %v6671_v28, %v13573_v23 }
 0xca4   :  { %v6653_v19 = vpop.permute.xlu0 %6652 }
 0xca5   :  { %v6766_v1 = vrot.slane %v6653_v19, %v13573_v23  ;;  %v6739_v19 = vrot.slane %v6635_v33, %v13573_v23 }
 0xca8   :  { %v6620_v16 = vpop.permute.xlu0 %6619 }
 0xca9   :  { %v6717_v36 = vrot.slane %v6620_v16, %v13576_v42 }
 0xcac   :  { %v6623_v27 = vpop.permute.xlu0 %6622 }
 0xcad   :  { %v6721_v39 = vrot.slane %v6623_v27, %v13573_v23  ;;  %v6753_v27 = vrot.slane %v6644_v8, %v13576_v42 }
 0xcaf   :  { %v6722_v43 = vsel %vm6354_vm10, %v6721_v39, %v6717_v36  ;;  %v6758_v39 = vsel %vm6354_vm10, %v6757_v48, %v6753_v27 }
 0xcb0   :  { %v6656_v0 = vpop.permute.xlu0 %6655 }
 0xcb1   :  { %v6771_v51 = vrot.slane %v6656_v0, %v13576_v42  ;;  %v6748_v0 = vrot.slane %v6641_v3, %v13573_v23 }
 0xcb3   :  { %v6776_v26 = vsel %vm6354_vm10, %v6775_v63, %v6771_v51 }
 0xcb4   :  { %v6626_v2 = vpop.permute.xlu0 %6625 }
 0xcb5   :  { %v6726_v20 = vrot.slane %v6626_v2, %v13576_v42  ;;  %v6805_v2 = vsel %vm6475_vm12, %v6704_v7, %v6804_v53 }
 0xcb6   :  { %v6806_v33 = vsel %vm6477_vm13, %v6713_v15, %v6805_v2 }
 0xcb7   :  { %v6731_v37 = vsel %vm6354_vm10, %v6730_v14, %v6726_v20 }
 0xcb8   :  { %v6662_v22 = vpop.permute.xlu0 %6661 }
 0xcb9   :  { %v6780_v34 = vrot.slane %v6662_v22, %v13576_v42  ;;  %v6677_v22 = vpop.permute.xlu1 %6676 }
 0xcba   :  { %v6802_v20 = vrot.slane %v6677_v22, %v13573_v23 }
 0xcbb   :  { %v6785_v3 = vsel %vm6354_vm10, %v6784_v60, %v6780_v34 }
 0xcbc   :  { %v6632_v12 = vpop.permute.xlu0 %6631 }
 0xcbd   :  { %v6735_v59 = vrot.slane %v6632_v12, %v13576_v42  ;;  %v6767_v12 = vsel %vm6354_vm10, %v6766_v1, %v6762_v61 }
 0xcbe   :  { %v6811_v14 = vsel %vm6473_vm11, %v6767_v12, %v6758_v39  ;;  %v19_v12 = vstv %s14030_s11  ;;  %v15256_v39 = vld [vmem:[#allocation6_spill] sm:$0xff] }
 0xcbf   :  { %v6740_v13 = vsel %vm6354_vm10, %v6739_v19, %v6735_v59  ;;  %v6812_v63 = vsel %vm6475_vm12, %v6776_v26, %v6811_v14  ;;  %v17_v19 = vstv %s14029_s10  ;;  %20 = vst [vmem:[#allocation4] sm:$0x1] %v19_v12 }
 0xcc0   :  { %v6668_v17 = vpop.permute.xlu0 %6667  ;;  %v6813_v36 = vsel %vm6477_vm13, %v6785_v3, %v6812_v63  ;;  %18 = vst [vmem:[#allocation3] sm:$0x1] %v17_v19 }
 0xcc1   :  { %v6789_v16 = vrot.slane %v6668_v17, %v13576_v42  ;;  %v6807_v17 = vsel %vm6479_vm14, %v6722_v43, %v6806_v33 }
 0xcc2   :  { %v6808_v32 = vsel %vm6481_vm15, %v6731_v37, %v6807_v17 }
 0xcc3   :  { %v6794_v28 = vsel %vm6354_vm10, %v6793_v41, %v6789_v16  ;;  %v6809_v53 = vsel %vm6483_vm0, %v6740_v13, %v6808_v32 }
 0xcc4   :  { %v6638_v52 = vpop.permute.xlu0 %6637  ;;  %v6814_v51 = vsel %vm6479_vm14, %v6794_v28, %v6813_v36 }
 0xcc5   :  { %v6744_v8 = vrot.slane %v6638_v52, %v13576_v42 }
 0xcc6   :  { %v7275_v3 = vld [vmem:[#allocation4] ss:$0 sm:$0xff] }
 0xcc7   :  { %v6749_v7 = vsel %vm6354_vm10, %v6748_v0, %v6744_v8  ;;  %v6831_v33 = vld [vmem:[#allocation3] sm:$0x1] }
 0xcc8   :  { %v6674_v1 = vpop.permute.xlu0 %6673  ;;  %v6810_v60 = vsel %vm6485_vm1, %v6749_v7, %v6809_v53 }
 0xcc9   :  { %v6798_v48 = vrot.slane %v6674_v1, %v13576_v42  ;;  %v6818_v27 = vsel %vm6494_vm2, %v6810_v60, 0.0 }
 0xccb   :  { %v6803_v59 = vsel %vm6354_vm10, %v6802_v20, %v6798_v48 }
 0xccc   :  { %v6815_v15 = vsel %vm6481_vm15, %v6803_v59, %v6814_v51 }
 0xccd   :  { %v6819_v61 = vsel %vm6496_vm3, %v6815_v15, 0.0 }
 0xcce   :  { %v6820_v34 = vadd.f32 %v6819_v61, %v6818_v27 }
 0xcd0   :  { %6821 = vadd.xlane.f32.xlu0 %v6820_v34 }
 0xd5d   :  { %v6822_v2 = vpop.xlane.xlu0 %6821 }
 0xd5e   :  { %v6823_v43 = vrot.slane %v6822_v2, 4 }
 0xd60   :  { %v6824_v16 = vadd.f32 %v6823_v43, %v6822_v2 }
 0xd62   :  { %v6825_v52 = vrot.slane %v6824_v16, 2 }
 0xd64   :  { %v6826_v0 = vadd.f32 %v6825_v52, %v6824_v16 }
 0xd66   :  { %v6827_v37 = vrot.slane %v6826_v0, 1 }
 0xd68   :  { %v6828_v8 = vadd.f32 %v6827_v37, %v6826_v0 }
 0xd6a   :  { %7392 = vpush %v6828_v8 }
 0xd9b   :  { %s7393_s6 = spop %7392 }
 0xd9c   :  { %s6830_s26 = smul.f32 0.0051020407, %s7393_s6 }
 0xd9e   :  { %s6832_s7 = sadd.f32 1e-05, %s6830_s26 }
 0xda0   :  { %v6833_v41 = vstv %s6832_s7 }
 0xda1   :  { %7472 = vrsqrt.f32 %v6833_v41 }
 0xdab   :  { %v7473_v22 = vpop.eup %7472 }
 0xdac   :  { %7394 = vpush %v7473_v22 }
 0xddd   :  { %s7395_s10 = spop %7394 }
 0xdde   :  { %v6836_v26 = vstv %s7395_s10 }
 0xddf   :  { %v6837_v13 = vmul.f32 %v6836_v26, %v6831_v33 }
 0xde1   :  { %v6842_v17 = vrot.slane %v6837_v13, %v15256_v39 }
 0xde3   :  { %6844 = vperm.xlu1 %7404, %v6842_v17  }
 0xde7   :  { %6882 = vperm.xlu1 %7404, %v7275_v3  }
 0xe62   :  { %v13869_v7 = vpop.permute.xlu1 %6844 }
 0xe63   :  { %v6853_v14 = vmul.f32 %v13869_v7, %v13716_v21  ;;  %v6847_v32 = vmul.f32 %v13869_v7, %v13644_v10  ;;  %v6866_v28 = vmul.f32 %v13869_v7, %v13748_v29  ;;  %v6848_v1 = vmul.f32 %v13869_v7, %v13656_v6 }
 0xe64   :  { %v6868_v21 = vmul.f32 %v13869_v7, %v13652_v55  ;;  %v6849_v29 = vmul.f32 %v13869_v7, %v13668_v54  ;;  %v6858_v34 = vmul.f32 %v13869_v7, %v13664_v35  ;;  %v6850_v55 = vmul.f32 %v13869_v7, %v13680_v44 }
 0xe65   :  { %v6870_v0 = vmul.f32 %v13869_v7, %v13676_v18  ;;  %v6851_v35 = vmul.f32 %v13869_v7, %v13692_v47  ;;  %v6860_v33 = vmul.f32 %v13869_v7, %v13688_v57  ;;  %v6852_v18 = vmul.f32 %v13869_v7, %v13704_v50 }
 0xe66   :  { %v13879_v20 = vpop.permute.xlu1 %6882  ;;  %v6854_v57 = vmul.f32 %v13869_v7, %v13728_v49 }
 0xe67   :  { %v6891_v63 = vadd.f32 %v13879_v20, %v6853_v14  ;;  %v6885_v53 = vadd.f32 %v13879_v20, %v6847_v32  ;;  %v6904_v48 = vadd.f32 %v13879_v20, %v6866_v28  ;;  %v6886_v36 = vadd.f32 %v13879_v20, %v6848_v1 }
 0xe68   :  { %v6906_v6 = vadd.f32 %v13879_v20, %v6868_v21  ;;  %v6887_v61 = vadd.f32 %v13879_v20, %v6849_v29  ;;  %v6896_v2 = vadd.f32 %v13879_v20, %v6858_v34  ;;  %v6888_v52 = vadd.f32 %v13879_v20, %v6850_v55 }
 0xe69   :  { %v6919_v10 = vmax.f32 %v6891_v63, -1.3402  ;;  %v6913_v60 = vmax.f32 %v6885_v53, -1.3402  ;;  %v6932_v51 = vmax.f32 %v6904_v48, -1.3402  ;;  %v6908_v37 = vadd.f32 %v13879_v20, %v6870_v0 }
 0xe6a   :  { %v6914_v27 = vmax.f32 %v6886_v36, -1.3402  ;;  %v6934_v19 = vmax.f32 %v6906_v6, -1.3402  ;;  %v6915_v16 = vmax.f32 %v6887_v61, -1.3402  ;;  %v6889_v22 = vadd.f32 %v13879_v20, %v6851_v35 }
 0xe6b   :  { %v6947_v59 = vmin.f32 %v6919_v10, 1.886  ;;  %v6941_v15 = vmin.f32 %v6913_v60, 1.886  ;;  %v6960_v54 = vmin.f32 %v6932_v51, 1.886  ;;  %v6898_v13 = vadd.f32 %v13879_v20, %v6860_v33 }
 0xe6c   :  { %v6942_v43 = vmin.f32 %v6914_v27, 1.886  ;;  %v6962_v12 = vmin.f32 %v6934_v19, 1.886  ;;  %v6943_v44 = vmin.f32 %v6915_v16, 1.886  ;;  %v6890_v3 = vadd.f32 %v13879_v20, %v6852_v18 }
 0xe6d   :  { %7016 = vperm.xlu0 %7405, %v6947_v59   ;;  %6998 = vperm.xlu1 %7404, %v6941_v15   ;;  %v6924_v8 = vmax.f32 %v6896_v2, -1.3402  ;;  %v6916_v41 = vmax.f32 %v6888_v52, -1.3402  ;;  %v6936_v26 = vmax.f32 %v6908_v37, -1.3402  ;;  %v6872_v14 = vmul.f32 %v13869_v7, %v13700_v38 }
 0xe6e   :  { %v6917_v17 = vmax.f32 %v6889_v22, -1.3402  ;;  %v6926_v32 = vmax.f32 %v6898_v13, -1.3402  ;;  %v6918_v63 = vmax.f32 %v6890_v3, -1.3402  ;;  %v6892_v53 = vadd.f32 %v13879_v20, %v6854_v57 }
 0xe6f   :  { %v6952_v47 = vmin.f32 %v6924_v8, 1.886  ;;  %v6944_v39 = vmin.f32 %v6916_v41, 1.886  ;;  %v6910_v28 = vadd.f32 %v13879_v20, %v6872_v14  ;;  %v6964_v50 = vmin.f32 %v6936_v26, 1.886 }
 0xe70   :  { %v6945_v1 = vmin.f32 %v6917_v17, 1.886  ;;  %v6862_v48 = vmul.f32 %v13869_v7, %v13712_v4  ;;  %v6855_v36 = vmul.f32 %v13869_v7, %v13754_v11  ;;  %v6954_v38 = vmin.f32 %v6926_v32, 1.886 }
 0xe71   :  { %7055 = vperm.xlu0 %7405, %v6960_v54   ;;  %7001 = vperm.xlu1 %7404, %v6942_v43   ;;  %v6946_v10 = vmin.f32 %v6918_v63, 1.886  ;;  %v6938_v60 = vmax.f32 %v6910_v28, -1.3402  ;;  %v6920_v29 = vmax.f32 %v6892_v53, -1.3402  ;;  %v6874_v51 = vmul.f32 %v13869_v7, %v13724_v25 }
 0xe72   :  { %v6900_v21 = vadd.f32 %v13879_v20, %v6862_v48  ;;  %v6893_v49 = vadd.f32 %v13879_v20, %v6855_v36  ;;  %v6856_v4 = vmul.f32 %v13869_v7, %v13760_v45  ;;  %v6863_v34 = vmul.f32 %v13869_v7, %v13736_v5 }
 0xe73   :  { %v6966_v59 = vmin.f32 %v6938_v60, 1.886  ;;  %v6948_v15 = vmin.f32 %v6920_v29, 1.886  ;;  %v6912_v27 = vadd.f32 %v13879_v20, %v6874_v51  ;;  %v6864_v45 = vmul.f32 %v13869_v7, %v13640_v56 }
 0xe74   :  { %v6928_v6 = vmax.f32 %v6900_v21, -1.3402  ;;  %v6921_v11 = vmax.f32 %v6893_v49, -1.3402  ;;  %v6894_v61 = vadd.f32 %v13879_v20, %v6856_v4  ;;  %v6901_v54 = vadd.f32 %v13879_v20, %v6863_v34 }
 0xe75   :  { %7061 = vperm.xlu0 %7405, %v6962_v12   ;;  %7004 = vperm.xlu1 %7404, %v6943_v44   ;;  %v6940_v2 = vmax.f32 %v6912_v27, -1.3402  ;;  %v6902_v0 = vadd.f32 %v13879_v20, %v6864_v45  ;;  %v6865_v5 = vmul.f32 %v13869_v7, %v13742_v9  ;;  %v6867_v44 = vmul.f32 %v13869_v7, %v13766_v40 }
 0xe76   :  { %v6956_v55 = vmin.f32 %v6928_v6, 1.886  ;;  %v6949_v19 = vmin.f32 %v6921_v11, 1.886  ;;  %v6922_v25 = vmax.f32 %v6894_v61, -1.3402  ;;  %v6857_v22 = vmul.f32 %v13869_v7, %v13772_v62 }
 0xe77   :  { %v6968_v43 = vmin.f32 %v6940_v2, 1.886  ;;  %v6929_v52 = vmax.f32 %v6901_v54, -1.3402  ;;  %v6930_v12 = vmax.f32 %v6902_v0, -1.3402  ;;  %v6903_v37 = vadd.f32 %v13879_v20, %v6865_v5 }
 0xe78   :  { %v6950_v16 = vmin.f32 %v6922_v25, 1.886  ;;  %v6905_v41 = vadd.f32 %v13879_v20, %v6867_v44  ;;  %v6895_v9 = vadd.f32 %v13879_v20, %v6857_v22  ;;  %v6869_v26 = vmul.f32 %v13869_v7, %v13778_v31 }
 0xe79   :  { %7031 = vperm.xlu0 %7405, %v6952_v47   ;;  %7007 = vperm.xlu1 %7404, %v6944_v39   ;;  %v6957_v35 = vmin.f32 %v6929_v52, 1.886  ;;  %v6958_v8 = vmin.f32 %v6930_v12, 1.886  ;;  %v6931_v56 = vmax.f32 %v6903_v37, -1.3402  ;;  %v6859_v39 = vmul.f32 %v13869_v7, %v13784_v46 }
 0xe7a   :  { %v6933_v18 = vmax.f32 %v6905_v41, -1.3402  ;;  %v6923_v47 = vmax.f32 %v6895_v9, -1.3402  ;;  %v6907_v40 = vadd.f32 %v13879_v20, %v6869_v26  ;;  %v6871_v14 = vmul.f32 %v13869_v7, %v13790_v30 }
 0xe7b   :  { %v6959_v33 = vmin.f32 %v6931_v56, 1.886  ;;  %v6897_v62 = vadd.f32 %v13879_v20, %v6859_v39  ;;  %v6861_v28 = vmul.f32 %v13869_v7, %v13796_v58  ;;  %v6873_v63 = vmul.f32 %v13869_v7, %v13802_v24 }
 0xe7c   :  { %v6961_v13 = vmin.f32 %v6933_v18, 1.886  ;;  %v6951_v17 = vmin.f32 %v6923_v47, 1.886  ;;  %v6935_v3 = vmax.f32 %v6907_v40, -1.3402  ;;  %v6909_v31 = vadd.f32 %v13879_v20, %v6871_v14 }
 0xe7d   :  { %7067 = vperm.xlu0 %7405, %v6964_v50   ;;  %7010 = vperm.xlu1 %7404, %v6945_v1   ;;  %v6925_v32 = vmax.f32 %v6897_v62, -1.3402  ;;  %v6899_v46 = vadd.f32 %v13879_v20, %v6861_v28  ;;  %v6911_v30 = vadd.f32 %v13879_v20, %v6873_v63 }
 0xe7e   :  { %v6963_v57 = vmin.f32 %v6935_v3, 1.886  ;;  %v6937_v1 = vmax.f32 %v6909_v31, -1.3402 }
 0xe7f   :  { %v6953_v50 = vmin.f32 %v6925_v32, 1.886  ;;  %v6927_v48 = vmax.f32 %v6899_v46, -1.3402 }
 0xe80   :  { %v6965_v53 = vmin.f32 %v6937_v1, 1.886 }
 0xe81   :  { %7037 = vperm.xlu0 %7405, %v6954_v38   ;;  %7013 = vperm.xlu1 %7404, %v6946_v10   ;;  %v6955_v36 = vmin.f32 %v6927_v48, 1.886  ;;  %v6939_v38 = vmax.f32 %v6911_v30, -1.3402 }
 0xe83   :  { %v6967_v21 = vmin.f32 %v6939_v38, 1.886 }
 0xe85   :  { %7073 = vperm.xlu0 %7405, %v6966_v59   ;;  %7019 = vperm.xlu1 %7404, %v6948_v15  }
 0xe89   :  { %7043 = vperm.xlu0 %7405, %v6956_v55   ;;  %7022 = vperm.xlu1 %7404, %v6949_v19  }
 0xe8d   :  { %7079 = vperm.xlu0 %7405, %v6968_v43   ;;  %7025 = vperm.xlu1 %7404, %v6950_v16  }
 0xe91   :  { %7046 = vperm.xlu1 %7404, %v6957_v35  }
 0xe95   :  { %7049 = vperm.xlu1 %7404, %v6958_v8  }
 0xe99   :  { %7052 = vperm.xlu1 %7404, %v6959_v33  }
 0xe9d   :  { %7058 = vperm.xlu1 %7404, %v6961_v13  }
 0xea1   :  { %7028 = vperm.xlu1 %7404, %v6951_v17  }
 0xea5   :  { %7064 = vperm.xlu1 %7404, %v6963_v57  }
 0xea9   :  { %7034 = vperm.xlu1 %7404, %v6953_v50  }
 0xead   :  { %7070 = vperm.xlu1 %7404, %v6965_v53  }
 0xeb1   :  { %7040 = vperm.xlu1 %7404, %v6955_v36  }
 0xeb5   :  { %7076 = vperm.xlu1 %7404, %v6967_v21  }
 0xeec   :  { %v6999_v49 = vpop.permute.xlu1 %6998  ;;  %v7017_v4 = vpop.permute.xlu0 %7016 }
 0xeed   :  { %v7084_v5 = vrot.slane %v6999_v49, %v13576_v42  ;;  %v7111_v8 = vrot.slane %v7017_v4, %v13576_v42 }
 0xef0   :  { %v7002_v58 = vpop.permute.xlu1 %7001  ;;  %v7056_v11 = vpop.permute.xlu0 %7055 }
 0xef1   :  { %v7088_v43 = vrot.slane %v7002_v58, %v13573_v23  ;;  %v7169_v56 = vrot.slane %v7056_v11, %v13573_v23 }
 0xef3   :  { %v7089_v41 = vsel %vm6354_vm10, %v7088_v43, %v7084_v5 }
 0xef4   :  { %v7005_v10 = vpop.permute.xlu1 %7004  ;;  %v7062_v59 = vpop.permute.xlu0 %7061 }
 0xef5   :  { %v7093_v16 = vrot.slane %v7005_v10, %v13576_v42  ;;  %v7178_v33 = vrot.slane %v7062_v59, %v13573_v23 }
 0xef8   :  { %v7008_v60 = vpop.permute.xlu1 %7007  ;;  %v7032_v20 = vpop.permute.xlu0 %7031 }
 0xef9   :  { %v7097_v54 = vrot.slane %v7008_v60, %v13573_v23  ;;  %v7133_v40 = vrot.slane %v7032_v20, %v13573_v23 }
 0xefb   :  { %v7098_v12 = vsel %vm6354_vm10, %v7097_v54, %v7093_v16 }
 0xefc   :  { %v7011_v29 = vpop.permute.xlu1 %7010  ;;  %v7068_v34 = vpop.permute.xlu0 %7067  ;;  %v7207_v39 = vsel %vm6473_vm11, %v7098_v12, %v7089_v41 }
 0xefd   :  { %v7102_v37 = vrot.slane %v7011_v29, %v13576_v42  ;;  %v7187_v62 = vrot.slane %v7068_v34, %v13573_v23 }
 0xf00   :  { %v7014_v51 = vpop.permute.xlu1 %7013  ;;  %v7038_v19 = vpop.permute.xlu0 %7037 }
 0xf01   :  { %v7106_v52 = vrot.slane %v7014_v51, %v13573_v23  ;;  %v7142_v14 = vrot.slane %v7038_v19, %v13573_v23 }
 0xf03   :  { %v7107_v18 = vsel %vm6354_vm10, %v7106_v52, %v7102_v37 }
 0xf04   :  { %v7020_v6 = vpop.permute.xlu1 %7019  ;;  %v7074_v45 = vpop.permute.xlu0 %7073  ;;  %v7208_v31 = vsel %vm6475_vm12, %v7107_v18, %v7207_v39 }
 0xf05   :  { %v7115_v35 = vrot.slane %v7020_v6, %v13573_v23  ;;  %v7196_v58 = vrot.slane %v7074_v45, %v13573_v23 }
 0xf07   :  { %v7116_v17 = vsel %vm6354_vm10, %v7115_v35, %v7111_v8 }
 0xf08   :  { %v7023_v24 = vpop.permute.xlu1 %7022  ;;  %v7044_v9 = vpop.permute.xlu0 %7043  ;;  %v7209_v46 = vsel %vm6477_vm13, %v7116_v17, %v7208_v31 }
 0xf09   :  { %v7120_v26 = vrot.slane %v7023_v24, %v13576_v42  ;;  %v7151_v63 = vrot.slane %v7044_v9, %v13573_v23 }
 0xf0c   :  { %v7026_v7 = vpop.permute.xlu1 %7025  ;;  %v7080_v10 = vpop.permute.xlu0 %7079 }
 0xf0d   :  { %v7124_v44 = vrot.slane %v7026_v7, %v13573_v23  ;;  %v7205_v20 = vrot.slane %v7080_v10, %v13573_v23 }
 0xf0f   :  { %v7125_v57 = vsel %vm6354_vm10, %v7124_v44, %v7120_v26 }
 0xf10   :  { %v7047_v15 = vpop.permute.xlu1 %7046  ;;  %v7210_v36 = vsel %vm6479_vm14, %v7125_v57, %v7209_v46 }
 0xf11   :  { %v7156_v38 = vrot.slane %v7047_v15, %v13576_v42 }
 0xf14   :  { %v7050_v27 = vpop.permute.xlu1 %7049 }
 0xf15   :  { %v7160_v28 = vrot.slane %v7050_v27, %v13573_v23 }
 0xf17   :  { %v7161_v51 = vsel %vm6354_vm10, %v7160_v28, %v7156_v38 }
 0xf18   :  { %v7053_v61 = vpop.permute.xlu1 %7052 }
 0xf19   :  { %v7165_v3 = vrot.slane %v7053_v61, %v13576_v42 }
 0xf1b   :  { %v7170_v21 = vsel %vm6354_vm10, %v7169_v56, %v7165_v3 }
 0xf1c   :  { %v7059_v55 = vpop.permute.xlu1 %7058  ;;  %v7214_v24 = vsel %vm6473_vm11, %v7170_v21, %v7161_v51 }
 0xf1d   :  { %v7174_v32 = vrot.slane %v7059_v55, %v13576_v42 }
 0xf1f   :  { %v7179_v60 = vsel %vm6354_vm10, %v7178_v33, %v7174_v32 }
 0xf20   :  { %v7029_v2 = vpop.permute.xlu1 %7028  ;;  %v7215_v27 = vsel %vm6475_vm12, %v7179_v60, %v7214_v24 }
 0xf21   :  { %v7129_v22 = vrot.slane %v7029_v2, %v13576_v42 }
 0xf23   :  { %v7134_v50 = vsel %vm6354_vm10, %v7133_v40, %v7129_v22 }
 0xf24   :  { %v7065_v25 = vpop.permute.xlu1 %7064  ;;  %v7211_v29 = vsel %vm6481_vm15, %v7134_v50, %v7210_v36 }
 0xf25   :  { %v7183_v1 = vrot.slane %v7065_v25, %v13576_v42 }
 0xf27   :  { %v7188_v4 = vsel %vm6354_vm10, %v7187_v62, %v7183_v1 }
 0xf28   :  { %v7035_v0 = vpop.permute.xlu1 %7034  ;;  %v7216_v34 = vsel %vm6477_vm13, %v7188_v4, %v7215_v27 }
 0xf29   :  { %v7138_v13 = vrot.slane %v7035_v0, %v13576_v42 }
 0xf2b   :  { %v7143_v53 = vsel %vm6354_vm10, %v7142_v14, %v7138_v13 }
 0xf2c   :  { %v7071_v47 = vpop.permute.xlu1 %7070  ;;  %v7212_v6 = vsel %vm6483_vm0, %v7143_v53, %v7211_v29 }
 0xf2d   :  { %v7192_v48 = vrot.slane %v7071_v47, %v13576_v42 }
 0xf2f   :  { %v7197_v7 = vsel %vm6354_vm10, %v7196_v58, %v7192_v48 }
 0xf30   :  { %v7041_v30 = vpop.permute.xlu1 %7040  ;;  %v7217_v55 = vsel %vm6479_vm14, %v7197_v7, %v7216_v34 }
 0xf31   :  { %v7147_v49 = vrot.slane %v7041_v30, %v13576_v42 }
 0xf33   :  { %v7152_v11 = vsel %vm6354_vm10, %v7151_v63, %v7147_v49 }
 0xf34   :  { %v7213_v59 = vsel %vm6485_vm1, %v7152_v11, %v7212_v6  ;;  %v7077_v15 = vpop.permute.xlu1 %7076 }
 0xf35   :  { %7221 = vst.msk [vmem:[%s14031_s12] sm:$0xff] %vm6494_vm2, %v7213_v59  ;;  %v7201_v61 = vrot.slane %v7077_v15, %v13576_v42 }
 0xf37   :  { %v7206_v19 = vsel %vm6354_vm10, %v7205_v20, %v7201_v61 }
 0xf38   :  { %v7218_v2 = vsel %vm6481_vm15, %v7206_v19, %v7217_v55 }
 0xf39   :  { %7222 = vst.msk [vmem:[%s14031_s12 + $0x8] sm:$0x3f] %vm6496_vm3, %v7218_v2 }

</bundles_post_ra>
